<compile_context>
chip_gen: v7x
topology: tpu7x:2x2x1
jax: 0.10.0
libtpu: 0.0.40
codegen_flags: <defaults>
</compile_context>

<pallas_src>
import jax
import jax.numpy as jnp
from jax.experimental import pallas as pl
from jax.experimental.pallas import tpu as pltpu


def _layer_norm(x, g, b, eps=1e-5):
    # PyTorch nn.LayerNorm semantics (biased variance, eps=1e-5, affine) - reference only.
    mu = jnp.mean(x, axis=-1, keepdims=True)
    xc = x - mu
    var = jnp.mean(xc * xc, axis=-1, keepdims=True)
    return xc * jax.lax.rsqrt(var + eps) * g + b


def init_params(key, E, M, latent=1):
    """Deterministic init mirroring the torch module: torch.rand for ensemble
    linear weights/biases, nn.LayerNorm defaults (ones/zeros)."""
    ks = jax.random.split(key, 8)
    u = lambda k, shp: jax.random.uniform(k, shp, dtype=jnp.float32)
    out_dim = 2 * latent  # updater head (non-deterministic -> latent_size*2)
    return dict(
        # messenger: EnsembleLinear(5,M) -> ReLU -> [EnsembleLinear(M,M), ReLU, LN] -> LN -> EnsembleLinear(M,latent)
        mw1=u(ks[0], (E, 5, M)), mb1=u(ks[1], (E, 1, M)),
        mw2=u(ks[2], (E, M, M)), mb2=u(ks[3], (E, 1, M)),
        mga=jnp.ones((1, M), jnp.float32), mba=jnp.zeros((1, M), jnp.float32),
        mgb=jnp.ones((1, M), jnp.float32), mbb=jnp.zeros((1, M), jnp.float32),
        mw3=u(ks[4], (E, M, latent)), mb3=u(ks[5], (E, 1, latent)),
        # updater: EnsembleLinear(3,M) -> ReLU -> [EnsembleLinear(M,M), ReLU, LN] -> LN -> EnsembleLinear(M,2*latent)
        uw1=u(ks[6], (E, 3, M)), ub1=u(ks[7], (E, 1, M)),
        uw2=u(jax.random.fold_in(key, 100), (E, M, M)),
        ub2=u(jax.random.fold_in(key, 101), (E, 1, M)),
        uga=jnp.ones((1, M), jnp.float32), uba=jnp.zeros((1, M), jnp.float32),
        ugb=jnp.ones((1, M), jnp.float32), ubb=jnp.zeros((1, M), jnp.float32),
        uw3=u(jax.random.fold_in(key, 102), (E, M, out_dim)),
        ub3=u(jax.random.fold_in(key, 103), (E, 1, out_dim)),
    )


def _pack_params(p, E, M, n, mxu_dtype):
    """Pack ensemble weights so members live on the lane axis (width E*M)."""
    EM = E * M
    f32 = jnp.float32
    eye = jnp.eye(E, dtype=f32)

    def block_diag(w):                       # (E, din, dout) -> (E*din, E*dout)
        din, dout = w.shape[1], w.shape[2]
        return jnp.einsum('ef,eij->eifj', eye, w).reshape(E * din, E * dout)

    def pack_first(w):                       # (E, d, M) -> (d, E*M)  (shared input features)
        return jnp.transpose(w, (1, 0, 2)).reshape(w.shape[1], EM)

    def pack_bias(b):                        # (E, 1, d) -> (1, E*d)
        return b.reshape(1, E * b.shape[-1]).astype(f32)

    def tile_ln(g):                          # shared (1, M) LayerNorm param -> (1, E*M)
        return jnp.tile(g.reshape(1, M), (1, E)).astype(f32)

    cast = lambda a: a.astype(mxu_dtype)

    # messenger head (M -> 1) folded with the updater's msg-input column (1 -> M):
    #   cmsg[e*M+i, e*M+k] = mw3[e, i, 0] * uw1[e, 2, k]   (pure outer product, no contraction)
    cmsg = jnp.einsum('ef,ei,ek->eifk', eye, p['mw3'][:, :, 0], p['uw1'][:, 2, :]).reshape(EM, EM)
    # the bias of each of the n summed messages also flows through that column:
    ub1eff = (p['ub1'][:, 0, :] + n * p['mb3'][:, 0, :1] * p['uw1'][:, 2, :]).reshape(1, EM)

    return dict(
        w1=cast(pack_first(p['mw1'])), b1=pack_bias(p['mb1']),
        w2=cast(block_diag(p['mw2'])), b2=pack_bias(p['mb2']),
        ln=jnp.concatenate([tile_ln(p['mga']), tile_ln(p['mba']),
                            tile_ln(p['mgb']), tile_ln(p['mbb']),
                            tile_ln(p['uga']), tile_ln(p['uba']),
                            tile_ln(p['ugb']), tile_ln(p['ubb'])], axis=0),   # (8, EM)
        cmsg=cast(cmsg),
        uw1h=cast(jnp.transpose(p['uw1'][:, 0:2, :], (1, 0, 2)).reshape(2, EM)),
        ub1eff=ub1eff.astype(f32),
        uw2=cast(block_diag(p['uw2'])), ub2=pack_bias(p['ub2']),
        uw3=cast(block_diag(p['uw3'])), ub3=pack_bias(p['ub3']),
    )


def _make_kernel(E, M, n, tbn, mxu_dtype):
    EM = E * M

    def kernel(msg_in_ref, h_ref, w1_ref, b1_ref, w2_ref, b2_ref, ln_ref,
               cmsg_ref, uw1h_ref, ub1_ref, uw2_ref, ub2_ref, uw3_ref, ub3_ref,
               out_ref):
        f32 = jnp.float32
        cvt = lambda a: a.astype(mxu_dtype)

        def block_ln(x, g, b, eps=1e-5):
            # nn.LayerNorm over the M features of each ensemble block of the packed
            # layout (biased variance, eps=1e-5, affine); stays in f32 on the VPU.
            r = x.shape[0]
            xr = x.reshape(r, E, M)
            mu = jnp.mean(xr, axis=-1, keepdims=True)
            xc = xr - mu
            var = jnp.mean(xc * xc, axis=-1, keepdims=True)
            y = (xc * jax.lax.rsqrt(var + eps)).reshape(r, EM)
            return y * g + b

        # ---------------- messenger MLP: 5 -> EM -> EM -> LN -> LN -----------------
        x = msg_in_ref[...]                                                  # (tbn*n, 5)
        h1 = jnp.dot(x, w1_ref[...], preferred_element_type=f32) + b1_ref[...]
        h1 = jnp.maximum(h1, 0.0)
        h2 = jnp.dot(cvt(h1), w2_ref[...], preferred_element_type=f32) + b2_ref[...]
        h2 = jnp.maximum(h2, 0.0)
        h2 = block_ln(h2, ln_ref[0:1, :], ln_ref[1:2, :])
        h2 = block_ln(h2, ln_ref[2:3, :], ln_ref[3:4, :])

        # Sum over the sender axis j *before* the (linear) messenger head; the head
        # and the updater's msg-input column were pre-folded into cmsg, so the
        # lane-width-1 `msg` tensor never exists.
        h2s = jnp.sum(h2.reshape(tbn, n, EM), axis=1)                        # (tbn, EM)

        # --------------- updater MLP: 3 -> EM -> EM -> LN -> LN -> E*out -----------
        v1 = (jnp.dot(h_ref[...], uw1h_ref[...], preferred_element_type=f32)
              + jnp.dot(cvt(h2s), cmsg_ref[...], preferred_element_type=f32)
              + ub1_ref[...])
        v1 = jnp.maximum(v1, 0.0)
        v2 = jnp.dot(cvt(v1), uw2_ref[...], preferred_element_type=f32) + ub2_ref[...]
        v2 = jnp.maximum(v2, 0.0)
        v2 = block_ln(v2, ln_ref[4:5, :], ln_ref[5:6, :])
        v2 = block_ln(v2, ln_ref[6:7, :], ln_ref[7:8, :])
        out = jnp.dot(cvt(v2), uw3_ref[...], preferred_element_type=f32) + ub3_ref[...]
        out_ref[...] = out.astype(out_ref.dtype)

    return kernel


def graph_transition_forward(x, params, *, num_members, mid_weight, latent_size=1,
                             mxu_dtype=jnp.bfloat16, row_tile=None):
    E, M = num_members, mid_weight
    EM = E * M
    B, d = x.shape
    n = d - 1
    assert latent_size == 1, "graph wiring requires latent_size == 1"
    out_dim = 2 * latent_size            # non-deterministic head
    BN = B * n

    obs = x[:, :-1]                      # (B, n)
    action = x[:, -1]                    # (B,)

    # append_index / concater
    coor = jnp.arange(n, dtype=x.dtype) / n
    h = jnp.stack([obs, jnp.broadcast_to(coor, (B, n))], axis=-1)            # (B, n, 2)

    # vectorize_for_message_pass (glue: pure broadcast/rearrange), rows (b,i)-major, j minor.
    xi = jnp.broadcast_to(h[:, :, None, :], (B, n, n, 2))
    xj = jnp.broadcast_to(h[:, None, :, :], (B, n, n, 2))
    a = jnp.broadcast_to(action[:, None, None, None], (B, n, n, 1))
    msg_in = jnp.concatenate([xi, xj, a], axis=-1).reshape(BN * n, 5)

    msg_in = msg_in.astype(mxu_dtype)    # MXU operands in bf16 (or f32), accumulation f32
    h_flat = h.reshape(BN, 2).astype(mxu_dtype)

    pk = _pack_params(params, E, M, n, mxu_dtype)

    # Row tiling over the (b, i) receiver axis -> bounded VMEM + real DMA/compute pipeline.
    if row_tile is None:
        row_tile = BN if BN <= 256 else 256
    TBN = row_tile
    assert BN % TBN == 0 and (TBN == BN or TBN % 8 == 0), (BN, TBN)
    grid = (BN // TBN,)

    full = lambda arr: pl.BlockSpec(arr.shape, lambda r: (0, 0))
    in_specs = [
        pl.BlockSpec((TBN * n, 5), lambda r: (r, 0)),        # msg_in rows for this tile
        pl.BlockSpec((TBN, 2), lambda r: (r, 0)),            # h rows for this tile
        full(pk['w1']), full(pk['b1']), full(pk['w2']), full(pk['b2']),
        full(pk['ln']), full(pk['cmsg']),
        full(pk['uw1h']), full(pk['ub1eff']),
        full(pk['uw2']), full(pk['ub2']),
        full(pk['uw3']), full(pk['ub3']),
    ]
    # NOTE: output lanes stay at E*out_dim (=8); padding to 128 lanes for unmasked
    # stores would inflate output HBM traffic 16x (a net loss at these shapes).
    out_spec = pl.BlockSpec((TBN, E * out_dim), lambda r: (r, 0))

    # Advisory cost / VMEM hints for the XLA scheduler.
    isz = jnp.dtype(mxu_dtype).itemsize
    Rr = BN * n
    flops = 2 * (Rr * 5 * EM + Rr * EM * EM
                 + BN * 2 * EM + BN * EM * EM + BN * EM * EM + BN * EM * E * out_dim)
    transc = 2 * Rr * E + 2 * BN * E                         # rsqrt per LayerNorm row/member
    bytes_acc = ((Rr * 5 + BN * 2) * isz
                 + (5 * EM + 3 * EM * EM + 2 * EM + EM * E * out_dim) * isz
                 + (8 * EM + 4 * EM + E * out_dim) * 4
                 + BN * E * out_dim * 4)
    cost = pl.CostEstimate(flops=int(flops), transcendentals=int(transc),
                           bytes_accessed=int(bytes_acc))

    lane = lambda c: ((c + 127) // 128) * 128
    vmem_est = (2 * TBN * n * lane(5) * isz                  # msg_in (double buffered)
                + 2 * TBN * lane(2) * isz                    # h
                + 2 * TBN * lane(E * out_dim) * 4            # out
                + 2 * (5 + 2 + 4 * EM) * lane(EM) * isz      # packed weights
                + 24 * lane(EM) * 4                          # biases + LN params
                + 8 * TBN * n * lane(EM) * 4)                # live f32 intermediates
    vmem_limit = int(min(max(4 * vmem_est, 8 * 1024 * 1024), 32 * 1024 * 1024))

    kernel = _make_kernel(E, M, n, TBN, mxu_dtype)
    out = pl.pallas_call(
        kernel,
        out_shape=jax.ShapeDtypeStruct((BN, E * out_dim), jnp.float32),
        grid=grid,
        in_specs=in_specs,
        out_specs=out_spec,
        compiler_params=pltpu.CompilerParams(
            dimension_semantics=("parallel",),               # shards row tiles on v7x's 2 TCs
            vmem_limit_bytes=vmem_limit),
        cost_estimate=cost,
    )(msg_in, h_flat,
      pk['w1'], pk['b1'], pk['w2'], pk['b2'], pk['ln'], pk['cmsg'],
      pk['uw1h'], pk['ub1eff'], pk['uw2'], pk['ub2'], pk['uw3'], pk['ub3'])

    # (BN, E*out) -> (E, B, n, out); .squeeze(dim=-1) in the torch code is a no-op
    # for the non-deterministic (out_dim=2) head.
    return out.reshape(B, n, E, out_dim).transpose(2, 0, 1, 3).astype(x.dtype)


def _reference_forward(x, params, *, num_members, mid_weight, latent_size=1):
    """Pure-JAX reference of the torch forward (Precision.HIGHEST, for correctness check)."""
    p = params
    B, d = x.shape
    n = d - 1
    obs, action = x[:, :-1], x[:, -1]
    coor = jnp.arange(n, dtype=x.dtype) / n
    h = jnp.stack([obs, jnp.broadcast_to(coor, (B, n))], axis=-1)
    xi = jnp.broadcast_to(h[:, :, None, :], (B, n, n, 2))
    xj = jnp.broadcast_to(h[:, None, :, :], (B, n, n, 2))
    a = jnp.broadcast_to(action[:, None, None, None], (B, n, n, 1))
    msg_in = jnp.concatenate([xi, xj, a], axis=-1)                       # (B,n,n,5)

    hi = jax.lax.Precision.HIGHEST
    ee = lambda lhs, w: jnp.einsum('e...d,edh->e...h', lhs, w, precision=hi)

    z = jnp.einsum('...d,edh->e...h', msg_in, p['mw1'], precision=hi) + p['mb1'][:, None, None, :, :]
    z = jax.nn.relu(z)
    z = jax.nn.relu(ee(z, p['mw2']) + p['mb2'][:, None, None, :, :])
    z = _layer_norm(z, p['mga'][0], p['mba'][0])
    z = _layer_norm(z, p['mgb'][0], p['mbb'][0])
    messages = ee(z, p['mw3']) + p['mb3'][:, None, None, :, :]           # (E,B,n,n,1)
    msg = jnp.sum(messages, axis=-2)[..., 0]                             # (E,B,n)

    u_in = jnp.concatenate(
        [jnp.broadcast_to(h[None], (num_members, B, n, 2)), msg[..., None]], axis=-1)
    v = jax.nn.relu(ee(u_in, p['uw1']) + p['ub1'][:, None, :, :])
    v = jax.nn.relu(ee(v, p['uw2']) + p['ub2'][:, None, :, :])
    v = _layer_norm(v, p['uga'][0], p['uba'][0])
    v = _layer_norm(v, p['ugb'][0], p['ubb'][0])
    return ee(v, p['uw3']) + p['ub3'][:, None, :, :]                     # (E,B,n,2)


if __name__ == "__main__":
    E, B, n, M = 4, 2, 8, 32        # ensemble members, batch, obs/node dim, mid_weight
    latent = 1                      # latent_size must be 1 for the graph wiring to line up
    key = jax.random.PRNGKey(0)
    k_x, k_p = jax.random.split(key)
    x = jax.random.uniform(k_x, (B, n + 1), dtype=jnp.float32)           # obs (B,n) + action
    params = init_params(k_p, E, M, latent)

    ref = _reference_forward(x, params, num_members=E, mid_weight=M, latent_size=latent)

    # f32-operand MXU path: tight check against the Precision.HIGHEST reference.
    out_f32 = graph_transition_forward(x, params, num_members=E, mid_weight=M,
                                       latent_size=latent, mxu_dtype=jnp.float32)
    out_f32 = jax.block_until_ready(out_f32)
    assert out_f32.shape == (E, B, n, 2 * latent), out_f32.shape
    assert jnp.allclose(out_f32, ref, rtol=1e-2, atol=1e-2), float(jnp.max(jnp.abs(out_f32 - ref)))

    # bf16-operand MXU path (perf default; biggest win on v5e).  bf16 inputs with f32
    # accumulation move further from the f32 reference, so the tolerance is looser.
    out_bf16 = graph_transition_forward(x, params, num_members=E, mid_weight=M,
                                        latent_size=latent, mxu_dtype=jnp.bfloat16)
    out_bf16 = jax.block_until_ready(out_bf16)
    assert out_bf16.shape == (E, B, n, 2 * latent), out_bf16.shape
    assert bool(jnp.all(jnp.isfinite(out_bf16)))
    assert jnp.allclose(out_bf16, ref, rtol=1e-1, atol=5e-1), float(jnp.max(jnp.abs(out_bf16 - ref)))

    print("KERNEL_OK")
</pallas_src>

<mosaic_0001>
module attributes {stable_mosaic.version = 11 : i64} {
  func.func @kernel(%arg0: i32, %arg1: memref<128x5xf32, #tpu.memory_space<vmem>>, %arg2: memref<16x2xf32, #tpu.memory_space<vmem>>, %arg3: memref<5x128xf32, #tpu.memory_space<vmem>>, %arg4: memref<1x128xf32, #tpu.memory_space<vmem>>, %arg5: memref<128x128xf32, #tpu.memory_space<vmem>>, %arg6: memref<1x128xf32, #tpu.memory_space<vmem>>, %arg7: memref<8x128xf32, #tpu.memory_space<vmem>>, %arg8: memref<128x128xf32, #tpu.memory_space<vmem>>, %arg9: memref<2x128xf32, #tpu.memory_space<vmem>>, %arg10: memref<1x128xf32, #tpu.memory_space<vmem>>, %arg11: memref<128x128xf32, #tpu.memory_space<vmem>>, %arg12: memref<1x128xf32, #tpu.memory_space<vmem>>, %arg13: memref<128x8xf32, #tpu.memory_space<vmem>>, %arg14: memref<1x8xf32, #tpu.memory_space<vmem>>, %arg15: memref<16x8xf32, #tpu.memory_space<vmem>>) attributes {dimension_semantics = [#tpu.dimension_semantics<parallel>], iteration_bounds = array<i64: 1>, scalar_prefetch = 0 : i64, scratch_operands = 0 : i64, tpu.core_type = #tpu.core_type<tc>, window_params = [{transform_indices = @transform_0, window_bounds = array<i64: 128, 5>}, {transform_indices = @transform_1, window_bounds = array<i64: 16, 2>}, {pipeline_mode = #tpu.pipeline_mode<synchronous>, transform_indices = @transform_2, window_bounds = array<i64: 5, 128>}, {pipeline_mode = #tpu.pipeline_mode<synchronous>, transform_indices = @transform_3, window_bounds = array<i64: 1, 128>}, {pipeline_mode = #tpu.pipeline_mode<synchronous>, transform_indices = @transform_4, window_bounds = array<i64: 128, 128>}, {pipeline_mode = #tpu.pipeline_mode<synchronous>, transform_indices = @transform_5, window_bounds = array<i64: 1, 128>}, {pipeline_mode = #tpu.pipeline_mode<synchronous>, transform_indices = @transform_6, window_bounds = array<i64: 8, 128>}, {pipeline_mode = #tpu.pipeline_mode<synchronous>, transform_indices = @transform_7, window_bounds = array<i64: 128, 128>}, {pipeline_mode = #tpu.pipeline_mode<synchronous>, transform_indices = @transform_8, window_bounds = array<i64: 2, 128>}, {pipeline_mode = #tpu.pipeline_mode<synchronous>, transform_indices = @transform_9, window_bounds = array<i64: 1, 128>}, {pipeline_mode = #tpu.pipeline_mode<synchronous>, transform_indices = @transform_10, window_bounds = array<i64: 128, 128>}, {pipeline_mode = #tpu.pipeline_mode<synchronous>, transform_indices = @transform_11, window_bounds = array<i64: 1, 128>}, {pipeline_mode = #tpu.pipeline_mode<synchronous>, transform_indices = @transform_12, window_bounds = array<i64: 128, 8>}, {pipeline_mode = #tpu.pipeline_mode<synchronous>, transform_indices = @transform_13, window_bounds = array<i64: 1, 8>}, {transform_indices = @transform_14, window_bounds = array<i64: 16, 8>}]} {
    %c0 = arith.constant 0 : index
    %c0_0 = arith.constant 0 : index
    %0 = vector.load %arg1[%c0, %c0_0] : memref<128x5xf32, #tpu.memory_space<vmem>>, vector<128x5xf32>
    %c0_1 = arith.constant 0 : index
    %c0_2 = arith.constant 0 : index
    %1 = vector.load %arg3[%c0_1, %c0_2] : memref<5x128xf32, #tpu.memory_space<vmem>>, vector<5x128xf32>
    %cst = arith.constant dense<0.000000e+00> : vector<128x128xf32>
    %2 = tpu.matmul %0, %1, %cst {dimension_numbers = #tpu.dot_dimension_numbers<[1], [0], [0], [1], [0, 0, 1, 1], [], []>} : vector<128x5xf32>, vector<5x128xf32>, vector<128x128xf32> -> vector<128x128xf32>
    %c0_3 = arith.constant 0 : index
    %c0_4 = arith.constant 0 : index
    %3 = vector.load %arg4[%c0_3, %c0_4] : memref<1x128xf32, #tpu.memory_space<vmem>>, vector<1x128xf32>
    %4 = vector.broadcast %3 : vector<1x128xf32> to vector<128x128xf32>
    %5 = arith.addf %2, %4 : vector<128x128xf32>
    %cst_5 = arith.constant 0.000000e+00 : f32
    %6 = vector.broadcast %cst_5 : f32 to vector<128x128xf32>
    %7 = arith.maximumf %5, %6 : vector<128x128xf32>
    %c0_6 = arith.constant 0 : index
    %c0_7 = arith.constant 0 : index
    %8 = vector.load %arg5[%c0_6, %c0_7] : memref<128x128xf32, #tpu.memory_space<vmem>>, vector<128x128xf32>
    %cst_8 = arith.constant dense<0.000000e+00> : vector<128x128xf32>
    %9 = tpu.matmul %7, %8, %cst_8 {dimension_numbers = #tpu.dot_dimension_numbers<[1], [0], [0], [1], [0, 0, 1, 1], [], []>} : vector<128x128xf32>, vector<128x128xf32>, vector<128x128xf32> -> vector<128x128xf32>
    %c0_9 = arith.constant 0 : index
    %c0_10 = arith.constant 0 : index
    %10 = vector.load %arg6[%c0_9, %c0_10] : memref<1x128xf32, #tpu.memory_space<vmem>>, vector<1x128xf32>
    %11 = vector.broadcast %10 : vector<1x128xf32> to vector<128x128xf32>
    %12 = arith.addf %9, %11 : vector<128x128xf32>
    %cst_11 = arith.constant 0.000000e+00 : f32
    %13 = vector.broadcast %cst_11 : f32 to vector<128x128xf32>
    %14 = arith.maximumf %12, %13 : vector<128x128xf32>
    %c0_12 = arith.constant 0 : index
    %c0_13 = arith.constant 0 : index
    %15 = vector.load %arg7[%c0_12, %c0_13] : memref<8x128xf32, #tpu.memory_space<vmem>>, vector<1x128xf32>
    %c1 = arith.constant 1 : index
    %c0_14 = arith.constant 0 : index
    %16 = vector.load %arg7[%c1, %c0_14] : memref<8x128xf32, #tpu.memory_space<vmem>>, vector<1x128xf32>
    %17 = vector.shape_cast %14 : vector<128x128xf32> to vector<128x4x32xf32>
    %cst_15 = arith.constant dense<0.000000e+00> : vector<128x4xf32>
    %18 = vector.multi_reduction <add>, %17, %cst_15 [2] : vector<128x4x32xf32> to vector<128x4xf32>
    %19 = vector.shape_cast %18 : vector<128x4xf32> to vector<128x4x1xf32>
    %cst_16 = arith.constant 3.200000e+01 : f32
    %20 = vector.broadcast %cst_16 : f32 to vector<128x4x1xf32>
    %21 = arith.divf %19, %20 : vector<128x4x1xf32>
    %22 = vector.broadcast %21 : vector<128x4x1xf32> to vector<128x4x32xf32>
    %23 = arith.subf %17, %22 : vector<128x4x32xf32>
    %24 = arith.mulf %23, %23 : vector<128x4x32xf32>
    %cst_17 = arith.constant dense<0.000000e+00> : vector<128x4xf32>
    %25 = vector.multi_reduction <add>, %24, %cst_17 [2] : vector<128x4x32xf32> to vector<128x4xf32>
    %26 = vector.shape_cast %25 : vector<128x4xf32> to vector<128x4x1xf32>
    %cst_18 = arith.constant 3.200000e+01 : f32
    %27 = vector.broadcast %cst_18 : f32 to vector<128x4x1xf32>
    %28 = arith.divf %26, %27 : vector<128x4x1xf32>
    %cst_19 = arith.constant 9.99999974E-6 : f32
    %29 = vector.broadcast %cst_19 : f32 to vector<128x4x1xf32>
    %30 = arith.addf %28, %29 : vector<128x4x1xf32>
    %31 = math.rsqrt %30 : vector<128x4x1xf32>
    %32 = vector.broadcast %31 : vector<128x4x1xf32> to vector<128x4x32xf32>
    %33 = arith.mulf %23, %32 : vector<128x4x32xf32>
    %34 = vector.shape_cast %33 : vector<128x4x32xf32> to vector<128x128xf32>
    %35 = vector.broadcast %15 : vector<1x128xf32> to vector<128x128xf32>
    %36 = arith.mulf %34, %35 : vector<128x128xf32>
    %37 = vector.broadcast %16 : vector<1x128xf32> to vector<128x128xf32>
    %38 = arith.addf %36, %37 : vector<128x128xf32>
    %c2 = arith.constant 2 : index
    %c0_20 = arith.constant 0 : index
    %39 = vector.load %arg7[%c2, %c0_20] : memref<8x128xf32, #tpu.memory_space<vmem>>, vector<1x128xf32>
    %c3 = arith.constant 3 : index
    %c0_21 = arith.constant 0 : index
    %40 = vector.load %arg7[%c3, %c0_21] : memref<8x128xf32, #tpu.memory_space<vmem>>, vector<1x128xf32>
    %41 = vector.shape_cast %38 : vector<128x128xf32> to vector<128x4x32xf32>
    %cst_22 = arith.constant dense<0.000000e+00> : vector<128x4xf32>
    %42 = vector.multi_reduction <add>, %41, %cst_22 [2] : vector<128x4x32xf32> to vector<128x4xf32>
    %43 = vector.shape_cast %42 : vector<128x4xf32> to vector<128x4x1xf32>
    %cst_23 = arith.constant 3.200000e+01 : f32
    %44 = vector.broadcast %cst_23 : f32 to vector<128x4x1xf32>
    %45 = arith.divf %43, %44 : vector<128x4x1xf32>
    %46 = vector.broadcast %45 : vector<128x4x1xf32> to vector<128x4x32xf32>
    %47 = arith.subf %41, %46 : vector<128x4x32xf32>
    %48 = arith.mulf %47, %47 : vector<128x4x32xf32>
    %cst_24 = arith.constant dense<0.000000e+00> : vector<128x4xf32>
    %49 = vector.multi_reduction <add>, %48, %cst_24 [2] : vector<128x4x32xf32> to vector<128x4xf32>
    %50 = vector.shape_cast %49 : vector<128x4xf32> to vector<128x4x1xf32>
    %cst_25 = arith.constant 3.200000e+01 : f32
    %51 = vector.broadcast %cst_25 : f32 to vector<128x4x1xf32>
    %52 = arith.divf %50, %51 : vector<128x4x1xf32>
    %cst_26 = arith.constant 9.99999974E-6 : f32
    %53 = vector.broadcast %cst_26 : f32 to vector<128x4x1xf32>
    %54 = arith.addf %52, %53 : vector<128x4x1xf32>
    %55 = math.rsqrt %54 : vector<128x4x1xf32>
    %56 = vector.broadcast %55 : vector<128x4x1xf32> to vector<128x4x32xf32>
    %57 = arith.mulf %47, %56 : vector<128x4x32xf32>
    %58 = vector.shape_cast %57 : vector<128x4x32xf32> to vector<128x128xf32>
    %59 = vector.broadcast %39 : vector<1x128xf32> to vector<128x128xf32>
    %60 = arith.mulf %58, %59 : vector<128x128xf32>
    %61 = vector.broadcast %40 : vector<1x128xf32> to vector<128x128xf32>
    %62 = arith.addf %60, %61 : vector<128x128xf32>
    %63 = vector.shape_cast %62 : vector<128x128xf32> to vector<16x8x128xf32>
    %cst_27 = arith.constant dense<0.000000e+00> : vector<16x128xf32>
    %64 = vector.multi_reduction <add>, %63, %cst_27 [1] : vector<16x8x128xf32> to vector<16x128xf32>
    %c0_28 = arith.constant 0 : index
    %c0_29 = arith.constant 0 : index
    %65 = vector.load %arg2[%c0_28, %c0_29] : memref<16x2xf32, #tpu.memory_space<vmem>>, vector<16x2xf32>
    %c0_30 = arith.constant 0 : index
    %c0_31 = arith.constant 0 : index
    %66 = vector.load %arg9[%c0_30, %c0_31] : memref<2x128xf32, #tpu.memory_space<vmem>>, vector<2x128xf32>
    %cst_32 = arith.constant dense<0.000000e+00> : vector<16x128xf32>
    %67 = tpu.matmul %65, %66, %cst_32 {dimension_numbers = #tpu.dot_dimension_numbers<[1], [0], [0], [1], [0, 0, 1, 1], [], []>} : vector<16x2xf32>, vector<2x128xf32>, vector<16x128xf32> -> vector<16x128xf32>
    %c0_33 = arith.constant 0 : index
    %c0_34 = arith.constant 0 : index
    %68 = vector.load %arg8[%c0_33, %c0_34] : memref<128x128xf32, #tpu.memory_space<vmem>>, vector<128x128xf32>
    %cst_35 = arith.constant dense<0.000000e+00> : vector<16x128xf32>
    %69 = tpu.matmul %64, %68, %cst_35 {dimension_numbers = #tpu.dot_dimension_numbers<[1], [0], [0], [1], [0, 0, 1, 1], [], []>} : vector<16x128xf32>, vector<128x128xf32>, vector<16x128xf32> -> vector<16x128xf32>
    %70 = arith.addf %67, %69 : vector<16x128xf32>
    %c0_36 = arith.constant 0 : index
    %c0_37 = arith.constant 0 : index
    %71 = vector.load %arg10[%c0_36, %c0_37] : memref<1x128xf32, #tpu.memory_space<vmem>>, vector<1x128xf32>
    %72 = vector.broadcast %71 : vector<1x128xf32> to vector<16x128xf32>
    %73 = arith.addf %70, %72 : vector<16x128xf32>
    %cst_38 = arith.constant 0.000000e+00 : f32
    %74 = vector.broadcast %cst_38 : f32 to vector<16x128xf32>
    %75 = arith.maximumf %73, %74 : vector<16x128xf32>
    %c0_39 = arith.constant 0 : index
    %c0_40 = arith.constant 0 : index
    %76 = vector.load %arg11[%c0_39, %c0_40] : memref<128x128xf32, #tpu.memory_space<vmem>>, vector<128x128xf32>
    %cst_41 = arith.constant dense<0.000000e+00> : vector<16x128xf32>
    %77 = tpu.matmul %75, %76, %cst_41 {dimension_numbers = #tpu.dot_dimension_numbers<[1], [0], [0], [1], [0, 0, 1, 1], [], []>} : vector<16x128xf32>, vector<128x128xf32>, vector<16x128xf32> -> vector<16x128xf32>
    %c0_42 = arith.constant 0 : index
    %c0_43 = arith.constant 0 : index
    %78 = vector.load %arg12[%c0_42, %c0_43] : memref<1x128xf32, #tpu.memory_space<vmem>>, vector<1x128xf32>
    %79 = vector.broadcast %78 : vector<1x128xf32> to vector<16x128xf32>
    %80 = arith.addf %77, %79 : vector<16x128xf32>
    %cst_44 = arith.constant 0.000000e+00 : f32
    %81 = vector.broadcast %cst_44 : f32 to vector<16x128xf32>
    %82 = arith.maximumf %80, %81 : vector<16x128xf32>
    %c4 = arith.constant 4 : index
    %c0_45 = arith.constant 0 : index
    %83 = vector.load %arg7[%c4, %c0_45] : memref<8x128xf32, #tpu.memory_space<vmem>>, vector<1x128xf32>
    %c5 = arith.constant 5 : index
    %c0_46 = arith.constant 0 : index
    %84 = vector.load %arg7[%c5, %c0_46] : memref<8x128xf32, #tpu.memory_space<vmem>>, vector<1x128xf32>
    %85 = vector.shape_cast %82 : vector<16x128xf32> to vector<16x4x32xf32>
    %cst_47 = arith.constant dense<0.000000e+00> : vector<16x4xf32>
    %86 = vector.multi_reduction <add>, %85, %cst_47 [2] : vector<16x4x32xf32> to vector<16x4xf32>
    %87 = vector.shape_cast %86 : vector<16x4xf32> to vector<16x4x1xf32>
    %cst_48 = arith.constant 3.200000e+01 : f32
    %88 = vector.broadcast %cst_48 : f32 to vector<16x4x1xf32>
    %89 = arith.divf %87, %88 : vector<16x4x1xf32>
    %90 = vector.broadcast %89 : vector<16x4x1xf32> to vector<16x4x32xf32>
    %91 = arith.subf %85, %90 : vector<16x4x32xf32>
    %92 = arith.mulf %91, %91 : vector<16x4x32xf32>
    %cst_49 = arith.constant dense<0.000000e+00> : vector<16x4xf32>
    %93 = vector.multi_reduction <add>, %92, %cst_49 [2] : vector<16x4x32xf32> to vector<16x4xf32>
    %94 = vector.shape_cast %93 : vector<16x4xf32> to vector<16x4x1xf32>
    %cst_50 = arith.constant 3.200000e+01 : f32
    %95 = vector.broadcast %cst_50 : f32 to vector<16x4x1xf32>
    %96 = arith.divf %94, %95 : vector<16x4x1xf32>
    %cst_51 = arith.constant 9.99999974E-6 : f32
    %97 = vector.broadcast %cst_51 : f32 to vector<16x4x1xf32>
    %98 = arith.addf %96, %97 : vector<16x4x1xf32>
    %99 = math.rsqrt %98 : vector<16x4x1xf32>
    %100 = vector.broadcast %99 : vector<16x4x1xf32> to vector<16x4x32xf32>
    %101 = arith.mulf %91, %100 : vector<16x4x32xf32>
    %102 = vector.shape_cast %101 : vector<16x4x32xf32> to vector<16x128xf32>
    %103 = vector.broadcast %83 : vector<1x128xf32> to vector<16x128xf32>
    %104 = arith.mulf %102, %103 : vector<16x128xf32>
    %105 = vector.broadcast %84 : vector<1x128xf32> to vector<16x128xf32>
    %106 = arith.addf %104, %105 : vector<16x128xf32>
    %c6 = arith.constant 6 : index
    %c0_52 = arith.constant 0 : index
    %107 = vector.load %arg7[%c6, %c0_52] : memref<8x128xf32, #tpu.memory_space<vmem>>, vector<1x128xf32>
    %c7 = arith.constant 7 : index
    %c0_53 = arith.constant 0 : index
    %108 = vector.load %arg7[%c7, %c0_53] : memref<8x128xf32, #tpu.memory_space<vmem>>, vector<1x128xf32>
    %109 = vector.shape_cast %106 : vector<16x128xf32> to vector<16x4x32xf32>
    %cst_54 = arith.constant dense<0.000000e+00> : vector<16x4xf32>
    %110 = vector.multi_reduction <add>, %109, %cst_54 [2] : vector<16x4x32xf32> to vector<16x4xf32>
    %111 = vector.shape_cast %110 : vector<16x4xf32> to vector<16x4x1xf32>
    %cst_55 = arith.constant 3.200000e+01 : f32
    %112 = vector.broadcast %cst_55 : f32 to vector<16x4x1xf32>
    %113 = arith.divf %111, %112 : vector<16x4x1xf32>
    %114 = vector.broadcast %113 : vector<16x4x1xf32> to vector<16x4x32xf32>
    %115 = arith.subf %109, %114 : vector<16x4x32xf32>
    %116 = arith.mulf %115, %115 : vector<16x4x32xf32>
    %cst_56 = arith.constant dense<0.000000e+00> : vector<16x4xf32>
    %117 = vector.multi_reduction <add>, %116, %cst_56 [2] : vector<16x4x32xf32> to vector<16x4xf32>
    %118 = vector.shape_cast %117 : vector<16x4xf32> to vector<16x4x1xf32>
    %cst_57 = arith.constant 3.200000e+01 : f32
    %119 = vector.broadcast %cst_57 : f32 to vector<16x4x1xf32>
    %120 = arith.divf %118, %119 : vector<16x4x1xf32>
    %cst_58 = arith.constant 9.99999974E-6 : f32
    %121 = vector.broadcast %cst_58 : f32 to vector<16x4x1xf32>
    %122 = arith.addf %120, %121 : vector<16x4x1xf32>
    %123 = math.rsqrt %122 : vector<16x4x1xf32>
    %124 = vector.broadcast %123 : vector<16x4x1xf32> to vector<16x4x32xf32>
    %125 = arith.mulf %115, %124 : vector<16x4x32xf32>
    %126 = vector.shape_cast %125 : vector<16x4x32xf32> to vector<16x128xf32>
    %127 = vector.broadcast %107 : vector<1x128xf32> to vector<16x128xf32>
    %128 = arith.mulf %126, %127 : vector<16x128xf32>
    %129 = vector.broadcast %108 : vector<1x128xf32> to vector<16x128xf32>
    %130 = arith.addf %128, %129 : vector<16x128xf32>
    %c0_59 = arith.constant 0 : index
    %c0_60 = arith.constant 0 : index
    %131 = vector.load %arg13[%c0_59, %c0_60] : memref<128x8xf32, #tpu.memory_space<vmem>>, vector<128x8xf32>
    %cst_61 = arith.constant dense<0.000000e+00> : vector<16x8xf32>
    %132 = tpu.matmul %130, %131, %cst_61 {dimension_numbers = #tpu.dot_dimension_numbers<[1], [0], [0], [1], [0, 0, 1, 1], [], []>} : vector<16x128xf32>, vector<128x8xf32>, vector<16x8xf32> -> vector<16x8xf32>
    %c0_62 = arith.constant 0 : index
    %c0_63 = arith.constant 0 : index
    %133 = vector.load %arg14[%c0_62, %c0_63] : memref<1x8xf32, #tpu.memory_space<vmem>>, vector<1x8xf32>
    %134 = vector.broadcast %133 : vector<1x8xf32> to vector<16x8xf32>
    %135 = arith.addf %132, %134 : vector<16x8xf32>
    %c0_64 = arith.constant 0 : index
    %c0_65 = arith.constant 0 : index
    %136 = vector.load %arg15[%c0_64, %c0_65] : memref<16x8xf32, #tpu.memory_space<vmem>>, vector<16x8xf32>
    tpu.vector_store %arg15[%c0_64, %c0_65], %135 {strides = array<i32>} : memref<16x8xf32, #tpu.memory_space<vmem>>, vector<16x8xf32>,
    return
  }
  func.func @transform_0(%arg0: i32) -> (i32, i32) {
    %c0_i32 = arith.constant 0 : i32
    %c0_i32_0 = arith.constant 0 : i32
    return %arg0, %c0_i32 : i32, i32
  }
  func.func @transform_1(%arg0: i32) -> (i32, i32) {
    %c0_i32 = arith.constant 0 : i32
    %c0_i32_0 = arith.constant 0 : i32
    return %arg0, %c0_i32 : i32, i32
  }
  func.func @transform_2(%arg0: i32) -> (i32, i32) {
    %c0_i32 = arith.constant 0 : i32
    %c0_i32_0 = arith.constant 0 : i32
    %c0_i32_1 = arith.constant 0 : i32
    return %c0_i32, %c0_i32_0 : i32, i32
  }
  func.func @transform_3(%arg0: i32) -> (i32, i32) {
    %c0_i32 = arith.constant 0 : i32
    %c0_i32_0 = arith.constant 0 : i32
    %c0_i32_1 = arith.constant 0 : i32
    return %c0_i32, %c0_i32_0 : i32, i32
  }
  func.func @transform_4(%arg0: i32) -> (i32, i32) {
    %c0_i32 = arith.constant 0 : i32
    %c0_i32_0 = arith.constant 0 : i32
    %c0_i32_1 = arith.constant 0 : i32
    return %c0_i32, %c0_i32_0 : i32, i32
  }
  func.func @transform_5(%arg0: i32) -> (i32, i32) {
    %c0_i32 = arith.constant 0 : i32
    %c0_i32_0 = arith.constant 0 : i32
    %c0_i32_1 = arith.constant 0 : i32
    return %c0_i32, %c0_i32_0 : i32, i32
  }
  func.func @transform_6(%arg0: i32) -> (i32, i32) {
    %c0_i32 = arith.constant 0 : i32
    %c0_i32_0 = arith.constant 0 : i32
    %c0_i32_1 = arith.constant 0 : i32
    return %c0_i32, %c0_i32_0 : i32, i32
  }
  func.func @transform_7(%arg0: i32) -> (i32, i32) {
    %c0_i32 = arith.constant 0 : i32
    %c0_i32_0 = arith.constant 0 : i32
    %c0_i32_1 = arith.constant 0 : i32
    return %c0_i32, %c0_i32_0 : i32, i32
  }
  func.func @transform_8(%arg0: i32) -> (i32, i32) {
    %c0_i32 = arith.constant 0 : i32
    %c0_i32_0 = arith.constant 0 : i32
    %c0_i32_1 = arith.constant 0 : i32
    return %c0_i32, %c0_i32_0 : i32, i32
  }
  func.func @transform_9(%arg0: i32) -> (i32, i32) {
    %c0_i32 = arith.constant 0 : i32
    %c0_i32_0 = arith.constant 0 : i32
    %c0_i32_1 = arith.constant 0 : i32
    return %c0_i32, %c0_i32_0 : i32, i32
  }
  func.func @transform_10(%arg0: i32) -> (i32, i32) {
    %c0_i32 = arith.constant 0 : i32
    %c0_i32_0 = arith.constant 0 : i32
    %c0_i32_1 = arith.constant 0 : i32
    return %c0_i32, %c0_i32_0 : i32, i32
  }
  func.func @transform_11(%arg0: i32) -> (i32, i32) {
    %c0_i32 = arith.constant 0 : i32
    %c0_i32_0 = arith.constant 0 : i32
    %c0_i32_1 = arith.constant 0 : i32
    return %c0_i32, %c0_i32_0 : i32, i32
  }
  func.func @transform_12(%arg0: i32) -> (i32, i32) {
    %c0_i32 = arith.constant 0 : i32
    %c0_i32_0 = arith.constant 0 : i32
    %c0_i32_1 = arith.constant 0 : i32
    return %c0_i32, %c0_i32_0 : i32, i32
  }
  func.func @transform_13(%arg0: i32) -> (i32, i32) {
    %c0_i32 = arith.constant 0 : i32
    %c0_i32_0 = arith.constant 0 : i32
    %c0_i32_1 = arith.constant 0 : i32
    return %c0_i32, %c0_i32_0 : i32, i32
  }
  func.func @transform_14(%arg0: i32) -> (i32, i32) {
    %c0_i32 = arith.constant 0 : i32
    %c0_i32_0 = arith.constant 0 : i32
    return %arg0, %c0_i32 : i32, i32
  }
}

</mosaic_0001>

<bundles_post_ra>
// kernel: tpu_custom_call.1
= control target key start
LH: loop header
LB: loop body
LE: loop exit
PB: predicated region body
PF: predicated region fallthrough
CT: control target
= control target key end

     0   :  { %19 = vsyncpa [#allocation3], 0  ;;  %s11742_s29 = smov [#allocation2]   ;;  %s19170_s0 = inlined_call_operand.vmem [shape: f32[128,5], index: 0, kind: input, shape index: {}]   ;;  %s19171_s1 = inlined_call_operand.vmem [shape: f32[16,2], index: 1, kind: input, shape index: {}]   ;;  %s19172_s2 = inlined_call_operand.vmem [shape: f32[5,128], index: 2, kind: input, shape index: {}]   ;;  %s19173_s3 = inlined_call_operand.vmem [shape: f32[1,128], index: 3, kind: input, shape index: {}]   ;;  %s19174_s4 = inlined_call_operand.vmem [shape: f32[128,128], index: 4, kind: input, shape index: {}]   ;;  %s19175_s5 = inlined_call_operand.vmem [shape: f32[1,128], index: 5, kind: input, shape index: {}]   ;;  %s19176_s6 = inlined_call_operand.vmem [shape: f32[8,128], index: 6, kind: input, shape index: {}]   ;;  %s19177_s7 = inlined_call_operand.vmem [shape: f32[128,128], index: 7, kind: input, shape index: {}]   ;;  %s19178_s8 = inlined_call_operand.vmem [shape: f32[2,128], index: 8, kind: input, shape index: {}]   ;;  %s19179_s9 = inlined_call_operand.vmem [shape: f32[1,128], index: 9, kind: input, shape index: {}]   ;;  %s19180_s10 = inlined_call_operand.hbm [shape: f32[128,128], index: 10, kind: input, shape index: {}]   ;;  %s19181_s11 = inlined_call_operand.vmem [shape: f32[1,128], index: 11, kind: input, shape index: {}]   ;;  %s19182_s12 = inlined_call_operand.vmem [shape: f32[128,8], index: 12, kind: input, shape index: {}]   ;;  %s19183_s13 = inlined_call_operand.vmem [shape: f32[1,8], index: 13, kind: input, shape index: {}]   ;;  %s19184_s14 = inlined_call_operand.vmem [shape: f32[16,8], index: 14, kind: output, shape index: {}]  }
   0x1   :  { %s45_s30 = sshll.u32 %s11742_s29, 4  ;;  %s11718_s17 = scalar_lea.hbm %s19180_s10, 2048  ;;  %s46_s30 = int_to_ptr.vmem [resolvable:$true] %s45_s30 }
   0x2   :  { %p11719_p0 = scmp.ne.s32.totalorder %s19180_s10, %s11718_s17  ;;  %p11722_p1 = scmp.lt.u32.totalorder %s11718_s17, %s19180_s10 }
   0x4   :  { %p11724_p2 = pnand %p11722_p1, %p11719_p0 }
   0x6   :  { %11727 = shalt.err (!%p11724_p2)
}
   0x7   :  { %s11728_s22 = scalar_lea.vmem %s46_s30, 2048  ;;  %p11733_p4 = scmp.lt.s32.totalorder %s46_s30, %s46_s30 }
   0x8   :  { %p11729_p3 = scmp.ne.s32.totalorder %s46_s30, %s11728_s22  ;;  %p11734_p5 = scmp.lt.s32.totalorder %s11728_s22, %s11728_s22 }
   0xa   :  { %p11735_p6 = por %p11734_p5, %p11733_p4 }
   0xc   :  { %p11736_p7 = pnand %p11735_p6, %p11729_p3 }
   0xe   :  { %11739 = shalt.err (!%p11736_p7)
}
   0xf   :  { %s11743_s23 = smov 128   ;;  %s11744_s24 = smov 8  }
  0x10   :  { %51 = dma.hbm_to_vmem [thread:$0]  %s19180_s10, 2048, %s46_s30, [#allocation3], %s11743_s23, %s11743_s23, %s11744_s24  }
  0x11   :  { %11740 = dma.done.wait [#allocation3], 2048  }
  0x12   :  { %11741 = vsyncadd [#allocation3], 4294965248  ;;  %vm134_vm0 = vcmask 1044480   ;;  %vm85_vm1 = vcmask 39936   ;;  %v77_v0 = vld [vmem:[%s19172_s2] sm:$0x1f] }
  0x13   :  { %v61_v1 = vld [vmem:[%s19170_s0] sm:$0xff]  ;;  %v62_v2 = vld [vmem:[%s19170_s0 + $0x8] sm:$0xff]  ;;  %10811 = vmatprep.subr.msk.mxu1 %vm134_vm0, %v77_v0  ;;  %v63_v3 = vld [vmem:[%s19170_s0 + $0x10] sm:$0xff]  ;;  %s11746_s23 = smov 96   ;;  %vm1733_vm2 = vcmask 257024   ;;  %vm4679_vm3 = vcmask 261120  }
  0x14   :  { %10813 = vmatprep.mubr.msk.f32.mxu1 %vm85_vm1, %v61_v1  ;;  %10812 = vmatpush3.msk.msra.mxu1 %vm134_vm0, %v77_v0  ;;  %v64_v4 = vld [vmem:[%s19170_s0 + $0x18] sm:$0xff]  ;;  %v65_v5 = vld [vmem:[%s19170_s0 + $0x20] sm:$0xff]  ;;  %v300_v7 = vld [vmem:[%s19174_s4 + $0x8] sm:$0xff]  ;;  %vm4696_vm4 = vcmask 523264   ;;  %vm4713_vm5 = vcmask 785408   ;;  %vm9183_vm6 = vcmask 1041409  }
  0x15   :  { %10814 = vmatmul.mubr.msk.f32.vlgmr.msra.gmra.mrb[0].mxu1 %vm85_vm1, %v62_v2  ;;  %v299_v6 = vld [vmem:[%s19174_s4] sm:$0xff]  ;;  %v301_v8 = vld [vmem:[%s19174_s4 + $0x10] sm:$0xff]  ;;  %v302_v9 = vld [vmem:[%s19174_s4 + $0x18] sm:$0xff]  ;;  %vm9185_vm7 = vcmask 1042434   ;;  %vm9187_vm8 = vcmask 1043459   ;;  %vm9189_vm9 = vcmask 1044484  }
  0x16   :  { %10816 = vmatprep.mubr.msk.f32.mxu1 %vm85_vm1, %v63_v3  ;;  %v11003_v10 = vpack.c.bf16 %v300_v7, %v299_v6  ;;  %v11007_v11 = vpack.c.bf16 %v302_v9, %v301_v8  ;;  %v66_v12 = vld [vmem:[%s19170_s0 + $0x28] sm:$0xff]  ;;  %v303_v13 = vld [vmem:[%s19174_s4 + $0x20] sm:$0xff]  ;;  %v67_v15 = vld [vmem:[%s19170_s0 + $0x30] sm:$0xff]  ;;  %vm9191_vm10 = vcmask 1045509   ;;  %vm9288_vm11 = vcmask 1041408  }
  0x17   :  { %v304_v14 = vld [vmem:[%s19174_s4 + $0x28] sm:$0xff]  ;;  %v68_v17 = vld [vmem:[%s19170_s0 + $0x38] sm:$0xff]  ;;  %v305_v18 = vld [vmem:[%s19174_s4 + $0x30] sm:$0xff]  ;;  %vm9193_vm12 = vcmask 1046534   ;;  %vm9195_vm13 = vcmask 1047559   ;;  %vm9281_vm14 = vcmask 15360  }
  0x18   :  { %11004 = vmatprep.subr.bf16.mxu1 %v11003_v10  ;;  %v11011_v16 = vpack.c.bf16 %v304_v14, %v303_v13  ;;  %v306_v19 = vld [vmem:[%s19174_s4 + $0x38] sm:$0xff]  ;;  %v69_v20 = vld [vmem:[%s19170_s0 + $0x40] sm:$0xff]  ;;  %v70_v22 = vld [vmem:[%s19170_s0 + $0x48] sm:$0xff]  ;;  %vm10664_vm15 = vcmask 64512  }
  0x19   :  { %10817 = vmatmul.mubr.msk.f32.gmra.mrb[2].mxu1 %vm85_vm1, %v64_v4  ;;  %v11015_v21 = vpack.c.bf16 %v306_v19, %v305_v18  ;;  %v307_v23 = vld [vmem:[%s19174_s4 + $0x40] sm:$0xff]  ;;  %v308_v24 = vld [vmem:[%s19174_s4 + $0x48] sm:$0xff]  ;;  %v71_v25 = vld [vmem:[%s19170_s0 + $0x50] sm:$0xff] }
  0x1a   :  { %10819 = vmatprep.mubr.msk.f32.mxu1 %vm85_vm1, %v65_v5  ;;  %11006 = vmatpush3.bf16.msra.mxu1 %v11003_v10  ;;  %v11019_v26 = vpack.c.bf16 %v308_v24, %v307_v23  ;;  %v72_v27 = vld [vmem:[%s19170_s0 + $0x58] sm:$0xff]  ;;  %v309_v28 = vld [vmem:[%s19174_s4 + $0x50] sm:$0xff]  ;;  %v73_v30 = vld [vmem:[%s19170_s0 + $0x60] sm:$0xff] }
  0x1b   :  { %11008 = vmatprep.subr.bf16.mxu1 %v11007_v11  ;;  %v310_v29 = vld [vmem:[%s19174_s4 + $0x58] sm:$0xff]  ;;  %v74_v32 = vld [vmem:[%s19170_s0 + $0x68] sm:$0xff]  ;;  %v311_v33 = vld [vmem:[%s19174_s4 + $0x60] sm:$0xff] }
  0x1c   :  { %v11023_v31 = vpack.c.bf16 %v310_v29, %v309_v28  ;;  %v312_v34 = vld [vmem:[%s19174_s4 + $0x68] sm:$0xff]  ;;  %v75_v35 = vld [vmem:[%s19170_s0 + $0x70] sm:$0xff]  ;;  %v76_v37 = vld [vmem:[%s19170_s0 + $0x78] sm:$0xff] }
  0x1d   :  { %10820 = vmatmul.mubr.msk.f32.gmra.mrb[4].mxu1 %vm85_vm1, %v66_v12  ;;  %v11027_v36 = vpack.c.bf16 %v312_v34, %v311_v33  ;;  %v313_v38 = vld [vmem:[%s19174_s4 + $0x70] sm:$0xff]  ;;  %v314_v39 = vld [vmem:[%s19174_s4 + $0x78] sm:$0xff]  ;;  %v10672_v41 = vld [vmem:[%s19173_s3] ss:$0 sm:$0xff]  ;;  %s11745_s4 = smov 64  }
  0x1e   :  { %10822 = vmatprep.mubr.msk.f32.mxu1 %vm85_vm1, %v67_v15  ;;  %11010 = vmatpush3.bf16.msra.mxu1 %v11007_v11  ;;  %v11031_v40 = vpack.c.bf16 %v314_v39, %v313_v38 }
  0x1f   :  { %11012 = vmatprep.subr.bf16.mxu1 %v11011_v16 }
  0x21   :  { %10823 = vmatmul.mubr.msk.f32.gmra.mrb[6].mxu1 %vm85_vm1, %v68_v17 }
  0x22   :  { %10825 = vmatprep.mubr.msk.f32.mxu1 %vm85_vm1, %v69_v20  ;;  %11014 = vmatpush3.bf16.msra.mxu1 %v11011_v16 }
  0x23   :  { %11016 = vmatprep.subr.bf16.mxu1 %v11015_v21 }
  0x25   :  { %10826 = vmatmul.mubr.msk.f32.gmra.mrb[8].mxu1 %vm85_vm1, %v70_v22 }
  0x26   :  { %10828 = vmatprep.mubr.msk.f32.mxu1 %vm85_vm1, %v71_v25  ;;  %11018 = vmatpush3.bf16.msra.mxu1 %v11015_v21 }
  0x27   :  { %11020 = vmatprep.subr.bf16.mxu1 %v11019_v26 }
  0x29   :  { %10829 = vmatmul.mubr.msk.f32.gmra.mrb[10].mxu1 %vm85_vm1, %v72_v27 }
  0x2a   :  { %10831 = vmatprep.mubr.msk.f32.mxu1 %vm85_vm1, %v73_v30  ;;  %11022 = vmatpush3.bf16.msra.mxu1 %v11019_v26  ;;  %v11959_v26 = vld [vmem:[%s19175_s5] ss:$0 sm:$0xff]  ;;  %s11747_s5 = smov 32  }
  0x2b   :  { %11024 = vmatprep.subr.bf16.mxu1 %v11023_v31 }
  0x2d   :  { %10832 = vmatmul.mubr.msk.f32.gmra.mrb[12].mxu1 %vm85_vm1, %v74_v32 }
  0x2e   :  { %10834 = vmatprep.mubr.msk.f32.mxu1 %vm85_vm1, %v75_v35  ;;  %11026 = vmatpush3.bf16.msra.mxu1 %v11023_v31 }
  0x2f   :  { %11028 = vmatprep.subr.bf16.mxu1 %v11027_v36 }
  0x31   :  { %10835 = vmatmul.mubr.msk.f32.gmra.mrb[14].mxu1 %vm85_vm1, %v76_v37 }
  0x32   :  { %11030 = vmatpush3.bf16.msra.mxu1 %v11027_v36 }
  0x33   :  { %11032 = vmatprep.subr.bf16.mxu1 %v11031_v40 }
  0x36   :  { %11034 = vmatpush3.bf16.msra.mxu1 %v11031_v40 }
  0xe8   :  { %v10815_v42 = vpop.f32.mrb[0].mxu1 }
  0xe9   :  { %v210_v43 = vadd.f32 %v10815_v42, %v10672_v41  ;;  %v204_v44 = vpop.f32.mrb[1].mxu1 }
  0xea   :  { %v205_v45 = vadd.f32 %v10672_v41, %v204_v44 }
  0xeb   :  { %v284_v48 = vmax.f32 %v210_v43, 0.0 }
  0xec   :  { %v283_v46 = vmax.f32 %v205_v45, 0.0  ;;  %v10818_v47 = vpop.f32.mrb[2].mxu1 }
  0xed   :  { %v220_v49 = vadd.f32 %v10818_v47, %v10672_v41  ;;  %v214_v50 = vpop.f32.mrb[3].mxu1 }
  0xee   :  { %10869 = vmatprep.mubr.f32.mxu1 %v283_v46  ;;  %v215_v51 = vadd.f32 %v10672_v41, %v214_v50 }
  0xef   :  { %10870 = vmatmul.mubr.f32.vlgmr.msra.gmra.mrb[16].mxu1 %v284_v48  ;;  %v286_v52 = vmax.f32 %v220_v49, 0.0 }
  0xf0   :  { %v285_v53 = vmax.f32 %v215_v51, 0.0  ;;  %v10821_v54 = vpop.f32.mrb[4].mxu1 }
  0xf1   :  { %v230_v55 = vadd.f32 %v10821_v54, %v10672_v41  ;;  %v224_v56 = vpop.f32.mrb[5].mxu1 }
  0xf2   :  { %v225_v57 = vadd.f32 %v10672_v41, %v224_v56  ;;  %10872 = vmatprep.mubr.f32.mxu1 %v285_v53 }
  0xf3   :  { %v288_v58 = vmax.f32 %v230_v55, 0.0  ;;  %10873 = vmatmul.mubr.f32.gmra.mrb[18].mxu1 %v286_v52 }
  0xf4   :  { %v287_v59 = vmax.f32 %v225_v57, 0.0  ;;  %v10824_v60 = vpop.f32.mrb[6].mxu1 }
  0xf5   :  { %v240_v61 = vadd.f32 %v10824_v60, %v10672_v41  ;;  %v234_v62 = vpop.f32.mrb[7].mxu1 }
  0xf6   :  { %v235_v63 = vadd.f32 %v10672_v41, %v234_v62  ;;  %10875 = vmatprep.mubr.f32.mxu1 %v287_v59 }
  0xf7   :  { %v290_v0 = vmax.f32 %v240_v61, 0.0  ;;  %10876 = vmatmul.mubr.f32.gmra.mrb[20].mxu1 %v288_v58 }
  0xf8   :  { %v289_v1 = vmax.f32 %v235_v63, 0.0  ;;  %v10827_v2 = vpop.f32.mrb[8].mxu1 }
  0xf9   :  { %v250_v3 = vadd.f32 %v10827_v2, %v10672_v41  ;;  %v244_v4 = vpop.f32.mrb[9].mxu1 }
  0xfa   :  { %v245_v5 = vadd.f32 %v10672_v41, %v244_v4  ;;  %10878 = vmatprep.mubr.f32.mxu1 %v289_v1 }
  0xfb   :  { %v292_v6 = vmax.f32 %v250_v3, 0.0  ;;  %10879 = vmatmul.mubr.f32.gmra.mrb[22].mxu1 %v290_v0 }
  0xfc   :  { %v291_v7 = vmax.f32 %v245_v5, 0.0  ;;  %v10830_v8 = vpop.f32.mrb[10].mxu1 }
  0xfd   :  { %v260_v9 = vadd.f32 %v10830_v8, %v10672_v41  ;;  %v254_v10 = vpop.f32.mrb[11].mxu1 }
  0xfe   :  { %10881 = vmatprep.mubr.f32.mxu1 %v291_v7  ;;  %v255_v11 = vadd.f32 %v10672_v41, %v254_v10 }
  0xff   :  { %10882 = vmatmul.mubr.f32.gmra.mrb[24].mxu1 %v292_v6  ;;  %v294_v12 = vmax.f32 %v260_v9, 0.0 }
 0x100   :  { %v293_v13 = vmax.f32 %v255_v11, 0.0  ;;  %v10833_v14 = vpop.f32.mrb[12].mxu1  ;;  %v11748_v11 = vmov 1983009808  }
 0x101   :  { %v270_v15 = vadd.f32 %v10833_v14, %v10672_v41  ;;  %v264_v16 = vpop.f32.mrb[13].mxu1 }
 0x102   :  { %10884 = vmatprep.mubr.f32.mxu1 %v293_v13  ;;  %v265_v17 = vadd.f32 %v10672_v41, %v264_v16  ;;  %v650_v13 = vlaneseq }
 0x103   :  { %10885 = vmatmul.mubr.f32.gmra.mrb[26].mxu1 %v294_v12  ;;  %v296_v18 = vmax.f32 %v270_v15, 0.0  ;;  %v648_v12 = vunpack.c.l.s4 %v11748_v11 }
 0x104   :  { %v295_v19 = vmax.f32 %v265_v17, 0.0  ;;  %v10836_v20 = vpop.f32.mrb[14].mxu1  ;;  %v651_v15 = vshrl.u32 %v650_v13, 7 }
 0x105   :  { %v280_v21 = vadd.f32 %v10836_v20, %v10672_v41  ;;  %v274_v22 = vpop.f32.mrb[15].mxu1  ;;  %v649_v14 = vunpack.c.0.s8 %v648_v12 }
 0x106   :  { %10887 = vmatprep.mubr.f32.mxu1 %v295_v19  ;;  %v275_v23 = vadd.f32 %v10672_v41, %v274_v22 }
 0x107   :  { %10888 = vmatmul.mubr.f32.gmra.mrb[28].mxu1 %v296_v18  ;;  %v298_v24 = vmax.f32 %v280_v21, 0.0  ;;  %v11749_v18 = vmov 1934713408   ;;  %v12105_v20 = vsub.s32 %v649_v14, %v651_v15  ;;  %v19189_v14 = vmov 0.0  }
 0x108   :  { %v297_v25 = vmax.f32 %v275_v23, 0.0  ;;  %v680_v19 = vunpack.c.l.s4 %v11749_v18 }
 0x109   :  { %19702 = vst [vmem:[#allocation5_spill] sm:$0xff] %v12105_v20 }
 0x10a   :  { %10890 = vmatprep.mubr.f32.mxu1 %v297_v25 }
 0x10b   :  { %10891 = vmatmul.mubr.f32.gmra.mrb[30].mxu1 %v298_v24  ;;  %v681_v24 = vunpack.c.0.s8 %v680_v19 }
 0x1c2   :  { %v10871_v27 = vpop.f32.mrb[16].mxu1 }
 0x1c3   :  { %v394_v28 = vadd.f32 %v10871_v27, %v11959_v26  ;;  %v388_v29 = vpop.f32.mrb[17].mxu1 }
 0x1c4   :  { %v389_v31 = vadd.f32 %v11959_v26, %v388_v29 }
 0x1c5   :  { %v11962_v30 = vmax.f32 %v394_v28, 0.0 }
 0x1c6   :  { %v10874_v32 = vpop.f32.mrb[18].mxu1  ;;  %v11969_v34 = vmax.f32 %v389_v31, 0.0 }
 0x1c7   :  { %551 = vrot.lane.b32.xlu1 %v11962_v30, %s11745_s4  ;;  %503 = vrot.lane.b32.xlu0 %v11962_v30, %s11746_s23  ;;  %v398_v33 = vpop.f32.mrb[19].mxu1  ;;  %v404_v36 = vadd.f32 %v10874_v32, %v11959_v26 }
 0x1c8   :  { %v399_v37 = vadd.f32 %v11959_v26, %v398_v33  ;;  %v12111_v33 = vsub.s32 %v681_v24, %v651_v15 }
 0x1c9   :  { %v11977_v40 = vmax.f32 %v404_v36, 0.0 }
 0x1ca   :  { %v10877_v35 = vpop.f32.mrb[20].mxu1  ;;  %v11979_v41 = vmax.f32 %v399_v37, 0.0  ;;  %19703 = vst [vmem:[#allocation6_spill] sm:$0xff] %v12111_v33 }
 0x1cb   :  { %599 = vrot.lane.b32.xlu1 %v11962_v30, %s11747_s5  ;;  %501 = vrot.lane.b32.xlu0 %v11969_v34, %s11746_s23  ;;  %v408_v38 = vpop.f32.mrb[21].mxu1  ;;  %v414_v54 = vadd.f32 %v10877_v35, %v11959_v26 }
 0x1cc   :  { %v409_v63 = vadd.f32 %v11959_v26, %v408_v38 }
 0x1cd   :  { %v12013_v61 = vmax.f32 %v414_v54, 0.0 }
 0x1ce   :  { %v10880_v39 = vpop.f32.mrb[22].mxu1  ;;  %v12030_v0 = vmax.f32 %v409_v63, 0.0 }
 0x1cf   :  { %549 = vrot.lane.b32.xlu1 %v11969_v34, %s11745_s4  ;;  %597 = vrot.lane.b32.xlu0 %v11969_v34, %s11747_s5  ;;  %v418_v42 = vpop.f32.mrb[23].mxu1  ;;  %v424_v3 = vadd.f32 %v10880_v39, %v11959_v26 }
 0x1d0   :  { %v419_v43 = vadd.f32 %v11959_v26, %v418_v42 }
 0x1d1   :  { %v12049_v5 = vmax.f32 %v424_v3, 0.0 }
 0x1d2   :  { %v10883_v44 = vpop.f32.mrb[24].mxu1  ;;  %v12065_v7 = vmax.f32 %v419_v43, 0.0 }
 0x1d3   :  { %507 = vrot.lane.b32.xlu1 %v11977_v40, %s11746_s23  ;;  %505 = vrot.lane.b32.xlu0 %v11979_v41, %s11746_s23  ;;  %v434_v45 = vadd.f32 %v10883_v44, %v11959_v26  ;;  %v428_v46 = vpop.f32.mrb[25].mxu1 }
 0x1d4   :  { %v429_v51 = vadd.f32 %v11959_v26, %v428_v46 }
 0x1d5   :  { %v11991_v48 = vmax.f32 %v434_v45, 0.0 }
 0x1d6   :  { %v10886_v47 = vpop.f32.mrb[26].mxu1  ;;  %v12004_v56 = vmax.f32 %v429_v51, 0.0 }
 0x1d7   :  { %555 = vrot.lane.b32.xlu1 %v11977_v40, %s11745_s4  ;;  %601 = vrot.lane.b32.xlu0 %v11979_v41, %s11747_s5  ;;  %v438_v49 = vpop.f32.mrb[27].mxu1  ;;  %v444_v57 = vadd.f32 %v10886_v47, %v11959_v26 }
 0x1d8   :  { %v439_v1 = vadd.f32 %v11959_v26, %v438_v49 }
 0x1d9   :  { %v12015_v62 = vmax.f32 %v444_v57, 0.0 }
 0x1da   :  { %v10889_v50 = vpop.f32.mrb[28].mxu1  ;;  %v12037_v2 = vmax.f32 %v439_v1, 0.0 }
 0x1db   :  { %603 = vrot.lane.b32.xlu1 %v11977_v40, %s11747_s5  ;;  %519 = vrot.lane.b32.xlu0 %v11991_v48, %s11746_s23  ;;  %v448_v52 = vpop.f32.mrb[29].mxu1  ;;  %v454_v4 = vadd.f32 %v10889_v50, %v11959_v26 }
 0x1dc   :  { %v449_v53 = vadd.f32 %v11959_v26, %v448_v52 }
 0x1dd   :  { %v12051_v6 = vmax.f32 %v454_v4, 0.0 }
 0x1de   :  { %v10892_v55 = vpop.f32.mrb[30].mxu1  ;;  %v12071_v8 = vmax.f32 %v449_v53, 0.0 }
 0x1df   :  { %553 = vrot.lane.b32.xlu1 %v11979_v41, %s11745_s4  ;;  %615 = vrot.lane.b32.xlu0 %v11991_v48, %s11747_s5  ;;  %v464_v58 = vadd.f32 %v10892_v55, %v11959_v26  ;;  %v458_v59 = vpop.f32.mrb[31].mxu1 }
 0x1e0   :  { %v459_v60 = vadd.f32 %v11959_v26, %v458_v59 }
 0x1e1   :  { %v12081_v9 = vmax.f32 %v464_v58, 0.0 }
 0x1e2   :  { %v12087_v10 = vmax.f32 %v459_v60, 0.0 }
 0x1e3   :  { %511 = vrot.lane.b32.xlu1 %v12013_v61, %s11746_s23  ;;  %565 = vrot.lane.b32.xlu0 %v12004_v56, %s11745_s4 }
 0x1e7   :  { %559 = vrot.lane.b32.xlu1 %v12013_v61, %s11745_s4  ;;  %523 = vrot.lane.b32.xlu0 %v12015_v62, %s11746_s23 }
 0x1eb   :  { %607 = vrot.lane.b32.xlu1 %v12013_v61, %s11747_s5  ;;  %571 = vrot.lane.b32.xlu0 %v12015_v62, %s11745_s4 }
 0x1ef   :  { %509 = vrot.lane.b32.xlu1 %v12030_v0, %s11746_s23  ;;  %619 = vrot.lane.b32.xlu0 %v12015_v62, %s11747_s5 }
 0x1f3   :  { %557 = vrot.lane.b32.xlu1 %v12030_v0, %s11745_s4  ;;  %521 = vrot.lane.b32.xlu0 %v12037_v2, %s11746_s23 }
 0x1f7   :  { %605 = vrot.lane.b32.xlu1 %v12030_v0, %s11747_s5  ;;  %569 = vrot.lane.b32.xlu0 %v12037_v2, %s11745_s4 }
 0x1fb   :  { %515 = vrot.lane.b32.xlu1 %v12049_v5, %s11746_s23  ;;  %617 = vrot.lane.b32.xlu0 %v12037_v2, %s11747_s5 }
 0x1ff   :  { %563 = vrot.lane.b32.xlu1 %v12049_v5, %s11745_s4  ;;  %527 = vrot.lane.b32.xlu0 %v12051_v6, %s11746_s23 }
 0x203   :  { %611 = vrot.lane.b32.xlu1 %v12049_v5, %s11747_s5  ;;  %575 = vrot.lane.b32.xlu0 %v12051_v6, %s11745_s4 }
 0x207   :  { %513 = vrot.lane.b32.xlu1 %v12065_v7, %s11746_s23  ;;  %623 = vrot.lane.b32.xlu0 %v12051_v6, %s11747_s5 }
 0x20b   :  { %561 = vrot.lane.b32.xlu1 %v12065_v7, %s11745_s4  ;;  %525 = vrot.lane.b32.xlu0 %v12071_v8, %s11746_s23 }
 0x20f   :  { %609 = vrot.lane.b32.xlu1 %v12065_v7, %s11747_s5  ;;  %573 = vrot.lane.b32.xlu0 %v12071_v8, %s11745_s4 }
 0x213   :  { %567 = vrot.lane.b32.xlu1 %v11991_v48, %s11745_s4  ;;  %621 = vrot.lane.b32.xlu0 %v12071_v8, %s11747_s5 }
 0x217   :  { %517 = vrot.lane.b32.xlu1 %v12004_v56, %s11746_s23  ;;  %579 = vrot.lane.b32.xlu0 %v12081_v9, %s11745_s4 }
 0x21b   :  { %613 = vrot.lane.b32.xlu1 %v12004_v56, %s11747_s5  ;;  %529 = vrot.lane.b32.xlu0 %v12087_v10, %s11746_s23 }
 0x21f   :  { %531 = vrot.lane.b32.xlu1 %v12081_v9, %s11746_s23  ;;  %577 = vrot.lane.b32.xlu0 %v12087_v10, %s11745_s4 }
 0x223   :  { %627 = vrot.lane.b32.xlu1 %v12081_v9, %s11747_s5  ;;  %625 = vrot.lane.b32.xlu0 %v12087_v10, %s11747_s5 }
 0x239   :  { %v552_v16 = vpop.permute.xlu1 %551  ;;  %v504_v17 = vpop.permute.xlu0 %503 }
 0x23a   :  { %v713_v21 = vcombine.low %v11962_v30, %v552_v16  ;;  %v714_v28 = vcombine.high %v11962_v30, %v552_v16 }
 0x23c   :  { %v721_v29 = vrot.slane %v713_v21, %v12105_v20  ;;  %v728_v30 = vrot.slane %v714_v28, %v12105_v20 }
 0x23d   :  { %v600_v22 = vpop.permute.xlu1 %599  ;;  %v502_v23 = vpop.permute.xlu0 %501 }
 0x23e   :  { %v729_v25 = vcombine.low %v504_v17, %v600_v22  ;;  %v730_v26 = vcombine.high %v504_v17, %v600_v22 }
 0x240   :  { %v737_v27 = vrot.slane %v729_v25, %v12105_v20  ;;  %v744_v37 = vrot.slane %v730_v26, %v12105_v20 }
 0x241   :  { %v550_v31 = vpop.permute.xlu1 %549  ;;  %v598_v32 = vpop.permute.xlu0 %597 }
 0x242   :  { %v645_v35 = vcombine.low %v11969_v34, %v550_v31  ;;  %v661_v36 = vcombine.low %v502_v23, %v598_v32  ;;  %v745_v38 = vcombine.low %v721_v29, %v737_v27  ;;  %v746_v39 = vcombine.high %v721_v29, %v737_v27 }
 0x243   :  { %v646_v46 = vcombine.high %v11969_v34, %v550_v31  ;;  %v662_v49 = vcombine.high %v502_v23, %v598_v32  ;;  %v761_v52 = vcombine.low %v728_v30, %v744_v37  ;;  %v762_v58 = vcombine.high %v728_v30, %v744_v37 }
 0x244   :  { %v653_v42 = vrot.slane %v645_v35, %v12105_v20  ;;  %v669_v43 = vrot.slane %v661_v36, %v12105_v20  ;;  %v12119_v45 = vrot.slane %v745_v38, %v12111_v33  ;;  %v12125_v51 = vrot.slane %v746_v39, %v12111_v33 }
 0x245   :  { %v508_v44 = vpop.permute.xlu1 %507  ;;  %v660_v55 = vrot.slane %v646_v46, %v12105_v20  ;;  %v676_v34 = vrot.slane %v662_v49, %v12105_v20  ;;  %v12137_v63 = vrot.slane %v761_v52, %v12111_v33  ;;  %v12145_v4 = vrot.slane %v762_v58, %v12111_v33  ;;  %v506_v38 = vpop.permute.xlu0 %505 }
 0x246   :  { %v677_v47 = vcombine.low %v653_v42, %v669_v43  ;;  %v1758_v50 = vsel %vm1733_vm2, %v12119_v45, 0.0  ;;  %v678_v54 = vcombine.high %v653_v42, %v669_v43  ;;  %v1764_v59 = vsel %vm1733_vm2, %v12125_v51, 0.0 }
 0x247   :  { %1759 = vadd.xlane.f32.xlu1 %v1758_v50  ;;  %v1770_v3 = vsel %vm1733_vm2, %v12137_v63, 0.0  ;;  %v693_v11 = vcombine.low %v660_v55, %v676_v34  ;;  %v12151_v15 = vcombine.high %v12119_v45, %v19189_v14  ;;  %v1776_v17 = vsel %vm1733_vm2, %v12145_v4, 0.0 }
 0x248   :  { %v12128_v53 = vrot.slane %v677_v47, %v12111_v33  ;;  %v12140_v1 = vrot.slane %v678_v54, %v12111_v33  ;;  %v694_v19 = vcombine.high %v660_v55, %v676_v34  ;;  %v12162_v22 = vcombine.high %v12125_v51, %v19189_v14 }
 0x249   :  { %v556_v57 = vpop.permute.xlu1 %555  ;;  %v12156_v18 = vrot.slane %v693_v11, %v12111_v33  ;;  %v1761_v21 = vsel %vm1733_vm2, %v12151_v15, 0.0  ;;  %v12175_v29 = vcombine.high %v12137_v63, %v19189_v14  ;;  %v12188_v42 = vcombine.high %v12145_v4, %v19189_v14  ;;  %v602_v54 = vpop.permute.xlu0 %601 }
 0x24a   :  { %v1734_v60 = vsel %vm1733_vm2, %v12128_v53, 0.0  ;;  %v1740_v13 = vsel %vm1733_vm2, %v12140_v1, 0.0  ;;  %v849_v23 = vcombine.low %v11977_v40, %v556_v57  ;;  %v12169_v26 = vrot.slane %v694_v19, %v12111_v33 }
 0x24b   :  { %1765 = vadd.xlane.f32.xlu1 %v1764_v59  ;;  %1735 = vadd.xlane.f32.xlu0 %v1734_v60  ;;  %v1746_v25 = vsel %vm1733_vm2, %v12156_v18, 0.0  ;;  %v1767_v28 = vsel %vm1733_vm2, %v12162_v22, 0.0  ;;  %v12182_v36 = vcombine.high %v12128_v53, %v19189_v14  ;;  %v1773_v39 = vsel %vm1733_vm2, %v12175_v29, 0.0 }
 0x24c   :  { %v857_v31 = vrot.slane %v849_v23, %v12105_v20  ;;  %v1752_v35 = vsel %vm1733_vm2, %v12169_v26, 0.0  ;;  %v850_v43 = vcombine.high %v11977_v40, %v556_v57  ;;  %v1779_v50 = vsel %vm1733_vm2, %v12188_v42, 0.0 }
 0x24d   :  { %v604_v12 = vpop.permute.xlu1 %603  ;;  %v1737_v46 = vsel %vm1733_vm2, %v12182_v36, 0.0  ;;  %v12203_v52 = vcombine.high %v12140_v1, %v19189_v14  ;;  %v797_v11 = vcombine.low %v506_v38, %v602_v54 }
 0x24e   :  { %v865_v16 = vcombine.low %v508_v44, %v604_v12  ;;  %v866_v32 = vcombine.high %v508_v44, %v604_v12  ;;  %v864_v40 = vrot.slane %v850_v43, %v12105_v20  ;;  %v798_v43 = vcombine.high %v506_v38, %v602_v54 }
 0x24f   :  { %1771 = vadd.xlane.f32.xlu1 %v1770_v3  ;;  %1741 = vadd.xlane.f32.xlu0 %v1740_v13  ;;  %19705 = vst [vmem:[#allocation8_spill] sm:$0xff] %v12203_v52  ;;  %v1743_v60 = vsel %vm1733_vm2, %v12203_v52, 0.0  ;;  %v12218_v3 = vcombine.high %v12156_v18, %v19189_v14  ;;  %v805_v23 = vrot.slane %v797_v11, %v12105_v20 }
 0x250   :  { %v873_v24 = vrot.slane %v865_v16, %v12105_v20  ;;  %v880_v44 = vrot.slane %v866_v32, %v12105_v20  ;;  %v812_v54 = vrot.slane %v798_v43, %v12105_v20 }
 0x251   :  { %v554_v27 = vpop.permute.xlu1 %553  ;;  %19707 = vst [vmem:[#allocation10_spill] sm:$0xff] %v12218_v3  ;;  %v1749_v19 = vsel %vm1733_vm2, %v12218_v3, 0.0 }
 0x252   :  { %v881_v37 = vcombine.low %v857_v31, %v873_v24  ;;  %v882_v49 = vcombine.high %v857_v31, %v873_v24  ;;  %v781_v55 = vcombine.low %v11979_v41, %v554_v27  ;;  %v897_v34 = vcombine.low %v864_v40, %v880_v44  ;;  %v12233_v24 = vpop.permute.xlu0 %519 }
 0x253   :  { %1777 = vadd.xlane.f32.xlu1 %v1776_v17  ;;  %1762 = vadd.xlane.f32.xlu0 %v1761_v21  ;;  %v898_v17 = vcombine.high %v864_v40, %v880_v44  ;;  %v12230_v21 = vcombine.high %v12169_v26, %v19189_v14 }
 0x254   :  { %v12197_v47 = vrot.slane %v881_v37, %v12111_v33  ;;  %v12210_v58 = vrot.slane %v882_v49, %v12111_v33  ;;  %v789_v12 = vrot.slane %v781_v55, %v12105_v20  ;;  %v12224_v16 = vrot.slane %v897_v34, %v12111_v33 }
 0x255   :  { %v12191_v30 = vpop.permute.xlu1 %511  ;;  %19709 = vst [vmem:[#allocation12_spill] sm:$0xff] %v12230_v21  ;;  %v12239_v32 = vrot.slane %v898_v17, %v12111_v33  ;;  %v1755_v37 = vsel %vm1733_vm2, %v12230_v21, 0.0 }
 0x256   :  { %19704 = vst [vmem:[#allocation7_spill] sm:$0xff] %v12197_v47  ;;  %v1806_v57 = vsel %vm1733_vm2, %v12197_v47, 0.0  ;;  %19706 = vst [vmem:[#allocation9_spill] sm:$0xff] %v12210_v58  ;;  %v1812_v13 = vsel %vm1733_vm2, %v12210_v58, 0.0  ;;  %v1818_v31 = vsel %vm1733_vm2, %v12224_v16, 0.0  ;;  %v12253_v49 = vpop.permute.xlu0 %615  ;;  %v12261_v38 = vcombine.high %v12210_v58, %v19189_v14 }
 0x257   :  { %1747 = vadd.xlane.f32.xlu1 %v1746_v25  ;;  %1768 = vadd.xlane.f32.xlu0 %v1767_v28  ;;  %19708 = vst [vmem:[#allocation11_spill] sm:$0xff] %v12224_v16  ;;  %v782_v28 = vcombine.high %v11979_v41, %v554_v27  ;;  %19710 = vst [vmem:[#allocation13_spill] sm:$0xff] %v12239_v32  ;;  %v1824_v41 = vsel %vm1733_vm2, %v12239_v32, 0.0  ;;  %v12292_v43 = vcombine.high %v12239_v32, %v19189_v14 }
 0x258   :  { %19713 = vst [vmem:[#allocation16_spill] sm:$0xff] %v12261_v38  ;;  %v1815_v11 = vsel %vm1733_vm2, %v12261_v38, 0.0 }
 0x259   :  { %v12212_v59 = vpop.permute.xlu1 %559  ;;  %v796_v44 = vrot.slane %v782_v28, %v12105_v20  ;;  %19717 = vst [vmem:[#allocation20_spill] sm:$0xff] %v12292_v43 }
 0x25a   :  { %v12278_v17 = vpop.permute.xlu0 %565 }
 0x25b   :  { %1753 = vadd.xlane.f32.xlu1 %v1752_v35  ;;  %1774 = vadd.xlane.f32.xlu0 %v1773_v39  ;;  %v813_v35 = vcombine.low %v789_v12, %v805_v23  ;;  %v12245_v39 = vcombine.high %v12197_v47, %v19189_v14 }
 0x25d   :  { %v608_v25 = vpop.permute.xlu1 %607  ;;  %19711 = vst [vmem:[#allocation14_spill] sm:$0xff] %v12245_v39  ;;  %v12251_v27 = vrot.slane %v813_v35, %v12111_v33  ;;  %v1809_v40 = vsel %vm1733_vm2, %v12245_v39, 0.0  ;;  %v830_v35 = vcombine.high %v796_v44, %v812_v54 }
 0x25e   :  { %v1001_v55 = vcombine.low %v12191_v30, %v608_v25 }
 0x25f   :  { %1738 = vadd.xlane.f32.xlu1 %v1737_v46  ;;  %1780 = vadd.xlane.f32.xlu0 %v1779_v50  ;;  %19712 = vst [vmem:[#allocation15_spill] sm:$0xff] %v12251_v27  ;;  %v814_v46 = vcombine.high %v789_v12, %v805_v23  ;;  %v12274_v12 = vcombine.high %v12224_v16, %v19189_v14 }
 0x260   :  { %v1009_v23 = vrot.slane %v1001_v55, %v12105_v20  ;;  %v12299_v55 = vrot.slane %v830_v35, %v12111_v33 }
 0x261   :  { %v12255_v50 = vpop.permute.xlu1 %509  ;;  %v12268_v34 = vrot.slane %v814_v46, %v12111_v33  ;;  %19715 = vst [vmem:[#allocation18_spill] sm:$0xff] %v12274_v12  ;;  %v1002_v46 = vcombine.high %v12191_v30, %v608_v25  ;;  %v986_v30 = vcombine.high %v12013_v61, %v12212_v59 }
 0x262   :  { %19718 = vst [vmem:[#allocation21_spill] sm:$0xff] %v12299_v55 }
 0x263   :  { %1807 = vadd.xlane.f32.xlu1 %v1806_v57  ;;  %1744 = vadd.xlane.f32.xlu0 %v1743_v60  ;;  %v1782_v57 = vsel %vm1733_vm2, %v12251_v27, 0.0  ;;  %19714 = vst [vmem:[#allocation17_spill] sm:$0xff] %v12268_v34  ;;  %v829_v60 = vcombine.low %v796_v44, %v812_v54  ;;  %v1788_v28 = vsel %vm1733_vm2, %v12268_v34, 0.0  ;;  %v12301_v54 = vpop.permute.xlu0 %523  ;;  %v1016_v25 = vrot.slane %v1002_v46, %v12105_v20 }
 0x267   :  { %1813 = vadd.xlane.f32.xlu1 %v1812_v13  ;;  %1750 = vadd.xlane.f32.xlu0 %v1749_v19  ;;  %v985_v13 = vcombine.low %v12013_v61, %v12212_v59  ;;  %v12280_v19 = vpop.permute.xlu1 %557  ;;  %v1000_v61 = vrot.slane %v986_v30, %v12105_v20  ;;  %v12324_v59 = vpop.permute.xlu0 %571 }
 0x26b   :  { %1819 = vadd.xlane.f32.xlu1 %v1818_v31  ;;  %1756 = vadd.xlane.f32.xlu0 %v1755_v37  ;;  %v12286_v31 = vrot.slane %v829_v60, %v12111_v33  ;;  %v1821_v37 = vsel %vm1733_vm2, %v12274_v12, 0.0  ;;  %v1827_v60 = vsel %vm1733_vm2, %v12292_v43, 0.0  ;;  %v12348_v12 = vpop.permute.xlu0 %619 }
 0x26d   :  { %19716 = vst [vmem:[#allocation19_spill] sm:$0xff] %v12286_v31  ;;  %v12338_v30 = vcombine.high %v12286_v31, %v19189_v14 }
 0x26f   :  { %1825 = vadd.xlane.f32.xlu1 %v1824_v41  ;;  %1810 = vadd.xlane.f32.xlu0 %v1809_v40  ;;  %v993_v41 = vrot.slane %v985_v13, %v12105_v20  ;;  %v1794_v40 = vsel %vm1733_vm2, %v12286_v31, 0.0  ;;  %v1800_v13 = vsel %vm1733_vm2, %v12299_v55, 0.0  ;;  %19723 = vst [vmem:[#allocation26_spill] sm:$0xff] %v12338_v30  ;;  %v19725_v31 = vmov 0.0  }
 0x271   :  { %v1017_v44 = vcombine.low %v993_v41, %v1009_v23  ;;  %v1018_v35 = vcombine.high %v993_v41, %v1009_v23 }
 0x273   :  { %1783 = vadd.xlane.f32.xlu1 %v1782_v57  ;;  %1816 = vadd.xlane.f32.xlu0 %v1815_v11  ;;  %v606_v57 = vpop.permute.xlu1 %605  ;;  %v12307_v11 = vcombine.high %v12251_v27, %v19189_v14  ;;  %v12332_v41 = vrot.slane %v1018_v35, %v12111_v33 }
 0x275   :  { %19719 = vst [vmem:[#allocation22_spill] sm:$0xff] %v12307_v11  ;;  %19722 = vst [vmem:[#allocation25_spill] sm:$0xff] %v12332_v41  ;;  %v1860_v43 = vsel %vm1733_vm2, %v12332_v41, 0.0 }
 0x277   :  { %1789 = vadd.xlane.f32.xlu1 %v1788_v28  ;;  %1822 = vadd.xlane.f32.xlu0 %v1821_v37  ;;  %v12315_v28 = vrot.slane %v1017_v44, %v12111_v33  ;;  %v1785_v37 = vsel %vm1733_vm2, %v12307_v11, 0.0  ;;  %v12326_v46 = vpop.permute.xlu1 %515  ;;  %v1033_v44 = vcombine.low %v1000_v61, %v1016_v25 }
 0x279   :  { %19720 = vst [vmem:[#allocation23_spill] sm:$0xff] %v12315_v28  ;;  %v1854_v23 = vsel %vm1733_vm2, %v12315_v28, 0.0  ;;  %v12346_v35 = vrot.slane %v1033_v44, %v12111_v33 }
 0x27b   :  { %1795 = vadd.xlane.f32.xlu1 %v1794_v40  ;;  %1828 = vadd.xlane.f32.xlu0 %v1827_v60  ;;  %v12321_v40 = vcombine.high %v12268_v34, %v19189_v14  ;;  %v933_v60 = vcombine.low %v12255_v50, %v606_v57  ;;  %19724 = vst [vmem:[#allocation27_spill] sm:$0xff] %v12346_v35  ;;  %v1797_v14 = vsel %vm1733_vm2, %v12338_v30, 0.0 }
 0x27c   :  { %v934_v34 = vcombine.high %v12255_v50, %v606_v57  ;;  %v12369_v30 = vcombine.high %v12315_v28, %v19725_v31  ;;  %v12373_v50 = vpop.permute.xlu0 %521 }
 0x27d   :  { %19721 = vst [vmem:[#allocation24_spill] sm:$0xff] %v12321_v40  ;;  %v941_v11 = vrot.slane %v933_v60, %v12105_v20 }
 0x27e   :  { %19728 = vst [vmem:[#allocation30_spill] sm:$0xff] %v12369_v30  ;;  %v1857_v28 = vsel %vm1733_vm2, %v12369_v30, 0.0 }
 0x27f   :  { %1801 = vadd.xlane.f32.xlu1 %v1800_v13  ;;  %1786 = vadd.xlane.f32.xlu0 %v1785_v37  ;;  %v1791_v13 = vsel %vm1733_vm2, %v12321_v40, 0.0  ;;  %v917_v37 = vcombine.low %v12030_v0, %v12280_v19  ;;  %v12350_v40 = vpop.permute.xlu1 %563 }
 0x281   :  { %v925_v60 = vrot.slane %v917_v37, %v12105_v20  ;;  %v948_v37 = vrot.slane %v934_v34, %v12105_v20 }
 0x283   :  { %1855 = vadd.xlane.f32.xlu1 %v1854_v23  ;;  %1792 = vadd.xlane.f32.xlu0 %v1791_v13  ;;  %v1034_v23 = vcombine.high %v1000_v61, %v1016_v25  ;;  %v12356_v13 = vcombine.high %v12299_v55, %v19725_v31  ;;  %v1866_v25 = vsel %vm1733_vm2, %v12346_v35, 0.0  ;;  %v949_v44 = vcombine.low %v925_v60, %v941_v11  ;;  %v612_v57 = vpop.permute.xlu1 %611 }
 0x284   :  { %v1137_v34 = vcombine.low %v12326_v46, %v612_v57  ;;  %v1138_v27 = vcombine.high %v12326_v46, %v612_v57 }
 0x285   :  { %19726 = vst [vmem:[#allocation28_spill] sm:$0xff] %v12356_v13  ;;  %v12363_v61 = vrot.slane %v1034_v23, %v12111_v33 }
 0x286   :  { %v1152_v46 = vrot.slane %v1138_v27, %v12105_v20 }
 0x287   :  { %1861 = vadd.xlane.f32.xlu1 %v1860_v43  ;;  %1798 = vadd.xlane.f32.xlu0 %v1797_v14  ;;  %19727 = vst [vmem:[#allocation29_spill] sm:$0xff] %v12363_v61  ;;  %v1803_v43 = vsel %vm1733_vm2, %v12356_v13, 0.0  ;;  %v918_v14 = vcombine.high %v12030_v0, %v12280_v19  ;;  %v1872_v23 = vsel %vm1733_vm2, %v12363_v61, 0.0  ;;  %v950_v13 = vcombine.high %v925_v60, %v941_v11  ;;  %v12394_v60 = vpop.permute.xlu0 %569 }
 0x288   :  { %v12385_v0 = vcombine.high %v12332_v41, %v19725_v31 }
 0x289   :  { %v932_v19 = vrot.slane %v918_v14, %v12105_v20  ;;  %v1121_v14 = vcombine.low %v12049_v5, %v12350_v40 }
 0x28a   :  { %19730 = vst [vmem:[#allocation32_spill] sm:$0xff] %v12385_v0  ;;  %v1863_v30 = vsel %vm1733_vm2, %v12385_v0, 0.0 }
 0x28b   :  { %1867 = vadd.xlane.f32.xlu1 %v1866_v25  ;;  %1804 = vadd.xlane.f32.xlu0 %v1803_v43  ;;  %v12379_v25 = vrot.slane %v949_v44, %v12111_v33  ;;  %v12392_v44 = vrot.slane %v950_v13, %v12111_v33  ;;  %v965_v11 = vcombine.low %v932_v19, %v948_v37 }
 0x28c   :  { %v1145_v13 = vrot.slane %v1137_v34, %v12105_v20  ;;  %v1129_v38 = vrot.slane %v1121_v14, %v12105_v20 }
 0x28d   :  { %19729 = vst [vmem:[#allocation31_spill] sm:$0xff] %v12379_v25  ;;  %v1830_v43 = vsel %vm1733_vm2, %v12379_v25, 0.0  ;;  %19731 = vst [vmem:[#allocation33_spill] sm:$0xff] %v12392_v44  ;;  %v1836_v41 = vsel %vm1733_vm2, %v12392_v44, 0.0  ;;  %v12410_v55 = vrot.slane %v965_v11, %v12111_v33  ;;  %v12431_v14 = vcombine.high %v12379_v25, %v19725_v31 }
 0x28f   :  { %1873 = vadd.xlane.f32.xlu1 %v1872_v23  ;;  %1858 = vadd.xlane.f32.xlu0 %v1857_v28  ;;  %v12396_v23 = vpop.permute.xlu1 %513  ;;  %v12402_v28 = vcombine.high %v12346_v35, %v19725_v31  ;;  %19733 = vst [vmem:[#allocation35_spill] sm:$0xff] %v12410_v55  ;;  %v12416_v35 = vcombine.high %v12363_v61, %v19725_v31  ;;  %v1842_v11 = vsel %vm1733_vm2, %v12410_v55, 0.0  ;;  %19736 = vst [vmem:[#allocation38_spill] sm:$0xff] %v12431_v14 }
 0x290   :  { %v1833_v25 = vsel %vm1733_vm2, %v12431_v14, 0.0 }
 0x291   :  { %19732 = vst [vmem:[#allocation34_spill] sm:$0xff] %v12402_v28  ;;  %v1869_v0 = vsel %vm1733_vm2, %v12402_v28, 0.0  ;;  %19734 = vst [vmem:[#allocation36_spill] sm:$0xff] %v12416_v35 }
 0x293   :  { %1831 = vadd.xlane.f32.xlu1 %v1830_v43  ;;  %1864 = vadd.xlane.f32.xlu0 %v1863_v30  ;;  %v966_v43 = vcombine.high %v932_v19, %v948_v37  ;;  %v12419_v30 = vpop.permute.xlu0 %617  ;;  %v562_v34 = vpop.permute.xlu1 %561  ;;  %v1153_v37 = vcombine.low %v1129_v38, %v1145_v13  ;;  %v1875_v19 = vsel %vm1733_vm2, %v12416_v35, 0.0 }
 0x297   :  { %1837 = vadd.xlane.f32.xlu1 %v1836_v41  ;;  %1870 = vadd.xlane.f32.xlu0 %v1869_v0  ;;  %v12425_v41 = vrot.slane %v966_v43, %v12111_v33  ;;  %v1122_v0 = vcombine.high %v12049_v5, %v12350_v40  ;;  %v12439_v43 = vrot.slane %v1153_v37, %v12111_v33  ;;  %v12441_v28 = vpop.permute.xlu0 %527  ;;  %v610_v35 = vpop.permute.xlu1 %609 }
 0x298   :  { %v12447_v5 = vcombine.high %v12392_v44, %v19725_v31 }
 0x299   :  { %19735 = vst [vmem:[#allocation37_spill] sm:$0xff] %v12425_v41  ;;  %v1848_v57 = vsel %vm1733_vm2, %v12425_v41, 0.0  ;;  %19737 = vst [vmem:[#allocation39_spill] sm:$0xff] %v12439_v43  ;;  %v1136_v27 = vrot.slane %v1122_v0, %v12105_v20  ;;  %v1053_v0 = vcombine.low %v12065_v7, %v562_v34 }
 0x29a   :  { %19738 = vst [vmem:[#allocation40_spill] sm:$0xff] %v12447_v5  ;;  %v1839_v37 = vsel %vm1733_vm2, %v12447_v5, 0.0 }
 0x29b   :  { %1843 = vadd.xlane.f32.xlu1 %v1842_v11  ;;  %1876 = vadd.xlane.f32.xlu0 %v1875_v19  ;;  %v1154_v11 = vcombine.high %v1129_v38, %v1145_v13  ;;  %v1169_v40 = vcombine.low %v1136_v27, %v1152_v46  ;;  %v1069_v19 = vcombine.low %v12396_v23, %v610_v35  ;;  %v1902_v38 = vsel %vm1733_vm2, %v12439_v43, 0.0 }
 0x29c   :  { %v1170_v14 = vcombine.high %v1136_v27, %v1152_v46  ;;  %v1070_v46 = vcombine.high %v12396_v23, %v610_v35 }
 0x29d   :  { %v12454_v13 = vrot.slane %v1154_v11, %v12111_v33  ;;  %v1077_v44 = vrot.slane %v1069_v19, %v12105_v20 }
 0x29e   :  { %v1084_v35 = vrot.slane %v1070_v46, %v12105_v20 }
 0x29f   :  { %1849 = vadd.xlane.f32.xlu1 %v1848_v57  ;;  %1834 = vadd.xlane.f32.xlu0 %v1833_v25  ;;  %19739 = vst [vmem:[#allocation41_spill] sm:$0xff] %v12454_v13  ;;  %v12460_v57 = vcombine.high %v12410_v55, %v19725_v31  ;;  %v12463_v25 = vpop.permute.xlu0 %575  ;;  %v1908_v11 = vsel %vm1733_vm2, %v12454_v13, 0.0  ;;  %v12475_v55 = vcombine.high %v12425_v41, %v19725_v31 }
 0x2a0   :  { %v12490_v41 = vcombine.high %v12439_v43, %v19725_v31  ;;  %v12503_v43 = vcombine.high %v12454_v13, %v19725_v31 }
 0x2a1   :  { %19740 = vst [vmem:[#allocation42_spill] sm:$0xff] %v12460_v57  ;;  %v1845_v5 = vsel %vm1733_vm2, %v12460_v57, 0.0  ;;  %19742 = vst [vmem:[#allocation44_spill] sm:$0xff] %v12475_v55  ;;  %v1851_v57 = vsel %vm1733_vm2, %v12475_v55, 0.0 }
 0x2a2   :  { %19744 = vst [vmem:[#allocation46_spill] sm:$0xff] %v12490_v41  ;;  %v1905_v55 = vsel %vm1733_vm2, %v12490_v41, 0.0  ;;  %19746 = vst [vmem:[#allocation48_spill] sm:$0xff] %v12503_v43 }
 0x2a3   :  { %1903 = vadd.xlane.f32.xlu1 %v1902_v38  ;;  %1840 = vadd.xlane.f32.xlu0 %v1839_v37  ;;  %v12469_v38 = vrot.slane %v1169_v40, %v12111_v33  ;;  %v1061_v37 = vrot.slane %v1053_v0, %v12105_v20  ;;  %v12482_v40 = vrot.slane %v1170_v14, %v12111_v33 }
 0x2a5   :  { %19741 = vst [vmem:[#allocation43_spill] sm:$0xff] %v12469_v38  ;;  %v1085_v27 = vcombine.low %v1061_v37, %v1077_v44  ;;  %v1914_v19 = vsel %vm1733_vm2, %v12469_v38, 0.0  ;;  %19743 = vst [vmem:[#allocation45_spill] sm:$0xff] %v12482_v40  ;;  %v1086_v23 = vcombine.high %v1061_v37, %v1077_v44  ;;  %v1920_v14 = vsel %vm1733_vm2, %v12482_v40, 0.0 }
 0x2a7   :  { %1909 = vadd.xlane.f32.xlu1 %v1908_v11  ;;  %1846 = vadd.xlane.f32.xlu0 %v1845_v5  ;;  %v12484_v11 = vpop.permute.xlu0 %623  ;;  %v1054_v5 = vcombine.high %v12065_v7, %v562_v34  ;;  %v12497_v0 = vrot.slane %v1085_v27, %v12111_v33  ;;  %v12512_v46 = vrot.slane %v1086_v23, %v12111_v33  ;;  %v1911_v27 = vsel %vm1733_vm2, %v12503_v43, 0.0 }
 0x2a9   :  { %19745 = vst [vmem:[#allocation47_spill] sm:$0xff] %v12497_v0  ;;  %v1068_v7 = vrot.slane %v1054_v5, %v12105_v20  ;;  %v1878_v37 = vsel %vm1733_vm2, %v12497_v0, 0.0  ;;  %19747 = vst [vmem:[#allocation49_spill] sm:$0xff] %v12512_v46  ;;  %v1884_v13 = vsel %vm1733_vm2, %v12512_v46, 0.0 }
 0x2ab   :  { %1915 = vadd.xlane.f32.xlu1 %v1914_v19  ;;  %1852 = vadd.xlane.f32.xlu0 %v1851_v57  ;;  %v568_v19 = vpop.permute.xlu1 %567  ;;  %v12506_v34 = vpop.permute.xlu0 %525  ;;  %v1101_v44 = vcombine.low %v1068_v7, %v1084_v35  ;;  %v1102_v5 = vcombine.high %v1068_v7, %v1084_v35 }
 0x2ac   :  { %v1257_v57 = vcombine.low %v11991_v48, %v568_v19 }
 0x2ad   :  { %v12526_v23 = vrot.slane %v1101_v44, %v12111_v33  ;;  %v12541_v61 = vrot.slane %v1102_v5, %v12111_v33 }
 0x2ae   :  { %v1265_v41 = vrot.slane %v1257_v57, %v12105_v20  ;;  %v1258_v57 = vcombine.high %v11991_v48, %v568_v19 }
 0x2af   :  { %1921 = vadd.xlane.f32.xlu1 %v1920_v14  ;;  %1906 = vadd.xlane.f32.xlu0 %v1905_v55  ;;  %v12518_v14 = vcombine.high %v12469_v38, %v19725_v31  ;;  %v1273_v55 = vcombine.low %v12233_v24, %v12253_v49  ;;  %19749 = vst [vmem:[#allocation51_spill] sm:$0xff] %v12526_v23  ;;  %v518_v7 = vpop.permute.xlu1 %517  ;;  %v1890_v44 = vsel %vm1733_vm2, %v12526_v23, 0.0  ;;  %19751 = vst [vmem:[#allocation53_spill] sm:$0xff] %v12541_v61 }
 0x2b0   :  { %v12534_v38 = vcombine.high %v12482_v40, %v19725_v31  ;;  %v1272_v19 = vrot.slane %v1258_v57, %v12105_v20  ;;  %v1896_v5 = vsel %vm1733_vm2, %v12541_v61, 0.0 }
 0x2b1   :  { %19748 = vst [vmem:[#allocation50_spill] sm:$0xff] %v12518_v14  ;;  %v1917_v43 = vsel %vm1733_vm2, %v12518_v14, 0.0  ;;  %v1281_v35 = vrot.slane %v1273_v55, %v12105_v20  ;;  %v12547_v14 = vcombine.high %v12497_v0, %v19725_v31 }
 0x2b2   :  { %19750 = vst [vmem:[#allocation52_spill] sm:$0xff] %v12534_v38 }
 0x2b3   :  { %1879 = vadd.xlane.f32.xlu1 %v1878_v37  ;;  %1912 = vadd.xlane.f32.xlu0 %v1911_v27  ;;  %v12528_v37 = vpop.permute.xlu0 %573  ;;  %v1289_v27 = vcombine.low %v1265_v41, %v1281_v35  ;;  %19752 = vst [vmem:[#allocation54_spill] sm:$0xff] %v12547_v14  ;;  %v1290_v55 = vcombine.high %v1265_v41, %v1281_v35  ;;  %v1881_v0 = vsel %vm1733_vm2, %v12547_v14, 0.0 }
 0x2b4   :  { %v12577_v14 = vcombine.high %v12526_v23, %v19725_v31 }
 0x2b6   :  { %19756 = vst [vmem:[#allocation58_spill] sm:$0xff] %v12577_v14 }
 0x2b7   :  { %1885 = vadd.xlane.f32.xlu1 %v1884_v13  ;;  %1918 = vadd.xlane.f32.xlu0 %v1917_v43  ;;  %v1923_v13 = vsel %vm1733_vm2, %v12534_v38, 0.0  ;;  %v1274_v43 = vcombine.high %v12233_v24, %v12253_v49  ;;  %v12551_v48 = vpop.permute.xlu0 %621  ;;  %v614_v38 = vpop.permute.xlu1 %613  ;;  %v12563_v24 = vcombine.high %v12512_v46, %v19725_v31 }
 0x2b8   :  { %v1205_v41 = vcombine.low %v518_v7, %v614_v38 }
 0x2b9   :  { %19754 = vst [vmem:[#allocation56_spill] sm:$0xff] %v12563_v24  ;;  %v1288_v49 = vrot.slane %v1274_v43, %v12105_v20 }
 0x2ba   :  { %v1213_v46 = vrot.slane %v1205_v41, %v12105_v20 }
 0x2bb   :  { %1891 = vadd.xlane.f32.xlu1 %v1890_v44  ;;  %1924 = vadd.xlane.f32.xlu0 %v1923_v13  ;;  %v12557_v44 = vrot.slane %v1289_v27, %v12111_v33  ;;  %v1305_v57 = vcombine.low %v1272_v19, %v1288_v49  ;;  %v12569_v27 = vrot.slane %v1290_v55, %v12111_v33  ;;  %v12571_v13 = vpop.permute.xlu0 %579 }
 0x2bc   :  { %v1306_v43 = vcombine.high %v1272_v19, %v1288_v49  ;;  %v1206_v49 = vcombine.high %v518_v7, %v614_v38  ;;  %v1190_v38 = vcombine.high %v12004_v56, %v12278_v17 }
 0x2bd   :  { %19753 = vst [vmem:[#allocation55_spill] sm:$0xff] %v12557_v44  ;;  %v1950_v35 = vsel %vm1733_vm2, %v12557_v44, 0.0  ;;  %19755 = vst [vmem:[#allocation57_spill] sm:$0xff] %v12569_v27  ;;  %v1956_v55 = vsel %vm1733_vm2, %v12569_v27, 0.0  ;;  %v12585_v40 = vrot.slane %v1305_v57, %v12111_v33 }
 0x2be   :  { %v1220_v7 = vrot.slane %v1206_v49, %v12105_v20 }
 0x2bf   :  { %1897 = vadd.xlane.f32.xlu1 %v1896_v5  ;;  %1882 = vadd.xlane.f32.xlu0 %v1881_v0  ;;  %v1887_v5 = vsel %vm1733_vm2, %v12563_v24, 0.0  ;;  %v1189_v0 = vcombine.low %v12004_v56, %v12278_v17  ;;  %19757 = vst [vmem:[#allocation59_spill] sm:$0xff] %v12585_v40  ;;  %v12591_v24 = vcombine.high %v12541_v61, %v19725_v31  ;;  %v12594_v19 = vpop.permute.xlu0 %529  ;;  %v1962_v57 = vsel %vm1733_vm2, %v12585_v40, 0.0 }
 0x2c0   :  { %v1204_v56 = vrot.slane %v1190_v38, %v12105_v20 }
 0x2c1   :  { %19758 = vst [vmem:[#allocation60_spill] sm:$0xff] %v12591_v24  ;;  %v1197_v23 = vrot.slane %v1189_v0, %v12105_v20  ;;  %v12607_v0 = vcombine.high %v12557_v44, %v19725_v31  ;;  %v12623_v44 = vcombine.high %v12569_v27, %v19725_v31 }
 0x2c3   :  { %1951 = vadd.xlane.f32.xlu1 %v1950_v35  ;;  %1888 = vadd.xlane.f32.xlu0 %v1887_v5  ;;  %v1893_v35 = vsel %vm1733_vm2, %v12577_v14, 0.0  ;;  %v1221_v41 = vcombine.low %v1197_v23, %v1213_v46  ;;  %v12596_v5 = vpop.permute.xlu1 %531  ;;  %v1899_v14 = vsel %vm1733_vm2, %v12591_v24, 0.0  ;;  %19760 = vst [vmem:[#allocation62_spill] sm:$0xff] %v12607_v0  ;;  %v1953_v24 = vsel %vm1733_vm2, %v12607_v0, 0.0  ;;  %19762 = vst [vmem:[#allocation64_spill] sm:$0xff] %v12623_v44 }
 0x2c4   :  { %v1959_v49 = vsel %vm1733_vm2, %v12623_v44, 0.0 }
 0x2c7   :  { %1957 = vadd.xlane.f32.xlu1 %v1956_v55  ;;  %1894 = vadd.xlane.f32.xlu0 %v1893_v35  ;;  %v12601_v55 = vrot.slane %v1306_v43, %v12111_v33  ;;  %v1222_v35 = vcombine.high %v1197_v23, %v1213_v46  ;;  %v12615_v43 = vrot.slane %v1221_v41, %v12111_v33  ;;  %v12626_v17 = vpop.permute.xlu1 %627 }
 0x2c8   :  { %v1409_v46 = vcombine.low %v12301_v54, %v12348_v12  ;;  %v12639_v41 = vcombine.high %v12585_v40, %v19725_v31 }
 0x2c9   :  { %19759 = vst [vmem:[#allocation61_spill] sm:$0xff] %v12601_v55  ;;  %v1968_v61 = vsel %vm1733_vm2, %v12601_v55, 0.0  ;;  %19761 = vst [vmem:[#allocation63_spill] sm:$0xff] %v12615_v43  ;;  %v1926_v23 = vsel %vm1733_vm2, %v12615_v43, 0.0 }
 0x2ca   :  { %19764 = vst [vmem:[#allocation66_spill] sm:$0xff] %v12639_v41  ;;  %v1417_v27 = vrot.slane %v1409_v46, %v12105_v20  ;;  %v1965_v40 = vsel %vm1733_vm2, %v12639_v41, 0.0 }
 0x2cb   :  { %1963 = vadd.xlane.f32.xlu1 %v1962_v57  ;;  %1900 = vadd.xlane.f32.xlu0 %v1899_v14  ;;  %v12617_v57 = vpop.permute.xlu0 %577  ;;  %v1237_v14 = vcombine.low %v1204_v56, %v1220_v7 }
 0x2cd   :  { %v12651_v44 = vrot.slane %v1237_v14, %v12111_v33 }
 0x2cf   :  { %1969 = vadd.xlane.f32.xlu1 %v1968_v61  ;;  %1954 = vadd.xlane.f32.xlu0 %v1953_v24  ;;  %v12633_v61 = vrot.slane %v1222_v35, %v12111_v33  ;;  %v1393_v24 = vcombine.low %v12015_v62, %v12324_v59  ;;  %v12645_v0 = vpop.permute.xlu0 %625  ;;  %v1238_v35 = vcombine.high %v1204_v56, %v1220_v7  ;;  %v1938_v14 = vsel %vm1733_vm2, %v12651_v44, 0.0 }
 0x2d0   :  { %19765 = vst [vmem:[#allocation67_spill] sm:$0xff] %v12651_v44  ;;  %v1410_v56 = vcombine.high %v12301_v54, %v12348_v12 }
 0x2d1   :  { %19763 = vst [vmem:[#allocation65_spill] sm:$0xff] %v12633_v61  ;;  %v1401_v39 = vrot.slane %v1393_v24, %v12105_v20  ;;  %v1394_v24 = vcombine.high %v12015_v62, %v12324_v59  ;;  %v12693_v62 = vcombine.high %v12633_v61, %v19725_v31 }
 0x2d3   :  { %1927 = vadd.xlane.f32.xlu1 %v1926_v23  ;;  %1960 = vadd.xlane.f32.xlu0 %v1959_v49  ;;  %v1932_v23 = vsel %vm1733_vm2, %v12633_v61, 0.0  ;;  %v12657_v49 = vcombine.high %v12601_v55, %v19725_v31  ;;  %v1425_v46 = vcombine.low %v1401_v39, %v1417_v27  ;;  %v1424_v55 = vrot.slane %v1410_v56, %v12105_v20 }
 0x2d4   :  { %v12643_v38 = vpop.xlane.xlu1 %1759  ;;  %19770 = vst [vmem:[#allocation72_spill] sm:$0xff] %v12693_v62  ;;  %v1408_v59 = vrot.slane %v1394_v24, %v12105_v20  ;;  %v1341_v56 = vcombine.low %v12373_v50, %v12419_v30  ;;  %v1325_v24 = vcombine.low %v12037_v2, %v12394_v60 }
 0x2d5   :  { %19766 = vst [vmem:[#allocation68_spill] sm:$0xff] %v12657_v49  ;;  %v1971_v41 = vsel %vm1733_vm2, %v12657_v49, 0.0  ;;  %v12687_v49 = vrot.slane %v1425_v46, %v12111_v33 }
 0x2d6   :  { %v1442_v16 = vcombine.high %v1408_v59, %v1424_v55  ;;  %v1333_v3 = vrot.slane %v1325_v24, %v12105_v20  ;;  %v1326_v24 = vcombine.high %v12037_v2, %v12394_v60 }
 0x2d7   :  { %1933 = vadd.xlane.f32.xlu1 %v1932_v23  ;;  %1966 = vadd.xlane.f32.xlu0 %v1965_v40  ;;  %v12669_v23 = vrot.slane %v1238_v35, %v12111_v33  ;;  %v12675_v40 = vcombine.high %v12615_v43, %v19725_v31  ;;  %v1426_v35 = vcombine.high %v1401_v39, %v1417_v27  ;;  %v1998_v46 = vsel %vm1733_vm2, %v12687_v49, 0.0 }
 0x2d8   :  { %v12660_v32 = vpop.xlane.xlu1 %1765  ;;  %v12662_v7 = vpop.xlane.xlu0 %1735  ;;  %19769 = vst [vmem:[#allocation71_spill] sm:$0xff] %v12687_v49  ;;  %v1441_v27 = vcombine.low %v1408_v59, %v1424_v55  ;;  %v1340_v60 = vrot.slane %v1326_v24, %v12105_v20  ;;  %v1529_v24 = vcombine.low %v12051_v6, %v12463_v25 }
 0x2d9   :  { %19767 = vst [vmem:[#allocation69_spill] sm:$0xff] %v12669_v23  ;;  %19768 = vst [vmem:[#allocation70_spill] sm:$0xff] %v12675_v40  ;;  %v1929_v43 = vsel %vm1733_vm2, %v12675_v40, 0.0  ;;  %v1935_v40 = vsel %vm1733_vm2, %v12693_v62, 0.0 }
 0x2da   :  { %v12723_v62 = vrot.slane %v1441_v27, %v12111_v33 }
 0x2db   :  { %1939 = vadd.xlane.f32.xlu1 %v1938_v14  ;;  %1972 = vadd.xlane.f32.xlu0 %v1971_v41  ;;  %v1944_v14 = vsel %vm1733_vm2, %v12669_v23, 0.0 }
 0x2dc   :  { %v12679_v12 = vpop.xlane.xlu1 %1771  ;;  %v12681_v54 = vpop.xlane.xlu0 %1741  ;;  %19773 = vst [vmem:[#allocation75_spill] sm:$0xff] %v12723_v62 }
 0x2df   :  { %1945 = vadd.xlane.f32.xlu1 %v1944_v14  ;;  %1930 = vadd.xlane.f32.xlu0 %v1929_v43  ;;  %v12705_v14 = vrot.slane %v1426_v35, %v12111_v33  ;;  %v12711_v43 = vcombine.high %v12651_v44, %v19725_v31  ;;  %v1349_v35 = vrot.slane %v1341_v56, %v12105_v20 }
 0x2e0   :  { %v12696_v41 = vpop.xlane.xlu1 %1777  ;;  %v12698_v39 = vpop.xlane.xlu0 %1762  ;;  %v1342_v56 = vcombine.high %v12373_v50, %v12419_v30 }
 0x2e1   :  { %19771 = vst [vmem:[#allocation73_spill] sm:$0xff] %v12705_v14  ;;  %19772 = vst [vmem:[#allocation74_spill] sm:$0xff] %v12711_v43  ;;  %v1941_v44 = vsel %vm1733_vm2, %v12711_v43, 0.0  ;;  %v1357_v27 = vcombine.low %v1333_v3, %v1349_v35  ;;  %v12741_v43 = vrot.slane %v1442_v16, %v12111_v33  ;;  %v1358_v16 = vcombine.high %v1333_v3, %v1349_v35 }
 0x2e2   :  { %v1356_v58 = vrot.slane %v1342_v56, %v12105_v20  ;;  %v12765_v2 = vcombine.high %v12705_v14, %v19725_v31  ;;  %v1545_v56 = vcombine.low %v12441_v28, %v12484_v11 }
 0x2e3   :  { %1999 = vadd.xlane.f32.xlu1 %v1998_v46  ;;  %1936 = vadd.xlane.f32.xlu0 %v1935_v40  ;;  %v2004_v46 = vsel %vm1733_vm2, %v12705_v14, 0.0  ;;  %v12729_v40 = vcombine.high %v12669_v23, %v19725_v31  ;;  %19775 = vst [vmem:[#allocation77_spill] sm:$0xff] %v12741_v43 }
 0x2e4   :  { %v12715_v61 = vpop.xlane.xlu1 %1747  ;;  %v12717_v21 = vpop.xlane.xlu0 %1768  ;;  %19778 = vst [vmem:[#allocation80_spill] sm:$0xff] %v12765_v2  ;;  %v1373_v35 = vcombine.low %v1340_v60, %v1356_v58  ;;  %v1374_v47 = vcombine.high %v1340_v60, %v1356_v58 }
 0x2e5   :  { %19774 = vst [vmem:[#allocation76_spill] sm:$0xff] %v12729_v40  ;;  %v1947_v23 = vsel %vm1733_vm2, %v12729_v40, 0.0  ;;  %v12759_v40 = vrot.slane %v1357_v27, %v12111_v33 }
 0x2e7   :  { %2005 = vadd.xlane.f32.xlu1 %v2004_v46  ;;  %1942 = vadd.xlane.f32.xlu0 %v1941_v44  ;;  %v2010_v46 = vsel %vm1733_vm2, %v12723_v62, 0.0  ;;  %v12747_v44 = vcombine.high %v12687_v49, %v19725_v31  ;;  %19777 = vst [vmem:[#allocation79_spill] sm:$0xff] %v12759_v40  ;;  %v1974_v27 = vsel %vm1733_vm2, %v12759_v40, 0.0 }
 0x2e8   :  { %v12732_v55 = vpop.xlane.xlu1 %1753  ;;  %v12734_v59 = vpop.xlane.xlu0 %1774 }
 0x2e9   :  { %19776 = vst [vmem:[#allocation78_spill] sm:$0xff] %v12747_v44  ;;  %v2001_v49 = vsel %vm1733_vm2, %v12747_v44, 0.0  ;;  %v2007_v44 = vsel %vm1733_vm2, %v12765_v2, 0.0  ;;  %v12795_v2 = vrot.slane %v1373_v35, %v12111_v33 }
 0x2eb   :  { %2011 = vadd.xlane.f32.xlu1 %v2010_v46  ;;  %1948 = vadd.xlane.f32.xlu0 %v1947_v23  ;;  %v2016_v46 = vsel %vm1733_vm2, %v12741_v43, 0.0  ;;  %19782 = vst [vmem:[#allocation84_spill] sm:$0xff] %v12795_v2 }
 0x2ec   :  { %v12751_v50 = vpop.xlane.xlu1 %1738  ;;  %v12753_v30 = vpop.xlane.xlu0 %1780 }
 0x2ef   :  { %2017 = vadd.xlane.f32.xlu1 %v2016_v46  ;;  %2002 = vadd.xlane.f32.xlu0 %v2001_v49  ;;  %v12777_v46 = vrot.slane %v1358_v16, %v12111_v33  ;;  %v12783_v49 = vcombine.high %v12723_v62, %v19725_v31  ;;  %v1553_v16 = vrot.slane %v1545_v56, %v12105_v20 }
 0x2f0   :  { %v12768_v23 = vpop.xlane.xlu1 %1807  ;;  %v12770_v3 = vpop.xlane.xlu0 %1744  ;;  %v1546_v56 = vcombine.high %v12441_v28, %v12484_v11 }
 0x2f1   :  { %19779 = vst [vmem:[#allocation81_spill] sm:$0xff] %v12777_v46  ;;  %19780 = vst [vmem:[#allocation82_spill] sm:$0xff] %v12783_v49  ;;  %v2013_v62 = vsel %vm1733_vm2, %v12783_v49, 0.0  ;;  %v12813_v49 = vrot.slane %v1374_v47, %v12111_v33 }
 0x2f3   :  { %1975 = vadd.xlane.f32.xlu1 %v1974_v27  ;;  %2008 = vadd.xlane.f32.xlu0 %v2007_v44  ;;  %v1980_v27 = vsel %vm1733_vm2, %v12777_v46, 0.0  ;;  %v12801_v44 = vcombine.high %v12741_v43, %v19725_v31  ;;  %19785 = vst [vmem:[#allocation87_spill] sm:$0xff] %v12813_v49 }
 0x2f4   :  { %v12787_v14 = vpop.xlane.xlu1 %1813  ;;  %v12789_v52 = vpop.xlane.xlu0 %1750 }
 0x2f5   :  { %19781 = vst [vmem:[#allocation83_spill] sm:$0xff] %v12787_v14  ;;  %19783 = vst [vmem:[#allocation85_spill] sm:$0xff] %v12801_v44  ;;  %v1537_v14 = vrot.slane %v1529_v24, %v12105_v20  ;;  %v2019_v43 = vsel %vm1733_vm2, %v12801_v44, 0.0  ;;  %v1530_v24 = vcombine.high %v12051_v6, %v12463_v25  ;;  %v12837_v6 = vcombine.high %v12777_v46, %v19725_v31 }
 0x2f7   :  { %1981 = vadd.xlane.f32.xlu1 %v1980_v27  ;;  %2014 = vadd.xlane.f32.xlu0 %v2013_v62  ;;  %v1561_v35 = vcombine.low %v1537_v14, %v1553_v16  ;;  %v1986_v27 = vsel %vm1733_vm2, %v12795_v2, 0.0  ;;  %v12819_v62 = vcombine.high %v12759_v40, %v19725_v31  ;;  %v1562_v47 = vcombine.high %v1537_v14, %v1553_v16 }
 0x2f8   :  { %v12804_v58 = vpop.xlane.xlu1 %1819  ;;  %v12806_v60 = vpop.xlane.xlu0 %1756  ;;  %19788 = vst [vmem:[#allocation90_spill] sm:$0xff] %v12837_v6  ;;  %v1544_v25 = vrot.slane %v1530_v24, %v12105_v20  ;;  %v1461_v24 = vcombine.low %v12071_v8, %v12528_v37 }
 0x2f9   :  { %19784 = vst [vmem:[#allocation86_spill] sm:$0xff] %v12806_v60  ;;  %19786 = vst [vmem:[#allocation88_spill] sm:$0xff] %v12819_v62  ;;  %v1560_v60 = vrot.slane %v1546_v56, %v12105_v20  ;;  %v12831_v44 = vrot.slane %v1561_v35, %v12111_v33  ;;  %v1977_v40 = vsel %vm1733_vm2, %v12819_v62, 0.0  ;;  %v1477_v56 = vcombine.low %v12506_v34, %v12551_v48 }
 0x2fa   :  { %v1983_v62 = vsel %vm1733_vm2, %v12837_v6, 0.0 }
 0x2fb   :  { %1987 = vadd.xlane.f32.xlu1 %v1986_v27  ;;  %2020 = vadd.xlane.f32.xlu0 %v2019_v43  ;;  %v1992_v27 = vsel %vm1733_vm2, %v12813_v49, 0.0  ;;  %19787 = vst [vmem:[#allocation89_spill] sm:$0xff] %v12831_v44  ;;  %v1577_v16 = vcombine.low %v1544_v25, %v1560_v60  ;;  %v2046_v35 = vsel %vm1733_vm2, %v12831_v44, 0.0 }
 0x2fc   :  { %v12823_v28 = vpop.xlane.xlu1 %1825  ;;  %v12825_v11 = vpop.xlane.xlu0 %1810 }
 0x2fd   :  { %v12867_v6 = vrot.slane %v1577_v16, %v12111_v33 }
 0x2ff   :  { %1993 = vadd.xlane.f32.xlu1 %v1992_v27  ;;  %1978 = vadd.xlane.f32.xlu0 %v1977_v40  ;;  %v12849_v27 = vrot.slane %v1562_v47, %v12111_v33  ;;  %v12855_v40 = vcombine.high %v12795_v2, %v19725_v31  ;;  %v1485_v47 = vrot.slane %v1477_v56, %v12105_v20 }
 0x300   :  { %v12840_v43 = vpop.xlane.xlu1 %1783  ;;  %v12842_v14 = vpop.xlane.xlu0 %1816  ;;  %19794 = vst [vmem:[#allocation96_spill] sm:$0xff] %v12867_v6  ;;  %v1478_v56 = vcombine.high %v12506_v34, %v12551_v48 }
 0x301   :  { %19789 = vst [vmem:[#allocation91_spill] sm:$0xff] %v12840_v43  ;;  %19790 = vst [vmem:[#allocation92_spill] sm:$0xff] %v12842_v14  ;;  %v1578_v43 = vcombine.high %v1544_v25, %v1560_v60  ;;  %v1989_v2 = vsel %vm1733_vm2, %v12855_v40, 0.0 }
 0x302   :  { %19791 = vst [vmem:[#allocation93_spill] sm:$0xff] %v12849_v27  ;;  %19792 = vst [vmem:[#allocation94_spill] sm:$0xff] %v12855_v40 }
 0x303   :  { %2047 = vadd.xlane.f32.xlu1 %v2046_v35  ;;  %1984 = vadd.xlane.f32.xlu0 %v1983_v62  ;;  %v2052_v35 = vsel %vm1733_vm2, %v12849_v27, 0.0  ;;  %v12873_v62 = vcombine.high %v12813_v49, %v19725_v31  ;;  %v12885_v40 = vrot.slane %v1578_v43, %v12111_v33 }
 0x304   :  { %v12859_v46 = vpop.xlane.xlu1 %1789  ;;  %v12861_v14 = vpop.xlane.xlu0 %1822 }
 0x305   :  { %19793 = vst [vmem:[#allocation95_spill] sm:$0xff] %v12859_v46  ;;  %19795 = vst [vmem:[#allocation97_spill] sm:$0xff] %v12873_v62  ;;  %v1469_v46 = vrot.slane %v1461_v24, %v12105_v20  ;;  %v1995_v49 = vsel %vm1733_vm2, %v12873_v62, 0.0  ;;  %v1462_v24 = vcombine.high %v12071_v8, %v12528_v37  ;;  %v12909_v8 = vcombine.high %v12849_v27, %v19725_v31 }
 0x306   :  { %19797 = vst [vmem:[#allocation99_spill] sm:$0xff] %v12885_v40 }
 0x307   :  { %2053 = vadd.xlane.f32.xlu1 %v2052_v35  ;;  %1990 = vadd.xlane.f32.xlu0 %v1989_v2  ;;  %v1493_v16 = vcombine.low %v1469_v46, %v1485_v47  ;;  %v2058_v35 = vsel %vm1733_vm2, %v12867_v6, 0.0  ;;  %v12891_v2 = vcombine.high %v12831_v44, %v19725_v31  ;;  %v1494_v43 = vcombine.high %v1469_v46, %v1485_v47 }
 0x308   :  { %v12876_v60 = vpop.xlane.xlu1 %1795  ;;  %v12878_v25 = vpop.xlane.xlu0 %1828  ;;  %19800 = vst [vmem:[#allocation102_spill] sm:$0xff] %v12909_v8  ;;  %v1476_v37 = vrot.slane %v1462_v24, %v12105_v20  ;;  %v1665_v24 = vcombine.low %v12081_v9, %v12571_v13 }
 0x309   :  { %19796 = vst [vmem:[#allocation98_spill] sm:$0xff] %v12878_v25  ;;  %19798 = vst [vmem:[#allocation100_spill] sm:$0xff] %v12891_v2  ;;  %v1492_v25 = vrot.slane %v1478_v56, %v12105_v20  ;;  %v12903_v62 = vrot.slane %v1493_v16, %v12111_v33  ;;  %v2049_v44 = vsel %vm1733_vm2, %v12891_v2, 0.0  ;;  %v1681_v56 = vcombine.low %v12596_v5, %v12626_v17 }
 0x30a   :  { %v2055_v2 = vsel %vm1733_vm2, %v12909_v8, 0.0 }
 0x30b   :  { %2059 = vadd.xlane.f32.xlu1 %v2058_v35  ;;  %1996 = vadd.xlane.f32.xlu0 %v1995_v49  ;;  %v2064_v35 = vsel %vm1733_vm2, %v12885_v40, 0.0  ;;  %19799 = vst [vmem:[#allocation101_spill] sm:$0xff] %v12903_v62  ;;  %v1509_v47 = vcombine.low %v1476_v37, %v1492_v25  ;;  %v2022_v16 = vsel %vm1733_vm2, %v12903_v62, 0.0 }
 0x30c   :  { %v12895_v34 = vpop.xlane.xlu1 %1801  ;;  %v12897_v48 = vpop.xlane.xlu0 %1786 }
 0x30d   :  { %v12939_v8 = vrot.slane %v1509_v47, %v12111_v33 }
 0x30f   :  { %2065 = vadd.xlane.f32.xlu1 %v2064_v35  ;;  %2050 = vadd.xlane.f32.xlu0 %v2049_v44  ;;  %v12921_v35 = vrot.slane %v1494_v43, %v12111_v33  ;;  %v12927_v44 = vcombine.high %v12867_v6, %v19725_v31  ;;  %v1689_v43 = vrot.slane %v1681_v56, %v12105_v20 }
 0x310   :  { %v12912_v49 = vpop.xlane.xlu1 %1855  ;;  %v12914_v46 = vpop.xlane.xlu0 %1792  ;;  %19806 = vst [vmem:[#allocation108_spill] sm:$0xff] %v12939_v8  ;;  %v1682_v56 = vcombine.high %v12596_v5, %v12626_v17 }
 0x311   :  { %19801 = vst [vmem:[#allocation103_spill] sm:$0xff] %v12912_v49  ;;  %19802 = vst [vmem:[#allocation104_spill] sm:$0xff] %v12914_v46  ;;  %v1510_v49 = vcombine.high %v1476_v37, %v1492_v25  ;;  %v2061_v6 = vsel %vm1733_vm2, %v12927_v44, 0.0 }
 0x312   :  { %19803 = vst [vmem:[#allocation105_spill] sm:$0xff] %v12921_v35  ;;  %19804 = vst [vmem:[#allocation106_spill] sm:$0xff] %v12927_v44 }
 0x313   :  { %2023 = vadd.xlane.f32.xlu1 %v2022_v16  ;;  %2056 = vadd.xlane.f32.xlu0 %v2055_v2  ;;  %v2028_v16 = vsel %vm1733_vm2, %v12921_v35, 0.0  ;;  %v12945_v2 = vcombine.high %v12885_v40, %v19725_v31  ;;  %v12957_v44 = vrot.slane %v1510_v49, %v12111_v33 }
 0x314   :  { %v12931_v27 = vpop.xlane.xlu1 %1861  ;;  %v12933_v46 = vpop.xlane.xlu0 %1798 }
 0x315   :  { %19805 = vst [vmem:[#allocation107_spill] sm:$0xff] %v12931_v27  ;;  %19807 = vst [vmem:[#allocation109_spill] sm:$0xff] %v12945_v2  ;;  %v1673_v27 = vrot.slane %v1665_v24, %v12105_v20  ;;  %v2067_v40 = vsel %vm1733_vm2, %v12945_v2, 0.0  ;;  %v1666_v24 = vcombine.high %v12081_v9, %v12571_v13  ;;  %v12981_v9 = vcombine.high %v12921_v35, %v19725_v31 }
 0x316   :  { %19809 = vst [vmem:[#allocation111_spill] sm:$0xff] %v12957_v44 }
 0x317   :  { %2029 = vadd.xlane.f32.xlu1 %v2028_v16  ;;  %2062 = vadd.xlane.f32.xlu0 %v2061_v6  ;;  %v1697_v47 = vcombine.low %v1673_v27, %v1689_v43  ;;  %v2034_v16 = vsel %vm1733_vm2, %v12939_v8, 0.0  ;;  %v12963_v6 = vcombine.high %v12903_v62, %v19725_v31  ;;  %v1698_v49 = vcombine.high %v1673_v27, %v1689_v43 }
 0x318   :  { %v12948_v25 = vpop.xlane.xlu1 %1867  ;;  %v12950_v37 = vpop.xlane.xlu0 %1804  ;;  %19812 = vst [vmem:[#allocation114_spill] sm:$0xff] %v12981_v9  ;;  %v1680_v13 = vrot.slane %v1666_v24, %v12105_v20  ;;  %v1597_v24 = vcombine.low %v12087_v10, %v12617_v57 }
 0x319   :  { %19808 = vst [vmem:[#allocation110_spill] sm:$0xff] %v12950_v37  ;;  %19810 = vst [vmem:[#allocation112_spill] sm:$0xff] %v12963_v6  ;;  %v1696_v37 = vrot.slane %v1682_v56, %v12105_v20  ;;  %v12975_v2 = vrot.slane %v1697_v47, %v12111_v33  ;;  %v2025_v62 = vsel %vm1733_vm2, %v12963_v6, 0.0  ;;  %v1613_v56 = vcombine.low %v12594_v19, %v12645_v0 }
 0x31a   :  { %v2031_v6 = vsel %vm1733_vm2, %v12981_v9, 0.0 }
 0x31b   :  { %2035 = vadd.xlane.f32.xlu1 %v2034_v16  ;;  %2068 = vadd.xlane.f32.xlu0 %v2067_v40  ;;  %v2040_v16 = vsel %vm1733_vm2, %v12957_v44, 0.0  ;;  %19811 = vst [vmem:[#allocation113_spill] sm:$0xff] %v12975_v2  ;;  %v1713_v43 = vcombine.low %v1680_v13, %v1696_v37  ;;  %v2094_v47 = vsel %vm1733_vm2, %v12975_v2, 0.0 }
 0x31c   :  { %v12967_v5 = vpop.xlane.xlu1 %1873  ;;  %v12969_v17 = vpop.xlane.xlu0 %1858 }
 0x31d   :  { %v13011_v9 = vrot.slane %v1713_v43, %v12111_v33 }
 0x31f   :  { %2041 = vadd.xlane.f32.xlu1 %v2040_v16  ;;  %2026 = vadd.xlane.f32.xlu0 %v2025_v62  ;;  %v12993_v16 = vrot.slane %v1698_v49, %v12111_v33  ;;  %v12999_v62 = vcombine.high %v12939_v8, %v19725_v31  ;;  %v1621_v49 = vrot.slane %v1613_v56, %v12105_v20 }
 0x320   :  { %v12984_v40 = vpop.xlane.xlu1 %1831  ;;  %v12986_v27 = vpop.xlane.xlu0 %1864  ;;  %19818 = vst [vmem:[#allocation120_spill] sm:$0xff] %v13011_v9  ;;  %v1614_v56 = vcombine.high %v12594_v19, %v12645_v0 }
 0x321   :  { %19813 = vst [vmem:[#allocation115_spill] sm:$0xff] %v12984_v40  ;;  %19814 = vst [vmem:[#allocation116_spill] sm:$0xff] %v12986_v27  ;;  %v1714_v40 = vcombine.high %v1680_v13, %v1696_v37  ;;  %v2037_v8 = vsel %vm1733_vm2, %v12999_v62, 0.0 }
 0x322   :  { %19815 = vst [vmem:[#allocation117_spill] sm:$0xff] %v12993_v16  ;;  %19816 = vst [vmem:[#allocation118_spill] sm:$0xff] %v12999_v62 }
 0x323   :  { %2095 = vadd.xlane.f32.xlu1 %v2094_v47  ;;  %2032 = vadd.xlane.f32.xlu0 %v2031_v6  ;;  %v2100_v47 = vsel %vm1733_vm2, %v12993_v16, 0.0  ;;  %v13017_v6 = vcombine.high %v12957_v44, %v19725_v31  ;;  %v13029_v62 = vrot.slane %v1714_v40, %v12111_v33 }
 0x324   :  { %v13003_v35 = vpop.xlane.xlu1 %1837  ;;  %v13005_v27 = vpop.xlane.xlu0 %1870 }
 0x325   :  { %19817 = vst [vmem:[#allocation119_spill] sm:$0xff] %v13003_v35  ;;  %19819 = vst [vmem:[#allocation121_spill] sm:$0xff] %v13017_v6  ;;  %v1605_v35 = vrot.slane %v1597_v24, %v12105_v20  ;;  %v2043_v44 = vsel %vm1733_vm2, %v13017_v6, 0.0  ;;  %v1598_v24 = vcombine.high %v12087_v10, %v12617_v57  ;;  %v13053_v10 = vcombine.high %v12993_v16, %v19725_v31 }
 0x326   :  { %19821 = vst [vmem:[#allocation123_spill] sm:$0xff] %v13029_v62 }
 0x327   :  { %2101 = vadd.xlane.f32.xlu1 %v2100_v47  ;;  %2038 = vadd.xlane.f32.xlu0 %v2037_v8  ;;  %v1629_v43 = vcombine.low %v1605_v35, %v1621_v49  ;;  %v2106_v47 = vsel %vm1733_vm2, %v13011_v9, 0.0  ;;  %v13035_v8 = vcombine.high %v12975_v2, %v19725_v31  ;;  %v1630_v40 = vcombine.high %v1605_v35, %v1621_v49 }
 0x328   :  { %v13020_v37 = vpop.xlane.xlu1 %1843  ;;  %v13022_v13 = vpop.xlane.xlu0 %1876  ;;  %19824 = vst [vmem:[#allocation126_spill] sm:$0xff] %v13053_v10  ;;  %v1612_v57 = vrot.slane %v1598_v24, %v12105_v20 }
 0x329   :  { %19820 = vst [vmem:[#allocation122_spill] sm:$0xff] %v13022_v13  ;;  %19822 = vst [vmem:[#allocation124_spill] sm:$0xff] %v13035_v8  ;;  %v1628_v13 = vrot.slane %v1614_v56, %v12105_v20  ;;  %v13047_v6 = vrot.slane %v1629_v43, %v12111_v33  ;;  %v2097_v2 = vsel %vm1733_vm2, %v13035_v8, 0.0  ;;  %v13063_v43 = vrot.slane %v1630_v40, %v12111_v33 }
 0x32a   :  { %v13069_v8 = vcombine.high %v13011_v9, %v19725_v31  ;;  %v2127_v20 = vmul.f32 0.03125, %v12643_v38 }
 0x32b   :  { %2107 = vadd.xlane.f32.xlu1 %v2106_v47  ;;  %2044 = vadd.xlane.f32.xlu0 %v2043_v44  ;;  %v2112_v47 = vsel %vm1733_vm2, %v13029_v62, 0.0  ;;  %19823 = vst [vmem:[#allocation125_spill] sm:$0xff] %v13047_v6  ;;  %v1645_v49 = vcombine.low %v1612_v57, %v1628_v13  ;;  %v2070_v56 = vsel %vm1733_vm2, %v13047_v6, 0.0  ;;  %19825 = vst [vmem:[#allocation127_spill] sm:$0xff] %v13063_v43  ;;  %v2076_v40 = vsel %vm1733_vm2, %v13063_v43, 0.0 }
 0x32c   :  { %v13039_v19 = vpop.xlane.xlu1 %1849  ;;  %v13041_v0 = vpop.xlane.xlu0 %1834  ;;  %19826 = vst [vmem:[#allocation128_spill] sm:$0xff] %v13069_v8  ;;  %v1646_v16 = vcombine.high %v1612_v57, %v1628_v13  ;;  %v13092_v38 = vsub.f32 %v12119_v45, %v2127_v20  ;;  %v2129_v57 = vmul.f32 0.03125, %v12660_v32  ;;  %v2131_v32 = vmul.f32 0.03125, %v12679_v12 }
 0x32e   :  { %19829 = vst [vmem:[#allocation131_spill] sm:$0xff] %v13092_v38  ;;  %v13111_v45 = vsub.f32 %v12125_v51, %v2129_v57  ;;  %v13129_v12 = vsub.f32 %v12137_v63, %v2131_v32  ;;  %v2133_v57 = vmul.f32 0.03125, %v12696_v41  ;;  %v2119_v41 = vmul.f32 0.03125, %v12662_v7 }
 0x32f   :  { %2113 = vadd.xlane.f32.xlu1 %v2112_v47  ;;  %2098 = vadd.xlane.f32.xlu0 %v2097_v2  ;;  %v2103_v47 = vsel %vm1733_vm2, %v13053_v10, 0.0  ;;  %v2109_v10 = vsel %vm1733_vm2, %v13069_v8, 0.0 }
 0x330   :  { %v13056_v44 = vpop.xlane.xlu1 %1903  ;;  %v13058_v35 = vpop.xlane.xlu0 %1840  ;;  %19832 = vst [vmem:[#allocation134_spill] sm:$0xff] %v13111_v45  ;;  %19834 = vst [vmem:[#allocation136_spill] sm:$0xff] %v13129_v12 }
 0x333   :  { %2071 = vadd.xlane.f32.xlu1 %v2070_v56  ;;  %2104 = vadd.xlane.f32.xlu0 %v2103_v47  ;;  %v13079_v56 = vrot.slane %v1645_v49, %v12111_v33  ;;  %v13085_v47 = vcombine.high %v13029_v62, %v19725_v31 }
 0x334   :  { %v13071_v2 = vpop.xlane.xlu1 %1909  ;;  %v13073_v24 = vpop.xlane.xlu0 %1846 }
 0x335   :  { %19827 = vst [vmem:[#allocation129_spill] sm:$0xff] %v13079_v56  ;;  %19828 = vst [vmem:[#allocation130_spill] sm:$0xff] %v13085_v47  ;;  %v2082_v49 = vsel %vm1733_vm2, %v13079_v56, 0.0  ;;  %v2115_v8 = vsel %vm1733_vm2, %v13085_v47, 0.0 }
 0x337   :  { %2077 = vadd.xlane.f32.xlu1 %v2076_v40  ;;  %2110 = vadd.xlane.f32.xlu0 %v2109_v10  ;;  %v13098_v40 = vrot.slane %v1646_v16, %v12111_v33  ;;  %v13104_v10 = vcombine.high %v13047_v6, %v19725_v31 }
 0x338   :  { %v13087_v9 = vpop.xlane.xlu1 %1915  ;;  %v13089_v13 = vpop.xlane.xlu0 %1852 }
 0x339   :  { %19830 = vst [vmem:[#allocation132_spill] sm:$0xff] %v13098_v40  ;;  %19831 = vst [vmem:[#allocation133_spill] sm:$0xff] %v13104_v10  ;;  %v2088_v16 = vsel %vm1733_vm2, %v13098_v40, 0.0  ;;  %v2073_v47 = vsel %vm1733_vm2, %v13104_v10, 0.0  ;;  %v2128_v10 = vmul.f32 0.03125, %v12698_v39  ;;  %v13161_v7 = vcombine.high %v13098_v40, %v19725_v31  ;;  %v19849_v40 = vld [vmem:[#allocation83_spill] sm:$0xff] }
 0x33b   :  { %2083 = vadd.xlane.f32.xlu1 %v2082_v49  ;;  %2116 = vadd.xlane.f32.xlu0 %v2115_v8  ;;  %v2383_v49 = vmul.f32 %v13092_v38, %v13092_v38  ;;  %v13122_v8 = vcombine.high %v13063_v43, %v19725_v31  ;;  %v13140_v43 = vcombine.high %v13079_v56, %v19725_v31  ;;  %v2130_v56 = vmul.f32 0.03125, %v12717_v21 }
 0x33c   :  { %v13106_v62 = vpop.xlane.xlu1 %1921  ;;  %v13108_v20 = vpop.xlane.xlu0 %1906  ;;  %19838 = vst [vmem:[#allocation140_spill] sm:$0xff] %v13161_v7  ;;  %v2132_v31 = vmul.f32 0.03125, %v12734_v59 }
 0x33d   :  { %19833 = vst [vmem:[#allocation135_spill] sm:$0xff] %v13122_v8  ;;  %v2527_v33 = vsel %vm1733_vm2, %v2383_v49, 0.0  ;;  %19835 = vst [vmem:[#allocation137_spill] sm:$0xff] %v13140_v43  ;;  %v13148_v49 = vsub.f32 %v12145_v4, %v2133_v57 }
 0x33f   :  { %2089 = vadd.xlane.f32.xlu1 %v2088_v16  ;;  %2074 = vadd.xlane.f32.xlu0 %v2073_v47  ;;  %v2385_v16 = vmul.f32 %v13111_v45, %v13111_v45  ;;  %v2079_v47 = vsel %vm1733_vm2, %v13122_v8, 0.0  ;;  %19836 = vst [vmem:[#allocation138_spill] sm:$0xff] %v13148_v49  ;;  %v13154_v8 = vsub.f32 %v12151_v15, %v2128_v10  ;;  %v2121_v15 = vmul.f32 0.03125, %v12681_v54 }
 0x340   :  { %v13124_v6 = vpop.xlane.xlu1 %1879  ;;  %v13126_v51 = vpop.xlane.xlu0 %1912  ;;  %v2389_v10 = vmul.f32 %v13148_v49, %v13148_v49 }
 0x341   :  { %v2533_v39 = vsel %vm1733_vm2, %v2385_v16, 0.0  ;;  %19837 = vst [vmem:[#allocation139_spill] sm:$0xff] %v13154_v8  ;;  %v13168_v16 = vsub.f32 %v12128_v53, %v2119_v41  ;;  %v2384_v53 = vmul.f32 %v13154_v8, %v13154_v8 }
 0x343   :  { %2528 = vadd.xlane.f32.xlu1 %v2527_v33  ;;  %2080 = vadd.xlane.f32.xlu0 %v2079_v47  ;;  %v2387_v33 = vmul.f32 %v13129_v12, %v13129_v12  ;;  %v2085_v47 = vsel %vm1733_vm2, %v13140_v43, 0.0  ;;  %19839 = vst [vmem:[#allocation141_spill] sm:$0xff] %v13168_v16  ;;  %v2375_v59 = vmul.f32 %v13168_v16, %v13168_v16 }
 0x344   :  { %v13142_v63 = vpop.xlane.xlu1 %1885  ;;  %v13144_v32 = vpop.xlane.xlu0 %1918 }
 0x345   :  { %v2539_v21 = vsel %vm1733_vm2, %v2387_v33, 0.0  ;;  %v13187_v33 = vsub.f32 %v12140_v1, %v2121_v15 }
 0x347   :  { %2534 = vadd.xlane.f32.xlu1 %v2533_v39  ;;  %2086 = vadd.xlane.f32.xlu0 %v2085_v47  ;;  %v13175_v39 = vsub.f32 %v12162_v22, %v2130_v56  ;;  %v2091_v47 = vsel %vm1733_vm2, %v13161_v7, 0.0  ;;  %19841 = vst [vmem:[#allocation143_spill] sm:$0xff] %v13187_v33  ;;  %v2123_v22 = vmul.f32 0.03125, %v12715_v61  ;;  %v2545_v56 = vsel %vm1733_vm2, %v2389_v10, 0.0 }
 0x348   :  { %v13163_v4 = vpop.xlane.xlu1 %1891  ;;  %v13165_v57 = vpop.xlane.xlu0 %1924  ;;  %v2134_v7 = vmul.f32 0.03125, %v12753_v30  ;;  %v2125_v10 = vmul.f32 0.03125, %v12732_v55  ;;  %v2120_v30 = vmul.f32 0.03125, %v12751_v50 }
 0x349   :  { %19840 = vst [vmem:[#allocation142_spill] sm:$0xff] %v13175_v39  ;;  %v2386_v43 = vmul.f32 %v13175_v39, %v13175_v39  ;;  %v13205_v15 = vsub.f32 %v12156_v18, %v2123_v22 }
 0x34a   :  { %v13223_v22 = vsub.f32 %v12169_v26, %v2125_v10  ;;  %v19847_v10 = vld [vmem:[#allocation7_spill] sm:$0xff] }
 0x34b   :  { %2540 = vadd.xlane.f32.xlu1 %v2539_v21  ;;  %2092 = vadd.xlane.f32.xlu0 %v2091_v47  ;;  %v13194_v21 = vsub.f32 %v12175_v29, %v2132_v31  ;;  %v2530_v47 = vsel %vm1733_vm2, %v2384_v53, 0.0  ;;  %19843 = vst [vmem:[#allocation145_spill] sm:$0xff] %v13205_v15  ;;  %v2503_v29 = vsel %vm1733_vm2, %v2375_v59, 0.0  ;;  %v2377_v31 = vmul.f32 %v13187_v33, %v13187_v33 }
 0x34c   :  { %v13182_v41 = vpop.xlane.xlu1 %1897  ;;  %v13184_v54 = vpop.xlane.xlu0 %1882  ;;  %v13213_v53 = vsub.f32 %v12188_v42, %v2134_v7  ;;  %19845 = vst [vmem:[#allocation147_spill] sm:$0xff] %v13223_v22  ;;  %v2143_v59 = vmul.f32 0.03125, %v12768_v23  ;;  %v2379_v42 = vmul.f32 %v13205_v15, %v13205_v15  ;;  %v2122_v7 = vmul.f32 0.03125, %v12770_v3 }
 0x34d   :  { %19842 = vst [vmem:[#allocation144_spill] sm:$0xff] %v13194_v21  ;;  %v2509_v50 = vsel %vm1733_vm2, %v2377_v31, 0.0  ;;  %v2145_v15 = vmul.f32 0.03125, %v19849_v40  ;;  %v2381_v3 = vmul.f32 %v13223_v22, %v13223_v22  ;;  %v2147_v22 = vmul.f32 0.03125, %v12804_v58 }
 0x34e   :  { %19844 = vst [vmem:[#allocation146_spill] sm:$0xff] %v13213_v53  ;;  %v13241_v31 = vsub.f32 %v19847_v10, %v2143_v59 }
 0x34f   :  { %2546 = vadd.xlane.f32.xlu1 %v2545_v56  ;;  %2531 = vadd.xlane.f32.xlu0 %v2530_v47  ;;  %v2536_v56 = vsel %vm1733_vm2, %v2386_v43, 0.0  ;;  %v2388_v47 = vmul.f32 %v13194_v21, %v13194_v21  ;;  %v13230_v43 = vsub.f32 %v12182_v36, %v2120_v30  ;;  %v2515_v36 = vsel %vm1733_vm2, %v2379_v42, 0.0  ;;  %v19850_v30 = vld [vmem:[#allocation8_spill] sm:$0xff]  ;;  %v19852_v42 = vld [vmem:[#allocation9_spill] sm:$0xff] }
 0x350   :  { %v13200_v1 = vpop.xlane.xlu1 %1951  ;;  %v13202_v61 = vpop.xlane.xlu0 %1888  ;;  %19848 = vst [vmem:[#allocation7_spill] sm:$0xff] %v13241_v31  ;;  %v13259_v10 = vsub.f32 %v19852_v42, %v2145_v15 }
 0x351   :  { %19846 = vst [vmem:[#allocation148_spill] sm:$0xff] %v13230_v43 }
 0x352   :  { %19853 = vst [vmem:[#allocation8_spill] sm:$0xff] %v13259_v10 }
 0x353   :  { %2504 = vadd.xlane.f32.xlu1 %v2503_v29  ;;  %2537 = vadd.xlane.f32.xlu0 %v2536_v56  ;;  %v2542_v29 = vsel %vm1733_vm2, %v2388_v47, 0.0  ;;  %v2390_v56 = vmul.f32 %v13213_v53, %v13213_v53  ;;  %v13248_v47 = vsub.f32 %v19850_v30, %v2122_v7  ;;  %v2376_v53 = vmul.f32 %v13230_v43, %v13230_v43  ;;  %v19856_v30 = vld [vmem:[#allocation86_spill] sm:$0xff] }
 0x354   :  { %v13218_v18 = vpop.xlane.xlu1 %1957  ;;  %v13220_v55 = vpop.xlane.xlu0 %1894  ;;  %v2521_v7 = vsel %vm1733_vm2, %v2381_v3, 0.0  ;;  %v2126_v43 = vmul.f32 0.03125, %v19856_v30  ;;  %v19857_v3 = vld [vmem:[#allocation11_spill] sm:$0xff]  ;;  %v2144_v30 = vmul.f32 0.03125, %v12825_v11 }
 0x355   :  { %19851 = vst [vmem:[#allocation83_spill] sm:$0xff] %v13248_v47  ;;  %v2378_v21 = vmul.f32 %v13248_v47, %v13248_v47  ;;  %v13277_v42 = vsub.f32 %v19857_v3, %v2147_v22 }
 0x357   :  { %2510 = vadd.xlane.f32.xlu1 %v2509_v50  ;;  %2543 = vadd.xlane.f32.xlu0 %v2542_v29  ;;  %v2124_v50 = vmul.f32 0.03125, %v12789_v52  ;;  %v2548_v29 = vsel %vm1733_vm2, %v2390_v56, 0.0  ;;  %v2399_v52 = vmul.f32 %v13241_v31, %v13241_v31  ;;  %v2149_v31 = vmul.f32 0.03125, %v12823_v28 }
 0x358   :  { %v13236_v26 = vpop.xlane.xlu1 %1963  ;;  %v13238_v23 = vpop.xlane.xlu0 %1900  ;;  %v2403_v11 = vmul.f32 %v13277_v42, %v13277_v42 }
 0x35b   :  { %2516 = vadd.xlane.f32.xlu1 %v2515_v36  ;;  %2549 = vadd.xlane.f32.xlu0 %v2548_v29  ;;  %v19854_v36 = vld [vmem:[#allocation10_spill] sm:$0xff]  ;;  %v2506_v29 = vsel %vm1733_vm2, %v2376_v53, 0.0 }
 0x35c   :  { %v13254_v59 = vpop.xlane.xlu1 %1969  ;;  %v13256_v40 = vpop.xlane.xlu0 %1954  ;;  %v13266_v56 = vsub.f32 %v19854_v36, %v2124_v50  ;;  %19858 = vst [vmem:[#allocation10_spill] sm:$0xff] %v13277_v42  ;;  %v2575_v50 = vsel %vm1733_vm2, %v2399_v52, 0.0  ;;  %v19859_v36 = vld [vmem:[#allocation12_spill] sm:$0xff]  ;;  %v19861_v52 = vld [vmem:[#allocation13_spill] sm:$0xff]  ;;  %v19869_v42 = vld [vmem:[#allocation95_spill] sm:$0xff] }
 0x35d   :  { %v13284_v53 = vsub.f32 %v19859_v36, %v2126_v43  ;;  %v13295_v3 = vsub.f32 %v19861_v52, %v2149_v31  ;;  %v19866_v36 = vld [vmem:[#allocation92_spill] sm:$0xff]  ;;  %v2137_v39 = vmul.f32 0.03125, %v19869_v42 }
 0x35e   :  { %19855 = vst [vmem:[#allocation9_spill] sm:$0xff] %v13266_v56  ;;  %v2380_v47 = vmul.f32 %v13266_v56, %v13266_v56  ;;  %v2146_v56 = vmul.f32 0.03125, %v19866_v36  ;;  %v2148_v36 = vmul.f32 0.03125, %v12861_v14 }
 0x35f   :  { %2522 = vadd.xlane.f32.xlu1 %v2521_v7  ;;  %2507 = vadd.xlane.f32.xlu0 %v2506_v29  ;;  %v2401_v7 = vmul.f32 %v13259_v10, %v13259_v10  ;;  %19860 = vst [vmem:[#allocation86_spill] sm:$0xff] %v13284_v53  ;;  %v2512_v29 = vsel %vm1733_vm2, %v2378_v21, 0.0  ;;  %19862 = vst [vmem:[#allocation11_spill] sm:$0xff] %v13295_v3  ;;  %v19863_v10 = vld [vmem:[#allocation91_spill] sm:$0xff]  ;;  %v2382_v16 = vmul.f32 %v13284_v53, %v13284_v53 }
 0x360   :  { %v13272_v15 = vpop.xlane.xlu1 %1927  ;;  %v13274_v58 = vpop.xlane.xlu0 %1960  ;;  %v2135_v33 = vmul.f32 0.03125, %v19863_v10 }
 0x361   :  { %v2581_v43 = vsel %vm1733_vm2, %v2401_v7, 0.0  ;;  %v19867_v7 = vld [vmem:[#allocation15_spill] sm:$0xff] }
 0x362   :  { %v13313_v52 = vsub.f32 %v19867_v7, %v2135_v33 }
 0x363   :  { %2576 = vadd.xlane.f32.xlu1 %v2575_v50  ;;  %2513 = vadd.xlane.f32.xlu0 %v2512_v29  ;;  %v19864_v50 = vld [vmem:[#allocation14_spill] sm:$0xff]  ;;  %v2518_v29 = vsel %vm1733_vm2, %v2380_v47, 0.0 }
 0x364   :  { %v13290_v22 = vpop.xlane.xlu1 %1933  ;;  %v13292_v28 = vpop.xlane.xlu0 %1966  ;;  %v13302_v21 = vsub.f32 %v19864_v50, %v2144_v30  ;;  %19868 = vst [vmem:[#allocation13_spill] sm:$0xff] %v13313_v52  ;;  %v2587_v30 = vsel %vm1733_vm2, %v2403_v11, 0.0  ;;  %v19870_v50 = vld [vmem:[#allocation16_spill] sm:$0xff]  ;;  %v19872_v11 = vld [vmem:[#allocation17_spill] sm:$0xff]  ;;  %v2391_v14 = vmul.f32 %v13313_v52, %v13313_v52  ;;  %v2141_v52 = vmul.f32 0.03125, %v12895_v34 }
 0x365   :  { %v13320_v47 = vsub.f32 %v19870_v50, %v2146_v56  ;;  %v13331_v7 = vsub.f32 %v19872_v11, %v2137_v39  ;;  %v19876_v50 = vld [vmem:[#allocation98_spill] sm:$0xff] }
 0x366   :  { %19865 = vst [vmem:[#allocation12_spill] sm:$0xff] %v13302_v21  ;;  %v2400_v53 = vmul.f32 %v13302_v21, %v13302_v21  ;;  %v2150_v21 = vmul.f32 0.03125, %v19876_v50  ;;  %v2136_v50 = vmul.f32 0.03125, %v12897_v48 }
 0x367   :  { %2582 = vadd.xlane.f32.xlu1 %v2581_v43  ;;  %2519 = vadd.xlane.f32.xlu0 %v2518_v29  ;;  %v2405_v43 = vmul.f32 %v13295_v3, %v13295_v3  ;;  %19871 = vst [vmem:[#allocation91_spill] sm:$0xff] %v13320_v47  ;;  %v2524_v29 = vsel %vm1733_vm2, %v2382_v16, 0.0  ;;  %19873 = vst [vmem:[#allocation14_spill] sm:$0xff] %v13331_v7  ;;  %v2139_v3 = vmul.f32 0.03125, %v12876_v60 }
 0x368   :  { %v13308_v31 = vpop.xlane.xlu1 %1939  ;;  %v13310_v10 = vpop.xlane.xlu0 %1972  ;;  %v2402_v8 = vmul.f32 %v13320_v47, %v13320_v47 }
 0x369   :  { %v2593_v56 = vsel %vm1733_vm2, %v2405_v43, 0.0  ;;  %v19877_v43 = vld [vmem:[#allocation19_spill] sm:$0xff] }
 0x36a   :  { %v13349_v11 = vsub.f32 %v19877_v43, %v2139_v3 }
 0x36b   :  { %2588 = vadd.xlane.f32.xlu1 %v2587_v30  ;;  %2525 = vadd.xlane.f32.xlu0 %v2524_v29  ;;  %v19874_v30 = vld [vmem:[#allocation18_spill] sm:$0xff]  ;;  %v2578_v29 = vsel %vm1733_vm2, %v2400_v53, 0.0 }
 0x36c   :  { %v13326_v33 = vpop.xlane.xlu1 %1945  ;;  %v13328_v42 = vpop.xlane.xlu0 %1930  ;;  %v13338_v16 = vsub.f32 %v19874_v30, %v2148_v36  ;;  %19878 = vst [vmem:[#allocation15_spill] sm:$0xff] %v13349_v11  ;;  %v2551_v36 = vsel %vm1733_vm2, %v2391_v14, 0.0  ;;  %v19879_v30 = vld [vmem:[#allocation20_spill] sm:$0xff]  ;;  %v19881_v14 = vld [vmem:[#allocation21_spill] sm:$0xff]  ;;  %v2395_v48 = vmul.f32 %v13349_v11, %v13349_v11  ;;  %v19889_v11 = vld [vmem:[#allocation107_spill] sm:$0xff] }
 0x36d   :  { %v13356_v53 = vsub.f32 %v19879_v30, %v2150_v21  ;;  %v13367_v43 = vsub.f32 %v19881_v14, %v2141_v52  ;;  %v19886_v30 = vld [vmem:[#allocation104_spill] sm:$0xff]  ;;  %v2161_v45 = vmul.f32 0.03125, %v19889_v11 }
 0x36e   :  { %19875 = vst [vmem:[#allocation92_spill] sm:$0xff] %v13338_v16  ;;  %v2404_v47 = vmul.f32 %v13338_v16, %v13338_v16  ;;  %v2138_v16 = vmul.f32 0.03125, %v19886_v30  ;;  %v2140_v30 = vmul.f32 0.03125, %v12933_v46 }
 0x36f   :  { %2594 = vadd.xlane.f32.xlu1 %v2593_v56  ;;  %2579 = vadd.xlane.f32.xlu0 %v2578_v29  ;;  %v2393_v56 = vmul.f32 %v13331_v7, %v13331_v7  ;;  %19880 = vst [vmem:[#allocation95_spill] sm:$0xff] %v13356_v53  ;;  %v2584_v29 = vsel %vm1733_vm2, %v2402_v8, 0.0  ;;  %19882 = vst [vmem:[#allocation16_spill] sm:$0xff] %v13367_v43  ;;  %v19883_v7 = vld [vmem:[#allocation103_spill] sm:$0xff]  ;;  %v2406_v12 = vmul.f32 %v13356_v53, %v13356_v53 }
 0x370   :  { %v13344_v39 = vpop.xlane.xlu1 %1999  ;;  %v13346_v60 = vpop.xlane.xlu0 %1936  ;;  %v2159_v49 = vmul.f32 0.03125, %v19883_v7 }
 0x371   :  { %v2557_v21 = vsel %vm1733_vm2, %v2393_v56, 0.0  ;;  %v19887_v56 = vld [vmem:[#allocation23_spill] sm:$0xff] }
 0x372   :  { %v13385_v14 = vsub.f32 %v19887_v56, %v2159_v49 }
 0x373   :  { %2552 = vadd.xlane.f32.xlu1 %v2551_v36  ;;  %2585 = vadd.xlane.f32.xlu0 %v2584_v29  ;;  %v19884_v36 = vld [vmem:[#allocation22_spill] sm:$0xff]  ;;  %v2590_v29 = vsel %vm1733_vm2, %v2404_v47, 0.0 }
 0x374   :  { %v13362_v3 = vpop.xlane.xlu1 %2005  ;;  %v13364_v34 = vpop.xlane.xlu0 %1942  ;;  %v13374_v8 = vsub.f32 %v19884_v36, %v2136_v50  ;;  %19888 = vst [vmem:[#allocation18_spill] sm:$0xff] %v13385_v14  ;;  %v2563_v50 = vsel %vm1733_vm2, %v2395_v48, 0.0  ;;  %v19890_v36 = vld [vmem:[#allocation24_spill] sm:$0xff]  ;;  %v19892_v48 = vld [vmem:[#allocation25_spill] sm:$0xff]  ;;  %v2415_v46 = vmul.f32 %v13385_v14, %v13385_v14  ;;  %v2165_v14 = vmul.f32 0.03125, %v12967_v5 }
 0x375   :  { %v13392_v47 = vsub.f32 %v19890_v36, %v2138_v16  ;;  %v13403_v56 = vsub.f32 %v19892_v48, %v2161_v45  ;;  %v19896_v36 = vld [vmem:[#allocation110_spill] sm:$0xff] }
 0x376   :  { %19885 = vst [vmem:[#allocation17_spill] sm:$0xff] %v13374_v8  ;;  %v2392_v53 = vmul.f32 %v13374_v8, %v13374_v8  ;;  %v2142_v8 = vmul.f32 0.03125, %v19896_v36  ;;  %v2160_v36 = vmul.f32 0.03125, %v12969_v17 }
 0x377   :  { %2558 = vadd.xlane.f32.xlu1 %v2557_v21  ;;  %2591 = vadd.xlane.f32.xlu0 %v2590_v29  ;;  %v2397_v21 = vmul.f32 %v13367_v43, %v13367_v43  ;;  %19891 = vst [vmem:[#allocation98_spill] sm:$0xff] %v13392_v47  ;;  %v2596_v29 = vsel %vm1733_vm2, %v2406_v12, 0.0  ;;  %19893 = vst [vmem:[#allocation19_spill] sm:$0xff] %v13403_v56  ;;  %v2163_v43 = vmul.f32 0.03125, %v12948_v25 }
 0x378   :  { %v13380_v52 = vpop.xlane.xlu1 %2011  ;;  %v13382_v7 = vpop.xlane.xlu0 %1948  ;;  %v2394_v38 = vmul.f32 %v13392_v47, %v13392_v47 }
 0x379   :  { %v2569_v16 = vsel %vm1733_vm2, %v2397_v21, 0.0  ;;  %v19898_v21 = vld [vmem:[#allocation27_spill] sm:$0xff] }
 0x37a   :  { %v13421_v48 = vsub.f32 %v19898_v21, %v2163_v43 }
 0x37b   :  { %2564 = vadd.xlane.f32.xlu1 %v2563_v50  ;;  %2597 = vadd.xlane.f32.xlu0 %v2596_v29  ;;  %v19894_v50 = vld [vmem:[#allocation26_spill] sm:$0xff]  ;;  %v2554_v29 = vsel %vm1733_vm2, %v2392_v53, 0.0 }
 0x37c   :  { %v13398_v49 = vpop.xlane.xlu1 %2017  ;;  %v13400_v11 = vpop.xlane.xlu0 %2002  ;;  %v13410_v12 = vsub.f32 %v19894_v50, %v2140_v30  ;;  %19899 = vst [vmem:[#allocation103_spill] sm:$0xff] %v13421_v48  ;;  %v2623_v30 = vsel %vm1733_vm2, %v2415_v46, 0.0  ;;  %v19900_v50 = vld [vmem:[#allocation28_spill] sm:$0xff]  ;;  %v19904_v46 = vld [vmem:[#allocation29_spill] sm:$0xff]  ;;  %v2419_v17 = vmul.f32 %v13421_v48, %v13421_v48  ;;  %v19912_v48 = vld [vmem:[#allocation119_spill] sm:$0xff] }
 0x37d   :  { %v13428_v53 = vsub.f32 %v19900_v50, %v2142_v8  ;;  %v13439_v21 = vsub.f32 %v19904_v46, %v2165_v14  ;;  %v19909_v50 = vld [vmem:[#allocation116_spill] sm:$0xff] }
 0x37e   :  { %19895 = vst [vmem:[#allocation20_spill] sm:$0xff] %v13410_v12  ;;  %v2396_v47 = vmul.f32 %v13410_v12, %v13410_v12  ;;  %v2162_v12 = vmul.f32 0.03125, %v19909_v50  ;;  %v2164_v50 = vmul.f32 0.03125, %v13005_v27 }
 0x37f   :  { %2570 = vadd.xlane.f32.xlu1 %v2569_v16  ;;  %2555 = vadd.xlane.f32.xlu0 %v2554_v29  ;;  %v2417_v16 = vmul.f32 %v13403_v56, %v13403_v56  ;;  %19901 = vst [vmem:[#allocation22_spill] sm:$0xff] %v13428_v53  ;;  %v2560_v29 = vsel %vm1733_vm2, %v2394_v38, 0.0  ;;  %19905 = vst [vmem:[#allocation107_spill] sm:$0xff] %v13439_v21  ;;  %v19906_v56 = vld [vmem:[#allocation115_spill] sm:$0xff] }
 0x380   :  { %v13416_v45 = vpop.xlane.xlu1 %1975  ;;  %v13418_v25 = vpop.xlane.xlu0 %2008 }
 0x381   :  { %19897 = vst [vmem:[#allocation21_spill] sm:$0xff] %v13418_v25  ;;  %v2151_v25 = vmul.f32 0.03125, %v19906_v56  ;;  %v2629_v8 = vsel %vm1733_vm2, %v2417_v16, 0.0  ;;  %v19910_v16 = vld [vmem:[#allocation31_spill] sm:$0xff] }
 0x383   :  { %2624 = vadd.xlane.f32.xlu1 %v2623_v30  ;;  %2561 = vadd.xlane.f32.xlu0 %v2560_v29  ;;  %v19907_v30 = vld [vmem:[#allocation30_spill] sm:$0xff]  ;;  %v2566_v29 = vsel %vm1733_vm2, %v2396_v47, 0.0  ;;  %v13457_v46 = vsub.f32 %v19910_v16, %v2151_v25 }
 0x384   :  { %v13434_v43 = vpop.xlane.xlu1 %1981  ;;  %v13436_v5 = vpop.xlane.xlu0 %2014  ;;  %v13446_v38 = vsub.f32 %v19907_v30, %v2160_v36  ;;  %v2635_v36 = vsel %vm1733_vm2, %v2419_v17, 0.0  ;;  %v19913_v30 = vld [vmem:[#allocation32_spill] sm:$0xff]  ;;  %v19916_v17 = vld [vmem:[#allocation33_spill] sm:$0xff] }
 0x385   :  { %19902 = vst [vmem:[#allocation104_spill] sm:$0xff] %v13434_v43  ;;  %19903 = vst [vmem:[#allocation23_spill] sm:$0xff] %v13436_v5  ;;  %v2398_v5 = vmul.f32 %v13428_v53, %v13428_v53  ;;  %v2153_v43 = vmul.f32 0.03125, %v19912_v48  ;;  %v13464_v47 = vsub.f32 %v19913_v30, %v2162_v12  ;;  %v2407_v27 = vmul.f32 %v13457_v46, %v13457_v46  ;;  %v19920_v30 = vld [vmem:[#allocation122_spill] sm:$0xff] }
 0x386   :  { %19908 = vst [vmem:[#allocation24_spill] sm:$0xff] %v13446_v38  ;;  %19911 = vst [vmem:[#allocation25_spill] sm:$0xff] %v13457_v46  ;;  %v2416_v53 = vmul.f32 %v13446_v38, %v13446_v38  ;;  %v2166_v38 = vmul.f32 0.03125, %v19920_v30  ;;  %v2157_v46 = vmul.f32 0.03125, %v13039_v19  ;;  %v2152_v30 = vmul.f32 0.03125, %v13041_v0 }
 0x387   :  { %2630 = vadd.xlane.f32.xlu1 %v2629_v8  ;;  %2567 = vadd.xlane.f32.xlu0 %v2566_v29  ;;  %v2421_v8 = vmul.f32 %v13439_v21, %v13439_v21  ;;  %19914 = vst [vmem:[#allocation26_spill] sm:$0xff] %v13464_v47  ;;  %v2572_v29 = vsel %vm1733_vm2, %v2398_v5, 0.0  ;;  %v13475_v16 = vsub.f32 %v19916_v17, %v2153_v43  ;;  %v2155_v21 = vmul.f32 0.03125, %v13020_v37 }
 0x388   :  { %v13452_v14 = vpop.xlane.xlu1 %1987  ;;  %v13454_v56 = vpop.xlane.xlu0 %2020 }
 0x389   :  { %19917 = vst [vmem:[#allocation27_spill] sm:$0xff] %v13475_v16  ;;  %v2641_v12 = vsel %vm1733_vm2, %v2421_v8, 0.0  ;;  %v19921_v8 = vld [vmem:[#allocation35_spill] sm:$0xff] }
 0x38a   :  { %v13493_v17 = vsub.f32 %v19921_v8, %v2155_v21 }
 0x38b   :  { %2636 = vadd.xlane.f32.xlu1 %v2635_v36  ;;  %2573 = vadd.xlane.f32.xlu0 %v2572_v29  ;;  %v19918_v36 = vld [vmem:[#allocation34_spill] sm:$0xff]  ;;  %v2626_v29 = vsel %vm1733_vm2, %v2416_v53, 0.0 }
 0x38c   :  { %v13470_v25 = vpop.xlane.xlu1 %1993  ;;  %v13472_v48 = vpop.xlane.xlu0 %1978  ;;  %v13482_v5 = vsub.f32 %v19918_v36, %v2164_v50  ;;  %19922 = vst [vmem:[#allocation29_spill] sm:$0xff] %v13493_v17  ;;  %v2599_v50 = vsel %vm1733_vm2, %v2407_v27, 0.0  ;;  %v19923_v36 = vld [vmem:[#allocation36_spill] sm:$0xff]  ;;  %v19925_v27 = vld [vmem:[#allocation37_spill] sm:$0xff]  ;;  %v2411_v0 = vmul.f32 %v13493_v17, %v13493_v17  ;;  %v2177_v17 = vmul.f32 0.03125, %v13071_v2 }
 0x38d   :  { %19915 = vst [vmem:[#allocation110_spill] sm:$0xff] %v13472_v48  ;;  %v2418_v48 = vmul.f32 %v13464_v47, %v13464_v47  ;;  %v13500_v53 = vsub.f32 %v19923_v36, %v2166_v38  ;;  %v13511_v8 = vsub.f32 %v19925_v27, %v2157_v46  ;;  %v2154_v36 = vmul.f32 0.03125, %v13058_v35 }
 0x38e   :  { %19919 = vst [vmem:[#allocation28_spill] sm:$0xff] %v13482_v5  ;;  %v2420_v47 = vmul.f32 %v13482_v5, %v13482_v5 }
 0x38f   :  { %2642 = vadd.xlane.f32.xlu1 %v2641_v12  ;;  %2627 = vadd.xlane.f32.xlu0 %v2626_v29  ;;  %v2409_v12 = vmul.f32 %v13475_v16, %v13475_v16  ;;  %19924 = vst [vmem:[#allocation115_spill] sm:$0xff] %v13500_v53  ;;  %v2632_v29 = vsel %vm1733_vm2, %v2418_v48, 0.0  ;;  %19926 = vst [vmem:[#allocation30_spill] sm:$0xff] %v13511_v8  ;;  %v2175_v16 = vmul.f32 0.03125, %v13056_v44 }
 0x390   :  { %v13488_v43 = vpop.xlane.xlu1 %2047  ;;  %v13490_v37 = vpop.xlane.xlu0 %1984  ;;  %v2422_v5 = vmul.f32 %v13500_v53, %v13500_v53  ;;  %v2413_v35 = vmul.f32 %v13511_v8, %v13511_v8  ;;  %v2179_v8 = vmul.f32 0.03125, %v13087_v9 }
 0x391   :  { %v2605_v38 = vsel %vm1733_vm2, %v2409_v12, 0.0  ;;  %v19929_v12 = vld [vmem:[#allocation39_spill] sm:$0xff] }
 0x392   :  { %v13529_v27 = vsub.f32 %v19929_v12, %v2175_v16 }
 0x393   :  { %2600 = vadd.xlane.f32.xlu1 %v2599_v50  ;;  %2633 = vadd.xlane.f32.xlu0 %v2632_v29  ;;  %v19927_v50 = vld [vmem:[#allocation38_spill] sm:$0xff]  ;;  %v2638_v29 = vsel %vm1733_vm2, %v2420_v47, 0.0 }
 0x394   :  { %v13506_v21 = vpop.xlane.xlu1 %2053  ;;  %v13508_v19 = vpop.xlane.xlu0 %1990  ;;  %v13518_v48 = vsub.f32 %v19927_v50, %v2152_v30  ;;  %19930 = vst [vmem:[#allocation31_spill] sm:$0xff] %v13529_v27  ;;  %v2611_v30 = vsel %vm1733_vm2, %v2411_v0, 0.0  ;;  %v2156_v50 = vmul.f32 0.03125, %v13073_v24  ;;  %v19933_v0 = vld [vmem:[#allocation41_spill] sm:$0xff]  ;;  %v2431_v24 = vmul.f32 %v13529_v27, %v13529_v27 }
 0x395   :  { %v13547_v12 = vsub.f32 %v19933_v0, %v2177_v17  ;;  %v2181_v27 = vmul.f32 0.03125, %v13106_v62 }
 0x396   :  { %19928 = vst [vmem:[#allocation116_spill] sm:$0xff] %v13518_v48  ;;  %v2408_v53 = vmul.f32 %v13518_v48, %v13518_v48 }
 0x397   :  { %2606 = vadd.xlane.f32.xlu1 %v2605_v38  ;;  %2639 = vadd.xlane.f32.xlu0 %v2638_v29  ;;  %v19931_v38 = vld [vmem:[#allocation40_spill] sm:$0xff]  ;;  %v2644_v29 = vsel %vm1733_vm2, %v2422_v5, 0.0  ;;  %19934 = vst [vmem:[#allocation32_spill] sm:$0xff] %v13547_v12 }
 0x398   :  { %v13524_v46 = vpop.xlane.xlu1 %2059  ;;  %v13526_v44 = vpop.xlane.xlu0 %1996  ;;  %v13536_v47 = vsub.f32 %v19931_v38, %v2154_v36  ;;  %v2617_v36 = vsel %vm1733_vm2, %v2413_v35, 0.0  ;;  %v2158_v38 = vmul.f32 0.03125, %v13089_v13  ;;  %v19937_v35 = vld [vmem:[#allocation43_spill] sm:$0xff]  ;;  %v2433_v13 = vmul.f32 %v13547_v12, %v13547_v12 }
 0x399   :  { %v13565_v0 = vsub.f32 %v19937_v35, %v2179_v8  ;;  %v2167_v12 = vmul.f32 0.03125, %v13124_v6 }
 0x39a   :  { %19932 = vst [vmem:[#allocation119_spill] sm:$0xff] %v13536_v47  ;;  %v2410_v48 = vmul.f32 %v13536_v47, %v13536_v47 }
 0x39b   :  { %2612 = vadd.xlane.f32.xlu1 %v2611_v30  ;;  %2645 = vadd.xlane.f32.xlu0 %v2644_v29  ;;  %v19935_v30 = vld [vmem:[#allocation42_spill] sm:$0xff]  ;;  %v2602_v29 = vsel %vm1733_vm2, %v2408_v53, 0.0  ;;  %19938 = vst [vmem:[#allocation34_spill] sm:$0xff] %v13565_v0 }
 0x39c   :  { %v13542_v16 = vpop.xlane.xlu1 %2065  ;;  %v13544_v2 = vpop.xlane.xlu0 %2050  ;;  %v13554_v5 = vsub.f32 %v19935_v30, %v2156_v50  ;;  %v2671_v50 = vsel %vm1733_vm2, %v2431_v24, 0.0  ;;  %v2176_v30 = vmul.f32 0.03125, %v13108_v20  ;;  %v19941_v24 = vld [vmem:[#allocation45_spill] sm:$0xff]  ;;  %v2435_v20 = vmul.f32 %v13565_v0, %v13565_v0 }
 0x39d   :  { %v13583_v35 = vsub.f32 %v19941_v24, %v2181_v27  ;;  %v2169_v0 = vmul.f32 0.03125, %v13142_v63 }
 0x39e   :  { %19936 = vst [vmem:[#allocation33_spill] sm:$0xff] %v13554_v5  ;;  %v2412_v47 = vmul.f32 %v13554_v5, %v13554_v5 }
 0x39f   :  { %2618 = vadd.xlane.f32.xlu1 %v2617_v36  ;;  %2603 = vadd.xlane.f32.xlu0 %v2602_v29  ;;  %v19939_v36 = vld [vmem:[#allocation44_spill] sm:$0xff]  ;;  %v2608_v29 = vsel %vm1733_vm2, %v2410_v48, 0.0  ;;  %19942 = vst [vmem:[#allocation35_spill] sm:$0xff] %v13583_v35 }
 0x3a0   :  { %v13560_v17 = vpop.xlane.xlu1 %2023  ;;  %v13562_v9 = vpop.xlane.xlu0 %2056  ;;  %v13572_v53 = vsub.f32 %v19939_v36, %v2158_v38  ;;  %v2677_v38 = vsel %vm1733_vm2, %v2433_v13, 0.0  ;;  %v2178_v36 = vmul.f32 0.03125, %v13126_v51  ;;  %v19945_v13 = vld [vmem:[#allocation47_spill] sm:$0xff]  ;;  %v2437_v51 = vmul.f32 %v13583_v35, %v13583_v35 }
 0x3a1   :  { %v13601_v24 = vsub.f32 %v19945_v13, %v2167_v12  ;;  %v2171_v35 = vmul.f32 0.03125, %v13163_v4  ;;  %v2173_v4 = vmul.f32 0.03125, %v13182_v41 }
 0x3a2   :  { %19940 = vst [vmem:[#allocation122_spill] sm:$0xff] %v13572_v53  ;;  %v2414_v5 = vmul.f32 %v13572_v53, %v13572_v53 }
 0x3a3   :  { %2672 = vadd.xlane.f32.xlu1 %v2671_v50  ;;  %2609 = vadd.xlane.f32.xlu0 %v2608_v29  ;;  %v19943_v50 = vld [vmem:[#allocation46_spill] sm:$0xff]  ;;  %v2614_v29 = vsel %vm1733_vm2, %v2412_v47, 0.0  ;;  %19946 = vst [vmem:[#allocation37_spill] sm:$0xff] %v13601_v24 }
 0x3a4   :  { %v13578_v8 = vpop.xlane.xlu1 %2029  ;;  %v13580_v62 = vpop.xlane.xlu0 %2062  ;;  %v13590_v48 = vsub.f32 %v19943_v50, %v2176_v30  ;;  %v2683_v30 = vsel %vm1733_vm2, %v2435_v20, 0.0  ;;  %v2180_v50 = vmul.f32 0.03125, %v13144_v32  ;;  %v19949_v20 = vld [vmem:[#allocation49_spill] sm:$0xff]  ;;  %v2423_v32 = vmul.f32 %v13601_v24, %v13601_v24  ;;  %v19953_v24 = vld [vmem:[#allocation51_spill] sm:$0xff] }
 0x3a5   :  { %v13619_v13 = vsub.f32 %v19949_v20, %v2169_v0 }
 0x3a6   :  { %19944 = vst [vmem:[#allocation36_spill] sm:$0xff] %v13590_v48  ;;  %v2432_v53 = vmul.f32 %v13590_v48, %v13590_v48 }
 0x3a7   :  { %2678 = vadd.xlane.f32.xlu1 %v2677_v38  ;;  %2615 = vadd.xlane.f32.xlu0 %v2614_v29  ;;  %v19947_v38 = vld [vmem:[#allocation48_spill] sm:$0xff]  ;;  %v2620_v29 = vsel %vm1733_vm2, %v2414_v5, 0.0  ;;  %19950 = vst [vmem:[#allocation39_spill] sm:$0xff] %v13619_v13 }
 0x3a8   :  { %v13596_v27 = vpop.xlane.xlu1 %2035  ;;  %v13598_v6 = vpop.xlane.xlu0 %2068  ;;  %v13608_v47 = vsub.f32 %v19947_v38, %v2178_v36  ;;  %v2689_v36 = vsel %vm1733_vm2, %v2437_v51, 0.0  ;;  %v2182_v38 = vmul.f32 0.03125, %v13165_v57  ;;  %v2168_v51 = vmul.f32 0.03125, %v13184_v54 }
 0x3a9   :  { %v2191_v57 = vmul.f32 0.03125, %v13200_v1  ;;  %v2172_v1 = vmul.f32 0.03125, %v13220_v55 }
 0x3aa   :  { %19948 = vst [vmem:[#allocation38_spill] sm:$0xff] %v13608_v47  ;;  %v2434_v48 = vmul.f32 %v13608_v47, %v13608_v47  ;;  %v2170_v47 = vmul.f32 0.03125, %v13202_v61 }
 0x3ab   :  { %2684 = vadd.xlane.f32.xlu1 %v2683_v30  ;;  %2621 = vadd.xlane.f32.xlu0 %v2620_v29  ;;  %v19951_v30 = vld [vmem:[#allocation50_spill] sm:$0xff]  ;;  %v2674_v29 = vsel %vm1733_vm2, %v2432_v53, 0.0  ;;  %v2425_v53 = vmul.f32 %v13619_v13, %v13619_v13 }
 0x3ac   :  { %v13614_v12 = vpop.xlane.xlu1 %2041  ;;  %v13616_v63 = vpop.xlane.xlu0 %2026  ;;  %v13626_v5 = vsub.f32 %v19951_v30, %v2180_v50  ;;  %v13639_v50 = vsub.f32 %v19953_v24, %v2171_v35  ;;  %v19955_v30 = vld [vmem:[#allocation52_spill] sm:$0xff]  ;;  %v2680_v41 = vsel %vm1733_vm2, %v2434_v48, 0.0  ;;  %v2193_v35 = vmul.f32 0.03125, %v13218_v18 }
 0x3ad   :  { %v2653_v18 = vsel %vm1733_vm2, %v2425_v53, 0.0 }
 0x3ae   :  { %19952 = vst [vmem:[#allocation40_spill] sm:$0xff] %v13626_v5  ;;  %19954 = vst [vmem:[#allocation41_spill] sm:$0xff] %v13639_v50  ;;  %v2436_v54 = vmul.f32 %v13626_v5, %v13626_v5  ;;  %v2195_v5 = vmul.f32 0.03125, %v13236_v26  ;;  %v2427_v55 = vmul.f32 %v13639_v50, %v13639_v50  ;;  %v19968_v26 = vld [vmem:[#allocation58_spill] sm:$0xff] }
 0x3af   :  { %2690 = vadd.xlane.f32.xlu1 %v2689_v36  ;;  %2675 = vadd.xlane.f32.xlu0 %v2674_v29  ;;  %v2647_v36 = vsel %vm1733_vm2, %v2423_v32, 0.0  ;;  %v13646_v29 = vsub.f32 %v19955_v30, %v2182_v38  ;;  %v19958_v32 = vld [vmem:[#allocation53_spill] sm:$0xff]  ;;  %v19960_v38 = vld [vmem:[#allocation54_spill] sm:$0xff] }
 0x3b0   :  { %v13632_v0 = vpop.xlane.xlu1 %2095  ;;  %v13636_v20 = vpop.xlane.xlu0 %2032  ;;  %v13657_v13 = vsub.f32 %v19958_v32, %v2173_v4  ;;  %v13660_v30 = vsub.f32 %v19960_v38, %v2168_v51  ;;  %v2174_v4 = vmul.f32 0.03125, %v13238_v23  ;;  %v2686_v51 = vsel %vm1733_vm2, %v2436_v54, 0.0 }
 0x3b1   :  { %19956 = vst [vmem:[#allocation42_spill] sm:$0xff] %v13646_v29  ;;  %v2438_v32 = vmul.f32 %v13646_v29, %v13646_v29  ;;  %v2186_v29 = vmul.f32 0.03125, %v13346_v60  ;;  %v19990_v60 = vld [vmem:[#allocation69_spill] sm:$0xff] }
 0x3b2   :  { %19959 = vst [vmem:[#allocation44_spill] sm:$0xff] %v13657_v13  ;;  %19961 = vst [vmem:[#allocation45_spill] sm:$0xff] %v13660_v30  ;;  %v2429_v23 = vmul.f32 %v13657_v13, %v13657_v13  ;;  %v2424_v54 = vmul.f32 %v13660_v30, %v13660_v30  ;;  %v2183_v30 = vmul.f32 0.03125, %v13272_v15 }
 0x3b3   :  { %2648 = vadd.xlane.f32.xlu1 %v2647_v36  ;;  %2681 = vadd.xlane.f32.xlu0 %v2680_v41  ;;  %v19962_v36 = vld [vmem:[#allocation55_spill] sm:$0xff]  ;;  %v19964_v41 = vld [vmem:[#allocation56_spill] sm:$0xff] }
 0x3b4   :  { %v13654_v24 = vpop.xlane.xlu1 %2101  ;;  %v13662_v61 = vpop.xlane.xlu0 %2038  ;;  %v13665_v48 = vsub.f32 %v19962_v36, %v2191_v57  ;;  %v19966_v57 = vld [vmem:[#allocation57_spill] sm:$0xff]  ;;  %v13682_v36 = vsub.f32 %v19968_v26, %v2172_v1  ;;  %v2659_v1 = vsel %vm1733_vm2, %v2427_v55, 0.0  ;;  %v2692_v26 = vsel %vm1733_vm2, %v2438_v32, 0.0 }
 0x3b5   :  { %19957 = vst [vmem:[#allocation43_spill] sm:$0xff] %v13654_v24  ;;  %v13672_v24 = vsub.f32 %v19964_v41, %v2170_v47  ;;  %v13679_v38 = vsub.f32 %v19966_v57, %v2193_v35  ;;  %v2197_v47 = vmul.f32 0.03125, %v13254_v59  ;;  %v2192_v35 = vmul.f32 0.03125, %v13256_v40  ;;  %v19972_v57 = vld [vmem:[#allocation60_spill] sm:$0xff] }
 0x3b6   :  { %19963 = vst [vmem:[#allocation46_spill] sm:$0xff] %v13665_v48  ;;  %19969 = vst [vmem:[#allocation49_spill] sm:$0xff] %v13682_v36  ;;  %v13701_v59 = vsub.f32 %v19972_v57, %v2174_v4  ;;  %v2428_v55 = vmul.f32 %v13682_v36, %v13682_v36  ;;  %v2665_v32 = vsel %vm1733_vm2, %v2429_v23, 0.0  ;;  %v2650_v57 = vsel %vm1733_vm2, %v2424_v54, 0.0  ;;  %v19978_v54 = vld [vmem:[#allocation63_spill] sm:$0xff] }
 0x3b7   :  { %19965 = vst [vmem:[#allocation47_spill] sm:$0xff] %v13672_v24  ;;  %2654 = vadd.xlane.f32.xlu1 %v2653_v18  ;;  %19967 = vst [vmem:[#allocation48_spill] sm:$0xff] %v13679_v38  ;;  %2687 = vadd.xlane.f32.xlu0 %v2686_v51  ;;  %v19970_v18 = vld [vmem:[#allocation59_spill] sm:$0xff]  ;;  %v2447_v51 = vmul.f32 %v13665_v48, %v13665_v48  ;;  %v2426_v13 = vmul.f32 %v13672_v24, %v13672_v24  ;;  %v19976_v48 = vld [vmem:[#allocation62_spill] sm:$0xff]  ;;  %v2185_v36 = vmul.f32 0.03125, %v13290_v22 }
 0x3b8   :  { %v13684_v53 = vpop.xlane.xlu1 %2107  ;;  %v13687_v41 = vpop.xlane.xlu0 %2044  ;;  %v13694_v50 = vsub.f32 %v19970_v18, %v2195_v5  ;;  %19973 = vst [vmem:[#allocation51_spill] sm:$0xff] %v13701_v59  ;;  %v2449_v40 = vmul.f32 %v13679_v38, %v13679_v38  ;;  %v19974_v18 = vld [vmem:[#allocation61_spill] sm:$0xff]  ;;  %v13721_v15 = vsub.f32 %v19976_v48, %v2192_v35  ;;  %v2430_v23 = vmul.f32 %v13701_v59, %v13701_v59 }
 0x3b9   :  { %v13714_v4 = vsub.f32 %v19974_v18, %v2197_v47  ;;  %v2719_v24 = vsel %vm1733_vm2, %v2447_v51, 0.0  ;;  %v2196_v47 = vmul.f32 0.03125, %v13292_v28  ;;  %v2656_v18 = vsel %vm1733_vm2, %v2426_v13, 0.0 }
 0x3ba   :  { %19971 = vst [vmem:[#allocation50_spill] sm:$0xff] %v13694_v50  ;;  %19977 = vst [vmem:[#allocation53_spill] sm:$0xff] %v13721_v15  ;;  %v2451_v38 = vmul.f32 %v13694_v50, %v13694_v50  ;;  %v13733_v48 = vsub.f32 %v19978_v54, %v2183_v30  ;;  %v2725_v51 = vsel %vm1733_vm2, %v2449_v40, 0.0  ;;  %v2662_v22 = vsel %vm1733_vm2, %v2428_v55, 0.0  ;;  %v19980_v54 = vld [vmem:[#allocation64_spill] sm:$0xff] }
 0x3bb   :  { %2660 = vadd.xlane.f32.xlu1 %v2659_v1  ;;  %2693 = vadd.xlane.f32.xlu0 %v2692_v26  ;;  %19975 = vst [vmem:[#allocation52_spill] sm:$0xff] %v13714_v4  ;;  %v2194_v26 = vmul.f32 0.03125, %v13274_v58  ;;  %v2187_v58 = vmul.f32 0.03125, %v13308_v31  ;;  %v2198_v28 = vmul.f32 0.03125, %v13310_v10  ;;  %v2184_v13 = vmul.f32 0.03125, %v13328_v42  ;;  %v19982_v10 = vld [vmem:[#allocation65_spill] sm:$0xff] }
 0x3bc   :  { %v13707_v5 = vpop.xlane.xlu1 %2113  ;;  %v13716_v1 = vpop.xlane.xlu0 %2098  ;;  %19979 = vst [vmem:[#allocation54_spill] sm:$0xff] %v13733_v48  ;;  %v2453_v30 = vmul.f32 %v13714_v4, %v13714_v4  ;;  %v2731_v40 = vsel %vm1733_vm2, %v2451_v38, 0.0  ;;  %v2448_v55 = vmul.f32 %v13721_v15, %v13721_v15  ;;  %v13755_v59 = vsub.f32 %v19982_v10, %v2185_v36 }
 0x3bd   :  { %v13748_v31 = vsub.f32 %v19980_v54, %v2194_v26  ;;  %v2668_v4 = vsel %vm1733_vm2, %v2430_v23, 0.0  ;;  %v19986_v26 = vld [vmem:[#allocation67_spill] sm:$0xff]  ;;  %v2188_v38 = vmul.f32 0.03125, %v13364_v34  ;;  %v2439_v36 = vmul.f32 %v13733_v48, %v13733_v48  ;;  %v19992_v23 = vld [vmem:[#allocation70_spill] sm:$0xff] }
 0x3be   :  { %19983 = vst [vmem:[#allocation56_spill] sm:$0xff] %v13755_v59  ;;  %v13763_v54 = vsub.f32 %v19986_v26, %v2187_v58  ;;  %v19994_v34 = vld [vmem:[#allocation71_spill] sm:$0xff]  ;;  %v2211_v26 = vmul.f32 0.03125, %v13380_v52  ;;  %v2722_v48 = vsel %vm1733_vm2, %v2448_v55, 0.0  ;;  %v20000_v52 = vld [vmem:[#allocation74_spill] sm:$0xff] }
 0x3bf   :  { %2666 = vadd.xlane.f32.xlu1 %v2665_v32  ;;  %2651 = vadd.xlane.f32.xlu0 %v2650_v57  ;;  %v2189_v32 = vmul.f32 0.03125, %v13326_v33  ;;  %19981 = vst [vmem:[#allocation55_spill] sm:$0xff] %v13748_v31  ;;  %v2207_v57 = vmul.f32 0.03125, %v13344_v39  ;;  %v19984_v33 = vld [vmem:[#allocation66_spill] sm:$0xff]  ;;  %v2209_v39 = vmul.f32 0.03125, %v13362_v3  ;;  %v2737_v3 = vsel %vm1733_vm2, %v2453_v30, 0.0 }
 0x3c0   :  { %v13736_v35 = vpop.xlane.xlu1 %2071  ;;  %v13743_v50 = vpop.xlane.xlu0 %2104  ;;  %v13758_v42 = vsub.f32 %v19984_v33, %v2196_v47  ;;  %19987 = vst [vmem:[#allocation58_spill] sm:$0xff] %v13763_v54  ;;  %v19988_v47 = vld [vmem:[#allocation68_spill] sm:$0xff]  ;;  %v13778_v33 = vsub.f32 %v19992_v23, %v2184_v13  ;;  %v2190_v13 = vmul.f32 0.03125, %v13382_v7  ;;  %v13802_v55 = vsub.f32 %v20000_v52, %v2188_v38  ;;  %v20003_v38 = vld [vmem:[#allocation75_spill] sm:$0xff] }
 0x3c1   :  { %v13772_v10 = vsub.f32 %v19988_v47, %v2198_v28  ;;  %v2450_v28 = vmul.f32 %v13748_v31, %v13748_v31  ;;  %v19996_v47 = vld [vmem:[#allocation72_spill] sm:$0xff]  ;;  %v2443_v7 = vmul.f32 %v13763_v54, %v13763_v54  ;;  %v20015_v31 = vld [vmem:[#allocation23_spill] sm:$0xff] }
 0x3c2   :  { %19985 = vst [vmem:[#allocation57_spill] sm:$0xff] %v13758_v42  ;;  %19993 = vst [vmem:[#allocation61_spill] sm:$0xff] %v13778_v33  ;;  %v2452_v30 = vmul.f32 %v13758_v42, %v13758_v42  ;;  %v20005_v54 = vld [vmem:[#allocation76_spill] sm:$0xff] }
 0x3c3   :  { %2720 = vadd.xlane.f32.xlu1 %v2719_v24  ;;  %2657 = vadd.xlane.f32.xlu0 %v2656_v18  ;;  %19989 = vst [vmem:[#allocation59_spill] sm:$0xff] %v13772_v10  ;;  %v13775_v24 = vsub.f32 %v19990_v60, %v2189_v32  ;;  %v13784_v18 = vsub.f32 %v19994_v34, %v2207_v57  ;;  %v19998_v57 = vld [vmem:[#allocation73_spill] sm:$0xff]  ;;  %20001 = vst [vmem:[#allocation65_spill] sm:$0xff] %v13802_v55  ;;  %v2728_v52 = vsel %vm1733_vm2, %v2450_v28, 0.0 }
 0x3c4   :  { %v13767_v15 = vpop.xlane.xlu1 %2077  ;;  %v13780_v58 = vpop.xlane.xlu0 %2110  ;;  %v13791_v32 = vsub.f32 %v19996_v47, %v2186_v29  ;;  %v2441_v60 = vmul.f32 %v13755_v59, %v13755_v59  ;;  %v13799_v23 = vsub.f32 %v19998_v57, %v2209_v39  ;;  %v2695_v29 = vsel %vm1733_vm2, %v2439_v36, 0.0 }
 0x3c5   :  { %19991 = vst [vmem:[#allocation60_spill] sm:$0xff] %v13775_v24  ;;  %19995 = vst [vmem:[#allocation62_spill] sm:$0xff] %v13784_v18  ;;  %v2454_v59 = vmul.f32 %v13772_v10, %v13772_v10  ;;  %v2445_v39 = vmul.f32 %v13775_v24, %v13775_v24  ;;  %v13819_v57 = vsub.f32 %v20003_v38, %v2211_v26  ;;  %v2208_v36 = vmul.f32 0.03125, %v13400_v11 }
 0x3c6   :  { %19997 = vst [vmem:[#allocation63_spill] sm:$0xff] %v13791_v32  ;;  %19999 = vst [vmem:[#allocation64_spill] sm:$0xff] %v13799_v23  ;;  %v13826_v42 = vsub.f32 %v20005_v54, %v2190_v13  ;;  %v2701_v10 = vsel %vm1733_vm2, %v2441_v60, 0.0  ;;  %v13830_v24 = vsel %vm1733_vm2, %v2452_v30, 0.0  ;;  %v2442_v26 = vmul.f32 %v13791_v32, %v13791_v32  ;;  %v20008_v13 = vld [vmem:[#allocation77_spill] sm:$0xff] }
 0x3c7   :  { %2726 = vadd.xlane.f32.xlu1 %v2725_v51  ;;  %2663 = vadd.xlane.f32.xlu0 %v2662_v22  ;;  %v2213_v51 = vmul.f32 0.03125, %v13398_v49  ;;  %v2440_v22 = vmul.f32 %v13778_v33, %v13778_v33  ;;  %20004 = vst [vmem:[#allocation67_spill] sm:$0xff] %v13819_v57  ;;  %v2463_v49 = vmul.f32 %v13784_v18, %v13784_v18  ;;  %v2199_v38 = vmul.f32 0.03125, %v13416_v45 }
 0x3c8   :  { %v13804_v34 = vpop.xlane.xlu1 %2083  ;;  %v13810_v47 = vpop.xlane.xlu0 %2116  ;;  %20006 = vst [vmem:[#allocation68_spill] sm:$0xff] %v13826_v42  ;;  %v13838_v28 = vsel %vm1733_vm2, %v2443_v7, 0.0  ;;  %v2465_v54 = vmul.f32 %v13799_v23, %v13799_v23  ;;  %v13850_v18 = vsel %vm1733_vm2, %v2454_v59, 0.0  ;;  %v13853_v45 = vsel %vm1733_vm2, %v2445_v39, 0.0  ;;  %v20011_v7 = vld [vmem:[#allocation78_spill] sm:$0xff]  ;;  %v20013_v23 = vld [vmem:[#allocation21_spill] sm:$0xff] }
 0x3c9   :  { %20002 = vst [vmem:[#allocation66_spill] sm:$0xff] %v13810_v47  ;;  %v13845_v60 = vsub.f32 %v20008_v13, %v2213_v51  ;;  %v13859_v33 = vsub.f32 %v20011_v7, %v2208_v36  ;;  %v2210_v32 = vmul.f32 0.03125, %v20013_v23  ;;  %v2467_v51 = vmul.f32 %v13819_v57, %v13819_v57  ;;  %v20014_v13 = vld [vmem:[#allocation104_spill] sm:$0xff]  ;;  %v20016_v36 = vld [vmem:[#allocation79_spill] sm:$0xff] }
 0x3ca   :  { %v2201_v59 = vmul.f32 0.03125, %v20014_v13  ;;  %v13870_v39 = vsel %vm1733_vm2, %v2442_v26, 0.0  ;;  %v13875_v7 = vsub.f32 %v20016_v36, %v2199_v38  ;;  %v2203_v23 = vmul.f32 0.03125, %v13452_v14  ;;  %v20019_v36 = vld [vmem:[#allocation80_spill] sm:$0xff] }
 0x3cb   :  { %2732 = vadd.xlane.f32.xlu1 %v2731_v40  ;;  %2669 = vadd.xlane.f32.xlu0 %v2668_v4  ;;  %v2444_v40 = vmul.f32 %v13802_v55, %v13802_v55  ;;  %20009 = vst [vmem:[#allocation70_spill] sm:$0xff] %v13845_v60  ;;  %v13856_v4 = vsel %vm1733_vm2, %v2440_v22, 0.0  ;;  %20012 = vst [vmem:[#allocation72_spill] sm:$0xff] %v13859_v33  ;;  %v13863_v55 = vsel %vm1733_vm2, %v2463_v49, 0.0  ;;  %v13879_v57 = vsel %vm1733_vm2, %v2465_v54, 0.0 }
 0x3cc   :  { %v13835_v11 = vpop.xlane.xlu1 %2089  ;;  %v13847_v30 = vpop.xlane.xlu0 %2074  ;;  %v2446_v22 = vmul.f32 %v13826_v42, %v13826_v42  ;;  %20017 = vst [vmem:[#allocation73_spill] sm:$0xff] %v13875_v7  ;;  %v2469_v38 = vmul.f32 %v13845_v60, %v13845_v60  ;;  %v13891_v14 = vsub.f32 %v20019_v36, %v2210_v32  ;;  %v13895_v54 = vsel %vm1733_vm2, %v2467_v51, 0.0  ;;  %v20024_v32 = vld [vmem:[#allocation84_spill] sm:$0xff] }
 0x3cd   :  { %20007 = vst [vmem:[#allocation69_spill] sm:$0xff] %v13835_v11  ;;  %20010 = vst [vmem:[#allocation71_spill] sm:$0xff] %v13847_v30  ;;  %v2212_v30 = vmul.f32 0.03125, %v20015_v31  ;;  %v13882_v13 = vsel %vm1733_vm2, %v2444_v40, 0.0  ;;  %v2214_v31 = vmul.f32 0.03125, %v13454_v56  ;;  %v2464_v40 = vmul.f32 %v13859_v33, %v13859_v33  ;;  %v20021_v56 = vld [vmem:[#allocation81_spill] sm:$0xff] }
 0x3ce   :  { %v13900_v47 = vsub.f32 %v20021_v56, %v2201_v59  ;;  %v13906_v60 = vsel %vm1733_vm2, %v2446_v22, 0.0  ;;  %v13909_v36 = vsub.f32 %v20024_v32, %v2203_v23  ;;  %v2223_v51 = vmul.f32 0.03125, %v13488_v43  ;;  %v20026_v56 = vld [vmem:[#allocation85_spill] sm:$0xff]  ;;  %v20030_v43 = vld [vmem:[#allocation88_spill] sm:$0xff] }
 0x3cf   :  { %2738 = vadd.xlane.f32.xlu1 %v2737_v3  ;;  %2723 = vadd.xlane.f32.xlu0 %v2722_v48  ;;  %v2205_v3 = vmul.f32 0.03125, %v13470_v25  ;;  %v20020_v48 = vld [vmem:[#allocation110_spill] sm:$0xff]  ;;  %v2455_v59 = vmul.f32 %v13875_v7, %v13875_v7  ;;  %v13924_v23 = vsel %vm1733_vm2, %v2469_v38, 0.0 }
 0x3d0   :  { %v2529_v49 = vpop.xlane.xlu1 %2528  ;;  %v13886_v11 = vpop.xlane.xlu0 %2080  ;;  %v2200_v42 = vmul.f32 0.03125, %v20020_v48  ;;  %20022 = vst [vmem:[#allocation75_spill] sm:$0xff] %v13900_v47  ;;  %v20023_v25 = vld [vmem:[#allocation82_spill] sm:$0xff]  ;;  %20025 = vst [vmem:[#allocation76_spill] sm:$0xff] %v13909_v36  ;;  %v2202_v48 = vmul.f32 0.03125, %v13490_v37  ;;  %v2225_v37 = vmul.f32 0.03125, %v13506_v21 }
 0x3d1   :  { %v2895_v26 = vmul.f32 0.03125, %v2529_v49  ;;  %20018 = vst [vmem:[#allocation74_spill] sm:$0xff] %v13886_v11  ;;  %v13903_v49 = vsub.f32 %v20023_v25, %v2212_v30  ;;  %v13916_v30 = vsub.f32 %v20026_v56, %v2214_v31  ;;  %v2466_v31 = vmul.f32 %v13891_v14, %v13891_v14  ;;  %v20032_v56 = vld [vmem:[#allocation89_spill] sm:$0xff] }
 0x3d2   :  { %v13927_v32 = vsub.f32 %v20030_v43, %v2200_v42  ;;  %v13940_v42 = vsub.f32 %v20032_v56, %v2223_v51  ;;  %v13947_v43 = vsel %vm1733_vm2, %v2455_v59, 0.0  ;;  %v20036_v56 = vld [vmem:[#allocation93_spill] sm:$0xff] }
 0x3d3   :  { %v3023_v11 = vadd.f32 1e-05, %v2895_v26  ;;  %2696 = vadd.xlane.f32.xlu1 %v2695_v29  ;;  %2729 = vadd.xlane.f32.xlu0 %v2728_v52  ;;  %20027 = vst [vmem:[#allocation77_spill] sm:$0xff] %v13916_v30  ;;  %v20028_v26 = vld [vmem:[#allocation87_spill] sm:$0xff]  ;;  %v13931_v52 = vsel %vm1733_vm2, %v2464_v40, 0.0  ;;  %v2468_v38 = vmul.f32 %v13903_v49, %v13903_v49  ;;  %v2470_v51 = vmul.f32 %v13916_v30, %v13916_v30 }
 0x3d4   :  { %v2535_v33 = vpop.xlane.xlu1 %2534  ;;  %v13919_v29 = vsub.f32 %v20028_v26, %v2205_v3  ;;  %v13921_v25 = vpop.xlane.xlu0 %2086  ;;  %20031 = vst [vmem:[#allocation21_spill] sm:$0xff] %v13927_v32  ;;  %20033 = vst [vmem:[#allocation104_spill] sm:$0xff] %v13940_v42  ;;  %v20034_v26 = vld [vmem:[#allocation90_spill] sm:$0xff]  ;;  %v13962_v59 = vsel %vm1733_vm2, %v2466_v31, 0.0 }
 0x3d5   :  { %v2897_v22 = vmul.f32 0.03125, %v2535_v33  ;;  %11142 = vrsqrt.f32 %v3023_v11  ;;  %v2457_v33 = vmul.f32 %v13900_v47, %v13900_v47  ;;  %v13943_v21 = vsub.f32 %v20034_v26, %v2202_v48 }
 0x3d6   :  { %20029 = vst [vmem:[#allocation78_spill] sm:$0xff] %v13919_v29  ;;  %v2461_v48 = vmul.f32 %v13919_v29, %v13919_v29  ;;  %v13958_v26 = vsub.f32 %v20036_v56, %v2225_v37  ;;  %v13972_v29 = vsel %vm1733_vm2, %v2468_v38, 0.0  ;;  %v2206_v37 = vmul.f32 0.03125, %v13526_v44 }
 0x3d7   :  { %v3025_v3 = vadd.f32 1e-05, %v2897_v22  ;;  %2702 = vadd.xlane.f32.xlu1 %v2701_v10  ;;  %20035 = vst [vmem:[#allocation23_spill] sm:$0xff] %v13943_v21  ;;  %2735 = vadd.xlane.f32.xlu0 %v13830_v24  ;;  %v2459_v10 = vmul.f32 %v13909_v36, %v13909_v36  ;;  %v2204_v24 = vmul.f32 0.03125, %v13508_v19  ;;  %v13969_v7 = vsel %vm1733_vm2, %v2457_v33, 0.0 }
 0x3d8   :  { %v2541_v40 = vpop.xlane.xlu1 %2540  ;;  %v13951_v22 = vpop.xlane.xlu0 %2092  ;;  %20037 = vst [vmem:[#allocation79_spill] sm:$0xff] %v13958_v26  ;;  %v2229_v33 = vmul.f32 0.03125, %v13542_v16  ;;  %v13985_v38 = vsel %vm1733_vm2, %v2470_v51, 0.0  ;;  %v13988_v44 = vsel %vm1733_vm2, %v2461_v48, 0.0  ;;  %v20042_v48 = vld [vmem:[#allocation97_spill] sm:$0xff] }
 0x3d9   :  { %11144 = vrsqrt.f32 %v3025_v3  ;;  %v2899_v11 = vmul.f32 0.03125, %v2541_v40  ;;  %v2456_v3 = vmul.f32 %v13927_v32, %v13927_v32  ;;  %v2227_v40 = vmul.f32 0.03125, %v13524_v46 }
 0x3da   :  { %v13977_v31 = vsel %vm1733_vm2, %v2459_v10, 0.0  ;;  %v2479_v46 = vmul.f32 %v13940_v42, %v13940_v42  ;;  %v2481_v42 = vmul.f32 %v13958_v26, %v13958_v26  ;;  %v14004_v30 = vsub.f32 %v20042_v48, %v2206_v37  ;;  %v20045_v48 = vld [vmem:[#allocation100_spill] sm:$0xff] }
 0x3db   :  { %v3027_v36 = vadd.f32 1e-05, %v2899_v11  ;;  %2708 = vadd.xlane.f32.xlu1 %v13838_v28  ;;  %2741 = vadd.xlane.f32.xlu0 %v13850_v18  ;;  %v2458_v28 = vmul.f32 %v13943_v21, %v13943_v21  ;;  %v20038_v18 = vld [vmem:[#allocation94_spill] sm:$0xff]  ;;  %v13994_v47 = vsel %vm1733_vm2, %v2456_v3, 0.0  ;;  %v20040_v21 = vld [vmem:[#allocation96_spill] sm:$0xff] }
 0x3dc   :  { %v2547_v19 = vpop.xlane.xlu1 %2546  ;;  %v2532_v56 = vpop.xlane.xlu0 %2531  ;;  %v13991_v32 = vsub.f32 %v20038_v18, %v2204_v24  ;;  %v13999_v16 = vsub.f32 %v20040_v21, %v2227_v40  ;;  %v20043_v40 = vld [vmem:[#allocation99_spill] sm:$0xff] }
 0x3dd   :  { %v2901_v11 = vmul.f32 0.03125, %v2547_v19  ;;  %v2896_v10 = vmul.f32 0.03125, %v2532_v56  ;;  %v2224_v19 = vmul.f32 0.03125, %v13544_v2  ;;  %11146 = vrsqrt.f32 %v3027_v36 }
 0x3de   :  { %20039 = vst [vmem:[#allocation80_spill] sm:$0xff] %v13991_v32  ;;  %20041 = vst [vmem:[#allocation110_spill] sm:$0xff] %v13999_v16  ;;  %v14008_v56 = vsel %vm1733_vm2, %v2479_v46, 0.0  ;;  %v14011_v18 = vsel %vm1733_vm2, %v2458_v28, 0.0  ;;  %v14014_v2 = vsub.f32 %v20043_v40, %v2229_v33  ;;  %v2215_v36 = vmul.f32 0.03125, %v13560_v17 }
 0x3df   :  { %v3029_v51 = vadd.f32 1e-05, %v2901_v11  ;;  %2714 = vadd.xlane.f32.xlu1 %v13853_v45  ;;  %v3024_v24 = vadd.f32 1e-05, %v2896_v10  ;;  %2699 = vadd.xlane.f32.xlu0 %v13856_v4  ;;  %v11143_v21 = vpop.eup %11142  ;;  %v2226_v11 = vmul.f32 0.03125, %v13562_v9  ;;  %v14019_v4 = vsel %vm1733_vm2, %v2481_v42, 0.0 }
 0x3e0   :  { %v2505_v3 = vpop.xlane.xlu1 %2504  ;;  %20044 = vst [vmem:[#allocation81_spill] sm:$0xff] %v14014_v2  ;;  %v2538_v37 = vpop.xlane.xlu0 %2537  ;;  %v2460_v46 = vmul.f32 %v13991_v32, %v13991_v32  ;;  %v14024_v26 = vsub.f32 %v20045_v48, %v2224_v19  ;;  %v2217_v33 = vmul.f32 0.03125, %v13578_v8  ;;  %v2483_v17 = vmul.f32 %v13999_v16, %v13999_v16  ;;  %v20047_v9 = vld [vmem:[#allocation131_spill] sm:$0xff]  ;;  %v20048_v42 = vld [vmem:[#allocation134_spill] sm:$0xff]  ;;  %v20049_v48 = vld [vmem:[#allocation101_spill] sm:$0xff] }
 0x3e1   :  { %11148 = vrsqrt.f32 %v3029_v51  ;;  %v2887_v45 = vmul.f32 0.03125, %v2505_v3  ;;  %v2898_v10 = vmul.f32 0.03125, %v2538_v37  ;;  %v14031_v51 = vmul.f32 %v11143_v21, %v20047_v9  ;;  %v20051_v9 = vld [vmem:[#allocation102_spill] sm:$0xff] }
 0x3e2   :  { %20046 = vst [vmem:[#allocation82_spill] sm:$0xff] %v14024_v26  ;;  %11150 = vrsqrt.f32 %v3024_v24  ;;  %v14038_v32 = vsub.f32 %v20049_v48, %v2215_v36  ;;  %v2485_v21 = vmul.f32 %v14014_v2, %v14014_v2  ;;  %v14045_v16 = vsub.f32 %v20051_v9, %v2226_v11 }
 0x3e3   :  { %v11145_v28 = vpop.eup %11144  ;;  %v3015_v40 = vadd.f32 1e-05, %v2887_v45  ;;  %2768 = vadd.xlane.f32.xlu1 %v13863_v55  ;;  %v3026_v37 = vadd.f32 1e-05, %v2898_v10  ;;  %2705 = vadd.xlane.f32.xlu0 %v13870_v39  ;;  %v2462_v55 = vmul.f32 %v14004_v30, %v14004_v30  ;;  %v20053_v10 = vld [vmem:[#allocation105_spill] sm:$0xff]  ;;  %v2228_v36 = vmul.f32 0.03125, %v13580_v62 }
 0x3e4   :  { %v14034_v3 = vmul.f32 %v11145_v28, %v20048_v42  ;;  %v2511_v19 = vpop.xlane.xlu1 %2510  ;;  %20050 = vst [vmem:[#allocation84_spill] sm:$0xff] %v14038_v32  ;;  %v2544_v45 = vpop.xlane.xlu0 %2543  ;;  %20052 = vst [vmem:[#allocation85_spill] sm:$0xff] %v14045_v16  ;;  %v14050_v28 = vsub.f32 %v20053_v10, %v2217_v33  ;;  %v14056_v11 = vsel %vm1733_vm2, %v2460_v46, 0.0  ;;  %v2480_v33 = vmul.f32 %v14024_v26, %v14024_v26  ;;  %v20055_v10 = vld [vmem:[#allocation106_spill] sm:$0xff] }
 0x3e5   :  { %v2889_v8 = vmul.f32 0.03125, %v2511_v19  ;;  %11152 = vrsqrt.f32 %v3026_v37  ;;  %v2900_v24 = vmul.f32 0.03125, %v2544_v45  ;;  %v14059_v37 = vsel %vm1733_vm2, %v2483_v17, 0.0 }
 0x3e6   :  { %20054 = vst [vmem:[#allocation87_spill] sm:$0xff] %v14050_v28  ;;  %11154 = vrsqrt.f32 %v3015_v40  ;;  %v2219_v62 = vmul.f32 0.03125, %v13596_v27  ;;  %v2230_v40 = vmul.f32 0.03125, %v13598_v6  ;;  %v14069_v46 = vsel %vm1733_vm2, %v2485_v21, 0.0  ;;  %v20058_v21 = vld [vmem:[#allocation138_spill] sm:$0xff] }
 0x3e7   :  { %v3017_v42 = vadd.f32 1e-05, %v2889_v8  ;;  %2774 = vadd.xlane.f32.xlu1 %v13879_v57  ;;  %v3028_v19 = vadd.f32 1e-05, %v2900_v24  ;;  %2711 = vadd.xlane.f32.xlu0 %v13882_v13  ;;  %v11147_v45 = vpop.eup %11146  ;;  %v14066_v13 = vsel %vm1733_vm2, %v2462_v55, 0.0  ;;  %v2471_v17 = vmul.f32 %v14038_v32, %v14038_v32 }
 0x3e8   :  { %v2517_v48 = vpop.xlane.xlu1 %2516  ;;  %v2550_v8 = vpop.xlane.xlu0 %2549  ;;  %v14074_v39 = vsub.f32 %v20055_v10, %v2228_v36  ;;  %v2482_v6 = vmul.f32 %v14045_v16, %v14045_v16  ;;  %v2473_v55 = vmul.f32 %v14050_v28, %v14050_v28  ;;  %v14095_v28 = vsel %vm1733_vm2, %v2480_v33, 0.0 }
 0x3e9   :  { %11156 = vrsqrt.f32 %v3017_v42  ;;  %v2891_v57 = vmul.f32 0.03125, %v2517_v48  ;;  %v2902_v9 = vmul.f32 0.03125, %v2550_v8  ;;  %v20057_v42 = vld [vmem:[#allocation136_spill] sm:$0xff] }
 0x3ea   :  { %20056 = vst [vmem:[#allocation88_spill] sm:$0xff] %v14074_v39  ;;  %v14082_v48 = vmul.f32 %v11147_v45, %v20057_v42  ;;  %11158 = vrsqrt.f32 %v3028_v19  ;;  %v2216_v42 = vmul.f32 0.03125, %v13616_v63 }
 0x3eb   :  { %v11149_v24 = vpop.eup %11148  ;;  %v3019_v27 = vadd.f32 1e-05, %v2891_v57  ;;  %2780 = vadd.xlane.f32.xlu1 %v13895_v54  ;;  %v3030_v32 = vadd.f32 1e-05, %v2902_v9  ;;  %2717 = vadd.xlane.f32.xlu0 %v13906_v60  ;;  %v20059_v57 = vld [vmem:[#allocation108_spill] sm:$0xff]  ;;  %v20061_v54 = vld [vmem:[#allocation109_spill] sm:$0xff] }
 0x3ec   :  { %v14085_v8 = vmul.f32 %v11149_v24, %v20058_v21  ;;  %v2523_v36 = vpop.xlane.xlu1 %2522  ;;  %v14089_v10 = vsub.f32 %v20059_v57, %v2219_v62  ;;  %v14092_v2 = vsub.f32 %v20061_v54, %v2230_v40  ;;  %v2508_v16 = vpop.xlane.xlu0 %2507  ;;  %v2221_v24 = vmul.f32 0.03125, %v13614_v12  ;;  %v20064_v54 = vld [vmem:[#allocation111_spill] sm:$0xff] }
 0x3ed   :  { %v2893_v26 = vmul.f32 0.03125, %v2523_v36  ;;  %v11151_v45 = vpop.eup %11150  ;;  %11160 = vrsqrt.f32 %v3030_v32  ;;  %v2888_v19 = vmul.f32 0.03125, %v2508_v16  ;;  %v14102_v62 = vsel %vm1733_vm2, %v2471_v17, 0.0  ;;  %v20062_v16 = vld [vmem:[#allocation139_spill] sm:$0xff] }
 0x3ee   :  { %20060 = vst [vmem:[#allocation89_spill] sm:$0xff] %v14089_v10  ;;  %11162 = vrsqrt.f32 %v3019_v27  ;;  %v14105_v40 = vsel %vm1733_vm2, %v2482_v6, 0.0  ;;  %v14110_v32 = vsel %vm1733_vm2, %v2473_v55, 0.0  ;;  %v3280_v17 = vmul.f32 %v11151_v45, %v20062_v16  ;;  %v20063_v27 = vld [vmem:[#allocation142_spill] sm:$0xff] }
 0x3ef   :  { %v3021_v9 = vadd.f32 1e-05, %v2893_v26  ;;  %2786 = vadd.xlane.f32.xlu1 %v13924_v23  ;;  %v11153_v33 = vpop.eup %11152  ;;  %v3016_v21 = vadd.f32 1e-05, %v2888_v19  ;;  %2771 = vadd.xlane.f32.xlu0 %v13931_v52  ;;  %v2484_v26 = vmul.f32 %v14074_v39, %v14074_v39  ;;  %v14117_v63 = vsub.f32 %v20064_v54, %v2221_v24  ;;  %v20068_v24 = vld [vmem:[#allocation141_spill] sm:$0xff] }
 0x3f0   :  { %v2577_v12 = vpop.xlane.xlu1 %2576  ;;  %v11155_v23 = vpop.eup %11154  ;;  %v3282_v36 = vmul.f32 %v11153_v33, %v20063_v27  ;;  %v2475_v52 = vmul.f32 %v14089_v10, %v14089_v10  ;;  %v2486_v55 = vmul.f32 %v14092_v2, %v14092_v2  ;;  %v2239_v39 = vmul.f32 0.03125, %v13632_v0  ;;  %v20066_v33 = vld [vmem:[#allocation112_spill] sm:$0xff]  ;;  %v20069_v27 = vld [vmem:[#allocation143_spill] sm:$0xff] }
 0x3f1   :  { %11164 = vrsqrt.f32 %v3021_v9  ;;  %v2911_v6 = vmul.f32 0.03125, %v2577_v12  ;;  %v2514_v57 = vpop.xlane.xlu0 %2513  ;;  %20065 = vst [vmem:[#allocation90_spill] sm:$0xff] %v14117_v63  ;;  %v14126_v12 = vsub.f32 %v20066_v33, %v2216_v42  ;;  %v14129_v16 = vmul.f32 %v11155_v23, %v20068_v24 }
 0x3f2   :  { %v2890_v19 = vmul.f32 0.03125, %v2514_v57  ;;  %11166 = vrsqrt.f32 %v3016_v21  ;;  %v3475_v9 = vcombine.low %v3280_v17, %v3282_v36  ;;  %v14157_v24 = vsel %vm1733_vm2, %v2484_v26, 0.0 }
 0x3f3   :  { %v11157_v60 = vpop.eup %11156  ;;  %v3039_v45 = vadd.f32 1e-05, %v2911_v6  ;;  %2744 = vadd.xlane.f32.xlu1 %v13947_v43  ;;  %20067 = vst [vmem:[#allocation93_spill] sm:$0xff] %v14126_v12  ;;  %2777 = vadd.xlane.f32.xlu0 %v13962_v59  ;;  %v20070_v6 = vld [vmem:[#allocation5_spill] sm:$0xff]  ;;  %v20071_v43 = vcombine.low %v14031_v51, %v14034_v3  ;;  %v14172_v26 = vmul.f32 %v14117_v63, %v14117_v63  ;;  %v20077_v59 = vld [vmem:[#allocation43_spill] sm:$0xff] }
 0x3f4   :  { %v14132_v57 = vmul.f32 %v11157_v60, %v20069_v27  ;;  %v3018_v54 = vadd.f32 1e-05, %v2890_v19  ;;  %v2583_v10 = vpop.xlane.xlu1 %2582  ;;  %v14142_v42 = vrot.slane %v3475_v9, %v20070_v6  ;;  %v11159_v23 = vpop.eup %11158  ;;  %v2218_v60 = vmul.f32 0.03125, %v13636_v20  ;;  %v20072_v19 = vld [vmem:[#allocation113_spill] sm:$0xff] }
 0x3f5   :  { %11168 = vrsqrt.f32 %v3039_v45  ;;  %v2913_v0 = vmul.f32 0.03125, %v2583_v10  ;;  %v2520_v21 = vpop.xlane.xlu0 %2519  ;;  %v14139_v17 = vrot.slane %v20071_v43, %v20070_v6  ;;  %v14148_v10 = vsub.f32 %v20072_v19, %v2239_v39 }
 0x3f6   :  { %11170 = vrsqrt.f32 %v3018_v54  ;;  %v2892_v36 = vmul.f32 0.03125, %v2520_v21  ;;  %v14160_v39 = vsel %vm1733_vm2, %v2475_v52, 0.0  ;;  %v14163_v27 = vsel %vm1733_vm2, %v2486_v55, 0.0  ;;  %v20074_v54 = vld [vmem:[#allocation144_spill] sm:$0xff]  ;;  %v20075_v21 = vld [vmem:[#allocation146_spill] sm:$0xff] }
 0x3f7   :  { %20073 = vst [vmem:[#allocation94_spill] sm:$0xff] %v14148_v10  ;;  %v3041_v45 = vadd.f32 1e-05, %v2913_v0  ;;  %2750 = vadd.xlane.f32.xlu1 %v13969_v7  ;;  %v3500_v51 = vcombine.high %v14139_v17, %v14142_v42  ;;  %v3499_v3 = vcombine.low %v14139_v17, %v14142_v42  ;;  %v11161_v9 = vpop.eup %11160  ;;  %2783 = vadd.xlane.f32.xlu0 %v13972_v29 }
 0x3f8   :  { %v3020_v33 = vadd.f32 1e-05, %v2892_v36  ;;  %v2589_v20 = vpop.xlane.xlu1 %2588  ;;  %v11163_v7 = vpop.eup %11162  ;;  %v3284_v0 = vmul.f32 %v11159_v23, %v20074_v54  ;;  %v3286_v43 = vmul.f32 %v11161_v9, %v20075_v21  ;;  %v20076_v36 = vld [vmem:[#allocation114_spill] sm:$0xff]  ;;  %v14176_v52 = vmul.f32 %v14126_v12, %v14126_v12  ;;  %v20078_v9 = vld [vmem:[#allocation145_spill] sm:$0xff]  ;;  %v20079_v21 = vld [vmem:[#allocation147_spill] sm:$0xff] }
 0x3f9   :  { %11172 = vrsqrt.f32 %v3041_v45  ;;  %v2915_v17 = vmul.f32 0.03125, %v2589_v20  ;;  %v2526_v42 = vpop.xlane.xlu0 %2525  ;;  %v14168_v29 = vsub.f32 %v20076_v36, %v2218_v60  ;;  %v2241_v23 = vmul.f32 0.03125, %v20077_v59 }
 0x3fa   :  { %v2894_v19 = vmul.f32 0.03125, %v2526_v42  ;;  %v14182_v45 = vmul.f32 %v14148_v10, %v14148_v10  ;;  %v3491_v60 = vcombine.low %v3284_v0, %v3286_v43  ;;  %v14185_v20 = vmul.f32 %v11163_v7, %v20078_v9 }
 0x3fb   :  { %v11165_v55 = vpop.eup %11164  ;;  %v3043_v54 = vadd.f32 1e-05, %v2915_v17  ;;  %2756 = vadd.xlane.f32.xlu1 %v13977_v31  ;;  %11174 = vrsqrt.f32 %v3020_v33  ;;  %2789 = vadd.xlane.f32.xlu0 %v13985_v38  ;;  %v2220_v17 = vmul.f32 0.03125, %v13662_v61  ;;  %v20080_v0 = vcombine.low %v14082_v48, %v14085_v8  ;;  %v20081_v8 = vld [vmem:[#allocation148_spill] sm:$0xff]  ;;  %v20083_v38 = vld [vmem:[#allocation83_spill] sm:$0xff] }
 0x3fc   :  { %v14188_v42 = vmul.f32 %v11165_v55, %v20079_v21  ;;  %v3022_v36 = vadd.f32 1e-05, %v2894_v19  ;;  %v2595_v63 = vpop.xlane.xlu1 %2594  ;;  %v11167_v59 = vpop.eup %11166  ;;  %v3498_v7 = vrot.slane %v3491_v60, %v20070_v6  ;;  %v14199_v33 = vmul.f32 %v14168_v29, %v14168_v29 }
 0x3fd   :  { %v2917_v31 = vmul.f32 0.03125, %v2595_v63  ;;  %v2580_v12 = vpop.xlane.xlu0 %2579  ;;  %v3490_v43 = vrot.slane %v20080_v0, %v20070_v6  ;;  %v3272_v21 = vmul.f32 %v11167_v59, %v20081_v8 }
 0x3fe   :  { %11176 = vrsqrt.f32 %v3022_v36  ;;  %v2912_v55 = vmul.f32 0.03125, %v2580_v12  ;;  %v20082_v36 = vld [vmem:[#allocation6_spill] sm:$0xff] }
 0x3ff   :  { %v11169_v19 = vpop.eup %11168  ;;  %11178 = vrsqrt.f32 %v3043_v54  ;;  %v3045_v61 = vadd.f32 1e-05, %v2917_v31  ;;  %2762 = vadd.xlane.f32.xlu1 %v13988_v44  ;;  %v3516_v63 = vcombine.high %v3490_v43, %v3498_v7  ;;  %v3515_v9 = vcombine.low %v3490_v43, %v3498_v7  ;;  %2747 = vadd.xlane.f32.xlu0 %v13994_v47  ;;  %v20084_v7 = vld [vmem:[#allocation7_spill] sm:$0xff] }
 0x400   :  { %v11171_v48 = vpop.eup %11170  ;;  %v3040_v60 = vadd.f32 1e-05, %v2912_v55  ;;  %v2553_v12 = vpop.xlane.xlu1 %2552  ;;  %v14207_v0 = vrot.slane %v3500_v51, %v20082_v36  ;;  %v14210_v10 = vrot.slane %v3499_v3, %v20082_v36  ;;  %v14217_v59 = vmul.f32 %v11169_v19, %v20084_v7  ;;  %v20087_v7 = vld [vmem:[#allocation117_spill] sm:$0xff] }
 0x401   :  { %v3274_v54 = vmul.f32 %v11171_v48, %v20083_v38  ;;  %11180 = vrsqrt.f32 %v3045_v61  ;;  %v2903_v31 = vmul.f32 0.03125, %v2553_v12  ;;  %v2586_v44 = vpop.xlane.xlu0 %2585  ;;  %v14214_v43 = vrot.slane %v3516_v63, %v20082_v36  ;;  %v20085_v63 = vld [vmem:[#allocation8_spill] sm:$0xff] }
 0x402   :  { %11182 = vrsqrt.f32 %v3040_v60  ;;  %v2914_v47 = vmul.f32 0.03125, %v2586_v44  ;;  %v14220_v55 = vrot.slane %v3515_v9, %v20082_v36  ;;  %v20092_v61 = vld [vmem:[#allocation120_spill] sm:$0xff] }
 0x403   :  { %v11173_v51 = vpop.eup %11172  ;;  %v3031_v8 = vadd.f32 1e-05, %v2903_v31  ;;  %2816 = vadd.xlane.f32.xlu1 %v14008_v56  ;;  %v3407_v38 = vcombine.low %v3272_v21, %v3274_v54  ;;  %2753 = vadd.xlane.f32.xlu0 %v14011_v18  ;;  %v20086_v21 = vcombine.low %v14129_v16, %v14132_v57  ;;  %v20091_v56 = vld [vmem:[#allocation86_spill] sm:$0xff] }
 0x404   :  { %v14228_v48 = vmul.f32 %v11173_v51, %v20085_v63  ;;  %v3042_v19 = vadd.f32 1e-05, %v2914_v47  ;;  %v2559_v60 = vpop.xlane.xlu1 %2558  ;;  %v14245_v47 = vsub.f32 %v20087_v7, %v2241_v23  ;;  %v2243_v63 = vmul.f32 0.03125, %v13684_v53 }
 0x405   :  { %11184 = vrsqrt.f32 %v3031_v8  ;;  %v2905_v12 = vmul.f32 0.03125, %v2559_v60  ;;  %v2592_v31 = vpop.xlane.xlu0 %2591  ;;  %v14239_v54 = vrot.slane %v20086_v21, %v20070_v6  ;;  %v14242_v44 = vrot.slane %v3407_v38, %v20070_v6  ;;  %v11175_v18 = vpop.eup %11174  ;;  %v20089_v21 = vld [vmem:[#allocation118_spill] sm:$0xff] }
 0x406   :  { %20088 = vst [vmem:[#allocation96_spill] sm:$0xff] %v14245_v47  ;;  %11186 = vrsqrt.f32 %v3042_v19  ;;  %v2916_v51 = vmul.f32 0.03125, %v2592_v31  ;;  %v14256_v23 = vsub.f32 %v20089_v21, %v2220_v17  ;;  %v14261_v53 = vsel %vm1733_vm2, %v14172_v26, 0.0 }
 0x407   :  { %v3033_v60 = vadd.f32 1e-05, %v2905_v12  ;;  %2822 = vadd.xlane.f32.xlu1 %v14019_v4  ;;  %v3431_v16 = vcombine.low %v14239_v54, %v14242_v44  ;;  %v3432_v57 = vcombine.high %v14239_v54, %v14242_v44  ;;  %2759 = vadd.xlane.f32.xlu0 %v14056_v11  ;;  %v14265_v4 = vsel %vm1733_vm2, %v14176_v52, 0.0  ;;  %v20090_v54 = vld [vmem:[#allocation9_spill] sm:$0xff] }
 0x408   :  { %v11177_v38 = vpop.eup %11176  ;;  %v3044_v19 = vadd.f32 1e-05, %v2916_v51  ;;  %v2565_v31 = vpop.xlane.xlu1 %2564  ;;  %v2222_v7 = vmul.f32 0.03125, %v13687_v41  ;;  %v3276_v44 = vmul.f32 %v11175_v18, %v20090_v54  ;;  %v14272_v11 = vsel %vm1733_vm2, %v14182_v45, 0.0  ;;  %v20094_v54 = vld [vmem:[#allocation10_spill] sm:$0xff] }
 0x409   :  { %v11179_v12 = vpop.eup %11178  ;;  %v3278_v17 = vmul.f32 %v11177_v38, %v20091_v56  ;;  %11188 = vrsqrt.f32 %v3033_v60  ;;  %v2598_v51 = vpop.xlane.xlu0 %2597  ;;  %v14276_v26 = vsel %vm1733_vm2, %v14199_v33, 0.0  ;;  %v14280_v52 = vmul.f32 %v14245_v47, %v14245_v47  ;;  %v20095_v33 = vld [vmem:[#allocation11_spill] sm:$0xff] }
 0x40a   :  { %v2918_v21 = vmul.f32 0.03125, %v2598_v51  ;;  %v14283_v18 = vsub.f32 %v20092_v61, %v2243_v63  ;;  %v2245_v56 = vmul.f32 0.03125, %v13707_v5  ;;  %v2240_v60 = vmul.f32 0.03125, %v13716_v1  ;;  %v20096_v63 = vld [vmem:[#allocation121_spill] sm:$0xff] }
 0x40b   :  { %v11181_v41 = vpop.eup %11180  ;;  %2828 = vadd.xlane.f32.xlu1 %v14059_v37  ;;  %v3423_v45 = vcombine.low %v3276_v44, %v3278_v17  ;;  %v14289_v51 = vmul.f32 %v11179_v12, %v20094_v54  ;;  %11190 = vrsqrt.f32 %v3044_v19  ;;  %2765 = vadd.xlane.f32.xlu0 %v14066_v13  ;;  %v14296_v8 = vsub.f32 %v20096_v63, %v2222_v7  ;;  %v20099_v7 = vld [vmem:[#allocation123_spill] sm:$0xff]  ;;  %v20101_v63 = vld [vmem:[#allocation124_spill] sm:$0xff] }
 0x40c   :  { %20093 = vst [vmem:[#allocation97_spill] sm:$0xff] %v14283_v18  ;;  %v11183_v38 = vpop.eup %11182  ;;  %v14292_v9 = vmul.f32 %v11181_v41, %v20095_v33  ;;  %v3046_v3 = vadd.f32 1e-05, %v2918_v21  ;;  %v2571_v61 = vpop.xlane.xlu1 %2570  ;;  %v2476_v1 = vmul.f32 %v14256_v23, %v14256_v23  ;;  %v20098_v37 = vcombine.low %v14185_v20, %v14188_v42 }
 0x40d   :  { %20097 = vst [vmem:[#allocation99_spill] sm:$0xff] %v14296_v8  ;;  %v2556_v5 = vpop.xlane.xlu0 %2555  ;;  %v3430_v44 = vrot.slane %v3423_v45, %v20070_v6  ;;  %v2909_v19 = vmul.f32 0.03125, %v2571_v61  ;;  %v14308_v41 = vsub.f32 %v20099_v7, %v2245_v56  ;;  %v2499_v54 = vmul.f32 %v14283_v18, %v14283_v18  ;;  %v20104_v7 = vld [vmem:[#allocation91_spill] sm:$0xff] }
 0x40e   :  { %v3422_v12 = vrot.slane %v20098_v37, %v20070_v6  ;;  %11192 = vrsqrt.f32 %v3046_v3  ;;  %v2904_v17 = vmul.f32 0.03125, %v2556_v5  ;;  %v14314_v45 = vsub.f32 %v20101_v63, %v2240_v60  ;;  %v20103_v37 = vld [vmem:[#allocation12_spill] sm:$0xff] }
 0x40f   :  { %v11185_v21 = vpop.eup %11184  ;;  %20100 = vst [vmem:[#allocation100_spill] sm:$0xff] %v14308_v41  ;;  %2834 = vadd.xlane.f32.xlu1 %v14069_v46  ;;  %v2231_v3 = vmul.f32 0.03125, %v13736_v35  ;;  %v2907_v61 = vmul.f32 0.03125, %v2565_v31  ;;  %2819 = vadd.xlane.f32.xlu0 %v14095_v28  ;;  %v14319_v56 = vrot.slane %v3431_v16, %v20082_v36  ;;  %v3296_v46 = vmul.f32 %v11183_v38, %v20103_v37  ;;  %v20105_v16 = vld [vmem:[#allocation13_spill] sm:$0xff] }
 0x410   :  { %v3447_v33 = vcombine.low %v3422_v12, %v3430_v44  ;;  %v3448_v20 = vcombine.high %v3422_v12, %v3430_v44  ;;  %v11187_v42 = vpop.eup %11186  ;;  %20102 = vst [vmem:[#allocation131_spill] sm:$0xff] %v14314_v45  ;;  %v2625_v5 = vpop.xlane.xlu1 %2624  ;;  %v3032_v18 = vadd.f32 1e-05, %v2904_v17  ;;  %v3037_v60 = vadd.f32 1e-05, %v2909_v19 }
 0x411   :  { %v3298_v13 = vmul.f32 %v11187_v42, %v20104_v7  ;;  %v2562_v47 = vpop.xlane.xlu0 %2561  ;;  %v14327_v35 = vrot.slane %v3432_v57, %v20082_v36  ;;  %v14333_v63 = vmul.f32 %v11185_v21, %v20105_v16  ;;  %v2242_v42 = vmul.f32 0.03125, %v13743_v50 }
 0x412   :  { %v14324_v12 = vrot.slane %v3447_v33, %v20082_v36  ;;  %v2906_v44 = vmul.f32 0.03125, %v2562_v47  ;;  %v14330_v28 = vrot.slane %v3448_v20, %v20082_v36  ;;  %v20106_v47 = vld [vmem:[#allocation14_spill] sm:$0xff]  ;;  %11194 = vrsqrt.f32 %v3032_v18 }
 0x413   :  { %v11189_v31 = vpop.eup %11188  ;;  %2792 = vadd.xlane.f32.xlu1 %v14102_v62  ;;  %v3611_v17 = vcombine.low %v3296_v46, %v3298_v13  ;;  %2825 = vadd.xlane.f32.xlu0 %v14105_v40  ;;  %v20107_v37 = vcombine.low %v14217_v59, %v14228_v48  ;;  %v14363_v50 = vsel %vm1733_vm2, %v14280_v52, 0.0  ;;  %v2478_v59 = vmul.f32 %v14296_v8, %v14296_v8 }
 0x414   :  { %v14341_v33 = vmul.f32 %v11189_v31, %v20106_v47  ;;  %v3034_v57 = vadd.f32 1e-05, %v2906_v44  ;;  %v2631_v20 = vpop.xlane.xlu1 %2630  ;;  %v3035_v44 = vadd.f32 1e-05, %v2907_v61  ;;  %v14376_v52 = vsel %vm1733_vm2, %v2499_v54, 0.0 }
 0x415   :  { %v2568_v13 = vpop.xlane.xlu0 %2567  ;;  %v14353_v46 = vrot.slane %v20107_v37, %v20070_v6  ;;  %v14356_v7 = vrot.slane %v3611_v17, %v20070_v6  ;;  %v11191_v40 = vpop.eup %11190  ;;  %v20109_v37 = vld [vmem:[#allocation95_spill] sm:$0xff]  ;;  %v2233_v21 = vmul.f32 0.03125, %v13767_v15  ;;  %v2927_v38 = vmul.f32 0.03125, %v2625_v5 }
 0x416   :  { %11196 = vrsqrt.f32 %v3034_v57  ;;  %v2908_v31 = vmul.f32 0.03125, %v2568_v13  ;;  %v20108_v57 = vld [vmem:[#allocation92_spill] sm:$0xff] }
 0x417   :  { %2798 = vadd.xlane.f32.xlu1 %v14110_v32  ;;  %v3635_v48 = vcombine.low %v14353_v46, %v14356_v7  ;;  %v3636_v18 = vcombine.high %v14353_v46, %v14356_v7  ;;  %11198 = vrsqrt.f32 %v3037_v60  ;;  %2831 = vadd.xlane.f32.xlu0 %v14157_v24  ;;  %v14373_v32 = vsel %vm1733_vm2, %v2476_v1, 0.0  ;;  %v20110_v7 = vld [vmem:[#allocation125_spill] sm:$0xff] }
 0x418   :  { %v11193_v61 = vpop.eup %11192  ;;  %v3036_v17 = vadd.f32 1e-05, %v2908_v31  ;;  %v2637_v47 = vpop.xlane.xlu1 %2636  ;;  %v3300_v13 = vmul.f32 %v11191_v40, %v20108_v57  ;;  %v2501_v46 = vmul.f32 %v14308_v41, %v14308_v41  ;;  %v2496_v60 = vmul.f32 %v14314_v45, %v14314_v45  ;;  %v20112_v31 = vld [vmem:[#allocation126_spill] sm:$0xff] }
 0x419   :  { %v3302_v19 = vmul.f32 %v11193_v61, %v20109_v37  ;;  %v2574_v62 = vpop.xlane.xlu0 %2573  ;;  %v14385_v24 = vsub.f32 %v20110_v7, %v2231_v3  ;;  %v14388_v1 = vsub.f32 %v20112_v31, %v2242_v42  ;;  %11200 = vrsqrt.f32 %v3035_v44 }
 0x41a   :  { %v2910_v54 = vmul.f32 0.03125, %v2574_v62  ;;  %v2929_v40 = vmul.f32 0.03125, %v2631_v20  ;;  %v14393_v61 = vsel %vm1733_vm2, %v2478_v59, 0.0  ;;  %v2244_v37 = vmul.f32 0.03125, %v13780_v58  ;;  %v20115_v59 = vld [vmem:[#allocation127_spill] sm:$0xff] }
 0x41b   :  { %20111 = vst [vmem:[#allocation134_spill] sm:$0xff] %v14385_v24  ;;  %20113 = vst [vmem:[#allocation101_spill] sm:$0xff] %v14388_v1  ;;  %2804 = vadd.xlane.f32.xlu1 %v14160_v39  ;;  %v3627_v57 = vcombine.low %v3300_v13, %v3302_v19  ;;  %11202 = vrsqrt.f32 %v3036_v17  ;;  %2837 = vadd.xlane.f32.xlu0 %v14163_v27  ;;  %v14398_v62 = vsel %vm1733_vm2, %v2501_v46, 0.0  ;;  %v14401_v15 = vsel %vm1733_vm2, %v2496_v60, 0.0  ;;  %v20117_v60 = vld [vmem:[#allocation128_spill] sm:$0xff] }
 0x41c   :  { %v3038_v3 = vadd.f32 1e-05, %v2910_v54  ;;  %v2643_v42 = vpop.xlane.xlu1 %2642  ;;  %v20114_v39 = vcombine.low %v14289_v51, %v14292_v9  ;;  %v2487_v27 = vmul.f32 %v14385_v24, %v14385_v24  ;;  %v2498_v20 = vmul.f32 %v14388_v1, %v14388_v1  ;;  %v11195_v44 = vpop.eup %11194 }
 0x41d   :  { %v2628_v7 = vpop.xlane.xlu0 %2627  ;;  %v3634_v58 = vrot.slane %v3627_v57, %v20070_v6  ;;  %v14413_v17 = vsub.f32 %v20115_v59, %v2233_v21  ;;  %v3057_v13 = vadd.f32 1e-05, %v2929_v40  ;;  %v14417_v31 = vsub.f32 %v20117_v60, %v2244_v37 }
 0x41e   :  { %v3626_v19 = vrot.slane %v20114_v39, %v20070_v6  ;;  %11204 = vrsqrt.f32 %v3038_v3  ;;  %v2928_v5 = vmul.f32 0.03125, %v2628_v7  ;;  %v2235_v54 = vmul.f32 0.03125, %v13804_v34  ;;  %v20119_v39 = vld [vmem:[#allocation98_spill] sm:$0xff] }
 0x41f   :  { %20116 = vst [vmem:[#allocation102_spill] sm:$0xff] %v14413_v17  ;;  %2810 = vadd.xlane.f32.xlu1 %v14261_v53  ;;  %20118 = vst [vmem:[#allocation105_spill] sm:$0xff] %v14417_v31  ;;  %v3055_v57 = vadd.f32 1e-05, %v2927_v38  ;;  %v2933_v3 = vmul.f32 0.03125, %v2643_v42  ;;  %2795 = vadd.xlane.f32.xlu0 %v14265_v4  ;;  %v14423_v40 = vrot.slane %v3635_v48, %v20082_v36  ;;  %v2931_v37 = vmul.f32 0.03125, %v2637_v47 }
 0x420   :  { %v3651_v46 = vcombine.low %v3626_v19, %v3634_v58  ;;  %v3652_v9 = vcombine.high %v3626_v19, %v3634_v58  ;;  %v11197_v51 = vpop.eup %11196  ;;  %v2601_v7 = vpop.xlane.xlu1 %2600  ;;  %v3056_v21 = vadd.f32 1e-05, %v2928_v5  ;;  %v14429_v34 = vrot.slane %v3636_v18, %v20082_v36  ;;  %v20122_v4 = vld [vmem:[#allocation17_spill] sm:$0xff]  ;;  %v20125_v48 = vld [vmem:[#allocation15_spill] sm:$0xff] }
 0x421   :  { %v3290_v16 = vmul.f32 %v11197_v51, %v20119_v39  ;;  %v2634_v59 = vpop.xlane.xlu0 %2633  ;;  %20120 = vst [vmem:[#allocation106_spill] sm:$0xff] %v14423_v40  ;;  %v11199_v19 = vpop.eup %11198  ;;  %v3288_v42 = vmul.f32 %v11195_v44, %v20122_v4  ;;  %11206 = vrsqrt.f32 %v3057_v13  ;;  %v3061_v47 = vadd.f32 1e-05, %v2933_v3  ;;  %v20123_v13 = vld [vmem:[#allocation16_spill] sm:$0xff]  ;;  %v20124_v3 = vld [vmem:[#allocation66_spill] sm:$0xff] }
 0x422   :  { %v14426_v53 = vrot.slane %v3651_v46, %v20082_v36  ;;  %v2930_v58 = vmul.f32 0.03125, %v2634_v59  ;;  %v14432_v38 = vrot.slane %v3652_v9, %v20082_v36  ;;  %11208 = vrsqrt.f32 %v3056_v21  ;;  %v20130_v9 = vld [vmem:[#allocation130_spill] sm:$0xff] }
 0x423   :  { %2864 = vadd.xlane.f32.xlu1 %v14272_v11  ;;  %v11201_v46 = vpop.eup %11200  ;;  %2801 = vadd.xlane.f32.xlu0 %v14276_v26  ;;  %v3293_v11 = vmul.f32 %v11199_v19, %v20123_v13  ;;  %v2489_v39 = vmul.f32 %v14413_v17, %v14413_v17  ;;  %v3543_v59 = vcombine.low %v3288_v42, %v3290_v16  ;;  %v3059_v5 = vadd.f32 1e-05, %v2931_v37  ;;  %v20126_v13 = vld [vmem:[#allocation129_spill] sm:$0xff] }
 0x424   :  { %20121 = vst [vmem:[#allocation136_spill] sm:$0xff] %v14426_v53  ;;  %v3058_v51 = vadd.f32 1e-05, %v2930_v58  ;;  %v2607_v18 = vpop.xlane.xlu1 %2606  ;;  %v2246_v58 = vmul.f32 0.03125, %v20124_v3  ;;  %v3291_v24 = vmul.f32 %v11201_v46, %v20125_v48  ;;  %v14452_v44 = vsel %vm1733_vm2, %v2487_v27, 0.0 }
 0x425   :  { %v2640_v60 = vpop.xlane.xlu0 %2639  ;;  %v11203_v4 = vpop.eup %11202  ;;  %v2500_v21 = vmul.f32 %v14417_v31, %v14417_v31  ;;  %v14457_v16 = vsub.f32 %v20126_v13, %v2235_v54  ;;  %v2872_v48 = vsel %vm1733_vm2, %v2498_v20, 0.0 }
 0x426   :  { %11210 = vrsqrt.f32 %v3058_v51  ;;  %v2932_v26 = vmul.f32 0.03125, %v2640_v60  ;;  %v3550_v60 = vrot.slane %v3543_v59, %v20070_v6  ;;  %v3551_v3 = vcombine.low %v3291_v24, %v3293_v11  ;;  %v20133_v11 = vld [vmem:[#allocation69_spill] sm:$0xff] }
 0x427   :  { %11212 = vrsqrt.f32 %v3055_v57  ;;  %2870 = vadd.xlane.f32.xlu1 %v14363_v50  ;;  %20127 = vst [vmem:[#allocation138_spill] sm:$0xff] %v14457_v16  ;;  %2807 = vadd.xlane.f32.xlu0 %v14373_v32  ;;  %v20128_v57 = vld [vmem:[#allocation20_spill] sm:$0xff]  ;;  %v20129_v50 = vld [vmem:[#allocation22_spill] sm:$0xff]  ;;  %v14465_v17 = vsub.f32 %v20130_v9, %v2246_v58  ;;  %v2921_v32 = vmul.f32 0.03125, %v2607_v18  ;;  %v14472_v20 = vsel %vm1733_vm2, %v2500_v21, 0.0 }
 0x428   :  { %v11205_v19 = vpop.eup %11204  ;;  %11214 = vrsqrt.f32 %v3061_v47  ;;  %v3060_v42 = vadd.f32 1e-05, %v2932_v26  ;;  %v2613_v37 = vpop.xlane.xlu1 %2612  ;;  %v3292_v46 = vmul.f32 %v11203_v4, %v20128_v57  ;;  %v14468_v47 = vsel %vm1733_vm2, %v2489_v39, 0.0 }
 0x429   :  { %v3294_v51 = vmul.f32 %v11205_v19, %v20129_v50  ;;  %v2646_v27 = vpop.xlane.xlu0 %2645  ;;  %20131 = vst [vmem:[#allocation108_spill] sm:$0xff] %v14465_v17  ;;  %11216 = vrsqrt.f32 %v3059_v5  ;;  %v20132_v4 = vcombine.low %v14333_v63, %v14341_v33  ;;  %v2237_v9 = vmul.f32 0.03125, %v20133_v11  ;;  %v20134_v19 = vld [vmem:[#allocation71_spill] sm:$0xff] }
 0x42a   :  { %v2934_v54 = vmul.f32 0.03125, %v2646_v27  ;;  %v2919_v58 = vmul.f32 0.03125, %v2601_v7  ;;  %11218 = vrsqrt.f32 %v3060_v42  ;;  %v3558_v21 = vrot.slane %v3551_v3, %v20070_v6  ;;  %v20135_v3 = vld [vmem:[#allocation74_spill] sm:$0xff] }
 0x42b   :  { %2876 = vadd.xlane.f32.xlu1 %v14376_v52  ;;  %v3542_v59 = vrot.slane %v20132_v4, %v20070_v6  ;;  %v3559_v24 = vcombine.low %v3292_v46, %v3294_v51  ;;  %2813 = vadd.xlane.f32.xlu0 %v14393_v61  ;;  %v11207_v18 = vpop.eup %11206  ;;  %v14482_v52 = vmul.f32 %v14457_v16, %v14457_v16  ;;  %v2232_v13 = vmul.f32 0.03125, %v20134_v19  ;;  %v20136_v4 = vld [vmem:[#allocation19_spill] sm:$0xff] }
 0x42c   :  { %v3062_v5 = vadd.f32 1e-05, %v2934_v54  ;;  %v2619_v39 = vpop.xlane.xlu1 %2618  ;;  %v11209_v57 = vpop.eup %11208  ;;  %v3049_v46 = vadd.f32 1e-05, %v2921_v32  ;;  %v14490_v61 = vmul.f32 %v14465_v17, %v14465_v17  ;;  %v2234_v54 = vmul.f32 0.03125, %v20135_v3 }
 0x42d   :  { %v2604_v26 = vpop.xlane.xlu0 %2603  ;;  %v3566_v63 = vrot.slane %v3559_v24, %v20070_v6  ;;  %v3567_v33 = vcombine.low %v3542_v59, %v3550_v60  ;;  %v3568_v42 = vcombine.high %v3542_v59, %v3550_v60  ;;  %v14494_v24 = vmul.f32 %v11207_v18, %v20136_v4  ;;  %v20137_v59 = vld [vmem:[#allocation26_spill] sm:$0xff] }
 0x42e   :  { %11220 = vrsqrt.f32 %v3062_v5  ;;  %v2920_v7 = vmul.f32 0.03125, %v2604_v26  ;;  %v3047_v11 = vadd.f32 1e-05, %v2919_v58  ;;  %v2925_v5 = vmul.f32 0.03125, %v2619_v39  ;;  %v20138_v39 = vld [vmem:[#allocation24_spill] sm:$0xff] }
 0x42f   :  { %2882 = vadd.xlane.f32.xlu1 %v14398_v62  ;;  %v3583_v50 = vcombine.low %v3558_v21, %v3566_v63  ;;  %v3584_v51 = vcombine.high %v3558_v21, %v3566_v63  ;;  %2867 = vadd.xlane.f32.xlu0 %v14401_v15  ;;  %v14499_v16 = vrot.slane %v3567_v33, %v20082_v36  ;;  %v2923_v3 = vmul.f32 0.03125, %v2613_v37 }
 0x430   :  { %v11211_v27 = vpop.eup %11210  ;;  %v2673_v60 = vpop.xlane.xlu1 %2672  ;;  %v3048_v26 = vadd.f32 1e-05, %v2920_v7  ;;  %v14505_v58 = vrot.slane %v3568_v42, %v20082_v36  ;;  %v3312_v4 = vmul.f32 %v11209_v57, %v20138_v39  ;;  %11222 = vrsqrt.f32 %v3049_v46  ;;  %v20139_v46 = vld [vmem:[#allocation18_spill] sm:$0xff]  ;;  %v20141_v7 = vld [vmem:[#allocation132_spill] sm:$0xff] }
 0x431   :  { %v11213_v32 = vpop.eup %11212  ;;  %v3314_v62 = vmul.f32 %v11211_v27, %v20137_v59  ;;  %v2610_v19 = vpop.xlane.xlu0 %2609  ;;  %v14502_v21 = vrot.slane %v3583_v50, %v20082_v36  ;;  %v14508_v15 = vrot.slane %v3584_v51, %v20082_v36  ;;  %v3053_v37 = vadd.f32 1e-05, %v2925_v5  ;;  %v20145_v51 = vld [vmem:[#allocation103_spill] sm:$0xff] }
 0x432   :  { %v11215_v63 = vpop.eup %11214  ;;  %v2922_v18 = vmul.f32 0.03125, %v2610_v19  ;;  %v3311_v59 = vmul.f32 %v11213_v32, %v20139_v46  ;;  %11224 = vrsqrt.f32 %v3048_v26  ;;  %v14523_v31 = vsub.f32 %v20141_v7, %v2237_v9 }
 0x433   :  { %2840 = vadd.xlane.f32.xlu1 %v14452_v44  ;;  %v11217_v50 = vpop.eup %11216  ;;  %2873 = vadd.xlane.f32.xlu0 %v2872_v48  ;;  %v20140_v44 = vld [vmem:[#allocation107_spill] sm:$0xff]  ;;  %v3747_v33 = vcombine.low %v3312_v4, %v3314_v62  ;;  %v3051_v5 = vadd.f32 1e-05, %v2923_v3  ;;  %v20148_v4 = vld [vmem:[#allocation28_spill] sm:$0xff]  ;;  %v2943_v46 = vmul.f32 0.03125, %v2673_v60  ;;  %v20150_v60 = vld [vmem:[#allocation137_spill] sm:$0xff] }
 0x434   :  { %v3050_v27 = vadd.f32 1e-05, %v2922_v18  ;;  %v2679_v42 = vpop.xlane.xlu1 %2678  ;;  %v3317_v19 = vmul.f32 %v11215_v63, %v20140_v44  ;;  %v11219_v17 = vpop.eup %11218  ;;  %20142 = vst [vmem:[#allocation109_spill] sm:$0xff] %v14523_v31  ;;  %v20143_v18 = vld [vmem:[#allocation133_spill] sm:$0xff]  ;;  %v3315_v45 = vmul.f32 %v11217_v50, %v20145_v51  ;;  %v3739_v32 = vcombine.low %v3311_v59, %v14494_v24  ;;  %v20146_v63 = vld [vmem:[#allocation135_spill] sm:$0xff] }
 0x435   :  { %v2616_v39 = vpop.xlane.xlu0 %2615  ;;  %v14526_v41 = vsub.f32 %v20143_v18, %v2232_v13  ;;  %v14532_v62 = vsub.f32 %v20146_v63, %v2234_v54  ;;  %v2851_v13 = vsel %vm1733_vm2, %v14482_v52, 0.0  ;;  %v3316_v7 = vmul.f32 %v11219_v17, %v20148_v4  ;;  %v20149_v50 = vld [vmem:[#allocation115_spill] sm:$0xff] }
 0x436   :  { %11226 = vrsqrt.f32 %v3050_v27  ;;  %v2924_v48 = vmul.f32 0.03125, %v2616_v39  ;;  %v3755_v24 = vcombine.low %v3315_v45, %v3317_v19  ;;  %v2236_v54 = vmul.f32 0.03125, %v13921_v25 }
 0x437   :  { %20144 = vst [vmem:[#allocation139_spill] sm:$0xff] %v14526_v41  ;;  %11228 = vrsqrt.f32 %v3047_v11  ;;  %2846 = vadd.xlane.f32.xlu1 %v14468_v47  ;;  %20147 = vst [vmem:[#allocation142_spill] sm:$0xff] %v14532_v62  ;;  %2879 = vadd.xlane.f32.xlu0 %v14472_v20  ;;  %v14540_v47 = vrot.slane %v3747_v33, %v20070_v6  ;;  %v2493_v20 = vmul.f32 %v14523_v31, %v14523_v31 }
 0x438   :  { %v11221_v26 = vpop.eup %11220  ;;  %11230 = vrsqrt.f32 %v3053_v37  ;;  %v3052_v9 = vadd.f32 1e-05, %v2924_v48  ;;  %v2685_v3 = vpop.xlane.xlu1 %2684  ;;  %v2884_v52 = vsel %vm1733_vm2, %v14490_v61, 0.0  ;;  %v2488_v17 = vmul.f32 %v14526_v41, %v14526_v41 }
 0x439   :  { %v3318_v11 = vmul.f32 %v11221_v26, %v20149_v50  ;;  %v2622_v27 = vpop.xlane.xlu0 %2621  ;;  %11232 = vrsqrt.f32 %v3051_v5  ;;  %v14550_v51 = vrot.slane %v3739_v32, %v20070_v6  ;;  %v2490_v59 = vmul.f32 %v14532_v62, %v14532_v62 }
 0x43a   :  { %v2926_v37 = vmul.f32 0.03125, %v2622_v27  ;;  %11234 = vrsqrt.f32 %v3052_v9  ;;  %v11223_v44 = vpop.eup %11222  ;;  %v2945_v19 = vmul.f32 0.03125, %v2679_v42  ;;  %v14555_v61 = vrot.slane %v3755_v24, %v20070_v6 }
 0x43b   :  { %2852 = vadd.xlane.f32.xlu1 %v2851_v13  ;;  %v3763_v33 = vcombine.low %v3316_v7, %v3318_v11  ;;  %2885 = vadd.xlane.f32.xlu0 %v2884_v52  ;;  %v3771_v48 = vcombine.low %v14550_v51, %v14540_v47  ;;  %v14563_v18 = vsub.f32 %v20150_v60, %v2236_v54  ;;  %v2238_v32 = vmul.f32 0.03125, %v13951_v22  ;;  %v20152_v22 = vld [vmem:[#allocation119_spill] sm:$0xff] }
 0x43c   :  { %v3054_v45 = vadd.f32 1e-05, %v2926_v37  ;;  %v2691_v25 = vpop.xlane.xlu1 %2690  ;;  %v2857_v26 = vsel %vm1733_vm2, %v2493_v20, 0.0  ;;  %v11225_v63 = vpop.eup %11224  ;;  %v2842_v9 = vsel %vm1733_vm2, %v2488_v17, 0.0  ;;  %v3071_v7 = vadd.f32 1e-05, %v2943_v46 }
 0x43d   :  { %v2676_v39 = vpop.xlane.xlu0 %2675  ;;  %v14558_v5 = vrot.slane %v3763_v33, %v20070_v6  ;;  %20151 = vst [vmem:[#allocation111_spill] sm:$0xff] %v14563_v18  ;;  %v2949_v50 = vmul.f32 0.03125, %v2691_v25  ;;  %v2848_v27 = vsel %vm1733_vm2, %v2490_v59, 0.0  ;;  %v3073_v37 = vadd.f32 1e-05, %v2945_v19  ;;  %v20155_v60 = vld [vmem:[#allocation27_spill] sm:$0xff] }
 0x43e   :  { %11236 = vrsqrt.f32 %v3054_v45  ;;  %v2944_v42 = vmul.f32 0.03125, %v2676_v39  ;;  %v14573_v52 = vrot.slane %v3771_v48, %v20082_v36  ;;  %v20153_v45 = vld [vmem:[#allocation140_spill] sm:$0xff]  ;;  %v2947_v46 = vmul.f32 0.03125, %v2685_v3 }
 0x43f   :  { %2858 = vadd.xlane.f32.xlu1 %v2857_v26  ;;  %v3787_v13 = vcombine.low %v14555_v61, %v14558_v5  ;;  %2843 = vadd.xlane.f32.xlu0 %v2842_v9  ;;  %v14579_v39 = vsub.f32 %v20153_v45, %v2238_v32  ;;  %v2492_v59 = vmul.f32 %v14563_v18, %v14563_v18  ;;  %v20156_v9 = vld [vmem:[#allocation116_spill] sm:$0xff]  ;;  %11238 = vrsqrt.f32 %v3071_v7  ;;  %v20157_v45 = vld [vmem:[#allocation25_spill] sm:$0xff] }
 0x440   :  { %v11227_v4 = vpop.eup %11226  ;;  %v2649_v11 = vpop.xlane.xlu1 %2648  ;;  %v3305_v26 = vmul.f32 %v11223_v44, %v20155_v60  ;;  %v3304_v19 = vmul.f32 %v11225_v63, %v20156_v9  ;;  %11240 = vrsqrt.f32 %v3073_v37  ;;  %v3075_v60 = vadd.f32 1e-05, %v2947_v46  ;;  %v20159_v9 = vld [vmem:[#allocation29_spill] sm:$0xff] }
 0x441   :  { %v11229_v24 = vpop.eup %11228  ;;  %v3306_v54 = vmul.f32 %v11227_v4, %v20152_v22  ;;  %v2682_v20 = vpop.xlane.xlu0 %2681  ;;  %v14576_v17 = vrot.slane %v3787_v13, %v20082_v36  ;;  %20154 = vst [vmem:[#allocation112_spill] sm:$0xff] %v14579_v39  ;;  %v3072_v4 = vadd.f32 1e-05, %v2944_v42  ;;  %v3077_v13 = vadd.f32 1e-05, %v2949_v50 }
 0x442   :  { %v11231_v33 = vpop.eup %11230  ;;  %v2946_v25 = vmul.f32 0.03125, %v2682_v20  ;;  %v3303_v3 = vmul.f32 %v11229_v24, %v20157_v45  ;;  %v20158_v20 = vld [vmem:[#allocation30_spill] sm:$0xff]  ;;  %v2854_v42 = vsel %vm1733_vm2, %v2492_v59, 0.0  ;;  %v2494_v7 = vmul.f32 %v14579_v39, %v14579_v39 }
 0x443   :  { %v11233_v22 = vpop.eup %11232  ;;  %2849 = vadd.xlane.f32.xlu0 %v2848_v27  ;;  %v3309_v31 = vmul.f32 %v11231_v33, %v20158_v20  ;;  %v3679_v41 = vcombine.low %v3304_v19, %v3306_v54  ;;  %v20160_v33 = vld [vmem:[#allocation33_spill] sm:$0xff] }
 0x444   :  { %v3074_v57 = vadd.f32 1e-05, %v2946_v25  ;;  %v2655_v32 = vpop.xlane.xlu1 %2654  ;;  %v11235_v44 = vpop.eup %11234  ;;  %v3307_v48 = vmul.f32 %v11233_v22, %v20159_v9  ;;  %v3671_v50 = vcombine.low %v3303_v3, %v3305_v26  ;;  %v20161_v25 = vld [vmem:[#allocation122_spill] sm:$0xff] }
 0x445   :  { %v2688_v18 = vpop.xlane.xlu0 %2687  ;;  %v3308_v54 = vmul.f32 %v11235_v44, %v20160_v33  ;;  %v2937_v20 = vmul.f32 0.03125, %v2655_v32 }
 0x446   :  { %11242 = vrsqrt.f32 %v3074_v57  ;;  %v2948_v63 = vmul.f32 0.03125, %v2688_v18  ;;  %v14596_v18 = vrot.slane %v3679_v41, %v20070_v6  ;;  %v3687_v59 = vcombine.low %v3307_v48, %v3309_v31 }
 0x447   :  { %11244 = vrsqrt.f32 %v3072_v4  ;;  %2855 = vadd.xlane.f32.xlu0 %v2854_v42  ;;  %v2860_v4 = vsel %vm1733_vm2, %v2494_v7, 0.0  ;;  %v14600_v26 = vrot.slane %v3671_v50, %v20070_v6  ;;  %v3065_v33 = vadd.f32 1e-05, %v2937_v20  ;;  %v20165_v20 = vld [vmem:[#allocation36_spill] sm:$0xff] }
 0x448   :  { %v11237_v27 = vpop.eup %11236  ;;  %11246 = vrsqrt.f32 %v3077_v13  ;;  %v3076_v24 = vadd.f32 1e-05, %v2948_v63  ;;  %v2661_v37 = vpop.xlane.xlu1 %2660  ;;  %v2935_v13 = vmul.f32 0.03125, %v2649_v11  ;;  %v14603_v63 = vrot.slane %v3687_v59, %v20070_v6  ;;  %v20163_v59 = vld [vmem:[#allocation38_spill] sm:$0xff] }
 0x449   :  { %v3310_v46 = vmul.f32 %v11237_v27, %v20161_v25  ;;  %v2694_v57 = vpop.xlane.xlu0 %2693  ;;  %11248 = vrsqrt.f32 %v3075_v60  ;;  %v3703_v31 = vcombine.low %v14600_v26, %v14596_v18  ;;  %v11239_v48 = vpop.eup %11238  ;;  %v20162_v27 = vcombine.high %v14207_v0, %v14214_v43 }
 0x44a   :  { %v2950_v19 = vmul.f32 0.03125, %v2694_v57  ;;  %11250 = vrsqrt.f32 %v3076_v24  ;;  %v11241_v60 = vpop.eup %11240  ;;  %v3063_v7 = vadd.f32 1e-05, %v2935_v13  ;;  %v20164_v13 = vld [vmem:[#allocation32_spill] sm:$0xff] }
 0x44b   :  { %v3695_v22 = vcombine.low %v3308_v54, %v3310_v46  ;;  %2861 = vadd.xlane.f32.xlu0 %v2860_v4  ;;  %v14617_v25 = vrot.slane %v3703_v31, %v20082_v36  ;;  %v2939_v4 = vmul.f32 0.03125, %v2661_v37  ;;  %v20167_v37 = vld [vmem:[#allocation31_spill] sm:$0xff] }
 0x44c   :  { %v3078_v45 = vadd.f32 1e-05, %v2950_v19  ;;  %v2667_v3 = vpop.xlane.xlu1 %2666 }
 0x44d   :  { %v2652_v44 = vpop.xlane.xlu0 %2651  ;;  %v14606_v41 = vrot.slane %v3695_v22, %v20070_v6  ;;  %v2941_v32 = vmul.f32 0.03125, %v2667_v3 }
 0x44e   :  { %11252 = vrsqrt.f32 %v3078_v45  ;;  %v2936_v42 = vmul.f32 0.03125, %v2652_v44  ;;  %v3329_v45 = vmul.f32 %v11241_v60, %v20164_v13  ;;  %v3067_v13 = vadd.f32 1e-05, %v2939_v4 }
 0x44f   :  { %v3719_v11 = vcombine.low %v14603_v63, %v14606_v41  ;;  %11254 = vrsqrt.f32 %v3063_v7  ;;  %v3069_v31 = vadd.f32 1e-05, %v2941_v32  ;;  %v20169_v7 = vld [vmem:[#allocation34_spill] sm:$0xff] }
 0x450   :  { %v11243_v9 = vpop.eup %11242  ;;  %v2721_v50 = vpop.xlane.xlu1 %2720  ;;  %4633 = vrot.lane.b32.xlu1 %v20162_v27, %s11746_s23  ;;  %v3064_v3 = vadd.f32 1e-05, %v2936_v42  ;;  %11256 = vrsqrt.f32 %v3065_v33  ;;  %v20171_v33 = vld [vmem:[#allocation40_spill] sm:$0xff] }
 0x451   :  { %v11245_v24 = vpop.eup %11244  ;;  %v2658_v54 = vpop.xlane.xlu0 %2657  ;;  %v14620_v46 = vrot.slane %v3719_v11, %v20082_v36  ;;  %v3330_v19 = vmul.f32 %v11243_v9, %v20163_v59  ;;  %v20166_v11 = vcombine.high %v14319_v56, %v14324_v12  ;;  %v3327_v9 = vmul.f32 %v11239_v48, %v20167_v37  ;;  %v20172_v37 = vld [vmem:[#allocation42_spill] sm:$0xff] }
 0x452   :  { %v11247_v57 = vpop.eup %11246  ;;  %v2938_v22 = vmul.f32 0.03125, %v2658_v54  ;;  %v3328_v39 = vmul.f32 %v11245_v24, %v20165_v20  ;;  %v20168_v54 = vld [vmem:[#allocation35_spill] sm:$0xff]  ;;  %v20170_v48 = vcombine.low %v14327_v35, %v14330_v28 }
 0x453   :  { %v11249_v27 = vpop.eup %11248  ;;  %v3333_v60 = vmul.f32 %v11247_v57, %v20168_v54  ;;  %v3875_v57 = vcombine.low %v3327_v9, %v3329_v45  ;;  %v20173_v45 = vcombine.high %v14423_v40, %v14426_v53 }
 0x454   :  { %v3066_v62 = vadd.f32 1e-05, %v2938_v22  ;;  %v2727_v1 = vpop.xlane.xlu1 %2726  ;;  %4503 = vrot.lane.b32.xlu1 %v20166_v11, %s11747_s5  ;;  %v11251_v59 = vpop.eup %11250  ;;  %v3883_v24 = vcombine.low %v3328_v39, %v3330_v19  ;;  %v3331_v32 = vmul.f32 %v11249_v27, %v20169_v7 }
 0x455   :  { %v2664_v42 = vpop.xlane.xlu0 %2663  ;;  %v3332_v11 = vmul.f32 %v11251_v59, %v20171_v33  ;;  %v14648_v9 = vrot.slane %v3875_v57, %v20070_v6 }
 0x456   :  { %11258 = vrsqrt.f32 %v3066_v62  ;;  %v2940_v44 = vmul.f32 0.03125, %v2664_v42  ;;  %v3891_v54 = vcombine.low %v3331_v32, %v3333_v60  ;;  %v14641_v19 = vrot.slane %v3883_v24, %v20070_v6 }
 0x457   :  { %11260 = vrsqrt.f32 %v3064_v3  ;;  %v2961_v3 = vmul.f32 0.03125, %v2727_v1  ;;  %v2959_v32 = vmul.f32 0.03125, %v2721_v50  ;;  %v3772_v50 = vcombine.high %v14550_v51, %v14540_v47 }
 0x458   :  { %v11253_v22 = vpop.eup %11252  ;;  %11262 = vrsqrt.f32 %v3069_v31  ;;  %v3068_v20 = vadd.f32 1e-05, %v2940_v44  ;;  %v2733_v8 = vpop.xlane.xlu1 %2732  ;;  %4567 = vrot.lane.b32.xlu1 %v20170_v48, %s11745_s4  ;;  %v14651_v60 = vrot.slane %v3891_v54, %v20070_v6  ;;  %v3907_v24 = vcombine.low %v14648_v9, %v14641_v19 }
 0x459   :  { %v3334_v4 = vmul.f32 %v11253_v22, %v20172_v37  ;;  %v2670_v62 = vpop.xlane.xlu0 %2669  ;;  %11264 = vrsqrt.f32 %v3067_v13  ;;  %v11255_v1 = vpop.eup %11254  ;;  %v3089_v22 = vadd.f32 1e-05, %v2961_v3  ;;  %v20175_v3 = vld [vmem:[#allocation47_spill] sm:$0xff]  ;;  %v3788_v47 = vcombine.high %v14555_v61, %v14558_v5 }
 0x45a   :  { %v2942_v39 = vmul.f32 0.03125, %v2670_v62  ;;  %11266 = vrsqrt.f32 %v3068_v20  ;;  %v11257_v7 = vpop.eup %11256 }
 0x45b   :  { %v3899_v44 = vcombine.low %v3332_v11, %v3334_v4  ;;  %v20174_v11 = vcombine.high %v14429_v34, %v14432_v38  ;;  %v2963_v4 = vmul.f32 0.03125, %v2733_v8  ;;  %v20177_v8 = vld [vmem:[#allocation39_spill] sm:$0xff] }
 0x45c   :  { %v3070_v27 = vadd.f32 1e-05, %v2942_v39  ;;  %v2739_v31 = vpop.xlane.xlu1 %2738  ;;  %4509 = vrot.lane.b32.xlu1 %v20173_v45, %s11747_s5  ;;  %v14674_v45 = vrot.slane %v3907_v24, %v20082_v36  ;;  %v20179_v24 = vcombine.high %v14499_v16, %v14502_v21 }
 0x45d   :  { %v2724_v42 = vpop.xlane.xlu0 %2723  ;;  %v14654_v59 = vrot.slane %v3899_v44, %v20070_v6  ;;  %v2965_v57 = vmul.f32 0.03125, %v2739_v31  ;;  %v20176_v31 = vcombine.high %v14210_v10, %v14220_v55 }
 0x45e   :  { %11268 = vrsqrt.f32 %v3070_v27  ;;  %v2960_v13 = vmul.f32 0.03125, %v2724_v42 }
 0x45f   :  { %v3923_v20 = vcombine.low %v14651_v60, %v14654_v59  ;;  %11270 = vrsqrt.f32 %v3089_v22  ;;  %v20181_v22 = vld [vmem:[#allocation44_spill] sm:$0xff] }
 0x460   :  { %v11259_v48 = vpop.eup %11258  ;;  %v14660_v33 = vpop.xlane.xlu1 %2696  ;;  %4637 = vrot.lane.b32.xlu1 %v20174_v11, %s11746_s23  ;;  %v3088_v62 = vadd.f32 1e-05, %v2960_v13  ;;  %v3321_v13 = vmul.f32 %v11257_v7, %v20177_v8  ;;  %v3087_v11 = vadd.f32 1e-05, %v2959_v32  ;;  %v20180_v7 = vld [vmem:[#allocation37_spill] sm:$0xff] }
 0x461   :  { %v11261_v37 = vpop.eup %11260  ;;  %v2730_v54 = vpop.xlane.xlu0 %2729  ;;  %v3322_v44 = vmul.f32 %v11259_v48, %v20175_v3  ;;  %4505 = vrot.lane.b32.xlu0 %v20176_v31, %s11747_s5  ;;  %v14677_v42 = vrot.slane %v3923_v20, %v20082_v36  ;;  %v20178_v48 = vld [vmem:[#allocation45_spill] sm:$0xff]  ;;  %v3093_v3 = vadd.f32 1e-05, %v2965_v57  ;;  %v3319_v32 = vmul.f32 %v11255_v1, %v20180_v7 }
 0x462   :  { %v11263_v39 = vpop.eup %11262  ;;  %v2962_v27 = vmul.f32 0.03125, %v2730_v54  ;;  %v3320_v54 = vmul.f32 %v11261_v37, %v20178_v48  ;;  %11272 = vrsqrt.f32 %v3088_v62  ;;  %v3091_v8 = vadd.f32 1e-05, %v2963_v4  ;;  %v20183_v48 = vld [vmem:[#allocation41_spill] sm:$0xff] }
 0x463   :  { %v11265_v51 = vpop.eup %11264  ;;  %v3325_v31 = vmul.f32 %v11263_v39, %v20181_v22  ;;  %v20182_v37 = vcombine.low %v14207_v0, %v14214_v43  ;;  %v14697_v20 = vrot.slane %v3772_v50, %v20082_v36  ;;  %v14700_v1 = vrot.slane %v3788_v47, %v20082_v36  ;;  %v20186_v50 = vld [vmem:[#allocation51_spill] sm:$0xff] }
 0x464   :  { %v3090_v53 = vadd.f32 1e-05, %v2962_v27  ;;  %v2703_v40 = vpop.xlane.xlu1 %2702  ;;  %4507 = vrot.lane.b32.xlu1 %v20179_v24, %s11747_s5  ;;  %v11267_v5 = vpop.eup %11266  ;;  %v3815_v27 = vcombine.low %v3320_v54, %v3322_v44  ;;  %v3323_v24 = vmul.f32 %v11265_v51, %v20183_v48  ;;  %v20184_v39 = vcombine.low %v14505_v58, %v14508_v15  ;;  %v20185_v44 = vld [vmem:[#allocation49_spill] sm:$0xff] }
 0x465   :  { %v2736_v61 = vpop.xlane.xlu0 %2735  ;;  %4569 = vrot.lane.b32.xlu0 %v20182_v37, %s11745_s4  ;;  %v3720_v0 = vcombine.high %v14603_v63, %v14606_v41  ;;  %v3807_v43 = vcombine.low %v3319_v32, %v3321_v13  ;;  %v3804_v47 = vcombine.high %v14573_v52, %v14576_v17  ;;  %v20187_v22 = vcombine.high %v14327_v35, %v14330_v28 }
 0x466   :  { %11274 = vrsqrt.f32 %v3090_v53  ;;  %v2964_v57 = vmul.f32 0.03125, %v2736_v61  ;;  %v3704_v63 = vcombine.high %v14600_v26, %v14596_v18  ;;  %v14719_v41 = vrot.slane %v3815_v27, %v20070_v6 }
 0x467   :  { %11276 = vrsqrt.f32 %v3087_v11  ;;  %v3324_v11 = vmul.f32 %v11267_v5, %v20185_v44  ;;  %v2953_v13 = vmul.f32 0.03125, %v2703_v40  ;;  %v3805_v32 = vcombine.low %v14697_v20, %v14700_v1 }
 0x468   :  { %v11269_v62 = vpop.eup %11268  ;;  %11278 = vrsqrt.f32 %v3093_v3  ;;  %v3092_v4 = vadd.f32 1e-05, %v2964_v57  ;;  %v2709_v53 = vpop.xlane.xlu1 %2708  ;;  %4571 = vrot.lane.b32.xlu1 %v20184_v39, %s11745_s4  ;;  %v3823_v3 = vcombine.low %v3323_v24, %v3325_v31  ;;  %v14728_v35 = vrot.slane %v3807_v43, %v20070_v6 }
 0x469   :  { %v3326_v51 = vmul.f32 %v11269_v62, %v20186_v50  ;;  %v2742_v54 = vpop.xlane.xlu0 %2741  ;;  %11280 = vrsqrt.f32 %v3091_v8  ;;  %4631 = vrot.lane.b32.xlu0 %v20187_v22, %s11746_s23  ;;  %v14725_v8 = vrot.slane %v3720_v0, %v20082_v36  ;;  %v11271_v28 = vpop.eup %11270  ;;  %v3908_v40 = vcombine.high %v14648_v9, %v14641_v19 }
 0x46a   :  { %v2966_v7 = vmul.f32 0.03125, %v2742_v54  ;;  %11282 = vrsqrt.f32 %v3092_v4  ;;  %v3924_v26 = vcombine.high %v14651_v60, %v14654_v59  ;;  %v3830_v57 = vrot.slane %v3823_v3, %v20070_v6 }
 0x46b   :  { %v3831_v61 = vcombine.low %v3324_v11, %v3326_v51  ;;  %v20188_v48 = vcombine.low %v14429_v34, %v14432_v38  ;;  %v14741_v24 = vrot.slane %v3704_v63, %v20082_v36  ;;  %v3839_v19 = vcombine.low %v14728_v35, %v14719_v41  ;;  %v20189_v11 = vld [vmem:[#allocation55_spill] sm:$0xff] }
 0x46c   :  { %v3094_v31 = vadd.f32 1e-05, %v2966_v7  ;;  %v2715_v5 = vpop.xlane.xlu1 %2714  ;;  %4513 = vrot.lane.b32.xlu1 %v3804_v47, %s11747_s5  ;;  %v11273_v9 = vpop.eup %11272  ;;  %v2951_v60 = vmul.f32 0.03125, %v14660_v33  ;;  %v3081_v59 = vadd.f32 1e-05, %v2953_v13  ;;  %v3806_v34 = vcombine.high %v14697_v20, %v14700_v1  ;;  %v20191_v13 = vld [vmem:[#allocation48_spill] sm:$0xff] }
 0x46d   :  { %v2700_v18 = vpop.xlane.xlu0 %2699  ;;  %v3838_v37 = vrot.slane %v3831_v61, %v20070_v6  ;;  %4573 = vrot.lane.b32.xlu0 %v20188_v48, %s11745_s4  ;;  %v2957_v39 = vmul.f32 0.03125, %v2715_v5  ;;  %v3736_v38 = vcombine.high %v14617_v25, %v14620_v46  ;;  %v3737_v43 = vcombine.low %v14741_v24, %v14725_v8  ;;  %v20192_v61 = vld [vmem:[#allocation53_spill] sm:$0xff] }
 0x46e   :  { %11284 = vrsqrt.f32 %v3094_v31  ;;  %v2952_v27 = vmul.f32 0.03125, %v2700_v18  ;;  %v14757_v54 = vrot.slane %v3908_v40, %v20082_v36  ;;  %v14760_v47 = vrot.slane %v3924_v26, %v20082_v36 }
 0x46f   :  { %v3855_v62 = vcombine.low %v3830_v57, %v3838_v37  ;;  %v2955_v7 = vmul.f32 0.03125, %v2709_v53  ;;  %v20190_v1 = vcombine.high %v14505_v58, %v14508_v15  ;;  %v14767_v22 = vrot.slane %v3839_v19, %v20082_v36  ;;  %v20194_v19 = vld [vmem:[#allocation52_spill] sm:$0xff] }
 0x470   :  { %v11275_v4 = vpop.eup %11274  ;;  %v14746_v0 = vpop.xlane.xlu1 %2768  ;;  %4577 = vrot.lane.b32.xlu1 %v3805_v32, %s11745_s4  ;;  %v3080_v50 = vadd.f32 1e-05, %v2952_v27  ;;  %v3345_v32 = vmul.f32 %v11271_v28, %v20191_v13  ;;  %v3344_v31 = vmul.f32 %v11273_v9, %v20192_v61  ;;  %v3079_v5 = vadd.f32 1e-05, %v2951_v60  ;;  %v20193_v27 = vld [vmem:[#allocation46_spill] sm:$0xff] }
 0x471   :  { %v11277_v44 = vpop.eup %11276  ;;  %v3346_v33 = vmul.f32 %v11275_v4, %v20189_v11  ;;  %v2706_v51 = vpop.xlane.xlu0 %2705  ;;  %4635 = vrot.lane.b32.xlu0 %v20190_v1, %s11746_s23  ;;  %v14770_v63 = vrot.slane %v3855_v62, %v20082_v36  ;;  %11286 = vrsqrt.f32 %v3081_v59  ;;  %v3085_v53 = vadd.f32 1e-05, %v2957_v39 }
 0x472   :  { %v11279_v3 = vpop.eup %11278  ;;  %v2954_v20 = vmul.f32 0.03125, %v2706_v51  ;;  %v3856_v58 = vcombine.high %v3830_v57, %v3838_v37  ;;  %v3343_v48 = vmul.f32 %v11277_v44, %v20193_v27  ;;  %11288 = vrsqrt.f32 %v3080_v50  ;;  %v20195_v57 = vld [vmem:[#allocation50_spill] sm:$0xff] }
 0x473   :  { %v11281_v18 = vpop.eup %11280  ;;  %v3349_v62 = vmul.f32 %v11279_v3, %v20194_v19  ;;  %v4019_v4 = vcombine.low %v3344_v31, %v3346_v33  ;;  %v3083_v60 = vadd.f32 1e-05, %v2955_v7  ;;  %v3840_v39 = vcombine.high %v14728_v35, %v14719_v41  ;;  %v20197_v7 = vld [vmem:[#allocation59_spill] sm:$0xff] }
 0x474   :  { %v3082_v40 = vadd.f32 1e-05, %v2954_v20  ;;  %v2775_v26 = vpop.xlane.xlu1 %2774  ;;  %4641 = vrot.lane.b32.xlu1 %v3806_v34, %s11746_s23  ;;  %v11283_v9 = vpop.eup %11282  ;;  %v3347_v37 = vmul.f32 %v11281_v18, %v20195_v57  ;;  %v4011_v34 = vcombine.low %v3343_v48, %v3345_v32  ;;  %v3941_v33 = vcombine.low %v14757_v54, %v14760_v47 }
 0x475   :  { %v2712_v28 = vpop.xlane.xlu0 %2711  ;;  %4511 = vrot.lane.b32.xlu0 %v3736_v38, %s11747_s5  ;;  %v14787_v50 = vrot.slane %v3856_v58, %v20082_v36  ;;  %v20196_v38 = vld [vmem:[#allocation57_spill] sm:$0xff]  ;;  %v4026_v20 = vrot.slane %v4019_v4, %v20070_v6  ;;  %v14796_v32 = vrot.slane %v3840_v39, %v20082_v36  ;;  %v2975_v19 = vmul.f32 0.03125, %v14746_v0 }
 0x476   :  { %11290 = vrsqrt.f32 %v3082_v40  ;;  %v2956_v59 = vmul.f32 0.03125, %v2712_v28  ;;  %v3348_v3 = vmul.f32 %v11283_v9, %v20196_v38  ;;  %v4027_v1 = vcombine.low %v3347_v37, %v3349_v62 }
 0x477   :  { %11292 = vrsqrt.f32 %v3079_v5  ;;  %v4018_v61 = vrot.slane %v4011_v34, %v20070_v6  ;;  %v2977_v5 = vmul.f32 0.03125, %v2775_v26  ;;  %v3874_v40 = vcombine.high %v14796_v32, %v14787_v50 }
 0x478   :  { %v11285_v11 = vpop.eup %11284  ;;  %11294 = vrsqrt.f32 %v3085_v53  ;;  %v3084_v44 = vadd.f32 1e-05, %v2956_v59  ;;  %v2781_v51 = vpop.xlane.xlu1 %2780  ;;  %4575 = vrot.lane.b32.xlu1 %v3737_v43, %s11745_s4  ;;  %v3738_v43 = vcombine.high %v14741_v24, %v14725_v8  ;;  %v4034_v48 = vrot.slane %v4027_v1, %v20070_v6 }
 0x479   :  { %v3350_v41 = vmul.f32 %v11285_v11, %v20197_v7  ;;  %v2718_v35 = vpop.xlane.xlu0 %2717  ;;  %11296 = vrsqrt.f32 %v3083_v60  ;;  %4581 = vrot.lane.b32.xlu0 %v3941_v33, %s11745_s4  ;;  %v4043_v24 = vcombine.low %v4018_v61, %v4026_v20  ;;  %v3940_v26 = vcombine.high %v14674_v45, %v14677_v42  ;;  %v20198_v11 = vld [vmem:[#allocation63_spill] sm:$0xff] }
 0x47a   :  { %v2958_v13 = vmul.f32 0.03125, %v2718_v35  ;;  %11298 = vrsqrt.f32 %v3084_v44  ;;  %v3105_v59 = vadd.f32 1e-05, %v2977_v5  ;;  %v3942_v37 = vcombine.high %v14757_v54, %v14760_v47  ;;  %v20199_v35 = vld [vmem:[#allocation56_spill] sm:$0xff]  ;;  %v20200_v5 = vld [vmem:[#allocation61_spill] sm:$0xff] }
 0x47b   :  { %v4035_v31 = vcombine.low %v3348_v3, %v3350_v41  ;;  %v11287_v58 = vpop.eup %11286  ;;  %v4044_v0 = vcombine.high %v4018_v61, %v4026_v20  ;;  %v14813_v3 = vrot.slane %v4043_v24, %v20082_v36  ;;  %v20247_v61 = vld [vmem:[#allocation112_spill] sm:$0xff] }
 0x47c   :  { %v3086_v18 = vadd.f32 1e-05, %v2958_v13  ;;  %v2787_v53 = vpop.xlane.xlu1 %2786  ;;  %4639 = vrot.lane.b32.xlu1 %v3738_v43, %s11746_s23  ;;  %v11289_v28 = vpop.eup %11288  ;;  %v3337_v1 = vmul.f32 %v11287_v58, %v20199_v35  ;;  %v3103_v13 = vadd.f32 1e-05, %v2975_v19  ;;  %v2979_v43 = vmul.f32 0.03125, %v2781_v51  ;;  %v20202_v51 = vld [vmem:[#allocation60_spill] sm:$0xff] }
 0x47d   :  { %v2772_v27 = vpop.xlane.xlu0 %2771  ;;  %v4042_v8 = vrot.slane %v4035_v31, %v20070_v6  ;;  %4643 = vrot.lane.b32.xlu0 %v3874_v40, %s11746_s23  ;;  %v2981_v39 = vmul.f32 0.03125, %v2787_v53  ;;  %v3336_v54 = vmul.f32 %v11289_v28, %v20200_v5  ;;  %v20201_v53 = vld [vmem:[#allocation54_spill] sm:$0xff]  ;;  %v4058_v19 = vrot.slane %v4044_v0, %v20082_v36  ;;  %v20204_v0 = vld [vmem:[#allocation65_spill] sm:$0xff] }
 0x47e   :  { %11300 = vrsqrt.f32 %v3086_v18  ;;  %v2976_v62 = vmul.f32 0.03125, %v2772_v27  ;;  %v3107_v28 = vadd.f32 1e-05, %v2979_v43 }
 0x47f   :  { %v4059_v4 = vcombine.low %v4034_v48, %v4042_v8  ;;  %v4060_v9 = vcombine.high %v4034_v48, %v4042_v8  ;;  %11302 = vrsqrt.f32 %v3105_v59  ;;  %v3109_v27 = vadd.f32 1e-05, %v2981_v39 }
 0x480   :  { %v11291_v60 = vpop.eup %11290  ;;  %v2745_v57 = vpop.xlane.xlu1 %2744  ;;  %4517 = vrot.lane.b32.xlu1 %v3940_v26, %s11747_s5  ;;  %v3104_v33 = vadd.f32 1e-05, %v2976_v62 }
 0x481   :  { %v11293_v34 = vpop.eup %11292  ;;  %v3338_v44 = vmul.f32 %v11291_v60, %v20198_v11  ;;  %v2778_v38 = vpop.xlane.xlu0 %2777  ;;  %v14816_v7 = vrot.slane %v4059_v4, %v20082_v36  ;;  %v14823_v20 = vrot.slane %v4060_v9, %v20082_v36  ;;  %v3872_v9 = vcombine.high %v14767_v22, %v14770_v63  ;;  %v20203_v60 = vld [vmem:[#allocation58_spill] sm:$0xff] }
 0x482   :  { %v11295_v41 = vpop.eup %11294  ;;  %v2978_v31 = vmul.f32 0.03125, %v2778_v38  ;;  %v3335_v40 = vmul.f32 %v11293_v34, %v20201_v53  ;;  %11304 = vrsqrt.f32 %v3104_v33  ;;  %v20205_v38 = vld [vmem:[#allocation68_spill] sm:$0xff] }
 0x483   :  { %v4076_v47 = vcombine.high %v14813_v3, %v14816_v7  ;;  %v11297_v18 = vpop.eup %11296  ;;  %v3341_v8 = vmul.f32 %v11295_v41, %v20202_v51  ;;  %v3951_v62 = vcombine.low %v3336_v54, %v3338_v44  ;;  %v4078_v39 = vcombine.high %v4058_v19, %v14823_v20 }
 0x484   :  { %v3106_v58 = vadd.f32 1e-05, %v2978_v31  ;;  %v2751_v48 = vpop.xlane.xlu1 %2750  ;;  %4645 = vrot.lane.b32.xlu1 %v3942_v37, %s11746_s23  ;;  %v11299_v26 = vpop.eup %11298  ;;  %v3339_v59 = vmul.f32 %v11297_v18, %v20203_v60  ;;  %v3943_v37 = vcombine.low %v3335_v40, %v3337_v1  ;;  %v3873_v1 = vcombine.low %v14796_v32, %v14787_v50 }
 0x485   :  { %4521 = vrot.lane.b32.xlu0 %v4076_v47, %s11747_s5  ;;  %v2784_v24 = vpop.xlane.xlu0 %2783  ;;  %v3340_v44 = vmul.f32 %v11299_v26, %v20204_v0  ;;  %v3958_v43 = vrot.slane %v3951_v62, %v20070_v6  ;;  %v2969_v5 = vmul.f32 0.03125, %v2751_v48  ;;  %v2967_v18 = vmul.f32 0.03125, %v2745_v57 }
 0x486   :  { %11306 = vrsqrt.f32 %v3106_v58  ;;  %v2980_v4 = vmul.f32 0.03125, %v2784_v24  ;;  %v3959_v31 = vcombine.low %v3339_v59, %v3341_v8  ;;  %v3950_v54 = vrot.slane %v3943_v37, %v20070_v6 }
 0x487   :  { %11308 = vrsqrt.f32 %v3103_v13  ;;  %v4077_v50 = vcombine.low %v4058_v19, %v14823_v20  ;;  %v3097_v26 = vadd.f32 1e-05, %v2969_v5 }
 0x488   :  { %v11301_v34 = vpop.eup %11300  ;;  %11310 = vrsqrt.f32 %v3109_v27  ;;  %v3108_v11 = vadd.f32 1e-05, %v2980_v4  ;;  %v2757_v33 = vpop.xlane.xlu1 %2756  ;;  %4515 = vrot.lane.b32.xlu1 %v3872_v9, %s11747_s5  ;;  %v3966_v58 = vrot.slane %v3959_v31, %v20070_v6  ;;  %v3976_v8 = vcombine.high %v3950_v54, %v3958_v43 }
 0x489   :  { %v3342_v41 = vmul.f32 %v11301_v34, %v20205_v38  ;;  %4649 = vrot.lane.b32.xlu0 %v4078_v39, %s11746_s23  ;;  %v2790_v35 = vpop.xlane.xlu0 %2789  ;;  %11312 = vrsqrt.f32 %v3107_v28  ;;  %v11303_v24 = vpop.eup %11302  ;;  %v3975_v32 = vcombine.low %v3950_v54, %v3958_v43  ;;  %v3095_v9 = vadd.f32 1e-05, %v2967_v18  ;;  %v20206_v43 = vld [vmem:[#allocation64_spill] sm:$0xff] }
 0x48a   :  { %v2982_v13 = vmul.f32 0.03125, %v2790_v35  ;;  %11314 = vrsqrt.f32 %v3108_v11  ;;  %v3990_v0 = vrot.slane %v3976_v8, %v20082_v36  ;;  %v3361_v31 = vmul.f32 %v11303_v24, %v20206_v43 }
 0x48b   :  { %v3967_v47 = vcombine.low %v3340_v44, %v3342_v41  ;;  %v2971_v44 = vmul.f32 0.03125, %v2757_v33  ;;  %v14853_v41 = vrot.slane %v3975_v32, %v20082_v36 }
 0x48c   :  { %v3110_v53 = vadd.f32 1e-05, %v2982_v13  ;;  %v2763_v40 = vpop.xlane.xlu1 %2762  ;;  %4579 = vrot.lane.b32.xlu1 %v3873_v1, %s11745_s4  ;;  %v11305_v48 = vpop.eup %11304  ;;  %v20207_v13 = vld [vmem:[#allocation72_spill] sm:$0xff] }
 0x48d   :  { %v2748_v27 = vpop.xlane.xlu0 %2747  ;;  %v3974_v51 = vrot.slane %v3967_v47, %v20070_v6  ;;  %v2973_v60 = vmul.f32 0.03125, %v2763_v40  ;;  %v3360_v1 = vmul.f32 %v11305_v48, %v20207_v13  ;;  %v20208_v40 = vld [vmem:[#allocation62_spill] sm:$0xff]  ;;  %v20210_v48 = vld [vmem:[#allocation67_spill] sm:$0xff] }
 0x48e   :  { %11316 = vrsqrt.f32 %v3110_v53  ;;  %v2968_v62 = vmul.f32 0.03125, %v2748_v27 }
 0x48f   :  { %v3992_v57 = vcombine.high %v3966_v58, %v3974_v51  ;;  %v3991_v28 = vcombine.low %v3966_v58, %v3974_v51  ;;  %11318 = vrsqrt.f32 %v3097_v26  ;;  %v3101_v54 = vadd.f32 1e-05, %v2973_v60  ;;  %v20209_v58 = vld [vmem:[#allocation70_spill] sm:$0xff] }
 0x490   :  { %v11307_v4 = vpop.eup %11306  ;;  %v2817_v59 = vpop.xlane.xlu1 %2816  ;;  %4585 = vrot.lane.b32.xlu1 %v4077_v50, %s11745_s4  ;;  %v3096_v34 = vadd.f32 1e-05, %v2968_v62  ;;  %v3099_v50 = vadd.f32 1e-05, %v2971_v44 }
 0x491   :  { %v11309_v39 = vpop.eup %11308  ;;  %v3362_v37 = vmul.f32 %v11307_v4, %v13891_v14  ;;  %v2754_v11 = vpop.xlane.xlu0 %2753  ;;  %v4006_v20 = vrot.slane %v3992_v57, %v20082_v36  ;;  %v14856_v35 = vrot.slane %v3991_v28, %v20082_v36 }
 0x492   :  { %v11311_v19 = vpop.eup %11310  ;;  %v2970_v38 = vmul.f32 0.03125, %v2754_v11  ;;  %v3359_v27 = vmul.f32 %v11309_v39, %v20208_v40  ;;  %11320 = vrsqrt.f32 %v3096_v34  ;;  %v20211_v11 = vld [vmem:[#allocation77_spill] sm:$0xff] }
 0x493   :  { %v4009_v14 = vcombine.low %v3990_v0, %v4006_v20  ;;  %v11313_v5 = vpop.eup %11312  ;;  %v4008_v33 = vcombine.high %v14853_v41, %v14856_v35  ;;  %v3365_v51 = vmul.f32 %v11311_v19, %v20209_v58  ;;  %v4155_v24 = vcombine.low %v3360_v1, %v3362_v37 }
 0x494   :  { %v3098_v47 = vadd.f32 1e-05, %v2970_v38  ;;  %v2823_v18 = vpop.xlane.xlu1 %2822  ;;  %v11315_v62 = vpop.eup %11314  ;;  %v3363_v26 = vmul.f32 %v11313_v5, %v20210_v48  ;;  %v4147_v57 = vcombine.low %v3359_v27, %v3361_v31  ;;  %v4010_v39 = vcombine.high %v3990_v0, %v4006_v20 }
 0x495   :  { %4583 = vrot.lane.b32.xlu0 %v4009_v14, %s11745_s4  ;;  %v2760_v8 = vpop.xlane.xlu0 %2759  ;;  %4519 = vrot.lane.b32.xlu1 %v4008_v33, %s11747_s5  ;;  %v3364_v34 = vmul.f32 %v11315_v62, %v13903_v49  ;;  %v4162_v44 = vrot.slane %v4155_v24, %v20070_v6  ;;  %v2993_v13 = vmul.f32 0.03125, %v2823_v18  ;;  %v2991_v1 = vmul.f32 0.03125, %v2817_v59 }
 0x496   :  { %11322 = vrsqrt.f32 %v3098_v47  ;;  %v2972_v32 = vmul.f32 0.03125, %v2760_v8  ;;  %v4163_v38 = vcombine.low %v3363_v26, %v3365_v51 }
 0x497   :  { %11324 = vrsqrt.f32 %v3095_v9  ;;  %v4154_v9 = vrot.slane %v4147_v57, %v20070_v6  ;;  %v3121_v58 = vadd.f32 1e-05, %v2993_v13  ;;  %v3119_v24 = vadd.f32 1e-05, %v2991_v1 }
 0x498   :  { %v11317_v28 = vpop.eup %11316  ;;  %11326 = vrsqrt.f32 %v3101_v54  ;;  %v3100_v4 = vadd.f32 1e-05, %v2972_v32  ;;  %v2829_v60 = vpop.xlane.xlu1 %2828  ;;  %v4170_v5 = vrot.slane %v4163_v38, %v20070_v6  ;;  %v20212_v32 = vld [vmem:[#allocation23_spill] sm:$0xff] }
 0x499   :  { %v3366_v19 = vmul.f32 %v11317_v28, %v20211_v11  ;;  %v2766_v37 = vpop.xlane.xlu0 %2765  ;;  %11328 = vrsqrt.f32 %v3099_v50  ;;  %4647 = vrot.lane.b32.xlu1 %v4010_v39, %s11746_s23  ;;  %v11319_v20 = vpop.eup %11318  ;;  %v4180_v47 = vcombine.high %v4154_v9, %v4162_v44  ;;  %v4179_v40 = vcombine.low %v4154_v9, %v4162_v44  ;;  %v20213_v44 = vld [vmem:[#allocation75_spill] sm:$0xff] }
 0x49a   :  { %v2974_v43 = vmul.f32 0.03125, %v2766_v37  ;;  %11330 = vrsqrt.f32 %v3100_v4  ;;  %v3353_v38 = vmul.f32 %v11319_v20, %v20213_v44 }
 0x49b   :  { %v4171_v31 = vcombine.low %v3364_v34, %v3366_v19  ;;  %v4194_v28 = vrot.slane %v4180_v47, %v20082_v36  ;;  %v2995_v34 = vmul.f32 0.03125, %v2829_v60  ;;  %v14880_v19 = vrot.slane %v4179_v40, %v20082_v36  ;;  %v20216_v47 = vld [vmem:[#allocation78_spill] sm:$0xff] }
 0x49c   :  { %v3102_v14 = vadd.f32 1e-05, %v2974_v43  ;;  %v2835_v0 = vpop.xlane.xlu1 %2834  ;;  %v11321_v27 = vpop.eup %11320  ;;  %v20214_v43 = vld [vmem:[#allocation21_spill] sm:$0xff] }
 0x49d   :  { %v2820_v49 = vpop.xlane.xlu0 %2819  ;;  %v4178_v54 = vrot.slane %v4171_v31, %v20070_v6  ;;  %v2997_v59 = vmul.f32 0.03125, %v2835_v0  ;;  %v3352_v13 = vmul.f32 %v11321_v27, %v20214_v43 }
 0x49e   :  { %11332 = vrsqrt.f32 %v3102_v14  ;;  %v2992_v33 = vmul.f32 0.03125, %v2820_v49  ;;  %v20246_v49 = vld [vmem:[#allocation111_spill] sm:$0xff] }
 0x49f   :  { %v4196_v18 = vcombine.high %v4170_v5, %v4178_v54  ;;  %v4195_v51 = vcombine.low %v4170_v5, %v4178_v54  ;;  %11334 = vrsqrt.f32 %v3121_v58  ;;  %v3125_v1 = vadd.f32 1e-05, %v2997_v59  ;;  %v20215_v5 = vld [vmem:[#allocation73_spill] sm:$0xff] }
 0x4a0   :  { %v11323_v8 = vpop.eup %11322  ;;  %v2793_v62 = vpop.xlane.xlu1 %2792  ;;  %v3120_v26 = vadd.f32 1e-05, %v2992_v33  ;;  %v3123_v58 = vadd.f32 1e-05, %v2995_v34 }
 0x4a1   :  { %v11325_v50 = vpop.eup %11324  ;;  %v3354_v48 = vmul.f32 %v11323_v8, %v20212_v32  ;;  %v2826_v57 = vpop.xlane.xlu0 %2825  ;;  %v4210_v4 = vrot.slane %v4196_v18, %v20082_v36  ;;  %v14883_v37 = vrot.slane %v4195_v51, %v20082_v36  ;;  %v20217_v51 = vld [vmem:[#allocation76_spill] sm:$0xff] }
 0x4a2   :  { %v11327_v39 = vpop.eup %11326  ;;  %v2994_v11 = vmul.f32 0.03125, %v2826_v57  ;;  %v3351_v54 = vmul.f32 %v11325_v50, %v20215_v5  ;;  %11336 = vrsqrt.f32 %v3120_v26  ;;  %v20218_v26 = vld [vmem:[#allocation80_spill] sm:$0xff] }
 0x4a3   :  { %v4213_v9 = vcombine.low %v4194_v28, %v4210_v4  ;;  %v11329_v31 = vpop.eup %11328  ;;  %v4212_v60 = vcombine.high %v14880_v19, %v14883_v37  ;;  %v3357_v33 = vmul.f32 %v11327_v39, %v20216_v47  ;;  %v4087_v40 = vcombine.low %v3352_v13, %v3354_v48 }
 0x4a4   :  { %v3122_v14 = vadd.f32 1e-05, %v2994_v11  ;;  %v2799_v0 = vpop.xlane.xlu1 %2798  ;;  %v11331_v27 = vpop.eup %11330  ;;  %v3355_v8 = vmul.f32 %v11329_v31, %v20217_v51  ;;  %v4214_v59 = vcombine.high %v4194_v28, %v4210_v4  ;;  %v4079_v32 = vcombine.low %v3351_v54, %v3353_v38 }
 0x4a5   :  { %4589 = vrot.lane.b32.xlu0 %v4213_v9, %s11745_s4  ;;  %v2832_v20 = vpop.xlane.xlu0 %2831  ;;  %4525 = vrot.lane.b32.xlu1 %v4212_v60, %s11747_s5  ;;  %v3356_v11 = vmul.f32 %v11331_v27, %v20218_v26  ;;  %v4094_v34 = vrot.slane %v4087_v40, %v20070_v6  ;;  %v2985_v9 = vmul.f32 0.03125, %v2799_v0  ;;  %v2983_v4 = vmul.f32 0.03125, %v2793_v62 }
 0x4a6   :  { %11338 = vrsqrt.f32 %v3122_v14  ;;  %v2996_v18 = vmul.f32 0.03125, %v2832_v20  ;;  %v4095_v43 = vcombine.low %v3355_v8, %v3357_v33  ;;  %v20219_v8 = vld [vmem:[#allocation85_spill] sm:$0xff] }
 0x4a7   :  { %11340 = vrsqrt.f32 %v3119_v24  ;;  %v4086_v24 = vrot.slane %v4079_v32, %v20070_v6  ;;  %v3113_v20 = vadd.f32 1e-05, %v2985_v9 }
 0x4a8   :  { %v11333_v57 = vpop.eup %11332  ;;  %11342 = vrsqrt.f32 %v3125_v1  ;;  %v3124_v50 = vadd.f32 1e-05, %v2996_v18  ;;  %v2805_v39 = vpop.xlane.xlu1 %2804 }
 0x4a9   :  { %v3358_v44 = vmul.f32 %v11333_v57, %v14004_v30  ;;  %4653 = vrot.lane.b32.xlu0 %v4214_v59, %s11746_s23  ;;  %v2838_v48 = vpop.xlane.xlu0 %2837  ;;  %11344 = vrsqrt.f32 %v3123_v58  ;;  %v11335_v1 = vpop.eup %11334  ;;  %v4102_v30 = vrot.slane %v4095_v43, %v20070_v6  ;;  %v4112_v5 = vcombine.high %v4086_v24, %v4094_v34 }
 0x4aa   :  { %v2998_v13 = vmul.f32 0.03125, %v2838_v48  ;;  %11346 = vrsqrt.f32 %v3124_v50  ;;  %v4111_v47 = vcombine.low %v4086_v24, %v4094_v34  ;;  %v3111_v58 = vadd.f32 1e-05, %v2983_v4  ;;  %v20221_v24 = vld [vmem:[#allocation82_spill] sm:$0xff] }
 0x4ab   :  { %v4103_v28 = vcombine.low %v3356_v11, %v3358_v44  ;;  %v4126_v50 = vrot.slane %v4112_v5, %v20082_v36  ;;  %v2987_v44 = vmul.f32 0.03125, %v2805_v39  ;;  %v20222_v5 = vld [vmem:[#allocation104_spill] sm:$0xff] }
 0x4ac   :  { %v3126_v38 = vadd.f32 1e-05, %v2998_v13  ;;  %v2811_v31 = vpop.xlane.xlu1 %2810  ;;  %v11337_v33 = vpop.eup %11336  ;;  %v14907_v34 = vrot.slane %v4111_v47, %v20082_v36  ;;  %v20220_v13 = vld [vmem:[#allocation79_spill] sm:$0xff]  ;;  %v20223_v47 = vld [vmem:[#allocation81_spill] sm:$0xff] }
 0x4ad   :  { %v2796_v14 = vpop.xlane.xlu0 %2795  ;;  %v4110_v60 = vrot.slane %v4103_v28, %v20070_v6  ;;  %v2989_v62 = vmul.f32 0.03125, %v2811_v31  ;;  %v3377_v9 = vmul.f32 %v11335_v1, %v20220_v13  ;;  %v3376_v28 = vmul.f32 %v11337_v33, %v20221_v24  ;;  %v20225_v24 = vld [vmem:[#allocation88_spill] sm:$0xff] }
 0x4ae   :  { %11348 = vrsqrt.f32 %v3126_v38  ;;  %v2984_v54 = vmul.f32 0.03125, %v2796_v14 }
 0x4af   :  { %v4128_v0 = vcombine.high %v4102_v30, %v4110_v60  ;;  %v4127_v40 = vcombine.low %v4102_v30, %v4110_v60  ;;  %11350 = vrsqrt.f32 %v3113_v20  ;;  %v3117_v31 = vadd.f32 1e-05, %v2989_v62  ;;  %v20224_v62 = vld [vmem:[#allocation110_spill] sm:$0xff] }
 0x4b0   :  { %v11339_v27 = vpop.eup %11338  ;;  %v2865_v18 = vpop.xlane.xlu1 %2864  ;;  %v3112_v32 = vadd.f32 1e-05, %v2984_v54 }
 0x4b1   :  { %v11341_v51 = vpop.eup %11340  ;;  %v3378_v59 = vmul.f32 %v11339_v27, %v20219_v8  ;;  %v2802_v57 = vpop.xlane.xlu0 %2801  ;;  %v4142_v26 = vrot.slane %v4128_v0, %v20082_v36  ;;  %v14910_v43 = vrot.slane %v4127_v40, %v20082_v36  ;;  %v3115_v40 = vadd.f32 1e-05, %v2987_v44 }
 0x4b2   :  { %v11343_v11 = vpop.eup %11342  ;;  %v2986_v48 = vmul.f32 0.03125, %v2802_v57  ;;  %v3375_v54 = vmul.f32 %v11341_v51, %v20222_v5  ;;  %11352 = vrsqrt.f32 %v3112_v32  ;;  %v3007_v51 = vmul.f32 0.03125, %v2865_v18 }
 0x4b3   :  { %v4145_v4 = vcombine.low %v4126_v50, %v4142_v26  ;;  %v11345_v38 = vpop.eup %11344  ;;  %v4144_v39 = vcombine.high %v14907_v34, %v14910_v43  ;;  %v3381_v0 = vmul.f32 %v11343_v11, %v20223_v47  ;;  %v4291_v33 = vcombine.low %v3376_v28, %v3378_v59 }
 0x4b4   :  { %v3114_v14 = vadd.f32 1e-05, %v2986_v48  ;;  %v2871_v30 = vpop.xlane.xlu1 %2870  ;;  %v11347_v20 = vpop.eup %11346  ;;  %v3379_v8 = vmul.f32 %v11345_v38, %v20224_v62  ;;  %v4283_v57 = vcombine.low %v3375_v54, %v3377_v9  ;;  %v4146_v32 = vcombine.high %v4126_v50, %v4142_v26 }
 0x4b5   :  { %4587 = vrot.lane.b32.xlu1 %v4145_v4, %s11745_s4  ;;  %v2808_v1 = vpop.xlane.xlu0 %2807  ;;  %4523 = vrot.lane.b32.xlu0 %v4144_v39, %s11747_s5  ;;  %v3380_v4 = vmul.f32 %v11347_v20, %v20225_v24  ;;  %v4298_v44 = vrot.slane %v4291_v33, %v20070_v6  ;;  %v3135_v18 = vadd.f32 1e-05, %v3007_v51 }
 0x4b6   :  { %11354 = vrsqrt.f32 %v3114_v14  ;;  %v2988_v27 = vmul.f32 0.03125, %v2808_v1  ;;  %v4299_v14 = vcombine.low %v3379_v8, %v3381_v0  ;;  %v4290_v9 = vrot.slane %v4283_v57, %v20070_v6 }
 0x4b7   :  { %11356 = vrsqrt.f32 %v3111_v58  ;;  %v3009_v58 = vmul.f32 0.03125, %v2871_v30 }
 0x4b8   :  { %v11349_v48 = vpop.eup %11348  ;;  %11358 = vrsqrt.f32 %v3117_v31  ;;  %v3116_v13 = vadd.f32 1e-05, %v2988_v27  ;;  %v2877_v11 = vpop.xlane.xlu1 %2876  ;;  %v4316_v47 = vcombine.high %v4290_v9, %v4298_v44  ;;  %v4315_v1 = vcombine.low %v4290_v9, %v4298_v44  ;;  %v20227_v9 = vld [vmem:[#allocation93_spill] sm:$0xff] }
 0x4b9   :  { %v3382_v59 = vmul.f32 %v11349_v48, %v14092_v2  ;;  %v2814_v28 = vpop.xlane.xlu0 %2813  ;;  %11360 = vrsqrt.f32 %v3115_v40  ;;  %4651 = vrot.lane.b32.xlu0 %v4146_v32, %s11746_s23  ;;  %v11351_v26 = vpop.eup %11350  ;;  %v4306_v2 = vrot.slane %v4299_v14, %v20070_v6  ;;  %v3137_v20 = vadd.f32 1e-05, %v3009_v58 }
 0x4ba   :  { %v2990_v38 = vmul.f32 0.03125, %v2814_v28  ;;  %11362 = vrsqrt.f32 %v3116_v13  ;;  %v4330_v32 = vrot.slane %v4316_v47, %v20082_v36  ;;  %v14934_v44 = vrot.slane %v4315_v1, %v20082_v36 }
 0x4bb   :  { %v4307_v31 = vcombine.low %v3380_v4, %v3382_v59  ;;  %v3011_v59 = vmul.f32 0.03125, %v2877_v11 }
 0x4bc   :  { %v3118_v39 = vadd.f32 1e-05, %v2990_v38  ;;  %v2883_v50 = vpop.xlane.xlu1 %2882  ;;  %v11353_v33 = vpop.eup %11352  ;;  %v20226_v38 = vld [vmem:[#allocation87_spill] sm:$0xff] }
 0x4bd   :  { %v2868_v5 = vpop.xlane.xlu0 %2867  ;;  %v4314_v54 = vrot.slane %v4307_v31, %v20070_v6  ;;  %v3013_v62 = vmul.f32 0.03125, %v2883_v50  ;;  %v3369_v58 = vmul.f32 %v11351_v26, %v20226_v38  ;;  %v3368_v31 = vmul.f32 %v11353_v33, %v20227_v9 }
 0x4be   :  { %11364 = vrsqrt.f32 %v3118_v39  ;;  %v3008_v0 = vmul.f32 0.03125, %v2868_v5 }
 0x4bf   :  { %v4332_v30 = vcombine.high %v4306_v2, %v4314_v54  ;;  %v4331_v40 = vcombine.low %v4306_v2, %v4314_v54  ;;  %11366 = vrsqrt.f32 %v3135_v18  ;;  %v3141_v39 = vadd.f32 1e-05, %v3013_v62  ;;  %v20228_v54 = vld [vmem:[#allocation84_spill] sm:$0xff] }
 0x4c0   :  { %v11355_v27 = vpop.eup %11354  ;;  %v2841_v8 = vpop.xlane.xlu1 %2840  ;;  %v3136_v51 = vadd.f32 1e-05, %v3008_v0  ;;  %11368 = vrsqrt.f32 %v3137_v20  ;;  %v20229_v0 = vld [vmem:[#allocation90_spill] sm:$0xff] }
 0x4c1   :  { %v11357_v57 = vpop.eup %11356  ;;  %v3370_v48 = vmul.f32 %v11355_v27, %v14168_v29  ;;  %v2874_v13 = vpop.xlane.xlu0 %2873  ;;  %v4346_v24 = vrot.slane %v4332_v30, %v20082_v36  ;;  %v14937_v14 = vrot.slane %v4331_v40, %v20082_v36  ;;  %v3139_v30 = vadd.f32 1e-05, %v3011_v59  ;;  %v20230_v27 = vld [vmem:[#allocation89_spill] sm:$0xff] }
 0x4c2   :  { %v11359_v4 = vpop.eup %11358  ;;  %v3010_v28 = vmul.f32 0.03125, %v2874_v13  ;;  %v3367_v47 = vmul.f32 %v11357_v57, %v20228_v54  ;;  %11370 = vrsqrt.f32 %v3136_v51 }
 0x4c3   :  { %v4350_v29 = vcombine.high %v4330_v32, %v4346_v24  ;;  %v11361_v18 = vpop.eup %11360  ;;  %v4348_v11 = vcombine.high %v14934_v44, %v14937_v14  ;;  %v3373_v1 = vmul.f32 %v11359_v4, %v20229_v0  ;;  %v4223_v33 = vcombine.low %v3368_v31, %v3370_v48  ;;  %v20231_v4 = vld [vmem:[#allocation99_spill] sm:$0xff] }
 0x4c4   :  { %v3138_v50 = vadd.f32 1e-05, %v3010_v28  ;;  %v2847_v5 = vpop.xlane.xlu1 %2846  ;;  %v11363_v20 = vpop.eup %11362  ;;  %v3371_v62 = vmul.f32 %v11361_v18, %v20230_v27  ;;  %v4215_v13 = vcombine.low %v3367_v47, %v3369_v58  ;;  %v4349_v9 = vcombine.low %v4330_v32, %v4346_v24 }
 0x4c5   :  { %4657 = vrot.lane.b32.xlu1 %v4350_v29, %s11746_s23  ;;  %v2880_v26 = vpop.xlane.xlu0 %2879  ;;  %4529 = vrot.lane.b32.xlu0 %v4348_v11, %s11747_s5  ;;  %v3372_v51 = vmul.f32 %v11363_v20, %v14256_v23  ;;  %v4230_v48 = vrot.slane %v4223_v33, %v20070_v6  ;;  %v2999_v20 = vmul.f32 0.03125, %v2841_v8 }
 0x4c6   :  { %11372 = vrsqrt.f32 %v3138_v50  ;;  %v3012_v40 = vmul.f32 0.03125, %v2880_v26  ;;  %v4231_v59 = vcombine.low %v3371_v62, %v3373_v1  ;;  %v4222_v58 = vrot.slane %v4215_v13, %v20070_v6 }
 0x4c7   :  { %11374 = vrsqrt.f32 %v3141_v39  ;;  %v3001_v39 = vmul.f32 0.03125, %v2847_v5 }
 0x4c8   :  { %v11365_v28 = vpop.eup %11364  ;;  %v3140_v38 = vadd.f32 1e-05, %v3012_v40  ;;  %v2853_v57 = vpop.xlane.xlu1 %2852  ;;  %11376 = vrsqrt.f32 %v3139_v30  ;;  %v4238_v47 = vrot.slane %v4231_v59, %v20070_v6  ;;  %v4247_v26 = vcombine.low %v4222_v58, %v4230_v48 }
 0x4c9   :  { %v3374_v29 = vmul.f32 %v11365_v28, %v20231_v4  ;;  %v2886_v54 = vpop.xlane.xlu0 %2885  ;;  %v11367_v31 = vpop.eup %11366  ;;  %4593 = vrot.lane.b32.xlu0 %v4349_v9, %s11745_s4  ;;  %v3129_v13 = vadd.f32 1e-05, %v3001_v39  ;;  %v3003_v5 = vmul.f32 0.03125, %v2853_v57  ;;  %v20232_v9 = vld [vmem:[#allocation101_spill] sm:$0xff]  ;;  %v20235_v39 = vld [vmem:[#allocation131_spill] sm:$0xff] }
 0x4ca   :  { %v3014_v50 = vmul.f32 0.03125, %v2886_v54  ;;  %11378 = vrsqrt.f32 %v3140_v38  ;;  %v11369_v24 = vpop.eup %11368  ;;  %v4248_v38 = vcombine.high %v4222_v58, %v4230_v48  ;;  %v14961_v54 = vrot.slane %v4247_v26, %v20082_v36 }
 0x4cb   :  { %v4239_v18 = vcombine.low %v3372_v51, %v3374_v29 }
 0x4cc   :  { %v3142_v11 = vadd.f32 1e-05, %v3014_v50  ;;  %v2859_v32 = vpop.xlane.xlu1 %2858  ;;  %v11371_v33 = vpop.eup %11370  ;;  %v20233_v50 = vld [vmem:[#allocation94_spill] sm:$0xff] }
 0x4cd   :  { %v2844_v23 = vpop.xlane.xlu0 %2843  ;;  %v4246_v0 = vrot.slane %v4239_v18, %v20070_v6  ;;  %v3005_v30 = vmul.f32 0.03125, %v2859_v32  ;;  %v3391_v18 = vmul.f32 %v11367_v31, %v20233_v50  ;;  %v3392_v57 = vmul.f32 %v11371_v33, %v20235_v39  ;;  %v20237_v50 = vld [vmem:[#allocation97_spill] sm:$0xff] }
 0x4ce   :  { %11380 = vrsqrt.f32 %v3142_v11  ;;  %v3000_v1 = vmul.f32 0.03125, %v2844_v23  ;;  %v20234_v11 = vld [vmem:[#allocation96_spill] sm:$0xff]  ;;  %v3131_v33 = vadd.f32 1e-05, %v3003_v5 }
 0x4cf   :  { %v4263_v40 = vcombine.low %v4238_v47, %v4246_v0  ;;  %v4264_v27 = vcombine.high %v4238_v47, %v4246_v0  ;;  %v3393_v32 = vmul.f32 %v11369_v24, %v20234_v11  ;;  %v3127_v47 = vadd.f32 1e-05, %v2999_v20  ;;  %v20236_v24 = vld [vmem:[#allocation100_spill] sm:$0xff] }
 0x4d0   :  { %v11373_v62 = vpop.eup %11372  ;;  %v14957_v28 = vpop.permute.xlu1 %4633  ;;  %v3128_v4 = vadd.f32 1e-05, %v3000_v1  ;;  %v3133_v48 = vadd.f32 1e-05, %v3005_v30  ;;  %11382 = vrsqrt.f32 %v3129_v13  ;;  %v4262_v30 = vrot.slane %v4248_v38, %v20082_v36 }
 0x4d1   :  { %v3394_v51 = vmul.f32 %v11373_v62, %v20232_v9  ;;  %v2850_v29 = vpop.xlane.xlu0 %2849  ;;  %v14964_v59 = vrot.slane %v4263_v40, %v20082_v36  ;;  %v11375_v8 = vpop.eup %11374  ;;  %v4278_v0 = vrot.slane %v4264_v27, %v20082_v36  ;;  %v4419_v13 = vcombine.low %v3391_v18, %v3393_v32 }
 0x4d2   :  { %v3002_v23 = vmul.f32 0.03125, %v2850_v29  ;;  %v11377_v26 = vpop.eup %11376  ;;  %v3397_v9 = vmul.f32 %v11375_v8, %v20236_v24  ;;  %11384 = vrsqrt.f32 %v3128_v4  ;;  %v20238_v4 = vld [vmem:[#allocation105_spill] sm:$0xff] }
 0x4d3   :  { %v4280_v58 = vcombine.high %v14961_v54, %v14964_v59  ;;  %v4427_v62 = vcombine.low %v3392_v57, %v3394_v51  ;;  %v3395_v11 = vmul.f32 %v11377_v26, %v20237_v50  ;;  %v4281_v51 = vcombine.low %v4262_v30, %v4278_v0 }
 0x4d4   :  { %v3130_v1 = vadd.f32 1e-05, %v3002_v23  ;;  %v14972_v40 = vpop.permute.xlu1 %4503  ;;  %v11379_v29 = vpop.eup %11378  ;;  %v4282_v26 = vcombine.high %v4262_v30, %v4278_v0 }
 0x4d5   :  { %4527 = vrot.lane.b32.xlu0 %v4280_v58, %s11747_s5  ;;  %v2856_v20 = vpop.xlane.xlu0 %2855  ;;  %v4434_v5 = vrot.slane %v4427_v62, %v20070_v6  ;;  %v3396_v8 = vmul.f32 %v11379_v29, %v20238_v4  ;;  %v20239_v58 = vld [vmem:[#allocation108_spill] sm:$0xff]  ;;  %v4435_v18 = vcombine.low %v3395_v11, %v3397_v9  ;;  %v20240_v4 = vld [vmem:[#allocation142_spill] sm:$0xff] }
 0x4d6   :  { %11386 = vrsqrt.f32 %v3130_v1  ;;  %v3004_v27 = vmul.f32 0.03125, %v2856_v20 }
 0x4d7   :  { %11388 = vrsqrt.f32 %v3133_v48  ;;  %v4426_v48 = vrot.slane %v4419_v13, %v20070_v6 }
 0x4d8   :  { %v11381_v39 = vpop.eup %11380  ;;  %11390 = vrsqrt.f32 %v3127_v47  ;;  %v3132_v57 = vadd.f32 1e-05, %v3004_v27  ;;  %v14980_v23 = vpop.permute.xlu1 %4567 }
 0x4d9   :  { %11392 = vrsqrt.f32 %v3131_v33  ;;  %v3398_v38 = vmul.f32 %v11381_v39, %v20239_v58  ;;  %4591 = vrot.lane.b32.xlu0 %v4281_v51, %s11745_s4  ;;  %v2862_v1 = vpop.xlane.xlu0 %2861  ;;  %v4452_v27 = vcombine.high %v4426_v48, %v4434_v5  ;;  %v4442_v33 = vrot.slane %v4435_v18, %v20070_v6 }
 0x4da   :  { %v3006_v32 = vmul.f32 0.03125, %v2862_v1  ;;  %11394 = vrsqrt.f32 %v3132_v57  ;;  %v4451_v50 = vcombine.low %v4426_v48, %v4434_v5  ;;  %v11383_v51 = vpop.eup %11382  ;;  %v20241_v48 = vld [vmem:[#allocation102_spill] sm:$0xff] }
 0x4db   :  { %v4443_v24 = vcombine.low %v3396_v8, %v3398_v38  ;;  %v4466_v39 = vrot.slane %v4452_v27, %v20082_v36 }
 0x4dc   :  { %v3134_v47 = vadd.f32 1e-05, %v3006_v32  ;;  %v14987_v20 = vpop.permute.xlu1 %4509  ;;  %v11385_v9 = vpop.eup %11384  ;;  %v14998_v1 = vrot.slane %v4451_v50, %v20082_v36 }
 0x4dd   :  { %4655 = vrot.lane.b32.xlu0 %v4282_v26, %s11746_s23  ;;  %v4506_v62 = vpop.permute.xlu0 %4505  ;;  %v4450_v29 = vrot.slane %v4443_v24, %v20070_v6  ;;  %v3385_v26 = vmul.f32 %v11383_v51, %v20241_v48  ;;  %v20242_v24 = vld [vmem:[#allocation139_spill] sm:$0xff] }
 0x4de   :  { %11396 = vrsqrt.f32 %v3134_v47  ;;  %v3384_v47 = vmul.f32 %v11385_v9, %v20242_v24  ;;  %v20245_v9 = vld [vmem:[#allocation138_spill] sm:$0xff] }
 0x4df   :  { %v4468_v11 = vcombine.high %v4442_v33, %v4450_v29  ;;  %v4467_v13 = vcombine.low %v4442_v33, %v4450_v29  ;;  %v20243_v29 = vld [vmem:[#allocation109_spill] sm:$0xff] }
 0x4e0   :  { %v11387_v0 = vpop.eup %11386  ;;  %v14992_v30 = vpop.permute.xlu1 %4637 }
 0x4e1   :  { %v11389_v57 = vpop.eup %11388  ;;  %v3386_v8 = vmul.f32 %v11387_v0, %v20240_v4  ;;  %v4570_v58 = vpop.permute.xlu0 %4569  ;;  %v4482_v38 = vrot.slane %v4468_v11, %v20082_v36  ;;  %v15001_v5 = vrot.slane %v4467_v13, %v20082_v36  ;;  %v20244_v11 = vld [vmem:[#allocation134_spill] sm:$0xff] }
 0x4e2   :  { %v11391_v18 = vpop.eup %11390  ;;  %v3389_v0 = vmul.f32 %v11389_v57, %v20243_v29 }
 0x4e3   :  { %v11393_v32 = vpop.eup %11392  ;;  %v4485_v33 = vcombine.low %v4466_v39, %v4482_v38  ;;  %v4484_v27 = vcombine.high %v14998_v1, %v15001_v5  ;;  %v3383_v13 = vmul.f32 %v11391_v18, %v20244_v11  ;;  %v4359_v51 = vcombine.low %v3384_v47, %v3386_v8 }
 0x4e4   :  { %v15008_v4 = vpop.permute.xlu1 %4507  ;;  %v11395_v48 = vpop.eup %11394  ;;  %v3387_v24 = vmul.f32 %v11393_v32, %v20245_v9  ;;  %v4486_v2 = vcombine.high %v4466_v39, %v4482_v38  ;;  %v20248_v39 = vcombine.low %v14210_v10, %v14220_v55  ;;  %v15036_v55 = vld [vmem:[%s19176_s6] ss:$0 sm:$0xff]  ;;  %v15058_v9 = vld [vmem:[%s19176_s6 + $0x1] ss:$0 sm:$0xff] }
 0x4e5   :  { %4597 = vrot.lane.b32.xlu0 %v4485_v33, %s11745_s4  ;;  %4533 = vrot.lane.b32.xlu1 %v4484_v27, %s11747_s5  ;;  %v4632_v31 = vpop.permute.xlu0 %4631  ;;  %v4351_v15 = vcombine.low %v3383_v13, %v3385_v26  ;;  %v3388_v53 = vmul.f32 %v11395_v48, %v20246_v49  ;;  %v4366_v18 = vrot.slane %v4359_v51, %v20070_v6 }
 0x4e6   :  { %v4367_v29 = vcombine.low %v3387_v24, %v3389_v0  ;;  %v4681_v38 = vsel %vm4679_vm3, %v20248_v39, %v4506_v62  ;;  %v20251_v39 = vld [vmem:[#allocation136_spill] sm:$0xff] }
 0x4e7   :  { %v4358_v8 = vrot.slane %v4351_v15, %v20070_v6 }
 0x4e8   :  { %v11397_v60 = vpop.eup %11396  ;;  %v4572_v57 = vpop.permute.xlu1 %4571  ;;  %v4374_v49 = vrot.slane %v4367_v29, %v20070_v6 }
 0x4e9   :  { %v3390_v50 = vmul.f32 %v11397_v60, %v20247_v61  ;;  %4661 = vrot.lane.b32.xlu1 %v4486_v2, %s11746_s23  ;;  %v4574_v32 = vpop.permute.xlu0 %4573  ;;  %v4698_v61 = vsel %vm4696_vm4, %v4681_v38, %v4570_v58  ;;  %v4384_v2 = vcombine.high %v4358_v8, %v4366_v18  ;;  %v4383_v33 = vcombine.low %v4358_v8, %v4366_v18 }
 0x4ea   :  { %v4715_v62 = vsel %vm4713_vm5, %v4698_v61, %v14957_v28 }
 0x4eb   :  { %v4375_v47 = vcombine.low %v3388_v53, %v3390_v50  ;;  %v20249_v53 = vcombine.low %v14319_v56, %v14324_v12  ;;  %v4398_v0 = vrot.slane %v4384_v2, %v20082_v36  ;;  %v15043_v11 = vrot.slane %v4383_v33, %v20082_v36 }
 0x4ec   :  { %v4514_v26 = vpop.permute.xlu1 %4513  ;;  %v4735_v13 = vmul.f32 %v15036_v55, %v4715_v62 }
 0x4ed   :  { %v4382_v60 = vrot.slane %v4375_v47, %v20070_v6  ;;  %v4680_v10 = vsel %vm4679_vm3, %v20249_v53, %v14972_v40  ;;  %v4636_v40 = vpop.permute.xlu0 %4635  ;;  %v20250_v47 = vld [vmem:[#allocation106_spill] sm:$0xff] }
 0x4ee   :  { %v4697_v12 = vsel %vm4696_vm4, %v4680_v10, %v14980_v23  ;;  %v15064_v23 = vadd.f32 %v15058_v9, %v4735_v13  ;;  %v20252_v38 = vcombine.low %v20250_v47, %v20251_v39 }
 0x4ef   :  { %v4400_v27 = vcombine.high %v4374_v49, %v4382_v60  ;;  %v4399_v15 = vcombine.low %v4374_v49, %v4382_v60  ;;  %v4714_v24 = vsel %vm4713_vm5, %v4697_v12, %v4632_v31  ;;  %v20254_v12 = vcombine.low %v14573_v52, %v14576_v17 }
 0x4f0   :  { %v4578_v58 = vpop.permute.xlu1 %4577  ;;  %v4734_v18 = vmul.f32 %v15036_v55, %v4714_v24  ;;  %v4683_v49 = vsel %vm4679_vm3, %v20252_v38, %v14987_v20  ;;  %v20253_v20 = vcombine.low %v14499_v16, %v14502_v21 }
 0x4f1   :  { %v4414_v50 = vrot.slane %v4400_v27, %v20082_v36  ;;  %v15046_v56 = vrot.slane %v4399_v15, %v20082_v36  ;;  %v4512_v61 = vpop.permute.xlu0 %4511  ;;  %v4700_v31 = vsel %vm4696_vm4, %v4683_v49, %v4574_v32 }
 0x4f2   :  { %v15077_v2 = vadd.f32 %v15058_v9, %v4734_v18  ;;  %v4717_v33 = vsel %vm4713_vm5, %v4700_v31, %v14992_v30  ;;  %v4682_v32 = vsel %vm4679_vm3, %v20253_v20, %v15008_v4 }
 0x4f3   :  { %v4417_v51 = vcombine.low %v4398_v0, %v4414_v50  ;;  %v4416_v28 = vcombine.high %v15043_v11, %v15046_v56  ;;  %v4415_v48 = vcombine.low %v15043_v11, %v15046_v56  ;;  %v4418_v8 = vcombine.high %v4398_v0, %v4414_v50 }
 0x4f4   :  { %v4642_v29 = vpop.permute.xlu1 %4641  ;;  %v4699_v53 = vsel %vm4696_vm4, %v4682_v32, %v4572_v57  ;;  %v4737_v10 = vmul.f32 %v15036_v55, %v4717_v33  ;;  %v20257_v33 = vcombine.low %v14617_v25, %v14620_v46 }
 0x4f5   :  { %4595 = vrot.lane.b32.xlu1 %v4417_v51, %s11745_s4  ;;  %4531 = vrot.lane.b32.xlu0 %v4416_v28, %s11747_s5  ;;  %v15090_v15 = vpop.permute.xlu0 %4581  ;;  %v4716_v30 = vsel %vm4713_vm5, %v4699_v53, %v4636_v40  ;;  %v4685_v40 = vsel %vm4679_vm3, %v20254_v12, %v4514_v26 }
 0x4f6   :  { %v15100_v0 = vadd.f32 %v15058_v9, %v4737_v10  ;;  %v4736_v16 = vmul.f32 %v15036_v55, %v4716_v30  ;;  %v4702_v51 = vsel %vm4696_vm4, %v4685_v40, %v4578_v58  ;;  %v4684_v20 = vsel %vm4679_vm3, %v20257_v33, %v4512_v61 }
 0x4f7   :  { %v4719_v28 = vsel %vm4713_vm5, %v4702_v51, %v4642_v29 }
 0x4f8   :  { %v4576_v60 = vpop.permute.xlu1 %4575  ;;  %v15110_v57 = vadd.f32 %v15058_v9, %v4736_v16  ;;  %v4739_v18 = vmul.f32 %v15036_v55, %v4719_v28  ;;  %v20259_v28 = vcombine.low %v14674_v45, %v14677_v42 }
 0x4f9   :  { %4659 = vrot.lane.b32.xlu0 %v4418_v8, %s11746_s23  ;;  %4790 = vrot.lane.b32.xlu1 %v15064_v23, %s11746_s23  ;;  %v15103_v21 = vpop.permute.xlu0 %4643  ;;  %v20255_v8 = vcombine.low %v14813_v3, %v14816_v7  ;;  %v20256_v7 = vcombine.low %v14853_v41, %v14856_v35  ;;  %v4701_v32 = vsel %vm4696_vm4, %v4684_v20, %v4576_v60 }
 0x4fa   :  { %v15136_v47 = vadd.f32 %v15058_v9, %v4739_v18 }
 0x4fc   :  { %v4640_v27 = vpop.permute.xlu1 %4639 }
 0x4fd   :  { %4838 = vrot.lane.b32.xlu1 %v15064_v23, %s11745_s4  ;;  %4788 = vrot.lane.b32.xlu0 %v15077_v2, %s11746_s23  ;;  %v4522_v13 = vpop.permute.xlu0 %4521  ;;  %v4718_v53 = vsel %vm4713_vm5, %v4701_v32, %v4640_v27  ;;  %v20258_v27 = vcombine.low %v14880_v19, %v14883_v37 }
 0x4fe   :  { %v4689_v52 = vsel %vm4679_vm3, %v20255_v8, %v4522_v13  ;;  %v4738_v46 = vmul.f32 %v15036_v55, %v4718_v53 }
 0x500   :  { %v4518_v62 = vpop.permute.xlu1 %4517  ;;  %v15175_v13 = vadd.f32 %v15058_v9, %v4738_v46 }
 0x501   :  { %4886 = vrot.lane.b32.xlu1 %v15064_v23, %s11747_s5  ;;  %4836 = vrot.lane.b32.xlu0 %v15077_v2, %s11745_s4  ;;  %v4650_v17 = vpop.permute.xlu0 %4649  ;;  %v4687_v19 = vsel %vm4679_vm3, %v20259_v28, %v4518_v62 }
 0x502   :  { %v4704_v8 = vsel %vm4696_vm4, %v4687_v19, %v15090_v15 }
 0x504   :  { %v4646_v4 = vpop.permute.xlu1 %4645 }
 0x505   :  { %4884 = vrot.lane.b32.xlu0 %v15077_v2, %s11747_s5  ;;  %4794 = vrot.lane.b32.xlu1 %v15100_v0, %s11746_s23 }
 0x507   :  { %v4584_v38 = vpop.permute.xlu0 %4583 }
 0x508   :  { %v4516_v50 = vpop.permute.xlu1 %4515 }
 0x509   :  { %4842 = vrot.lane.b32.xlu1 %v15100_v0, %s11745_s4  ;;  %4792 = vrot.lane.b32.xlu0 %v15110_v57, %s11746_s23 }
 0x50c   :  { %v4580_v24 = vpop.permute.xlu1 %4579 }
 0x50d   :  { %4890 = vrot.lane.b32.xlu1 %v15100_v0, %s11747_s5  ;;  %4888 = vrot.lane.b32.xlu0 %v15110_v57, %s11747_s5 }
 0x510   :  { %v4586_v26 = vpop.permute.xlu1 %4585 }
 0x511   :  { %v4706_v58 = vsel %vm4696_vm4, %v4689_v52, %v4586_v26  ;;  %4840 = vrot.lane.b32.xlu1 %v15110_v57, %s11745_s4  ;;  %v4721_v52 = vsel %vm4713_vm5, %v4704_v8, %v4646_v4  ;;  %v20261_v26 = vcombine.low %v14767_v22, %v14770_v63 }
 0x512   :  { %v4723_v29 = vsel %vm4713_vm5, %v4706_v58, %v4650_v17  ;;  %v4741_v45 = vmul.f32 %v15036_v55, %v4721_v52  ;;  %v20260_v17 = vcombine.low %v14907_v34, %v14910_v43 }
 0x513   :  { %v4743_v39 = vmul.f32 %v15036_v55, %v4723_v29  ;;  %v4686_v58 = vsel %vm4679_vm3, %v20261_v26, %v4516_v50 }
 0x514   :  { %v4520_v49 = vpop.permute.xlu1 %4519  ;;  %v15207_v4 = vadd.f32 %v15058_v9, %v4741_v45  ;;  %v4703_v34 = vsel %vm4696_vm4, %v4686_v58, %v4580_v24 }
 0x515   :  { %v15140_v3 = vadd.f32 %v15058_v9, %v4743_v39  ;;  %v4688_v31 = vsel %vm4679_vm3, %v20256_v7, %v4520_v49  ;;  %4798 = vrot.lane.b32.xlu1 %v15136_v47, %s11746_s23  ;;  %v4720_v22 = vsel %vm4713_vm5, %v4703_v34, %v15103_v21  ;;  %v20262_v49 = vcombine.low %v14934_v44, %v14937_v14 }
 0x516   :  { %v4705_v41 = vsel %vm4696_vm4, %v4688_v31, %v4584_v38  ;;  %v4740_v50 = vmul.f32 %v15036_v55, %v4720_v22 }
 0x517   :  { %4806 = vrot.lane.b32.xlu0 %v15140_v3, %s11746_s23  ;;  %v4590_v10 = vpop.permute.xlu0 %4589 }
 0x518   :  { %v4648_v30 = vpop.permute.xlu1 %4647  ;;  %v15236_v24 = vadd.f32 %v15058_v9, %v4740_v50 }
 0x519   :  { %v4722_v35 = vsel %vm4713_vm5, %v4705_v41, %v4648_v30  ;;  %4846 = vrot.lane.b32.xlu1 %v15136_v47, %s11745_s4  ;;  %v20263_v30 = vcombine.low %v14961_v54, %v14964_v59 }
 0x51a   :  { %v4742_v25 = vmul.f32 %v15036_v55, %v4722_v35 }
 0x51b   :  { %4902 = vrot.lane.b32.xlu0 %v15140_v3, %s11747_s5  ;;  %v4654_v12 = vpop.permute.xlu0 %4653 }
 0x51c   :  { %v15165_v61 = vadd.f32 %v15058_v9, %v4742_v25  ;;  %v4526_v60 = vpop.permute.xlu1 %4525 }
 0x51d   :  { %v4691_v16 = vsel %vm4679_vm3, %v20258_v27, %v4526_v60  ;;  %4894 = vrot.lane.b32.xlu1 %v15136_v47, %s11747_s5 }
 0x51e   :  { %v4708_v40 = vsel %vm4696_vm4, %v4691_v16, %v4590_v10 }
 0x51f   :  { %v4725_v51 = vsel %vm4713_vm5, %v4708_v40, %v4654_v12  ;;  %4852 = vrot.lane.b32.xlu0 %v15165_v61, %s11745_s4  ;;  %v20264_v12 = vcombine.low %v14998_v1, %v15001_v5 }
 0x520   :  { %v4745_v37 = vmul.f32 %v15036_v55, %v4725_v51 }
 0x521   :  { %4796 = vrot.lane.b32.xlu1 %v15175_v13, %s11746_s23 }
 0x522   :  { %v15188_v18 = vadd.f32 %v15058_v9, %v4745_v37 }
 0x524   :  { %4810 = vrot.lane.b32.xlu0 %v15188_v18, %s11746_s23 }
 0x525   :  { %4844 = vrot.lane.b32.xlu1 %v15175_v13, %s11745_s4 }
 0x527   :  { %v4524_v42 = vpop.permute.xlu0 %4523  ;;  %v4588_v62 = vpop.permute.xlu1 %4587 }
 0x528   :  { %4858 = vrot.lane.b32.xlu0 %v15188_v18, %s11745_s4  ;;  %v4690_v15 = vsel %vm4679_vm3, %v20260_v17, %v4524_v42 }
 0x529   :  { %4892 = vrot.lane.b32.xlu1 %v15175_v13, %s11747_s5  ;;  %v4707_v29 = vsel %vm4696_vm4, %v4690_v15, %v4588_v62 }
 0x52b   :  { %v4652_v39 = vpop.permute.xlu0 %4651 }
 0x52c   :  { %4906 = vrot.lane.b32.xlu0 %v15188_v18, %s11747_s5  ;;  %v4724_v43 = vsel %vm4713_vm5, %v4707_v29, %v4652_v39 }
 0x52d   :  { %4802 = vrot.lane.b32.xlu1 %v15207_v4, %s11746_s23  ;;  %v4744_v38 = vmul.f32 %v15036_v55, %v4724_v43 }
 0x52f   :  { %v15224_v63 = vadd.f32 %v15058_v9, %v4744_v38 }
 0x531   :  { %4850 = vrot.lane.b32.xlu1 %v15207_v4, %s11745_s4  ;;  %4808 = vrot.lane.b32.xlu0 %v15224_v63, %s11746_s23 }
 0x535   :  { %4898 = vrot.lane.b32.xlu1 %v15207_v4, %s11747_s5  ;;  %4856 = vrot.lane.b32.xlu0 %v15224_v63, %s11745_s4 }
 0x537   :  { %v4530_v21 = vpop.permute.xlu0 %4529  ;;  %v4658_v33 = vpop.permute.xlu1 %4657 }
 0x538   :  { %v4693_v7 = vsel %vm4679_vm3, %v20262_v49, %v4530_v21 }
 0x539   :  { %4800 = vrot.lane.b32.xlu1 %v15236_v24, %s11746_s23  ;;  %4904 = vrot.lane.b32.xlu0 %v15224_v63, %s11747_s5 }
 0x53b   :  { %v4594_v31 = vpop.permute.xlu0 %4593 }
 0x53c   :  { %v4710_v20 = vsel %vm4696_vm4, %v4693_v7, %v4594_v31 }
 0x53d   :  { %4848 = vrot.lane.b32.xlu1 %v15236_v24, %s11745_s4  ;;  %v4727_v32 = vsel %vm4713_vm5, %v4710_v20, %v4658_v33 }
 0x53e   :  { %v4747_v53 = vmul.f32 %v15036_v55, %v4727_v32 }
 0x540   :  { %v15252_v10 = vadd.f32 %v15058_v9, %v4747_v53 }
 0x541   :  { %4896 = vrot.lane.b32.xlu1 %v15236_v24, %s11747_s5 }
 0x542   :  { %4814 = vrot.lane.b32.xlu0 %v15252_v10, %s11746_s23 }
 0x545   :  { %4854 = vrot.lane.b32.xlu1 %v15140_v3, %s11745_s4 }
 0x546   :  { %4862 = vrot.lane.b32.xlu0 %v15252_v10, %s11745_s4 }
 0x547   :  { %v4528_v44 = vpop.permute.xlu0 %4527 }
 0x548   :  { %v4692_v41 = vsel %vm4679_vm3, %v20263_v30, %v4528_v44 }
 0x549   :  { %4804 = vrot.lane.b32.xlu1 %v15165_v61, %s11746_s23 }
 0x54a   :  { %4910 = vrot.lane.b32.xlu0 %v15252_v10, %s11747_s5 }
 0x54b   :  { %v4592_v14 = vpop.permute.xlu0 %4591 }
 0x54c   :  { %v4709_v35 = vsel %vm4696_vm4, %v4692_v41, %v4592_v14 }
 0x54d   :  { %4900 = vrot.lane.b32.xlu1 %v15165_v61, %s11747_s5 }
 0x54f   :  { %v4656_v25 = vpop.permute.xlu0 %4655 }
 0x550   :  { %v4726_v46 = vsel %vm4713_vm5, %v4709_v35, %v4656_v25 }
 0x551   :  { %v4746_v60 = vmul.f32 %v15036_v55, %v4726_v46 }
 0x553   :  { %v15276_v27 = vadd.f32 %v15058_v9, %v4746_v60 }
 0x555   :  { %4812 = vrot.lane.b32.xlu0 %v15276_v27, %s11746_s23 }
 0x557   :  { %v4534_v16 = vpop.permute.xlu1 %4533  ;;  %v4598_v59 = vpop.permute.xlu0 %4597 }
 0x558   :  { %v4695_v54 = vsel %vm4679_vm3, %v20264_v12, %v4534_v16 }
 0x559   :  { %4860 = vrot.lane.b32.xlu0 %v15276_v27, %s11745_s4  ;;  %v4712_v40 = vsel %vm4696_vm4, %v4695_v54, %v4598_v59 }
 0x55b   :  { %v4662_v51 = vpop.permute.xlu1 %4661 }
 0x55c   :  { %v4729_v28 = vsel %vm4713_vm5, %v4712_v40, %v4662_v51 }
 0x55d   :  { %v4749_v19 = vmul.f32 %v15036_v55, %v4729_v28  ;;  %4908 = vrot.lane.b32.xlu0 %v15276_v27, %s11747_s5 }
 0x55f   :  { %v15292_v37 = vadd.f32 %v15058_v9, %v4749_v19 }
 0x561   :  { %4866 = vrot.lane.b32.xlu0 %v15292_v37, %s11745_s4  ;;  %4818 = vrot.lane.b32.xlu1 %v15292_v37, %s11746_s23 }
 0x565   :  { %4914 = vrot.lane.b32.xlu1 %v15292_v37, %s11747_s5 }
 0x567   :  { %v4596_v1 = vpop.permute.xlu1 %4595  ;;  %v4532_v5 = vpop.permute.xlu0 %4531 }
 0x568   :  { %v4694_v8 = vsel %vm4679_vm3, %v4415_v48, %v4532_v5 }
 0x569   :  { %v4711_v45 = vsel %vm4696_vm4, %v4694_v8, %v4596_v1 }
 0x56b   :  { %v4791_v52 = vpop.permute.xlu1 %4790  ;;  %v4660_v42 = vpop.permute.xlu0 %4659 }
 0x56c   :  { %v4728_v62 = vsel %vm4713_vm5, %v4711_v45, %v4660_v42 }
 0x56d   :  { %v4748_v17 = vmul.f32 %v15036_v55, %v4728_v62 }
 0x56f   :  { %v15308_v15 = vadd.f32 %v15058_v9, %v4748_v17  ;;  %v4839_v26 = vpop.permute.xlu1 %4838  ;;  %v4789_v11 = vpop.permute.xlu0 %4788 }
 0x570   :  { %v5000_v48 = vcombine.low %v15064_v23, %v4839_v26  ;;  %v5001_v43 = vcombine.high %v15064_v23, %v4839_v26 }
 0x571   :  { %4816 = vrot.lane.b32.xlu0 %v15308_v15, %s11746_s23 }
 0x572   :  { %v5008_v9 = vrot.slane %v5000_v48, %v20070_v6  ;;  %v5015_v7 = vrot.slane %v5001_v43, %v20070_v6  ;;  %v20265_v48 = vmov 0.0  }
 0x573   :  { %v4887_v58 = vpop.permute.xlu1 %4886  ;;  %v4837_v29 = vpop.permute.xlu0 %4836 }
 0x574   :  { %v5016_v56 = vcombine.low %v4791_v52, %v4887_v58  ;;  %v5017_v39 = vcombine.high %v4791_v52, %v4887_v58  ;;  %v4932_v23 = vcombine.low %v15077_v2, %v4837_v29  ;;  %v4933_v44 = vcombine.high %v15077_v2, %v4837_v29 }
 0x575   :  { %4864 = vrot.lane.b32.xlu0 %v15308_v15, %s11745_s4 }
 0x576   :  { %v5024_v55 = vrot.slane %v5016_v56, %v20070_v6  ;;  %v5031_v38 = vrot.slane %v5017_v39, %v20070_v6  ;;  %v4940_v60 = vrot.slane %v4932_v23, %v20070_v6  ;;  %v4947_v16 = vrot.slane %v4933_v44, %v20070_v6 }
 0x577   :  { %v4885_v50 = vpop.permute.xlu0 %4884  ;;  %v4795_v49 = vpop.permute.xlu1 %4794 }
 0x578   :  { %v5032_v34 = vcombine.low %v5008_v9, %v5024_v55  ;;  %v5033_v22 = vcombine.high %v5008_v9, %v5024_v55  ;;  %v4948_v31 = vcombine.low %v4789_v11, %v4885_v50  ;;  %v5048_v33 = vcombine.low %v5015_v7, %v5031_v38 }
 0x579   :  { %4912 = vrot.lane.b32.xlu0 %v15308_v15, %s11747_s5  ;;  %v4949_v20 = vcombine.high %v4789_v11, %v4885_v50  ;;  %v5049_v41 = vcombine.high %v5015_v7, %v5031_v38 }
 0x57a   :  { %v15322_v21 = vrot.slane %v5032_v34, %v20082_v36  ;;  %v15328_v53 = vrot.slane %v5033_v22, %v20082_v36  ;;  %v4956_v14 = vrot.slane %v4948_v31, %v20070_v6  ;;  %v15337_v46 = vrot.slane %v5048_v33, %v20082_v36 }
 0x57b   :  { %v4843_v30 = vpop.permute.xlu1 %4842  ;;  %v4963_v35 = vrot.slane %v4949_v20, %v20070_v6  ;;  %v15344_v59 = vrot.slane %v5049_v41, %v20082_v36  ;;  %v4793_v43 = vpop.permute.xlu0 %4792 }
 0x57c   :  { %v6044_v32 = vsel %vm1733_vm2, %v15322_v21, 0.0  ;;  %v6050_v25 = vsel %vm1733_vm2, %v15328_v53, 0.0  ;;  %v4964_v12 = vcombine.low %v4940_v60, %v4956_v14  ;;  %v6056_v2 = vsel %vm1733_vm2, %v15337_v46, 0.0 }
 0x57d   :  { %v4980_v54 = vcombine.low %v4947_v16, %v4963_v35  ;;  %v4965_v51 = vcombine.high %v4940_v60, %v4956_v14  ;;  %v4981_v19 = vcombine.high %v4947_v16, %v4963_v35  ;;  %v6062_v5 = vsel %vm1733_vm2, %v15344_v59, 0.0 }
 0x57e   :  { %v15347_v28 = vrot.slane %v4964_v12, %v20082_v36  ;;  %v5136_v52 = vcombine.low %v15100_v0, %v4843_v30  ;;  %v15371_v55 = vcombine.high %v15322_v21, %v20265_v48  ;;  %v5137_v38 = vcombine.high %v15100_v0, %v4843_v30 }
 0x57f   :  { %v4891_v40 = vpop.permute.xlu1 %4890  ;;  %v15352_v8 = vrot.slane %v4980_v54, %v20082_v36  ;;  %v15358_v42 = vrot.slane %v4965_v51, %v20082_v36  ;;  %v15364_v26 = vrot.slane %v4981_v19, %v20082_v36  ;;  %v15399_v44 = vcombine.high %v15337_v46, %v20265_v48 }
 0x580   :  { %v5152_v1 = vcombine.low %v4795_v49, %v4891_v40  ;;  %v6020_v45 = vsel %vm1733_vm2, %v15347_v28, 0.0  ;;  %v5144_v11 = vrot.slane %v5136_v52, %v20070_v6  ;;  %v5153_v9 = vcombine.high %v4795_v49, %v4891_v40 }
 0x581   :  { %v6032_v17 = vsel %vm1733_vm2, %v15352_v8, 0.0  ;;  %v6026_v56 = vsel %vm1733_vm2, %v15358_v42, 0.0  ;;  %v6038_v39 = vsel %vm1733_vm2, %v15364_v26, 0.0  ;;  %v15377_v34 = vcombine.high %v15347_v28, %v20265_v48 }
 0x582   :  { %v5160_v62 = vrot.slane %v5152_v1, %v20070_v6  ;;  %v6047_v50 = vsel %vm1733_vm2, %v15371_v55, 0.0  ;;  %v15386_v49 = vcombine.high %v15328_v53, %v20265_v48  ;;  %v5167_v7 = vrot.slane %v5153_v9, %v20070_v6 }
 0x583   :  { %v4841_v58 = vpop.permute.xlu1 %4840  ;;  %20266 = vst [vmem:[#allocation141_spill] sm:$0xff] %v15377_v34  ;;  %v6023_v33 = vsel %vm1733_vm2, %v15377_v34, 0.0  ;;  %v5151_v0 = vrot.slane %v5137_v38, %v20070_v6  ;;  %v6059_v16 = vsel %vm1733_vm2, %v15399_v44, 0.0  ;;  %v15413_v12 = vcombine.high %v15344_v59, %v20265_v48 }
 0x584   :  { %v5168_v29 = vcombine.low %v5144_v11, %v5160_v62  ;;  %v5169_v31 = vcombine.high %v5144_v11, %v5160_v62  ;;  %v6053_v23 = vsel %vm1733_vm2, %v15386_v49, 0.0  ;;  %v5068_v30 = vcombine.low %v15110_v57, %v4841_v58 }
 0x585   :  { %v5184_v14 = vcombine.low %v5151_v0, %v5167_v7  ;;  %20268 = vst [vmem:[#allocation113_spill] sm:$0xff] %v15413_v12  ;;  %v5185_v54 = vcombine.high %v5151_v0, %v5167_v7  ;;  %v15426_v52 = vcombine.high %v15358_v42, %v20265_v48 }
 0x586   :  { %v15392_v20 = vrot.slane %v5168_v29, %v20082_v36  ;;  %v15405_v35 = vrot.slane %v5169_v31, %v20082_v36  ;;  %v15438_v29 = vcombine.high %v15352_v8, %v20265_v48  ;;  %v15453_v31 = vcombine.high %v15364_v26, %v20265_v48 }
 0x587   :  { %v15380_v22 = vpop.permute.xlu1 %4798  ;;  %v15419_v51 = vrot.slane %v5184_v14, %v20082_v36  ;;  %20270 = vst [vmem:[#allocation146_spill] sm:$0xff] %v15426_v52  ;;  %v15432_v11 = vrot.slane %v5185_v54, %v20082_v36  ;;  %v6029_v9 = vsel %vm1733_vm2, %v15426_v52, 0.0 }
 0x588   :  { %v6092_v41 = vsel %vm1733_vm2, %v15392_v20, 0.0  ;;  %20267 = vst [vmem:[#allocation143_spill] sm:$0xff] %v15405_v35  ;;  %v6098_v40 = vsel %vm1733_vm2, %v15405_v35, 0.0  ;;  %20272 = vst [vmem:[#allocation43_spill] sm:$0xff] %v15438_v29  ;;  %v6035_v7 = vsel %vm1733_vm2, %v15438_v29, 0.0 }
 0x589   :  { %6045 = vadd.xlane.f32.xlu1 %v6044_v32  ;;  %v4889_v32 = vpop.permute.xlu0 %4888  ;;  %20269 = vst [vmem:[#allocation144_spill] sm:$0xff] %v15419_v51  ;;  %20271 = vst [vmem:[#allocation114_spill] sm:$0xff] %v15432_v11 }
 0x58a   :  { %v5084_v60 = vcombine.low %v4793_v43, %v4889_v32  ;;  %20274 = vst [vmem:[#allocation147_spill] sm:$0xff] %v15453_v31 }
 0x58c   :  { %v5092_v19 = vrot.slane %v5084_v60, %v20070_v6  ;;  %v15469_v60 = vcombine.high %v15392_v20, %v20265_v48 }
 0x58d   :  { %6051 = vadd.xlane.f32.xlu1 %v6050_v25  ;;  %v15407_v25 = vpop.permute.xlu1 %4846 }
 0x58e   :  { %v5272_v14 = vcombine.low %v15136_v47, %v15407_v25  ;;  %20276 = vst [vmem:[#allocation83_spill] sm:$0xff] %v15469_v60 }
 0x591   :  { %6057 = vadd.xlane.f32.xlu1 %v6056_v2  ;;  %v5076_v2 = vrot.slane %v5068_v30, %v20070_v6  ;;  %v4895_v1 = vpop.permute.xlu1 %4894 }
 0x592   :  { %v5288_v0 = vcombine.low %v15380_v22, %v4895_v1 }
 0x593   :  { %v5100_v62 = vcombine.low %v5076_v2, %v5092_v19 }
 0x594   :  { %v5296_v54 = vrot.slane %v5288_v0, %v20070_v6 }
 0x595   :  { %6063 = vadd.xlane.f32.xlu1 %v6062_v5  ;;  %v6065_v5 = vsel %vm1733_vm2, %v15413_v12, 0.0  ;;  %v15444_v38 = vrot.slane %v5100_v62, %v20082_v36  ;;  %v15484_v62 = vcombine.high %v15405_v35, %v20265_v48 }
 0x597   :  { %20273 = vst [vmem:[#allocation145_spill] sm:$0xff] %v15444_v38  ;;  %20278 = vst [vmem:[#allocation8_spill] sm:$0xff] %v15484_v62 }
 0x598   :  { %6021 = vadd.xlane.f32.xlu0 %v6020_v45  ;;  %v5069_v45 = vcombine.high %v15110_v57, %v4841_v58  ;;  %v5101_v57 = vcombine.high %v5076_v2, %v5092_v19  ;;  %v6110_v58 = vsel %vm1733_vm2, %v15432_v11, 0.0  ;;  %v5280_v19 = vrot.slane %v5272_v14, %v20070_v6 }
 0x599   :  { %6033 = vadd.xlane.f32.xlu1 %v6032_v17  ;;  %v6104_v17 = vsel %vm1733_vm2, %v15419_v51, 0.0 }
 0x59c   :  { %6027 = vadd.xlane.f32.xlu0 %v6026_v56  ;;  %v5085_v56 = vcombine.high %v4793_v43, %v4889_v32  ;;  %v6068_v32 = vsel %vm1733_vm2, %v15444_v38, 0.0 }
 0x59d   :  { %6039 = vadd.xlane.f32.xlu1 %v6038_v39  ;;  %v5083_v39 = vrot.slane %v5069_v45, %v20070_v6  ;;  %v6095_v45 = vsel %vm1733_vm2, %v15469_v60, 0.0 }
 0x59e   :  { %v5099_v43 = vrot.slane %v5085_v56, %v20070_v6  ;;  %v5304_v56 = vcombine.low %v5280_v19, %v5296_v54 }
 0x5a0   :  { %6048 = vadd.xlane.f32.xlu0 %v6047_v50  ;;  %v15446_v50 = vpop.permute.xlu1 %4796  ;;  %v15504_v0 = vrot.slane %v5304_v56, %v20082_v36 }
 0x5a1   :  { %6024 = vadd.xlane.f32.xlu1 %v6023_v33  ;;  %v5116_v33 = vcombine.low %v5083_v39, %v5099_v43 }
 0x5a2   :  { %20281 = vst [vmem:[#allocation9_spill] sm:$0xff] %v15504_v0 }
 0x5a4   :  { %6054 = vadd.xlane.f32.xlu0 %v6053_v23  ;;  %v15459_v23 = vrot.slane %v5101_v57, %v20082_v36  ;;  %v15463_v30 = vpop.permute.xlu1 %4844 }
 0x5a5   :  { %6093 = vadd.xlane.f32.xlu1 %v6092_v41  ;;  %v6041_v41 = vsel %vm1733_vm2, %v15453_v31, 0.0 }
 0x5a6   :  { %20275 = vst [vmem:[#allocation148_spill] sm:$0xff] %v15459_v23  ;;  %v6074_v2 = vsel %vm1733_vm2, %v15459_v23, 0.0 }
 0x5a8   :  { %6060 = vadd.xlane.f32.xlu0 %v6059_v16  ;;  %v5117_v16 = vcombine.high %v5083_v39, %v5099_v43  ;;  %v4893_v57 = vpop.permute.xlu1 %4892  ;;  %v6101_v43 = vsel %vm1733_vm2, %v15484_v62, 0.0 }
 0x5a9   :  { %6099 = vadd.xlane.f32.xlu1 %v6098_v40  ;;  %v15475_v40 = vrot.slane %v5116_v33, %v20082_v36 }
 0x5aa   :  { %v15490_v39 = vrot.slane %v5117_v16, %v20082_v36 }
 0x5ab   :  { %20277 = vst [vmem:[#allocation7_spill] sm:$0xff] %v15475_v40 }
 0x5ac   :  { %6066 = vadd.xlane.f32.xlu0 %v6065_v5  ;;  %v15478_v5 = vpop.permute.xlu0 %4806  ;;  %20279 = vst [vmem:[#allocation117_spill] sm:$0xff] %v15490_v39  ;;  %v6086_v33 = vsel %vm1733_vm2, %v15490_v39, 0.0  ;;  %v15577_v62 = vcombine.high %v15490_v39, %v20265_v48 }
 0x5ad   :  { %6105 = vadd.xlane.f32.xlu1 %v6104_v17  ;;  %v5289_v17 = vcombine.high %v15380_v22, %v4895_v1  ;;  %v5305_v1 = vcombine.high %v5280_v19, %v5296_v54  ;;  %v5220_v54 = vcombine.low %v15446_v50, %v4893_v57 }
 0x5ae   :  { %20290 = vst [vmem:[#allocation91_spill] sm:$0xff] %v15577_v62 }
 0x5af   :  { %v5303_v22 = vrot.slane %v5289_v17, %v20070_v6  ;;  %v15521_v19 = vrot.slane %v5305_v1, %v20082_v36 }
 0x5b0   :  { %6030 = vadd.xlane.f32.xlu0 %v6029_v9  ;;  %v6080_v9 = vsel %vm1733_vm2, %v15475_v40, 0.0 }
 0x5b1   :  { %6111 = vadd.xlane.f32.xlu1 %v6110_v58  ;;  %v5273_v58 = vcombine.high %v15136_v47, %v15407_v25  ;;  %v15509_v25 = vpop.permute.xlu1 %4802  ;;  %20283 = vst [vmem:[#allocation120_spill] sm:$0xff] %v15521_v19  ;;  %v6146_v1 = vsel %vm1733_vm2, %v15521_v19, 0.0 }
 0x5b3   :  { %v5287_v47 = vrot.slane %v5273_v58, %v20070_v6 }
 0x5b4   :  { %6036 = vadd.xlane.f32.xlu0 %v6035_v7  ;;  %v15498_v7 = vcombine.high %v15419_v51, %v20265_v48 }
 0x5b5   :  { %6069 = vadd.xlane.f32.xlu1 %v6068_v32  ;;  %v15506_v32 = vpop.permute.xlu0 %4902  ;;  %v5320_v16 = vcombine.low %v5287_v47, %v5303_v22  ;;  %v5321_v58 = vcombine.high %v5287_v47, %v5303_v22  ;;  %v15546_v22 = vcombine.high %v15459_v23, %v20265_v48  ;;  %v5221_v47 = vcombine.high %v15446_v50, %v4893_v57 }
 0x5b6   :  { %20280 = vst [vmem:[#allocation118_spill] sm:$0xff] %v15498_v7  ;;  %v6107_v14 = vsel %vm1733_vm2, %v15498_v7, 0.0  ;;  %v15562_v50 = vcombine.high %v15475_v40, %v20265_v48 }
 0x5b7   :  { %20286 = vst [vmem:[#allocation121_spill] sm:$0xff] %v15546_v22  ;;  %v6077_v7 = vsel %vm1733_vm2, %v15546_v22, 0.0  ;;  %v5235_v57 = vrot.slane %v5221_v47, %v20070_v6 }
 0x5b8   :  { %6042 = vadd.xlane.f32.xlu0 %v6041_v41  ;;  %v15515_v41 = vcombine.high %v15432_v11, %v20265_v48  ;;  %20288 = vst [vmem:[#allocation124_spill] sm:$0xff] %v15562_v50  ;;  %v6083_v22 = vsel %vm1733_vm2, %v15562_v50, 0.0  ;;  %v15593_v50 = vcombine.high %v15504_v0, %v20265_v48 }
 0x5b9   :  { %6075 = vadd.xlane.f32.xlu1 %v6074_v2  ;;  %v6140_v2 = vsel %vm1733_vm2, %v15504_v0, 0.0  ;;  %v15525_v17 = vpop.permute.xlu0 %4852 }
 0x5ba   :  { %20282 = vst [vmem:[#allocation86_spill] sm:$0xff] %v15515_v41  ;;  %v6113_v56 = vsel %vm1733_vm2, %v15515_v41, 0.0  ;;  %20292 = vst [vmem:[#allocation14_spill] sm:$0xff] %v15593_v50  ;;  %v6143_v0 = vsel %vm1733_vm2, %v15593_v50, 0.0 }
 0x5bc   :  { %6096 = vadd.xlane.f32.xlu0 %v6095_v45  ;;  %v5204_v45 = vcombine.low %v15175_v13, %v15463_v30 }
 0x5bd   :  { %6081 = vadd.xlane.f32.xlu1 %v6080_v9  ;;  %v15531_v9 = vcombine.high %v15444_v38, %v20265_v48 }
 0x5bf   :  { %20284 = vst [vmem:[#allocation10_spill] sm:$0xff] %v15531_v9  ;;  %v6071_v41 = vsel %vm1733_vm2, %v15531_v9, 0.0 }
 0x5c0   :  { %6102 = vadd.xlane.f32.xlu0 %v6101_v43  ;;  %v5228_v43 = vrot.slane %v5220_v54, %v20070_v6 }
 0x5c1   :  { %6087 = vadd.xlane.f32.xlu1 %v6086_v33  ;;  %v15537_v33 = vrot.slane %v5320_v16, %v20082_v36 }
 0x5c3   :  { %20285 = vst [vmem:[#allocation11_spill] sm:$0xff] %v15537_v33  ;;  %v6152_v16 = vsel %vm1733_vm2, %v15537_v33, 0.0 }
 0x5c4   :  { %6108 = vadd.xlane.f32.xlu0 %v6107_v14  ;;  %v15539_v14 = vpop.permute.xlu1 %4850 }
 0x5c5   :  { %6141 = vadd.xlane.f32.xlu1 %v6140_v2  ;;  %v5212_v2 = vrot.slane %v5204_v45, %v20070_v6  ;;  %v5205_v45 = vcombine.high %v15175_v13, %v15463_v30 }
 0x5c7   :  { %v5236_v54 = vcombine.low %v5212_v2, %v5228_v43  ;;  %v5219_v13 = vrot.slane %v5205_v45, %v20070_v6  ;;  %v5408_v45 = vcombine.low %v15207_v4, %v15539_v14 }
 0x5c8   :  { %6114 = vadd.xlane.f32.xlu0 %v6113_v56  ;;  %v15552_v56 = vrot.slane %v5321_v58, %v20082_v36  ;;  %v4899_v9 = vpop.permute.xlu1 %4898 }
 0x5c9   :  { %6147 = vadd.xlane.f32.xlu1 %v6146_v1  ;;  %v15554_v1 = vpop.permute.xlu0 %4810  ;;  %v5416_v60 = vrot.slane %v5408_v45, %v20070_v6  ;;  %v5409_v45 = vcombine.high %v15207_v4, %v15539_v14 }
 0x5ca   :  { %20287 = vst [vmem:[#allocation123_spill] sm:$0xff] %v15552_v56  ;;  %v6158_v58 = vsel %vm1733_vm2, %v15552_v56, 0.0 }
 0x5cb   :  { %v5423_v14 = vrot.slane %v5409_v45, %v20070_v6 }
 0x5cc   :  { %6072 = vadd.xlane.f32.xlu0 %v6071_v41  ;;  %v5237_v41 = vcombine.high %v5212_v2, %v5228_v43  ;;  %v5252_v43 = vcombine.low %v5219_v13, %v5235_v57 }
 0x5cd   :  { %6153 = vadd.xlane.f32.xlu1 %v6152_v16  ;;  %v15568_v16 = vrot.slane %v5236_v54, %v20082_v36  ;;  %v15571_v30 = vpop.permute.xlu0 %4858  ;;  %v15585_v54 = vpop.permute.xlu1 %4800 }
 0x5ce   :  { %v15583_v47 = vrot.slane %v5237_v41, %v20082_v36  ;;  %v15599_v40 = vrot.slane %v5252_v43, %v20082_v36 }
 0x5cf   :  { %20289 = vst [vmem:[#allocation12_spill] sm:$0xff] %v15568_v16  ;;  %v6116_v2 = vsel %vm1733_vm2, %v15568_v16, 0.0 }
 0x5d0   :  { %6078 = vadd.xlane.f32.xlu0 %v6077_v7  ;;  %v5424_v7 = vcombine.low %v15509_v25, %v4899_v9  ;;  %20291 = vst [vmem:[#allocation13_spill] sm:$0xff] %v15583_v47  ;;  %v6122_v41 = vsel %vm1733_vm2, %v15583_v47, 0.0  ;;  %20293 = vst [vmem:[#allocation92_spill] sm:$0xff] %v15599_v40  ;;  %v6128_v43 = vsel %vm1733_vm2, %v15599_v40, 0.0 }
 0x5d1   :  { %6159 = vadd.xlane.f32.xlu1 %v6158_v58  ;;  %v6089_v58 = vsel %vm1733_vm2, %v15577_v62, 0.0  ;;  %v4849_v62 = vpop.permute.xlu1 %4848 }
 0x5d2   :  { %v5432_v39 = vrot.slane %v5424_v7, %v20070_v6  ;;  %v5340_v45 = vcombine.low %v15236_v24, %v4849_v62 }
 0x5d4   :  { %6084 = vadd.xlane.f32.xlu0 %v6083_v22  ;;  %v5253_v22 = vcombine.high %v5219_v13, %v5235_v57  ;;  %v15608_v57 = vcombine.high %v15521_v19, %v20265_v48  ;;  %v5425_v13 = vcombine.high %v15509_v25, %v4899_v9  ;;  %v5440_v7 = vcombine.low %v5416_v60, %v5432_v39 }
 0x5d5   :  { %6117 = vadd.xlane.f32.xlu1 %v6116_v2  ;;  %v15601_v2 = vpop.permute.xlu0 %4906  ;;  %v15624_v25 = vcombine.high %v15537_v33, %v20265_v48  ;;  %v5441_v9 = vcombine.high %v5416_v60, %v5432_v39  ;;  %v4897_v4 = vpop.permute.xlu1 %4896  ;;  %v15637_v33 = vcombine.high %v15552_v56, %v20265_v48 }
 0x5d6   :  { %20294 = vst [vmem:[#allocation95_spill] sm:$0xff] %v15608_v57  ;;  %v6149_v50 = vsel %vm1733_vm2, %v15608_v57, 0.0  ;;  %v5356_v60 = vcombine.low %v15585_v54, %v4897_v4 }
 0x5d7   :  { %20296 = vst [vmem:[#allocation126_spill] sm:$0xff] %v15624_v25  ;;  %v6155_v57 = vsel %vm1733_vm2, %v15624_v25, 0.0  ;;  %20298 = vst [vmem:[#allocation128_spill] sm:$0xff] %v15637_v33  ;;  %v15652_v25 = vcombine.high %v15568_v16, %v20265_v48 }
 0x5d8   :  { %6090 = vadd.xlane.f32.xlu0 %v6089_v58  ;;  %v15614_v58 = vrot.slane %v5253_v22, %v20082_v36 }
 0x5d9   :  { %6123 = vadd.xlane.f32.xlu1 %v6122_v41  ;;  %v15618_v41 = vpop.permute.xlu0 %4808  ;;  %20300 = vst [vmem:[#allocation17_spill] sm:$0xff] %v15652_v25 }
 0x5da   :  { %20295 = vst [vmem:[#allocation125_spill] sm:$0xff] %v15614_v58  ;;  %v6134_v22 = vsel %vm1733_vm2, %v15614_v58, 0.0 }
 0x5dc   :  { %6144 = vadd.xlane.f32.xlu0 %v6143_v0  ;;  %v5439_v0 = vrot.slane %v5425_v13, %v20070_v6 }
 0x5dd   :  { %6129 = vadd.xlane.f32.xlu1 %v6128_v43  ;;  %v15630_v43 = vrot.slane %v5440_v7, %v20082_v36  ;;  %v15645_v7 = vpop.permute.xlu0 %4856 }
 0x5de   :  { %v5456_v13 = vcombine.low %v5423_v14, %v5439_v0  ;;  %v5457_v56 = vcombine.high %v5423_v14, %v5439_v0  ;;  %v15667_v0 = vcombine.high %v15583_v47, %v20265_v48  ;;  %v5357_v14 = vcombine.high %v15585_v54, %v4897_v4 }
 0x5df   :  { %20297 = vst [vmem:[#allocation127_spill] sm:$0xff] %v15630_v43  ;;  %v6188_v39 = vsel %vm1733_vm2, %v15630_v43, 0.0  ;;  %v15682_v47 = vcombine.high %v15599_v40, %v20265_v48 }
 0x5e0   :  { %6150 = vadd.xlane.f32.xlu0 %v6149_v50  ;;  %v15643_v50 = vrot.slane %v5441_v9, %v20082_v36  ;;  %v15658_v19 = vrot.slane %v5456_v13, %v20082_v36  ;;  %20302 = vst [vmem:[#allocation66_spill] sm:$0xff] %v15667_v0 }
 0x5e1   :  { %6135 = vadd.xlane.f32.xlu1 %v6134_v22  ;;  %v6161_v22 = vsel %vm1733_vm2, %v15637_v33, 0.0  ;;  %v15661_v23 = vpop.permute.xlu0 %4904  ;;  %v6119_v33 = vsel %vm1733_vm2, %v15652_v25, 0.0  ;;  %v6125_v25 = vsel %vm1733_vm2, %v15667_v0, 0.0  ;;  %20304 = vst [vmem:[#allocation129_spill] sm:$0xff] %v15682_v47  ;;  %v15695_v0 = vcombine.high %v15614_v58, %v20265_v48 }
 0x5e2   :  { %20299 = vst [vmem:[#allocation98_spill] sm:$0xff] %v15643_v50  ;;  %v6194_v9 = vsel %vm1733_vm2, %v15643_v50, 0.0  ;;  %20301 = vst [vmem:[#allocation16_spill] sm:$0xff] %v15658_v19  ;;  %v6200_v13 = vsel %vm1733_vm2, %v15658_v19, 0.0 }
 0x5e3   :  { %20306 = vst [vmem:[#allocation22_spill] sm:$0xff] %v15695_v0 }
 0x5e4   :  { %6156 = vadd.xlane.f32.xlu0 %v6155_v57  ;;  %v5364_v57 = vrot.slane %v5356_v60, %v20070_v6 }
 0x5e5   :  { %6189 = vadd.xlane.f32.xlu1 %v6188_v39  ;;  %v5348_v39 = vrot.slane %v5340_v45, %v20070_v6  ;;  %v5341_v45 = vcombine.high %v15236_v24, %v4849_v62  ;;  %v4855_v24 = vpop.permute.xlu1 %4854 }
 0x5e7   :  { %v5372_v60 = vcombine.low %v5348_v39, %v5364_v57  ;;  %v5373_v54 = vcombine.high %v5348_v39, %v5364_v57  ;;  %v5355_v62 = vrot.slane %v5341_v45, %v20070_v6  ;;  %v5560_v45 = vcombine.low %v15478_v5, %v15506_v32 }
 0x5e8   :  { %6162 = vadd.xlane.f32.xlu0 %v6161_v22  ;;  %v15673_v22 = vrot.slane %v5457_v56, %v20082_v36 }
 0x5e9   :  { %6195 = vadd.xlane.f32.xlu1 %v6194_v9  ;;  %v15676_v9 = vpop.permute.xlu0 %4814  ;;  %v15688_v4 = vrot.slane %v5372_v60, %v20082_v36  ;;  %v15701_v39 = vrot.slane %v5373_v54, %v20082_v36  ;;  %v4805_v16 = vpop.permute.xlu1 %4804 }
 0x5ea   :  { %20303 = vst [vmem:[#allocation15_spill] sm:$0xff] %v15673_v22  ;;  %v6206_v56 = vsel %vm1733_vm2, %v15673_v22, 0.0 }
 0x5eb   :  { %20305 = vst [vmem:[#allocation20_spill] sm:$0xff] %v15688_v4  ;;  %v6164_v57 = vsel %vm1733_vm2, %v15688_v4, 0.0  ;;  %20307 = vst [vmem:[#allocation130_spill] sm:$0xff] %v15701_v39  ;;  %v6170_v54 = vsel %vm1733_vm2, %v15701_v39, 0.0 }
 0x5ec   :  { %6120 = vadd.xlane.f32.xlu0 %v6119_v33  ;;  %v5371_v33 = vrot.slane %v5357_v14, %v20070_v6 }
 0x5ed   :  { %6201 = vadd.xlane.f32.xlu1 %v6200_v13  ;;  %v6131_v13 = vsel %vm1733_vm2, %v15682_v47, 0.0  ;;  %v15703_v60 = vpop.permute.xlu0 %4862  ;;  %v15711_v47 = vcombine.high %v15630_v43, %v20265_v48 }
 0x5ee   :  { %v5388_v14 = vcombine.low %v5355_v62, %v5371_v33 }
 0x5ef   :  { %20308 = vst [vmem:[#allocation69_spill] sm:$0xff] %v15711_v47  ;;  %v6191_v43 = vsel %vm1733_vm2, %v15711_v47, 0.0 }
 0x5f0   :  { %6126 = vadd.xlane.f32.xlu0 %v6125_v25  ;;  %v5544_v25 = vcombine.low %v15140_v3, %v4855_v24  ;;  %v15717_v40 = vrot.slane %v5388_v14, %v20082_v36 }
 0x5f1   :  { %6207 = vadd.xlane.f32.xlu1 %v6206_v56  ;;  %v6137_v56 = vsel %vm1733_vm2, %v15695_v0, 0.0  ;;  %v15720_v31 = vpop.permute.xlu0 %4910 }
 0x5f2   :  { %v5552_v58 = vrot.slane %v5544_v25, %v20070_v6  ;;  %20309 = vst [vmem:[#allocation71_spill] sm:$0xff] %v15717_v40  ;;  %v6176_v14 = vsel %vm1733_vm2, %v15717_v40, 0.0 }
 0x5f4   :  { %6132 = vadd.xlane.f32.xlu0 %v6131_v13  ;;  %v5389_v13 = vcombine.high %v5355_v62, %v5371_v33  ;;  %v15726_v33 = vcombine.high %v15643_v50, %v20265_v48  ;;  %v5545_v62 = vcombine.high %v15140_v3, %v4855_v24  ;;  %v15742_v3 = vcombine.high %v15658_v19, %v20265_v48 }
 0x5f5   :  { %6165 = vadd.xlane.f32.xlu1 %v6164_v57  ;;  %v5568_v57 = vrot.slane %v5560_v45, %v20070_v6  ;;  %v5561_v45 = vcombine.high %v15478_v5, %v15506_v32  ;;  %v4901_v5 = vpop.permute.xlu1 %4900  ;;  %v15755_v19 = vcombine.high %v15673_v22, %v20265_v48 }
 0x5f6   :  { %20310 = vst [vmem:[#allocation74_spill] sm:$0xff] %v15726_v33  ;;  %v6197_v47 = vsel %vm1733_vm2, %v15726_v33, 0.0  ;;  %20312 = vst [vmem:[#allocation26_spill] sm:$0xff] %v15742_v3  ;;  %v6203_v33 = vsel %vm1733_vm2, %v15742_v3, 0.0  ;;  %v15770_v3 = vcombine.high %v15688_v4, %v20265_v48 }
 0x5f7   :  { %v5576_v25 = vcombine.low %v5552_v58, %v5568_v57  ;;  %v5577_v24 = vcombine.high %v5552_v58, %v5568_v57  ;;  %v5575_v32 = vrot.slane %v5561_v45, %v20070_v6  ;;  %20314 = vst [vmem:[#allocation18_spill] sm:$0xff] %v15755_v19  ;;  %v5492_v58 = vcombine.low %v4805_v16, %v4901_v5 }
 0x5f8   :  { %6138 = vadd.xlane.f32.xlu0 %v6137_v56  ;;  %v15732_v56 = vrot.slane %v5389_v13, %v20082_v36  ;;  %v5476_v45 = vcombine.low %v15165_v61, %v15525_v17  ;;  %20316 = vst [vmem:[#allocation132_spill] sm:$0xff] %v15770_v3 }
 0x5f9   :  { %6171 = vadd.xlane.f32.xlu1 %v6170_v54  ;;  %v15736_v54 = vpop.permute.xlu0 %4812  ;;  %v15760_v57 = vrot.slane %v5577_v24, %v20082_v36  ;;  %v5500_v22 = vrot.slane %v5492_v58, %v20070_v6 }
 0x5fa   :  { %20311 = vst [vmem:[#allocation19_spill] sm:$0xff] %v15732_v56  ;;  %v6182_v13 = vsel %vm1733_vm2, %v15732_v56, 0.0 }
 0x5fb   :  { %20315 = vst [vmem:[#allocation107_spill] sm:$0xff] %v15760_v57  ;;  %v6242_v24 = vsel %vm1733_vm2, %v15760_v57, 0.0 }
 0x5fc   :  { %6192 = vadd.xlane.f32.xlu0 %v6191_v43  ;;  %v5559_v43 = vrot.slane %v5545_v62, %v20070_v6 }
 0x5fd   :  { %6177 = vadd.xlane.f32.xlu1 %v6176_v14  ;;  %v15748_v14 = vrot.slane %v5576_v25, %v20082_v36  ;;  %v15762_v25 = vpop.permute.xlu0 %4860 }
 0x5fe   :  { %v5592_v62 = vcombine.low %v5559_v43, %v5575_v32 }
 0x5ff   :  { %20313 = vst [vmem:[#allocation24_spill] sm:$0xff] %v15748_v14 }
 0x600   :  { %6198 = vadd.xlane.f32.xlu0 %v6197_v47  ;;  %v6236_v47 = vsel %vm1733_vm2, %v15748_v14, 0.0  ;;  %v15776_v50 = vrot.slane %v5592_v62, %v20082_v36 }
 0x601   :  { %6183 = vadd.xlane.f32.xlu1 %v6182_v13  ;;  %v6209_v13 = vsel %vm1733_vm2, %v15755_v19, 0.0  ;;  %v15779_v0 = vpop.permute.xlu0 %4908  ;;  %v6167_v19 = vsel %vm1733_vm2, %v15770_v3, 0.0 }
 0x602   :  { %20317 = vst [vmem:[#allocation133_spill] sm:$0xff] %v15776_v50  ;;  %v6248_v62 = vsel %vm1733_vm2, %v15776_v50, 0.0 }
 0x604   :  { %6204 = vadd.xlane.f32.xlu0 %v6203_v33  ;;  %v5593_v33 = vcombine.high %v5559_v43, %v5575_v32  ;;  %v15785_v43 = vcombine.high %v15701_v39, %v20265_v48  ;;  %v5493_v32 = vcombine.high %v4805_v16, %v4901_v5  ;;  %v15800_v16 = vcombine.high %v15717_v40, %v20265_v48 }
 0x605   :  { %6237 = vadd.xlane.f32.xlu1 %v6236_v47  ;;  %v5484_v47 = vrot.slane %v5476_v45, %v20070_v6  ;;  %v5477_v45 = vcombine.high %v15165_v61, %v15525_v17 }
 0x606   :  { %20318 = vst [vmem:[#allocation103_spill] sm:$0xff] %v15785_v43  ;;  %v6173_v3 = vsel %vm1733_vm2, %v15785_v43, 0.0  ;;  %20320 = vst [vmem:[#allocation28_spill] sm:$0xff] %v15800_v16  ;;  %v5507_v5 = vrot.slane %v5493_v32, %v20070_v6  ;;  %v6179_v43 = vsel %vm1733_vm2, %v15800_v16, 0.0 }
 0x607   :  { %v5508_v58 = vcombine.low %v5484_v47, %v5500_v22  ;;  %v5491_v61 = vrot.slane %v5477_v45, %v20070_v6  ;;  %v5680_v45 = vcombine.low %v15188_v18, %v15571_v30 }
 0x608   :  { %6210 = vadd.xlane.f32.xlu0 %v6209_v13  ;;  %v15787_v13 = vpop.permute.xlu1 %4818 }
 0x609   :  { %6243 = vadd.xlane.f32.xlu1 %v6242_v24  ;;  %v15792_v24 = vrot.slane %v5593_v33, %v20082_v36  ;;  %v15806_v33 = vrot.slane %v5508_v58, %v20082_v36  ;;  %v5525_v4 = vcombine.high %v5491_v61, %v5507_v5  ;;  %v5688_v38 = vrot.slane %v5680_v45, %v20070_v6 }
 0x60a   :  { %v5681_v45 = vcombine.high %v15188_v18, %v15571_v30 }
 0x60b   :  { %20319 = vst [vmem:[#allocation135_spill] sm:$0xff] %v15792_v24  ;;  %v6254_v39 = vsel %vm1733_vm2, %v15792_v24, 0.0  ;;  %20321 = vst [vmem:[#allocation115_spill] sm:$0xff] %v15806_v33  ;;  %v6212_v32 = vsel %vm1733_vm2, %v15806_v33, 0.0 }
 0x60c   :  { %6168 = vadd.xlane.f32.xlu0 %v6167_v19  ;;  %v5509_v19 = vcombine.high %v5484_v47, %v5500_v22  ;;  %v15811_v17 = vpop.permute.xlu1 %4914  ;;  %v15817_v22 = vcombine.high %v15732_v56, %v20265_v48  ;;  %v5524_v47 = vcombine.low %v5491_v61, %v5507_v5  ;;  %v15853_v5 = vcombine.high %v15760_v57, %v20265_v48 }
 0x60d   :  { %6249 = vadd.xlane.f32.xlu1 %v6248_v62  ;;  %v15808_v62 = vpop.permute.xlu0 %4866  ;;  %v5695_v30 = vrot.slane %v5681_v45, %v20070_v6 }
 0x60e   :  { %20322 = vst [vmem:[#allocation137_spill] sm:$0xff] %v15817_v22  ;;  %v6185_v56 = vsel %vm1733_vm2, %v15817_v22, 0.0  ;;  %20326 = vst [vmem:[#allocation116_spill] sm:$0xff] %v15853_v5 }
 0x610   :  { %6174 = vadd.xlane.f32.xlu0 %v6173_v3  ;;  %v5696_v3 = vcombine.low %v15554_v1, %v15601_v2 }
 0x611   :  { %6255 = vadd.xlane.f32.xlu1 %v6254_v39  ;;  %v15824_v39 = vrot.slane %v5509_v19, %v20082_v36  ;;  %v15826_v58 = vpop.permute.xlu0 %4816 }
 0x612   :  { %v5704_v40 = vrot.slane %v5696_v3, %v20070_v6 }
 0x613   :  { %20323 = vst [vmem:[#allocation119_spill] sm:$0xff] %v15824_v39  ;;  %v6218_v19 = vsel %vm1733_vm2, %v15824_v39, 0.0 }
 0x614   :  { %6180 = vadd.xlane.f32.xlu0 %v6179_v43  ;;  %v15836_v43 = vcombine.high %v15748_v14, %v20265_v48  ;;  %v5712_v61 = vcombine.low %v5688_v38, %v5704_v40 }
 0x615   :  { %6213 = vadd.xlane.f32.xlu1 %v6212_v32  ;;  %v15842_v32 = vrot.slane %v5524_v47, %v20082_v36  ;;  %v15847_v22 = vpop.permute.xlu0 %4864  ;;  %v15860_v47 = vrot.slane %v5525_v4, %v20082_v36 }
 0x616   :  { %v15830_v16 = vpop.xlane.xlu1 %6045  ;;  %20324 = vst [vmem:[#allocation140_spill] sm:$0xff] %v15836_v43  ;;  %v6239_v14 = vsel %vm1733_vm2, %v15836_v43, 0.0  ;;  %v6245_v43 = vsel %vm1733_vm2, %v15853_v5, 0.0 }
 0x617   :  { %20325 = vst [vmem:[#allocation27_spill] sm:$0xff] %v15842_v32  ;;  %v6224_v3 = vsel %vm1733_vm2, %v15842_v32, 0.0  ;;  %20327 = vst [vmem:[#allocation25_spill] sm:$0xff] %v15860_v47  ;;  %v6230_v4 = vsel %vm1733_vm2, %v15860_v47, 0.0 }
 0x618   :  { %6186 = vadd.xlane.f32.xlu0 %v6185_v56  ;;  %v5697_v56 = vcombine.high %v15554_v1, %v15601_v2  ;;  %v15870_v1 = vcombine.high %v15776_v50, %v20265_v48 }
 0x619   :  { %6219 = vadd.xlane.f32.xlu1 %v6218_v19  ;;  %v15878_v18 = vpop.permute.xlu0 %4912 }
 0x61a   :  { %v15845_v29 = vpop.xlane.xlu1 %6051  ;;  %20328 = vst [vmem:[#allocation30_spill] sm:$0xff] %v15870_v1  ;;  %v5711_v2 = vrot.slane %v5697_v56, %v20070_v6  ;;  %v6251_v50 = vsel %vm1733_vm2, %v15870_v1, 0.0 }
 0x61c   :  { %6240 = vadd.xlane.f32.xlu0 %v6239_v14  ;;  %v5713_v14 = vcombine.high %v5688_v38, %v5704_v40  ;;  %v15887_v38 = vcombine.high %v15792_v24, %v20265_v48  ;;  %v5728_v40 = vcombine.low %v5695_v30, %v5711_v2  ;;  %v5729_v57 = vcombine.high %v5695_v30, %v5711_v2 }
 0x61d   :  { %6225 = vadd.xlane.f32.xlu1 %v6224_v3  ;;  %v15876_v3 = vrot.slane %v5712_v61, %v20082_v36  ;;  %v15923_v2 = vcombine.high %v15824_v39, %v20265_v48 }
 0x61e   :  { %v15864_v19 = vpop.xlane.xlu1 %6057  ;;  %20330 = vst [vmem:[#allocation33_spill] sm:$0xff] %v15887_v38  ;;  %v15894_v61 = vrot.slane %v5713_v14, %v20082_v36  ;;  %v6257_v24 = vsel %vm1733_vm2, %v15887_v38, 0.0 }
 0x61f   :  { %20329 = vst [vmem:[#allocation29_spill] sm:$0xff] %v15876_v3  ;;  %v6284_v56 = vsel %vm1733_vm2, %v15876_v3, 0.0  ;;  %20334 = vst [vmem:[#allocation36_spill] sm:$0xff] %v15923_v2  ;;  %v6221_v39 = vsel %vm1733_vm2, %v15923_v2, 0.0 }
 0x620   :  { %6246 = vadd.xlane.f32.xlu0 %v6245_v43  ;;  %v5628_v43 = vcombine.low %v15618_v41, %v15661_v23  ;;  %20331 = vst [vmem:[#allocation122_spill] sm:$0xff] %v15894_v61  ;;  %v6290_v14 = vsel %vm1733_vm2, %v15894_v61, 0.0 }
 0x621   :  { %6231 = vadd.xlane.f32.xlu1 %v6230_v4  ;;  %v5612_v4 = vcombine.low %v15224_v63, %v15645_v7 }
 0x622   :  { %v15881_v5 = vpop.xlane.xlu1 %6063  ;;  %v5636_v11 = vrot.slane %v5628_v43, %v20070_v6  ;;  %v15930_v43 = vrot.slane %v5729_v57, %v20082_v36 }
 0x623   :  { %v5620_v51 = vrot.slane %v5612_v4, %v20070_v6 }
 0x624   :  { %6252 = vadd.xlane.f32.xlu0 %v6251_v50  ;;  %v15906_v50 = vcombine.high %v15806_v33, %v20265_v48  ;;  %20335 = vst [vmem:[#allocation31_spill] sm:$0xff] %v15930_v43  ;;  %v6302_v57 = vsel %vm1733_vm2, %v15930_v43, 0.0 }
 0x625   :  { %6285 = vadd.xlane.f32.xlu1 %v6284_v56  ;;  %v15896_v45 = vpop.xlane.xlu0 %6021  ;;  %v15912_v56 = vrot.slane %v5728_v40, %v20082_v36  ;;  %v5644_v30 = vcombine.low %v5620_v51, %v5636_v11 }
 0x626   :  { %v15900_v1 = vpop.xlane.xlu1 %6033  ;;  %20332 = vst [vmem:[#allocation38_spill] sm:$0xff] %v15906_v50  ;;  %v6215_v33 = vsel %vm1733_vm2, %v15906_v50, 0.0 }
 0x627   :  { %20333 = vst [vmem:[#allocation32_spill] sm:$0xff] %v15912_v56  ;;  %v6296_v40 = vsel %vm1733_vm2, %v15912_v56, 0.0 }
 0x628   :  { %6258 = vadd.xlane.f32.xlu0 %v6257_v24  ;;  %v5629_v24 = vcombine.high %v15618_v41, %v15661_v23  ;;  %v15942_v23 = vcombine.high %v15842_v32, %v20265_v48 }
 0x629   :  { %6291 = vadd.xlane.f32.xlu1 %v6290_v14  ;;  %v15914_v52 = vpop.xlane.xlu0 %6027  ;;  %v5613_v14 = vcombine.high %v15224_v63, %v15645_v7 }
 0x62a   :  { %v15917_v38 = vpop.xlane.xlu1 %6039  ;;  %20337 = vst [vmem:[#allocation34_spill] sm:$0xff] %v15942_v23  ;;  %v5643_v41 = vrot.slane %v5629_v24, %v20070_v6  ;;  %v6227_v32 = vsel %vm1733_vm2, %v15942_v23, 0.0 }
 0x62b   :  { %v5627_v7 = vrot.slane %v5613_v14, %v20070_v6 }
 0x62c   :  { %6216 = vadd.xlane.f32.xlu0 %v6215_v33  ;;  %v5645_v33 = vcombine.high %v5620_v51, %v5636_v11  ;;  %v15959_v51 = vcombine.high %v15860_v47, %v20265_v48 }
 0x62d   :  { %6297 = vadd.xlane.f32.xlu1 %v6296_v40  ;;  %v15932_v4 = vpop.xlane.xlu0 %6048  ;;  %v15948_v40 = vrot.slane %v5644_v30, %v20082_v36  ;;  %v5660_v11 = vcombine.low %v5627_v7, %v5643_v41  ;;  %v5661_v34 = vcombine.high %v5627_v7, %v5643_v41  ;;  %v15995_v41 = vcombine.high %v15894_v61, %v20265_v48 }
 0x62e   :  { %v15936_v50 = vpop.xlane.xlu1 %6024  ;;  %20339 = vst [vmem:[#allocation42_spill] sm:$0xff] %v15959_v51  ;;  %v15966_v30 = vrot.slane %v5645_v33, %v20082_v36  ;;  %v6233_v47 = vsel %vm1733_vm2, %v15959_v51, 0.0 }
 0x62f   :  { %20336 = vst [vmem:[#allocation35_spill] sm:$0xff] %v15936_v50  ;;  %20338 = vst [vmem:[#allocation40_spill] sm:$0xff] %v15948_v40  ;;  %v6260_v24 = vsel %vm1733_vm2, %v15948_v40, 0.0  ;;  %v6293_v61 = vsel %vm1733_vm2, %v15995_v41, 0.0 }
 0x630   :  { %6222 = vadd.xlane.f32.xlu0 %v6221_v39  ;;  %v5832_v39 = vcombine.low %v15676_v9, %v15720_v31  ;;  %20340 = vst [vmem:[#allocation47_spill] sm:$0xff] %v15966_v30  ;;  %v6266_v33 = vsel %vm1733_vm2, %v15966_v30, 0.0  ;;  %20343 = vst [vmem:[#allocation37_spill] sm:$0xff] %v15995_v41 }
 0x631   :  { %6303 = vadd.xlane.f32.xlu1 %v6302_v57  ;;  %v15950_v63 = vpop.xlane.xlu0 %6054  ;;  %v5816_v57 = vcombine.low %v15252_v10, %v15703_v60 }
 0x632   :  { %v15953_v2 = vpop.xlane.xlu1 %6093  ;;  %v5840_v35 = vrot.slane %v5832_v39, %v20070_v6  ;;  %v16002_v39 = vrot.slane %v5661_v34, %v20082_v36 }
 0x633   :  { %v5824_v50 = vrot.slane %v5816_v57, %v20070_v6 }
 0x634   :  { %6228 = vadd.xlane.f32.xlu0 %v6227_v32  ;;  %v15978_v32 = vcombine.high %v15876_v3, %v20265_v48  ;;  %20344 = vst [vmem:[#allocation44_spill] sm:$0xff] %v16002_v39  ;;  %v6278_v34 = vsel %vm1733_vm2, %v16002_v39, 0.0 }
 0x635   :  { %6261 = vadd.xlane.f32.xlu1 %v6260_v24  ;;  %v15968_v14 = vpop.xlane.xlu0 %6060  ;;  %v15984_v24 = vrot.slane %v5660_v11, %v20082_v36  ;;  %v5848_v7 = vcombine.low %v5824_v50, %v5840_v35 }
 0x636   :  { %v15972_v23 = vpop.xlane.xlu1 %6099  ;;  %20341 = vst [vmem:[#allocation39_spill] sm:$0xff] %v15978_v32  ;;  %v6287_v3 = vsel %vm1733_vm2, %v15978_v32, 0.0 }
 0x637   :  { %20342 = vst [vmem:[#allocation45_spill] sm:$0xff] %v15984_v24  ;;  %v6272_v11 = vsel %vm1733_vm2, %v15984_v24, 0.0 }
 0x638   :  { %6234 = vadd.xlane.f32.xlu0 %v6233_v47  ;;  %v5833_v47 = vcombine.high %v15676_v9, %v15720_v31  ;;  %v16014_v31 = vcombine.high %v15912_v56, %v20265_v48 }
 0x639   :  { %6267 = vadd.xlane.f32.xlu1 %v6266_v33  ;;  %v15986_v12 = vpop.xlane.xlu0 %6066  ;;  %v5817_v33 = vcombine.high %v15252_v10, %v15703_v60 }
 0x63a   :  { %v15989_v51 = vpop.xlane.xlu1 %6105  ;;  %20345 = vst [vmem:[#allocation41_spill] sm:$0xff] %v16014_v31  ;;  %v5847_v9 = vrot.slane %v5833_v47, %v20070_v6  ;;  %v6299_v56 = vsel %vm1733_vm2, %v16014_v31, 0.0 }
 0x63b   :  { %v5831_v60 = vrot.slane %v5817_v33, %v20070_v6 }
 0x63c   :  { %6288 = vadd.xlane.f32.xlu0 %v6287_v3  ;;  %v5849_v3 = vcombine.high %v5824_v50, %v5840_v35  ;;  %v16031_v35 = vcombine.high %v15930_v43, %v20265_v48  ;;  %v5764_v50 = vcombine.low %v15736_v54, %v15779_v0 }
 0x63d   :  { %6273 = vadd.xlane.f32.xlu1 %v6272_v11  ;;  %v16004_v57 = vpop.xlane.xlu0 %6030  ;;  %v16020_v11 = vrot.slane %v5848_v7, %v20082_v36 }
 0x63e   :  { %v16008_v32 = vpop.xlane.xlu1 %6111  ;;  %20349 = vst [vmem:[#allocation48_spill] sm:$0xff] %v16031_v35  ;;  %v16038_v7 = vrot.slane %v5849_v3, %v20082_v36  ;;  %v6305_v43 = vsel %vm1733_vm2, %v16031_v35, 0.0 }
 0x63f   :  { %20346 = vst [vmem:[#allocation49_spill] sm:$0xff] %v16020_v11  ;;  %v6332_v47 = vsel %vm1733_vm2, %v16020_v11, 0.0 }
 0x640   :  { %6294 = vadd.xlane.f32.xlu0 %v6293_v61  ;;  %v5864_v61 = vcombine.low %v5831_v60, %v5847_v9  ;;  %20350 = vst [vmem:[#allocation53_spill] sm:$0xff] %v16038_v7  ;;  %v6338_v3 = vsel %vm1733_vm2, %v16038_v7, 0.0 }
 0x641   :  { %6279 = vadd.xlane.f32.xlu1 %v6278_v34  ;;  %v16022_v10 = vpop.xlane.xlu0 %6036  ;;  %v5748_v34 = vcombine.low %v15276_v27, %v15762_v25 }
 0x642   :  { %20347 = vst [vmem:[#allocation51_spill] sm:$0xff] %v16022_v10  ;;  %v16025_v41 = vpop.xlane.xlu1 %6069  ;;  %v5772_v10 = vrot.slane %v5764_v50, %v20070_v6 }
 0x643   :  { %20348 = vst [vmem:[#allocation55_spill] sm:$0xff] %v16025_v41  ;;  %v5865_v41 = vcombine.high %v5831_v60, %v5847_v9  ;;  %v16067_v9 = vcombine.high %v15966_v30, %v20265_v48 }
 0x644   :  { %6300 = vadd.xlane.f32.xlu0 %v6299_v56  ;;  %v16050_v56 = vcombine.high %v15948_v40, %v20265_v48 }
 0x645   :  { %6333 = vadd.xlane.f32.xlu1 %v6332_v47  ;;  %v16040_v33 = vpop.xlane.xlu0 %6042  ;;  %v16056_v47 = vrot.slane %v5864_v61, %v20082_v36  ;;  %20355 = vst [vmem:[#allocation59_spill] sm:$0xff] %v16067_v9  ;;  %v16074_v50 = vrot.slane %v5865_v41, %v20082_v36  ;;  %v6269_v30 = vsel %vm1733_vm2, %v16067_v9, 0.0 }
 0x646   :  { %20351 = vst [vmem:[#allocation46_spill] sm:$0xff] %v16040_v33  ;;  %v16044_v31 = vpop.xlane.xlu1 %6075  ;;  %20353 = vst [vmem:[#allocation50_spill] sm:$0xff] %v16050_v56  ;;  %v6263_v40 = vsel %vm1733_vm2, %v16050_v56, 0.0 }
 0x647   :  { %20352 = vst [vmem:[#allocation52_spill] sm:$0xff] %v16044_v31  ;;  %20354 = vst [vmem:[#allocation57_spill] sm:$0xff] %v16056_v47  ;;  %v5756_v31 = vrot.slane %v5748_v34, %v20070_v6  ;;  %v6344_v61 = vsel %vm1733_vm2, %v16056_v47, 0.0  ;;  %v6350_v41 = vsel %vm1733_vm2, %v16074_v50, 0.0 }
 0x648   :  { %6306 = vadd.xlane.f32.xlu0 %v6305_v43  ;;  %v5765_v43 = vcombine.high %v15736_v54, %v15779_v0  ;;  %20356 = vst [vmem:[#allocation63_spill] sm:$0xff] %v16074_v50  ;;  %v16086_v0 = vcombine.high %v15984_v24, %v20265_v48 }
 0x649   :  { %6339 = vadd.xlane.f32.xlu1 %v6338_v3  ;;  %v16058_v33 = vpop.xlane.xlu0 %6096  ;;  %v5780_v60 = vcombine.low %v5756_v31, %v5772_v10  ;;  %v5749_v3 = vcombine.high %v15276_v27, %v15762_v25 }
 0x64a   :  { %v16061_v35 = vpop.xlane.xlu1 %6081  ;;  %20357 = vst [vmem:[#allocation56_spill] sm:$0xff] %v16086_v0  ;;  %v5779_v54 = vrot.slane %v5765_v43, %v20070_v6  ;;  %v6275_v24 = vsel %vm1733_vm2, %v16086_v0, 0.0 }
 0x64b   :  { %v5763_v25 = vrot.slane %v5749_v3, %v20070_v6 }
 0x64c   :  { %6264 = vadd.xlane.f32.xlu0 %v6263_v40  ;;  %v5781_v40 = vcombine.high %v5756_v31, %v5772_v10  ;;  %v16103_v31 = vcombine.high %v16002_v39, %v20265_v48  ;;  %v5968_v10 = vcombine.low %v15787_v13, %v15811_v17 }
 0x64d   :  { %6345 = vadd.xlane.f32.xlu1 %v6344_v61  ;;  %v16076_v34 = vpop.xlane.xlu0 %6102  ;;  %v16092_v61 = vrot.slane %v5780_v60, %v20082_v36 }
 0x64e   :  { %v16080_v56 = vpop.xlane.xlu1 %6087  ;;  %20361 = vst [vmem:[#allocation58_spill] sm:$0xff] %v16103_v31  ;;  %v16110_v60 = vrot.slane %v5781_v40, %v20082_v36  ;;  %v6281_v39 = vsel %vm1733_vm2, %v16103_v31, 0.0 }
 0x64f   :  { %20358 = vst [vmem:[#allocation61_spill] sm:$0xff] %v16092_v61  ;;  %v6308_v43 = vsel %vm1733_vm2, %v16092_v61, 0.0 }
 0x650   :  { %6270 = vadd.xlane.f32.xlu0 %v6269_v30  ;;  %v5796_v30 = vcombine.low %v5763_v25, %v5779_v54  ;;  %20362 = vst [vmem:[#allocation65_spill] sm:$0xff] %v16110_v60  ;;  %v6314_v40 = vsel %vm1733_vm2, %v16110_v60, 0.0 }
 0x651   :  { %6351 = vadd.xlane.f32.xlu1 %v6350_v41  ;;  %v16094_v27 = vpop.xlane.xlu0 %6108  ;;  %v5952_v41 = vcombine.low %v15292_v37, %v15808_v62 }
 0x652   :  { %20359 = vst [vmem:[#allocation54_spill] sm:$0xff] %v16094_v27  ;;  %v16097_v9 = vpop.xlane.xlu1 %6141  ;;  %v5976_v27 = vrot.slane %v5968_v10, %v20070_v6 }
 0x653   :  { %20360 = vst [vmem:[#allocation60_spill] sm:$0xff] %v16097_v9  ;;  %v5797_v9 = vcombine.high %v5763_v25, %v5779_v54  ;;  %v16139_v54 = vcombine.high %v16038_v7, %v20265_v48 }
 0x654   :  { %6276 = vadd.xlane.f32.xlu0 %v6275_v24  ;;  %v16122_v24 = vcombine.high %v16020_v11, %v20265_v48 }
 0x655   :  { %6309 = vadd.xlane.f32.xlu1 %v6308_v43  ;;  %v16112_v3 = vpop.xlane.xlu0 %6114  ;;  %v16128_v43 = vrot.slane %v5796_v30, %v20082_v36  ;;  %20367 = vst [vmem:[#allocation70_spill] sm:$0xff] %v16139_v54  ;;  %v16146_v10 = vrot.slane %v5797_v9, %v20082_v36  ;;  %v6341_v7 = vsel %vm1733_vm2, %v16139_v54, 0.0 }
 0x656   :  { %20363 = vst [vmem:[#allocation68_spill] sm:$0xff] %v16112_v3  ;;  %v16116_v0 = vpop.xlane.xlu1 %6147  ;;  %20365 = vst [vmem:[#allocation72_spill] sm:$0xff] %v16122_v24  ;;  %v6335_v11 = vsel %vm1733_vm2, %v16122_v24, 0.0 }
 0x657   :  { %20364 = vst [vmem:[#allocation64_spill] sm:$0xff] %v16116_v0  ;;  %20366 = vst [vmem:[#allocation62_spill] sm:$0xff] %v16128_v43  ;;  %v5960_v0 = vrot.slane %v5952_v41, %v20070_v6  ;;  %v6320_v30 = vsel %vm1733_vm2, %v16128_v43, 0.0  ;;  %v6326_v9 = vsel %vm1733_vm2, %v16146_v10, 0.0 }
 0x658   :  { %6282 = vadd.xlane.f32.xlu0 %v6281_v39  ;;  %v5969_v39 = vcombine.high %v15787_v13, %v15811_v17  ;;  %20368 = vst [vmem:[#allocation67_spill] sm:$0xff] %v16146_v10  ;;  %v16158_v13 = vcombine.high %v16056_v47, %v20265_v48 }
 0x659   :  { %6315 = vadd.xlane.f32.xlu1 %v6314_v40  ;;  %v16130_v3 = vpop.xlane.xlu0 %6072  ;;  %v5984_v25 = vcombine.low %v5960_v0, %v5976_v27  ;;  %v5953_v40 = vcombine.high %v15292_v37, %v15808_v62 }
 0x65a   :  { %v16133_v31 = vpop.xlane.xlu1 %6153  ;;  %20369 = vst [vmem:[#allocation77_spill] sm:$0xff] %v16158_v13  ;;  %v5983_v17 = vrot.slane %v5969_v39, %v20070_v6  ;;  %v6347_v47 = vsel %vm1733_vm2, %v16158_v13, 0.0 }
 0x65b   :  { %v5967_v62 = vrot.slane %v5953_v40, %v20070_v6 }
 0x65c   :  { %6336 = vadd.xlane.f32.xlu0 %v6335_v11  ;;  %v5985_v11 = vcombine.high %v5960_v0, %v5976_v27  ;;  %v16175_v0 = vcombine.high %v16074_v50, %v20265_v48  ;;  %v5900_v27 = vcombine.low %v15826_v58, %v15878_v18 }
 0x65d   :  { %6321 = vadd.xlane.f32.xlu1 %v6320_v30  ;;  %v16148_v41 = vpop.xlane.xlu0 %6078  ;;  %v16164_v30 = vrot.slane %v5984_v25, %v20082_v36 }
 0x65e   :  { %v16152_v24 = vpop.xlane.xlu1 %6159  ;;  %20373 = vst [vmem:[#allocation73_spill] sm:$0xff] %v16175_v0  ;;  %v16182_v25 = vrot.slane %v5985_v11, %v20082_v36  ;;  %v6353_v50 = vsel %vm1733_vm2, %v16175_v0, 0.0 }
 0x65f   :  { %20370 = vst [vmem:[#allocation23_spill] sm:$0xff] %v16164_v30  ;;  %v6380_v39 = vsel %vm1733_vm2, %v16164_v30, 0.0 }
 0x660   :  { %6342 = vadd.xlane.f32.xlu0 %v6341_v7  ;;  %v6000_v7 = vcombine.low %v5967_v62, %v5983_v17  ;;  %20374 = vst [vmem:[#allocation78_spill] sm:$0xff] %v16182_v25  ;;  %v6386_v11 = vsel %vm1733_vm2, %v16182_v25, 0.0 }
 0x661   :  { %6327 = vadd.xlane.f32.xlu1 %v6326_v9  ;;  %v16166_v37 = vpop.xlane.xlu0 %6084  ;;  %v5884_v9 = vcombine.low %v15308_v15, %v15847_v22 }
 0x662   :  { %20371 = vst [vmem:[#allocation75_spill] sm:$0xff] %v16166_v37  ;;  %v16169_v54 = vpop.xlane.xlu1 %6117  ;;  %v5908_v37 = vrot.slane %v5900_v27, %v20070_v6 }
 0x663   :  { %20372 = vst [vmem:[#allocation21_spill] sm:$0xff] %v16169_v54  ;;  %v6001_v54 = vcombine.high %v5967_v62, %v5983_v17  ;;  %v16211_v17 = vcombine.high %v16110_v60, %v20265_v48 }
 0x664   :  { %6348 = vadd.xlane.f32.xlu0 %v6347_v47  ;;  %v16194_v47 = vcombine.high %v16092_v61, %v20265_v48 }
 0x665   :  { %6381 = vadd.xlane.f32.xlu1 %v6380_v39  ;;  %v16184_v40 = vpop.xlane.xlu0 %6090  ;;  %v16200_v39 = vrot.slane %v6000_v7, %v20082_v36  ;;  %20379 = vst [vmem:[#allocation82_spill] sm:$0xff] %v16211_v17  ;;  %v16218_v27 = vrot.slane %v6001_v54, %v20082_v36  ;;  %v6317_v60 = vsel %vm1733_vm2, %v16211_v17, 0.0 }
 0x666   :  { %20375 = vst [vmem:[#allocation76_spill] sm:$0xff] %v16184_v40  ;;  %v16188_v13 = vpop.xlane.xlu1 %6123  ;;  %20377 = vst [vmem:[#allocation85_spill] sm:$0xff] %v16194_v47  ;;  %v6311_v61 = vsel %vm1733_vm2, %v16194_v47, 0.0 }
 0x667   :  { %20376 = vst [vmem:[#allocation80_spill] sm:$0xff] %v16188_v13  ;;  %20378 = vst [vmem:[#allocation79_spill] sm:$0xff] %v16200_v39  ;;  %v5892_v13 = vrot.slane %v5884_v9, %v20070_v6  ;;  %v6392_v7 = vsel %vm1733_vm2, %v16200_v39, 0.0  ;;  %v6398_v54 = vsel %vm1733_vm2, %v16218_v27, 0.0 }
 0x668   :  { %6354 = vadd.xlane.f32.xlu0 %v6353_v50  ;;  %v5901_v50 = vcombine.high %v15826_v58, %v15878_v18  ;;  %20380 = vst [vmem:[#allocation104_spill] sm:$0xff] %v16218_v27  ;;  %v16230_v58 = vcombine.high %v16128_v43, %v20265_v48 }
 0x669   :  { %6387 = vadd.xlane.f32.xlu1 %v6386_v11  ;;  %v16202_v40 = vpop.xlane.xlu0 %6144  ;;  %v5916_v62 = vcombine.low %v5892_v13, %v5908_v37  ;;  %v5885_v11 = vcombine.high %v15308_v15, %v15847_v22 }
 0x66a   :  { %v16205_v0 = vpop.xlane.xlu1 %6129  ;;  %20381 = vst [vmem:[#allocation81_spill] sm:$0xff] %v16230_v58  ;;  %v5915_v18 = vrot.slane %v5901_v50, %v20070_v6  ;;  %v6323_v43 = vsel %vm1733_vm2, %v16230_v58, 0.0 }
 0x66b   :  { %v5899_v22 = vrot.slane %v5885_v11, %v20070_v6  ;;  %v16262_v6 = vcombine.high %v16164_v30, %v20265_v48 }
 0x66c   :  { %6312 = vadd.xlane.f32.xlu0 %v6311_v61  ;;  %v5917_v61 = vcombine.high %v5892_v13, %v5908_v37  ;;  %v16247_v13 = vcombine.high %v16146_v10, %v20265_v48 }
 0x66d   :  { %6393 = vadd.xlane.f32.xlu1 %v6392_v7  ;;  %v16220_v9 = vpop.xlane.xlu0 %6150  ;;  %v16236_v7 = vrot.slane %v5916_v62, %v20082_v36  ;;  %20386 = vst [vmem:[#allocation84_spill] sm:$0xff] %v16262_v6  ;;  %v5933_v58 = vcombine.high %v5899_v22, %v5915_v18 }
 0x66e   :  { %v16224_v47 = vpop.xlane.xlu1 %6135  ;;  %20383 = vst [vmem:[#allocation88_spill] sm:$0xff] %v16247_v13  ;;  %v16252_v50 = vrot.slane %v5917_v61, %v20082_v36 }
 0x66f   :  { %20382 = vst [vmem:[#allocation110_spill] sm:$0xff] %v16236_v7  ;;  %v6356_v37 = vsel %vm1733_vm2, %v16236_v7, 0.0 }
 0x670   :  { %6318 = vadd.xlane.f32.xlu0 %v6317_v60  ;;  %v5932_v60 = vcombine.low %v5899_v22, %v5915_v18  ;;  %20384 = vst [vmem:[#allocation87_spill] sm:$0xff] %v16252_v50  ;;  %v6362_v61 = vsel %vm1733_vm2, %v16252_v50, 0.0  ;;  %v16278_v18 = vcombine.high %v16182_v25, %v20265_v48  ;;  %v6414_v22 = vmul.f32 0.03125, %v15845_v29 }
 0x671   :  { %6399 = vadd.xlane.f32.xlu1 %v6398_v54  ;;  %v16238_v15 = vpop.xlane.xlu0 %6156  ;;  %v6329_v54 = vsel %vm1733_vm2, %v16247_v13, 0.0  ;;  %v6383_v13 = vsel %vm1733_vm2, %v16262_v6, 0.0 }
 0x672   :  { %v16241_v17 = vpop.xlane.xlu1 %6189  ;;  %20388 = vst [vmem:[#allocation89_spill] sm:$0xff] %v16278_v18  ;;  %v6389_v25 = vsel %vm1733_vm2, %v16278_v18, 0.0  ;;  %v16300_v29 = vsub.f32 %v15328_v53, %v6414_v22  ;;  %v16315_v53 = vcombine.high %v16218_v27, %v20265_v48 }
 0x674   :  { %6324 = vadd.xlane.f32.xlu0 %v6323_v43  ;;  %v6412_v43 = vmul.f32 0.03125, %v15830_v16  ;;  %20391 = vst [vmem:[#allocation94_spill] sm:$0xff] %v16300_v29  ;;  %20392 = vst [vmem:[#allocation96_spill] sm:$0xff] %v16315_v53 }
 0x675   :  { %6357 = vadd.xlane.f32.xlu1 %v6356_v37  ;;  %v16254_v62 = vpop.xlane.xlu0 %6162  ;;  %v16268_v37 = vrot.slane %v5932_v60, %v20082_v36 }
 0x676   :  { %v16256_v11 = vpop.xlane.xlu1 %6195  ;;  %v16281_v16 = vsub.f32 %v15322_v21, %v6412_v43  ;;  %v16297_v21 = vcombine.high %v16200_v39, %v20265_v48 }
 0x677   :  { %20385 = vst [vmem:[#allocation93_spill] sm:$0xff] %v16256_v11  ;;  %20387 = vst [vmem:[#allocation90_spill] sm:$0xff] %v16268_v37  ;;  %v6368_v60 = vsel %vm1733_vm2, %v16268_v37, 0.0 }
 0x678   :  { %6330 = vadd.xlane.f32.xlu0 %v6329_v54  ;;  %v16287_v54 = vrot.slane %v5933_v58, %v20082_v36  ;;  %20390 = vst [vmem:[#allocation101_spill] sm:$0xff] %v16297_v21  ;;  %v6668_v43 = vmul.f32 %v16281_v16, %v16281_v16  ;;  %v6395_v39 = vsel %vm1733_vm2, %v16297_v21, 0.0  ;;  %v6401_v21 = vsel %vm1733_vm2, %v16315_v53, 0.0 }
 0x679   :  { %6363 = vadd.xlane.f32.xlu1 %v6362_v61  ;;  %v16270_v10 = vpop.xlane.xlu0 %6120 }
 0x67a   :  { %v16272_v11 = vpop.xlane.xlu1 %6201  ;;  %20389 = vst [vmem:[#allocation99_spill] sm:$0xff] %v16287_v54  ;;  %v6374_v58 = vsel %vm1733_vm2, %v16287_v54, 0.0  ;;  %v6812_v22 = vsel %vm1733_vm2, %v6668_v43, 0.0 }
 0x67c   :  { %6384 = vadd.xlane.f32.xlu0 %v6383_v13  ;;  %v6416_v13 = vmul.f32 0.03125, %v15864_v19 }
 0x67d   :  { %6369 = vadd.xlane.f32.xlu1 %v6368_v60  ;;  %v16289_v61 = vpop.xlane.xlu0 %6126 }
 0x67e   :  { %v16291_v6 = vpop.xlane.xlu1 %6207  ;;  %v16318_v19 = vsub.f32 %v15337_v46, %v6416_v13  ;;  %v16332_v46 = vcombine.high %v16236_v7, %v20265_v48 }
 0x680   :  { %6390 = vadd.xlane.f32.xlu0 %v6389_v25  ;;  %20393 = vst [vmem:[#allocation131_spill] sm:$0xff] %v16318_v19  ;;  %v6418_v25 = vmul.f32 0.03125, %v15881_v5  ;;  %20394 = vst [vmem:[#allocation100_spill] sm:$0xff] %v16332_v46  ;;  %v6672_v43 = vmul.f32 %v16318_v19, %v16318_v19  ;;  %v6359_v53 = vsel %vm1733_vm2, %v16332_v46, 0.0  ;;  %v6413_v46 = vmul.f32 0.03125, %v15932_v4 }
 0x681   :  { %6375 = vadd.xlane.f32.xlu1 %v6374_v58  ;;  %v16307_v60 = vpop.xlane.xlu0 %6132  ;;  %v6670_v58 = vmul.f32 %v16300_v29, %v16300_v29 }
 0x682   :  { %v16309_v18 = vpop.xlane.xlu1 %6165  ;;  %v16335_v5 = vsub.f32 %v15344_v59, %v6418_v25  ;;  %v16349_v59 = vcombine.high %v16252_v50, %v20265_v48  ;;  %v6824_v25 = vsel %vm1733_vm2, %v6672_v43, 0.0 }
 0x683   :  { %v6818_v13 = vsel %vm1733_vm2, %v6670_v58, 0.0 }
 0x684   :  { %6396 = vadd.xlane.f32.xlu0 %v6395_v39  ;;  %20395 = vst [vmem:[#allocation97_spill] sm:$0xff] %v16335_v5  ;;  %v6404_v39 = vmul.f32 0.03125, %v15896_v45  ;;  %20396 = vst [vmem:[#allocation105_spill] sm:$0xff] %v16349_v59  ;;  %v6674_v58 = vmul.f32 %v16335_v5, %v16335_v5  ;;  %v6365_v50 = vsel %vm1733_vm2, %v16349_v59, 0.0  ;;  %v16381_v59 = vsub.f32 %v15371_v55, %v6413_v46 }
 0x685   :  { %6813 = vadd.xlane.f32.xlu1 %v6812_v22  ;;  %v16324_v30 = vpop.xlane.xlu0 %6138 }
 0x686   :  { %v16326_v36 = vpop.xlane.xlu1 %6171  ;;  %v16352_v45 = vsub.f32 %v15347_v28, %v6404_v39  ;;  %v16367_v28 = vcombine.high %v16268_v37, %v20265_v48  ;;  %v6830_v39 = vsel %vm1733_vm2, %v6674_v58, 0.0  ;;  %20400 = vst [vmem:[#allocation139_spill] sm:$0xff] %v16381_v59  ;;  %v6415_v37 = vmul.f32 0.03125, %v15950_v63 }
 0x688   :  { %6402 = vadd.xlane.f32.xlu0 %v6401_v21  ;;  %20397 = vst [vmem:[#allocation108_spill] sm:$0xff] %v16352_v45  ;;  %v6406_v21 = vmul.f32 0.03125, %v15914_v52  ;;  %20398 = vst [vmem:[#allocation142_spill] sm:$0xff] %v16367_v28  ;;  %v6408_v52 = vmul.f32 0.03125, %v15900_v1  ;;  %v6660_v43 = vmul.f32 %v16352_v45, %v16352_v45  ;;  %v16388_v1 = vcombine.high %v16287_v54, %v20265_v48  ;;  %v20422_v45 = vld [vmem:[#allocation51_spill] sm:$0xff] }
 0x689   :  { %6819 = vadd.xlane.f32.xlu1 %v6818_v13  ;;  %v16341_v22 = vpop.xlane.xlu0 %6192  ;;  %v6417_v48 = vmul.f32 0.03125, %v15968_v14 }
 0x68a   :  { %v16343_v27 = vpop.xlane.xlu1 %6177  ;;  %20401 = vst [vmem:[#allocation109_spill] sm:$0xff] %v16388_v1  ;;  %v6788_v58 = vsel %vm1733_vm2, %v6660_v43, 0.0  ;;  %v6428_v43 = vmul.f32 0.03125, %v15953_v2 }
 0x68c   :  { %6360 = vadd.xlane.f32.xlu0 %v6359_v53  ;;  %v16371_v53 = vsub.f32 %v15358_v42, %v6406_v21  ;;  %v6371_v42 = vsel %vm1733_vm2, %v16367_v28, 0.0  ;;  %v6410_v21 = vmul.f32 0.03125, %v15917_v38  ;;  %v6669_v38 = vmul.f32 %v16381_v59, %v16381_v59  ;;  %v20410_v28 = vld [vmem:[#allocation113_spill] sm:$0xff] }
 0x68d   :  { %6825 = vadd.xlane.f32.xlu1 %v6824_v25  ;;  %v16358_v13 = vpop.xlane.xlu0 %6198 }
 0x68e   :  { %v16360_v7 = vpop.xlane.xlu1 %6183  ;;  %20399 = vst [vmem:[#allocation102_spill] sm:$0xff] %v16371_v53  ;;  %v6662_v55 = vmul.f32 %v16371_v53, %v16371_v53  ;;  %v6409_v53 = vmul.f32 0.03125, %v20422_v45 }
 0x690   :  { %6366 = vadd.xlane.f32.xlu0 %v6365_v50  ;;  %v16391_v50 = vsub.f32 %v15352_v8, %v6408_v52  ;;  %v6377_v8 = vsel %vm1733_vm2, %v16388_v1, 0.0  ;;  %v16410_v52 = vsub.f32 %v15364_v26, %v6410_v21  ;;  %v6419_v1 = vmul.f32 0.03125, %v15986_v12  ;;  %v20409_v12 = vld [vmem:[#allocation35_spill] sm:$0xff] }
 0x691   :  { %6831 = vadd.xlane.f32.xlu1 %v6830_v39  ;;  %v16376_v4 = vpop.xlane.xlu0 %6204  ;;  %v16402_v39 = vsub.f32 %v15386_v49, %v6415_v37  ;;  %v6815_v26 = vsel %vm1733_vm2, %v6669_v38, 0.0  ;;  %v16428_v21 = vsub.f32 %v15392_v20, %v6428_v43  ;;  %v6405_v38 = vmul.f32 0.03125, %v20409_v12  ;;  %v20412_v43 = vld [vmem:[#allocation143_spill] sm:$0xff] }
 0x692   :  { %v16378_v25 = vpop.xlane.xlu1 %6237  ;;  %20402 = vst [vmem:[#allocation134_spill] sm:$0xff] %v16391_v50  ;;  %20405 = vst [vmem:[#allocation112_spill] sm:$0xff] %v16410_v52  ;;  %v6664_v49 = vmul.f32 %v16391_v50, %v16391_v50  ;;  %v16440_v54 = vsub.f32 %v20410_v28, %v6419_v1  ;;  %v20415_v1 = vld [vmem:[#allocation141_spill] sm:$0xff] }
 0x693   :  { %20404 = vst [vmem:[#allocation111_spill] sm:$0xff] %v16402_v39  ;;  %v6671_v2 = vmul.f32 %v16402_v39, %v16402_v39  ;;  %20407 = vst [vmem:[#allocation136_spill] sm:$0xff] %v16428_v21  ;;  %v6684_v50 = vmul.f32 %v16428_v21, %v16428_v21 }
 0x694   :  { %6372 = vadd.xlane.f32.xlu0 %v6371_v42  ;;  %v6794_v42 = vsel %vm1733_vm2, %v6662_v55, 0.0  ;;  %v6430_v55 = vmul.f32 0.03125, %v15972_v23  ;;  %20411 = vst [vmem:[#allocation35_spill] sm:$0xff] %v16440_v54 }
 0x695   :  { %6789 = vadd.xlane.f32.xlu1 %v6788_v58  ;;  %v16397_v63 = vpop.xlane.xlu0 %6210  ;;  %v16421_v58 = vsub.f32 %v15399_v44, %v6417_v48  ;;  %v6821_v20 = vsel %vm1733_vm2, %v6671_v2, 0.0  ;;  %v16457_v2 = vsub.f32 %v20415_v1, %v6405_v38 }
 0x696   :  { %20403 = vst [vmem:[#allocation138_spill] sm:$0xff] %v16397_v63  ;;  %v16399_v46 = vpop.xlane.xlu1 %6243 }
 0x697   :  { %20406 = vst [vmem:[#allocation106_spill] sm:$0xff] %v16421_v58  ;;  %v6673_v23 = vmul.f32 %v16421_v58, %v16421_v58  ;;  %20416 = vst [vmem:[#allocation141_spill] sm:$0xff] %v16457_v2 }
 0x698   :  { %6378 = vadd.xlane.f32.xlu0 %v6377_v8  ;;  %v6800_v8 = vsel %vm1733_vm2, %v6664_v49, 0.0  ;;  %v16446_v49 = vsub.f32 %v20412_v43, %v6430_v55  ;;  %v6434_v43 = vmul.f32 0.03125, %v16008_v32  ;;  %v6661_v32 = vmul.f32 %v16457_v2, %v16457_v2  ;;  %v20428_v2 = vld [vmem:[#allocation46_spill] sm:$0xff] }
 0x699   :  { %6795 = vadd.xlane.f32.xlu1 %v6794_v42  ;;  %v16416_v37 = vpop.xlane.xlu0 %6168  ;;  %v6666_v42 = vmul.f32 %v16410_v52, %v16410_v52  ;;  %v6407_v52 = vmul.f32 0.03125, %v16004_v57  ;;  %v6827_v55 = vsel %vm1733_vm2, %v6673_v23, 0.0  ;;  %v20420_v23 = vld [vmem:[#allocation146_spill] sm:$0xff]  ;;  %v6411_v58 = vmul.f32 0.03125, %v20428_v2 }
 0x69a   :  { %v16418_v14 = vpop.xlane.xlu1 %6249  ;;  %20413 = vst [vmem:[#allocation113_spill] sm:$0xff] %v16446_v49  ;;  %v6686_v21 = vmul.f32 %v16446_v49, %v16446_v49 }
 0x69b   :  { %v16475_v1 = vsub.f32 %v20420_v23, %v6407_v52 }
 0x69c   :  { %6816 = vadd.xlane.f32.xlu0 %v6815_v26  ;;  %v6432_v26 = vmul.f32 0.03125, %v15989_v51  ;;  %v6675_v51 = vmul.f32 %v16440_v54, %v16440_v54 }
 0x69d   :  { %6801 = vadd.xlane.f32.xlu1 %v6800_v8  ;;  %v16434_v48 = vpop.xlane.xlu0 %6174  ;;  %v6806_v8 = vsel %vm1733_vm2, %v6666_v42, 0.0  ;;  %20421 = vst [vmem:[#allocation146_spill] sm:$0xff] %v16475_v1 }
 0x69e   :  { %20408 = vst [vmem:[#allocation149_spill] sm:$0xff] %v16434_v48  ;;  %v16436_v44 = vpop.xlane.xlu1 %6255 }
 0x6a0   :  { %6822 = vadd.xlane.f32.xlu0 %v6821_v20  ;;  %v20417_v20 = vld [vmem:[#allocation144_spill] sm:$0xff] }
 0x6a1   :  { %6807 = vadd.xlane.f32.xlu1 %v6806_v8  ;;  %v16452_v12 = vpop.xlane.xlu0 %6180  ;;  %v16464_v42 = vsub.f32 %v20417_v20, %v6432_v26  ;;  %v6860_v8 = vsel %vm1733_vm2, %v6684_v50, 0.0  ;;  %v6833_v26 = vsel %vm1733_vm2, %v6675_v51, 0.0  ;;  %v20425_v20 = vld [vmem:[#allocation55_spill] sm:$0xff] }
 0x6a2   :  { %20414 = vst [vmem:[#allocation143_spill] sm:$0xff] %v16452_v12  ;;  %v16454_v28 = vpop.xlane.xlu1 %6213  ;;  %v6420_v49 = vmul.f32 0.03125, %v20425_v20  ;;  %v20426_v51 = vld [vmem:[#allocation43_spill] sm:$0xff]  ;;  %v20431_v20 = vld [vmem:[#allocation52_spill] sm:$0xff] }
 0x6a3   :  { %20418 = vst [vmem:[#allocation144_spill] sm:$0xff] %v16464_v42  ;;  %v6688_v54 = vmul.f32 %v16464_v42, %v16464_v42  ;;  %v16493_v23 = vsub.f32 %v20426_v51, %v6409_v53  ;;  %v6422_v42 = vmul.f32 0.03125, %v20431_v20  ;;  %v6424_v20 = vmul.f32 0.03125, %v16061_v35 }
 0x6a4   :  { %6828 = vadd.xlane.f32.xlu0 %v6827_v55  ;;  %v20423_v55 = vld [vmem:[#allocation114_spill] sm:$0xff] }
 0x6a5   :  { %6861 = vadd.xlane.f32.xlu1 %v6860_v8  ;;  %v16470_v38 = vpop.xlane.xlu0 %6186  ;;  %v16482_v50 = vsub.f32 %v20423_v55, %v6434_v43  ;;  %v6866_v8 = vsel %vm1733_vm2, %v6686_v21, 0.0  ;;  %20427 = vst [vmem:[#allocation114_spill] sm:$0xff] %v16493_v23  ;;  %v6791_v43 = vsel %vm1733_vm2, %v6661_v32, 0.0  ;;  %v20429_v55 = vld [vmem:[#allocation145_spill] sm:$0xff]  ;;  %v20432_v32 = vld [vmem:[#allocation147_spill] sm:$0xff] }
 0x6a6   :  { %20419 = vst [vmem:[#allocation150_spill] sm:$0xff] %v16470_v38  ;;  %v16472_v57 = vpop.xlane.xlu1 %6219  ;;  %v16500_v21 = vsub.f32 %v20429_v55, %v6420_v49  ;;  %v16511_v51 = vsub.f32 %v20432_v32, %v6411_v58  ;;  %v20434_v55 = vld [vmem:[#allocation148_spill] sm:$0xff] }
 0x6a7   :  { %20424 = vst [vmem:[#allocation51_spill] sm:$0xff] %v16482_v50  ;;  %v6690_v39 = vmul.f32 %v16482_v50, %v16482_v50 }
 0x6a8   :  { %6834 = vadd.xlane.f32.xlu0 %v6833_v26  ;;  %v6663_v26 = vmul.f32 %v16475_v1, %v16475_v1  ;;  %20430 = vst [vmem:[#allocation55_spill] sm:$0xff] %v16500_v21  ;;  %20433 = vst [vmem:[#allocation43_spill] sm:$0xff] %v16511_v51  ;;  %v6429_v1 = vmul.f32 0.03125, %v16058_v33  ;;  %v6676_v50 = vmul.f32 %v16500_v21, %v16500_v21 }
 0x6a9   :  { %6867 = vadd.xlane.f32.xlu1 %v6866_v8  ;;  %v16488_v52 = vpop.xlane.xlu0 %6240  ;;  %v6872_v8 = vsel %vm1733_vm2, %v6688_v54, 0.0  ;;  %v16518_v54 = vsub.f32 %v20434_v55, %v6422_v42  ;;  %v6667_v35 = vmul.f32 %v16511_v51, %v16511_v51  ;;  %v6426_v55 = vmul.f32 0.03125, %v16080_v56  ;;  %v20442_v51 = vld [vmem:[#allocation54_spill] sm:$0xff] }
 0x6aa   :  { %v16490_v45 = vpop.xlane.xlu1 %6225  ;;  %v6797_v49 = vsel %vm1733_vm2, %v6663_v26, 0.0  ;;  %v20436_v26 = vld [vmem:[#allocation83_spill] sm:$0xff]  ;;  %v6433_v59 = vmul.f32 0.03125, %v20442_v51 }
 0x6ab   :  { %20435 = vst [vmem:[#allocation46_spill] sm:$0xff] %v16518_v54  ;;  %v16529_v32 = vsub.f32 %v20436_v26, %v6429_v1  ;;  %v6678_v21 = vmul.f32 %v16518_v54, %v16518_v54 }
 0x6ac   :  { %6792 = vadd.xlane.f32.xlu0 %v6791_v43  ;;  %v6665_v43 = vmul.f32 %v16493_v23, %v16493_v23  ;;  %v6431_v23 = vmul.f32 0.03125, %v16076_v34 }
 0x6ad   :  { %6873 = vadd.xlane.f32.xlu1 %v6872_v8  ;;  %v16506_v53 = vpop.xlane.xlu0 %6246  ;;  %v6878_v8 = vsel %vm1733_vm2, %v6690_v39, 0.0  ;;  %20437 = vst [vmem:[#allocation145_spill] sm:$0xff] %v16529_v32  ;;  %v6685_v56 = vmul.f32 %v16529_v32, %v16529_v32  ;;  %v20448_v32 = vld [vmem:[#allocation68_spill] sm:$0xff] }
 0x6ae   :  { %v16508_v2 = vpop.xlane.xlu1 %6231  ;;  %v6803_v42 = vsel %vm1733_vm2, %v6665_v43, 0.0  ;;  %v20440_v43 = vld [vmem:[#allocation8_spill] sm:$0xff]  ;;  %v6435_v19 = vmul.f32 0.03125, %v20448_v32 }
 0x6af   :  { %v16547_v26 = vsub.f32 %v20440_v43, %v6431_v23 }
 0x6b0   :  { %6798 = vadd.xlane.f32.xlu0 %v6797_v49  ;;  %v20438_v49 = vld [vmem:[#allocation7_spill] sm:$0xff] }
 0x6b1   :  { %6879 = vadd.xlane.f32.xlu1 %v6878_v8  ;;  %v16524_v58 = vpop.xlane.xlu0 %6252  ;;  %v16536_v39 = vsub.f32 %v20438_v49, %v6424_v20  ;;  %v6836_v8 = vsel %vm1733_vm2, %v6676_v50, 0.0  ;;  %20441 = vst [vmem:[#allocation147_spill] sm:$0xff] %v16547_v26  ;;  %v6809_v20 = vsel %vm1733_vm2, %v6667_v35, 0.0  ;;  %v20445_v49 = vld [vmem:[#allocation60_spill] sm:$0xff]  ;;  %v20446_v35 = vld [vmem:[#allocation118_spill] sm:$0xff] }
 0x6b2   :  { %v16526_v33 = vpop.xlane.xlu1 %6285  ;;  %v6444_v54 = vmul.f32 0.03125, %v20445_v49  ;;  %v16565_v43 = vsub.f32 %v20446_v35, %v6433_v59  ;;  %v20451_v49 = vld [vmem:[#allocation64_spill] sm:$0xff] }
 0x6b3   :  { %20439 = vst [vmem:[#allocation52_spill] sm:$0xff] %v16536_v39  ;;  %v6680_v5 = vmul.f32 %v16536_v39, %v16536_v39  ;;  %v6446_v39 = vmul.f32 0.03125, %v20451_v49  ;;  %v6448_v49 = vmul.f32 0.03125, %v16133_v31 }
 0x6b4   :  { %6804 = vadd.xlane.f32.xlu0 %v6803_v42  ;;  %v20443_v42 = vld [vmem:[#allocation117_spill] sm:$0xff]  ;;  %20447 = vst [vmem:[#allocation83_spill] sm:$0xff] %v16565_v43 }
 0x6b5   :  { %6837 = vadd.xlane.f32.xlu1 %v6836_v8  ;;  %v16542_v1 = vpop.xlane.xlu0 %6258  ;;  %v16554_v50 = vsub.f32 %v20443_v42, %v6426_v55  ;;  %v6842_v8 = vsel %vm1733_vm2, %v6678_v21, 0.0  ;;  %v6863_v55 = vsel %vm1733_vm2, %v6685_v56, 0.0  ;;  %v20449_v42 = vld [vmem:[#allocation9_spill] sm:$0xff]  ;;  %v20452_v56 = vld [vmem:[#allocation86_spill] sm:$0xff] }
 0x6b6   :  { %v16544_v34 = vpop.xlane.xlu1 %6291  ;;  %v16572_v21 = vsub.f32 %v20449_v42, %v6444_v54  ;;  %v16583_v35 = vsub.f32 %v20452_v56, %v6435_v19  ;;  %v20454_v42 = vld [vmem:[#allocation120_spill] sm:$0xff] }
 0x6b7   :  { %20444 = vst [vmem:[#allocation148_spill] sm:$0xff] %v16554_v50  ;;  %v6682_v38 = vmul.f32 %v16554_v50, %v16554_v50 }
 0x6b8   :  { %6810 = vadd.xlane.f32.xlu0 %v6809_v20  ;;  %v6687_v20 = vmul.f32 %v16547_v26, %v16547_v26  ;;  %20450 = vst [vmem:[#allocation7_spill] sm:$0xff] %v16572_v21  ;;  %20453 = vst [vmem:[#allocation8_spill] sm:$0xff] %v16583_v35  ;;  %v6421_v26 = vmul.f32 0.03125, %v16130_v3  ;;  %v6700_v50 = vmul.f32 %v16572_v21, %v16572_v21 }
 0x6b9   :  { %6843 = vadd.xlane.f32.xlu1 %v6842_v8  ;;  %v16560_v23 = vpop.xlane.xlu0 %6216  ;;  %v6848_v8 = vsel %vm1733_vm2, %v6680_v5, 0.0  ;;  %v16590_v5 = vsub.f32 %v20454_v42, %v6446_v39  ;;  %v6691_v31 = vmul.f32 %v16583_v35, %v16583_v35  ;;  %v6450_v42 = vmul.f32 0.03125, %v16152_v24  ;;  %v20462_v35 = vld [vmem:[#allocation75_spill] sm:$0xff] }
 0x6ba   :  { %v16562_v51 = vpop.xlane.xlu1 %6297  ;;  %v6869_v54 = vsel %vm1733_vm2, %v6687_v20, 0.0  ;;  %v20456_v20 = vld [vmem:[#allocation10_spill] sm:$0xff]  ;;  %v6425_v12 = vmul.f32 0.03125, %v20462_v35 }
 0x6bb   :  { %20455 = vst [vmem:[#allocation54_spill] sm:$0xff] %v16590_v5  ;;  %v16601_v56 = vsub.f32 %v20456_v20, %v6421_v26  ;;  %v6702_v21 = vmul.f32 %v16590_v5, %v16590_v5 }
 0x6bc   :  { %6864 = vadd.xlane.f32.xlu0 %v6863_v55  ;;  %v6689_v55 = vmul.f32 %v16565_v43, %v16565_v43  ;;  %v6423_v43 = vmul.f32 0.03125, %v16148_v41 }
 0x6bd   :  { %6849 = vadd.xlane.f32.xlu1 %v6848_v8  ;;  %v16578_v59 = vpop.xlane.xlu0 %6222  ;;  %v6854_v8 = vsel %vm1733_vm2, %v6682_v38, 0.0  ;;  %20457 = vst [vmem:[#allocation117_spill] sm:$0xff] %v16601_v56  ;;  %v6677_v24 = vmul.f32 %v16601_v56, %v16601_v56  ;;  %v20468_v56 = vld [vmem:[#allocation76_spill] sm:$0xff] }
 0x6be   :  { %v16580_v32 = vpop.xlane.xlu1 %6303  ;;  %v6875_v39 = vsel %vm1733_vm2, %v6689_v55, 0.0  ;;  %v20460_v55 = vld [vmem:[#allocation121_spill] sm:$0xff]  ;;  %v6427_v48 = vmul.f32 0.03125, %v20468_v56 }
 0x6bf   :  { %v16619_v20 = vsub.f32 %v20460_v55, %v6423_v43 }
 0x6c0   :  { %6870 = vadd.xlane.f32.xlu0 %v6869_v54  ;;  %v20458_v54 = vld [vmem:[#allocation11_spill] sm:$0xff] }
 0x6c1   :  { %6855 = vadd.xlane.f32.xlu1 %v6854_v8  ;;  %v16596_v19 = vpop.xlane.xlu0 %6228  ;;  %v16608_v38 = vsub.f32 %v20458_v54, %v6448_v49  ;;  %v6908_v8 = vsel %vm1733_vm2, %v6700_v50, 0.0  ;;  %20461 = vst [vmem:[#allocation118_spill] sm:$0xff] %v16619_v20  ;;  %v6881_v49 = vsel %vm1733_vm2, %v6691_v31, 0.0  ;;  %v20465_v54 = vld [vmem:[#allocation21_spill] sm:$0xff]  ;;  %v20466_v31 = vld [vmem:[#allocation124_spill] sm:$0xff] }
 0x6c2   :  { %v16598_v3 = vpop.xlane.xlu1 %6261  ;;  %v6436_v5 = vmul.f32 0.03125, %v20465_v54  ;;  %v16637_v55 = vsub.f32 %v20466_v31, %v6425_v12  ;;  %v20471_v54 = vld [vmem:[#allocation80_spill] sm:$0xff] }
 0x6c3   :  { %20459 = vst [vmem:[#allocation60_spill] sm:$0xff] %v16608_v38  ;;  %v6704_v63 = vmul.f32 %v16608_v38, %v16608_v38  ;;  %v6438_v38 = vmul.f32 0.03125, %v20471_v54  ;;  %v6440_v54 = vmul.f32 0.03125, %v16205_v0 }
 0x6c4   :  { %6876 = vadd.xlane.f32.xlu0 %v6875_v39  ;;  %v20463_v39 = vld [vmem:[#allocation123_spill] sm:$0xff]  ;;  %20467 = vst [vmem:[#allocation9_spill] sm:$0xff] %v16637_v55 }
 0x6c5   :  { %6909 = vadd.xlane.f32.xlu1 %v6908_v8  ;;  %v16614_v26 = vpop.xlane.xlu0 %6234  ;;  %v16626_v50 = vsub.f32 %v20463_v39, %v6450_v42  ;;  %v6914_v8 = vsel %vm1733_vm2, %v6702_v21, 0.0  ;;  %v6839_v42 = vsel %vm1733_vm2, %v6677_v24, 0.0  ;;  %v20469_v39 = vld [vmem:[#allocation12_spill] sm:$0xff]  ;;  %v20472_v24 = vld [vmem:[#allocation91_spill] sm:$0xff] }
 0x6c6   :  { %v16616_v41 = vpop.xlane.xlu1 %6267  ;;  %v16644_v21 = vsub.f32 %v20469_v39, %v6436_v5  ;;  %v16655_v31 = vsub.f32 %v20472_v24, %v6427_v48  ;;  %v20474_v39 = vld [vmem:[#allocation13_spill] sm:$0xff] }
 0x6c7   :  { %20464 = vst [vmem:[#allocation68_spill] sm:$0xff] %v16626_v50  ;;  %v6706_v29 = vmul.f32 %v16626_v50, %v16626_v50 }
 0x6c8   :  { %6882 = vadd.xlane.f32.xlu0 %v6881_v49  ;;  %v6679_v49 = vmul.f32 %v16619_v20, %v16619_v20  ;;  %20470 = vst [vmem:[#allocation64_spill] sm:$0xff] %v16644_v21  ;;  %20473 = vst [vmem:[#allocation86_spill] sm:$0xff] %v16655_v31  ;;  %v6445_v20 = vmul.f32 0.03125, %v16202_v40  ;;  %v6692_v50 = vmul.f32 %v16644_v21, %v16644_v21 }
 0x6c9   :  { %6915 = vadd.xlane.f32.xlu1 %v6914_v8  ;;  %v16632_v43 = vpop.xlane.xlu0 %6288  ;;  %v6920_v8 = vsel %vm1733_vm2, %v6704_v63, 0.0  ;;  %v16662_v63 = vsub.f32 %v20474_v39, %v6438_v38  ;;  %v6683_v0 = vmul.f32 %v16655_v31, %v16655_v31  ;;  %v6442_v39 = vmul.f32 0.03125, %v16224_v47 }
 0x6ca   :  { %v16634_v35 = vpop.xlane.xlu1 %6273  ;;  %v6845_v5 = vsel %vm1733_vm2, %v6679_v49, 0.0  ;;  %v20476_v49 = vld [vmem:[#allocation14_spill] sm:$0xff]  ;;  %v6449_v31 = vmul.f32 0.03125, %v16238_v15 }
 0x6cb   :  { %20475 = vst [vmem:[#allocation120_spill] sm:$0xff] %v16662_v63  ;;  %v16673_v24 = vsub.f32 %v20476_v49, %v6445_v20  ;;  %v6694_v21 = vmul.f32 %v16662_v63, %v16662_v63 }
 0x6cc   :  { %6840 = vadd.xlane.f32.xlu0 %v6839_v42  ;;  %v6681_v42 = vmul.f32 %v16637_v55, %v16637_v55  ;;  %v6447_v55 = vmul.f32 0.03125, %v16220_v9 }
 0x6cd   :  { %6921 = vadd.xlane.f32.xlu1 %v6920_v8  ;;  %v16650_v12 = vpop.xlane.xlu0 %6294  ;;  %v6926_v8 = vsel %vm1733_vm2, %v6706_v29, 0.0  ;;  %20477 = vst [vmem:[#allocation10_spill] sm:$0xff] %v16673_v24  ;;  %v6701_v47 = vmul.f32 %v16673_v24, %v16673_v24  ;;  %v6451_v24 = vmul.f32 0.03125, %v16254_v62 }
 0x6ce   :  { %v16652_v56 = vpop.xlane.xlu1 %6279  ;;  %v6851_v38 = vsel %vm1733_vm2, %v6681_v42, 0.0  ;;  %v20480_v42 = vld [vmem:[#allocation95_spill] sm:$0xff] }
 0x6cf   :  { %v16691_v49 = vsub.f32 %v20480_v42, %v6447_v55 }
 0x6d0   :  { %6846 = vadd.xlane.f32.xlu0 %v6845_v5  ;;  %v20478_v5 = vld [vmem:[#allocation92_spill] sm:$0xff] }
 0x6d1   :  { %6927 = vadd.xlane.f32.xlu1 %v6926_v8  ;;  %v16668_v48 = vpop.xlane.xlu0 %6300  ;;  %v16680_v29 = vsub.f32 %v20478_v5, %v6440_v54  ;;  %v6884_v8 = vsel %vm1733_vm2, %v6692_v50, 0.0  ;;  %20481 = vst [vmem:[#allocation121_spill] sm:$0xff] %v16691_v49  ;;  %v6857_v54 = vsel %vm1733_vm2, %v6683_v0, 0.0  ;;  %v6452_v5 = vmul.f32 0.03125, %v16309_v18  ;;  %v20484_v0 = vld [vmem:[#allocation126_spill] sm:$0xff] }
 0x6d2   :  { %v16670_v40 = vpop.xlane.xlu1 %6333  ;;  %v16709_v42 = vsub.f32 %v20484_v0, %v6449_v31  ;;  %v6703_v18 = vmul.f32 %v16691_v49, %v16691_v49  ;;  %v6437_v49 = vmul.f32 0.03125, %v16270_v10 }
 0x6d3   :  { %20479 = vst [vmem:[#allocation11_spill] sm:$0xff] %v16680_v29  ;;  %v6696_v63 = vmul.f32 %v16680_v29, %v16680_v29 }
 0x6d4   :  { %6852 = vadd.xlane.f32.xlu0 %v6851_v38  ;;  %v20482_v38 = vld [vmem:[#allocation125_spill] sm:$0xff]  ;;  %20485 = vst [vmem:[#allocation123_spill] sm:$0xff] %v16709_v42 }
 0x6d5   :  { %6885 = vadd.xlane.f32.xlu1 %v6884_v8  ;;  %v16686_v20 = vpop.xlane.xlu0 %6306  ;;  %v16698_v50 = vsub.f32 %v20482_v38, %v6442_v39  ;;  %v6890_v8 = vsel %vm1733_vm2, %v6694_v21, 0.0  ;;  %v6911_v39 = vsel %vm1733_vm2, %v6701_v47, 0.0  ;;  %v6476_v38 = vmul.f32 0.03125, %v16378_v25  ;;  %v20488_v47 = vld [vmem:[#allocation128_spill] sm:$0xff] }
 0x6d6   :  { %v16688_v9 = vpop.xlane.xlu1 %6339  ;;  %v16727_v0 = vsub.f32 %v20488_v47, %v6451_v24  ;;  %v6705_v25 = vmul.f32 %v16709_v42, %v16709_v42  ;;  %v6439_v42 = vmul.f32 0.03125, %v16289_v61 }
 0x6d7   :  { %20483 = vst [vmem:[#allocation75_spill] sm:$0xff] %v16698_v50  ;;  %v6698_v29 = vmul.f32 %v16698_v50, %v16698_v50 }
 0x6d8   :  { %6858 = vadd.xlane.f32.xlu0 %v6857_v54  ;;  %v20486_v54 = vld [vmem:[#allocation20_spill] sm:$0xff]  ;;  %20489 = vst [vmem:[#allocation124_spill] sm:$0xff] %v16727_v0 }
 0x6d9   :  { %6891 = vadd.xlane.f32.xlu1 %v6890_v8  ;;  %v16704_v55 = vpop.xlane.xlu0 %6264  ;;  %v16716_v21 = vsub.f32 %v20486_v54, %v6452_v5  ;;  %v6896_v8 = vsel %vm1733_vm2, %v6696_v63, 0.0  ;;  %v6917_v5 = vsel %vm1733_vm2, %v6703_v18, 0.0  ;;  %v6478_v54 = vmul.f32 0.03125, %v16399_v46  ;;  %v20492_v18 = vld [vmem:[#allocation17_spill] sm:$0xff] }
 0x6da   :  { %v16706_v15 = vpop.xlane.xlu1 %6345  ;;  %v16745_v47 = vsub.f32 %v20492_v18, %v6437_v49  ;;  %v6707_v46 = vmul.f32 %v16727_v0, %v16727_v0  ;;  %v6441_v0 = vmul.f32 0.03125, %v16307_v60 }
 0x6db   :  { %20487 = vst [vmem:[#allocation21_spill] sm:$0xff] %v16716_v21  ;;  %v6708_v50 = vmul.f32 %v16716_v21, %v16716_v21 }
 0x6dc   :  { %6912 = vadd.xlane.f32.xlu0 %v6911_v39  ;;  %v20490_v39 = vld [vmem:[#allocation24_spill] sm:$0xff]  ;;  %20493 = vst [vmem:[#allocation12_spill] sm:$0xff] %v16745_v47 }
 0x6dd   :  { %6897 = vadd.xlane.f32.xlu1 %v6896_v8  ;;  %v16722_v31 = vpop.xlane.xlu0 %6270  ;;  %v16734_v63 = vsub.f32 %v20490_v39, %v6476_v38  ;;  %v6902_v8 = vsel %vm1733_vm2, %v6698_v29, 0.0  ;;  %v6923_v38 = vsel %vm1733_vm2, %v6705_v25, 0.0  ;;  %v6480_v39 = vmul.f32 0.03125, %v16418_v14  ;;  %v20496_v25 = vld [vmem:[#allocation66_spill] sm:$0xff] }
 0x6de   :  { %v16724_v62 = vpop.xlane.xlu1 %6351  ;;  %v16763_v18 = vsub.f32 %v20496_v25, %v6439_v42  ;;  %v6693_v14 = vmul.f32 %v16745_v47, %v16745_v47  ;;  %v6443_v47 = vmul.f32 0.03125, %v16324_v30 }
 0x6df   :  { %20491 = vst [vmem:[#allocation76_spill] sm:$0xff] %v16734_v63  ;;  %v6732_v21 = vmul.f32 %v16734_v63, %v16734_v63 }
 0x6e0   :  { %6918 = vadd.xlane.f32.xlu0 %v6917_v5  ;;  %v20494_v5 = vld [vmem:[#allocation107_spill] sm:$0xff]  ;;  %20497 = vst [vmem:[#allocation91_spill] sm:$0xff] %v16763_v18 }
 0x6e1   :  { %6903 = vadd.xlane.f32.xlu1 %v6902_v8  ;;  %v16740_v24 = vpop.xlane.xlu0 %6276  ;;  %v16752_v29 = vsub.f32 %v20494_v5, %v6478_v54  ;;  %v6932_v8 = vsel %vm1733_vm2, %v6708_v50, 0.0  ;;  %v6929_v54 = vsel %vm1733_vm2, %v6707_v46, 0.0  ;;  %v6482_v5 = vmul.f32 0.03125, %v16436_v44  ;;  %v20500_v46 = vld [vmem:[#allocation129_spill] sm:$0xff] }
 0x6e2   :  { %v16742_v10 = vpop.xlane.xlu1 %6309  ;;  %v16781_v25 = vsub.f32 %v20500_v46, %v6441_v0  ;;  %v6695_v44 = vmul.f32 %v16763_v18, %v16763_v18  ;;  %v6453_v18 = vmul.f32 0.03125, %v16416_v37 }
 0x6e3   :  { %20495 = vst [vmem:[#allocation80_spill] sm:$0xff] %v16752_v29  ;;  %v6734_v63 = vmul.f32 %v16752_v29, %v16752_v29 }
 0x6e4   :  { %6924 = vadd.xlane.f32.xlu0 %v6923_v38  ;;  %v20498_v38 = vld [vmem:[#allocation133_spill] sm:$0xff]  ;;  %20501 = vst [vmem:[#allocation14_spill] sm:$0xff] %v16781_v25 }
 0x6e5   :  { %6933 = vadd.xlane.f32.xlu1 %v6932_v8  ;;  %v16758_v49 = vpop.xlane.xlu0 %6282  ;;  %v16770_v50 = vsub.f32 %v20498_v38, %v6480_v39  ;;  %v7004_v8 = vsel %vm1733_vm2, %v6732_v21, 0.0  ;;  %v6887_v39 = vsel %vm1733_vm2, %v6693_v14, 0.0  ;;  %v6468_v38 = vmul.f32 0.03125, %v16454_v28  ;;  %v20504_v14 = vld [vmem:[#allocation22_spill] sm:$0xff] }
 0x6e6   :  { %v16760_v61 = vpop.xlane.xlu1 %6315  ;;  %v16799_v46 = vsub.f32 %v20504_v14, %v6443_v47  ;;  %v6697_v28 = vmul.f32 %v16781_v25, %v16781_v25  ;;  %v6477_v25 = vmul.f32 0.03125, %v16488_v52 }
 0x6e7   :  { %20499 = vst [vmem:[#allocation13_spill] sm:$0xff] %v16770_v50  ;;  %v6736_v29 = vmul.f32 %v16770_v50, %v16770_v50 }
 0x6e8   :  { %6930 = vadd.xlane.f32.xlu0 %v6929_v54  ;;  %v20502_v54 = vld [vmem:[#allocation135_spill] sm:$0xff]  ;;  %20505 = vst [vmem:[#allocation95_spill] sm:$0xff] %v16799_v46 }
 0x6e9   :  { %7005 = vadd.xlane.f32.xlu1 %v7004_v8  ;;  %v16776_v42 = vpop.xlane.xlu0 %6336  ;;  %v16788_v21 = vsub.f32 %v20502_v54, %v6482_v5  ;;  %v7010_v8 = vsel %vm1733_vm2, %v6734_v63, 0.0  ;;  %v6893_v5 = vsel %vm1733_vm2, %v6695_v44, 0.0  ;;  %v6470_v54 = vmul.f32 0.03125, %v16472_v57  ;;  %v20508_v44 = vld [vmem:[#allocation132_spill] sm:$0xff] }
 0x6ea   :  { %v16778_v60 = vpop.xlane.xlu1 %6321  ;;  %v16817_v14 = vsub.f32 %v20508_v44, %v6453_v18  ;;  %v6699_v57 = vmul.f32 %v16799_v46, %v16799_v46  ;;  %v6479_v46 = vmul.f32 0.03125, %v16506_v53 }
 0x6eb   :  { %20503 = vst [vmem:[#allocation92_spill] sm:$0xff] %v16788_v21  ;;  %v6738_v50 = vmul.f32 %v16788_v21, %v16788_v21 }
 0x6ec   :  { %6888 = vadd.xlane.f32.xlu0 %v6887_v39  ;;  %v20506_v39 = vld [vmem:[#allocation115_spill] sm:$0xff]  ;;  %20509 = vst [vmem:[#allocation126_spill] sm:$0xff] %v16817_v14 }
 0x6ed   :  { %7011 = vadd.xlane.f32.xlu1 %v7010_v8  ;;  %v16794_v0 = vpop.xlane.xlu0 %6342  ;;  %v16806_v63 = vsub.f32 %v20506_v39, %v6468_v38  ;;  %v7016_v8 = vsel %vm1733_vm2, %v6736_v29, 0.0  ;;  %v6899_v38 = vsel %vm1733_vm2, %v6697_v28, 0.0  ;;  %v6472_v39 = vmul.f32 0.03125, %v16490_v45  ;;  %v20512_v28 = vld [vmem:[#allocation140_spill] sm:$0xff] }
 0x6ee   :  { %v16796_v30 = vpop.xlane.xlu1 %6327  ;;  %v16835_v44 = vsub.f32 %v20512_v28, %v6477_v25  ;;  %v6709_v45 = vmul.f32 %v16817_v14, %v16817_v14  ;;  %v6481_v14 = vmul.f32 0.03125, %v16524_v58 }
 0x6ef   :  { %20507 = vst [vmem:[#allocation125_spill] sm:$0xff] %v16806_v63  ;;  %v6724_v21 = vmul.f32 %v16806_v63, %v16806_v63 }
 0x6f0   :  { %6894 = vadd.xlane.f32.xlu0 %v6893_v5  ;;  %v20510_v5 = vld [vmem:[#allocation119_spill] sm:$0xff]  ;;  %20513 = vst [vmem:[#allocation128_spill] sm:$0xff] %v16835_v44 }
 0x6f1   :  { %7017 = vadd.xlane.f32.xlu1 %v7016_v8  ;;  %v16812_v47 = vpop.xlane.xlu0 %6348  ;;  %v16824_v29 = vsub.f32 %v20510_v5, %v6470_v54  ;;  %v7022_v8 = vsel %vm1733_vm2, %v6738_v50, 0.0  ;;  %v6905_v54 = vsel %vm1733_vm2, %v6699_v57, 0.0  ;;  %v6474_v5 = vmul.f32 0.03125, %v16508_v2  ;;  %v20516_v57 = vld [vmem:[#allocation116_spill] sm:$0xff] }
 0x6f2   :  { %v16814_v37 = vpop.xlane.xlu1 %6381  ;;  %v16853_v28 = vsub.f32 %v20516_v57, %v6479_v46  ;;  %v6733_v2 = vmul.f32 %v16835_v44, %v16835_v44  ;;  %v6483_v44 = vmul.f32 0.03125, %v16542_v1 }
 0x6f3   :  { %20511 = vst [vmem:[#allocation20_spill] sm:$0xff] %v16824_v29  ;;  %v6726_v63 = vmul.f32 %v16824_v29, %v16824_v29 }
 0x6f4   :  { %6900 = vadd.xlane.f32.xlu0 %v6899_v38  ;;  %v20514_v38 = vld [vmem:[#allocation27_spill] sm:$0xff]  ;;  %20517 = vst [vmem:[#allocation17_spill] sm:$0xff] %v16853_v28 }
 0x6f5   :  { %7023 = vadd.xlane.f32.xlu1 %v7022_v8  ;;  %v16830_v18 = vpop.xlane.xlu0 %6354  ;;  %v16842_v50 = vsub.f32 %v20514_v38, %v6472_v39  ;;  %v6980_v8 = vsel %vm1733_vm2, %v6724_v21, 0.0  ;;  %v6935_v39 = vsel %vm1733_vm2, %v6709_v45, 0.0  ;;  %v6492_v38 = vmul.f32 0.03125, %v16526_v33  ;;  %v20521_v45 = vld [vmem:[#allocation30_spill] sm:$0xff] }
 0x6f6   :  { %v16832_v52 = vpop.xlane.xlu1 %6387  ;;  %v16871_v57 = vsub.f32 %v20521_v45, %v6481_v14  ;;  %v6735_v33 = vmul.f32 %v16853_v28, %v16853_v28  ;;  %v6469_v28 = vmul.f32 0.03125, %v16560_v23 }
 0x6f7   :  { %20515 = vst [vmem:[#allocation24_spill] sm:$0xff] %v16842_v50  ;;  %v6728_v29 = vmul.f32 %v16842_v50, %v16842_v50 }
 0x6f8   :  { %6906 = vadd.xlane.f32.xlu0 %v6905_v54  ;;  %v20518_v54 = vld [vmem:[#allocation25_spill] sm:$0xff]  ;;  %20522 = vst [vmem:[#allocation133_spill] sm:$0xff] %v16871_v57 }
 0x6f9   :  { %6981 = vadd.xlane.f32.xlu1 %v6980_v8  ;;  %v16848_v25 = vpop.xlane.xlu0 %6312  ;;  %v16860_v21 = vsub.f32 %v20518_v54, %v6474_v5  ;;  %v6986_v8 = vsel %vm1733_vm2, %v6726_v63, 0.0  ;;  %v7007_v5 = vsel %vm1733_vm2, %v6733_v2, 0.0  ;;  %v6494_v54 = vmul.f32 0.03125, %v16544_v34  ;;  %v20525_v2 = vld [vmem:[#allocation33_spill] sm:$0xff] }
 0x6fa   :  { %v16850_v53 = vpop.xlane.xlu1 %6393  ;;  %v16889_v45 = vsub.f32 %v20525_v2, %v6483_v44  ;;  %v6737_v34 = vmul.f32 %v16871_v57, %v16871_v57  ;;  %v6471_v57 = vmul.f32 0.03125, %v16578_v59  ;;  %v6460_v59 = vmul.f32 0.03125, %v16241_v17 }
 0x6fb   :  { %20519 = vst [vmem:[#allocation107_spill] sm:$0xff] %v16860_v21  ;;  %v6730_v50 = vmul.f32 %v16860_v21, %v16860_v21 }
 0x6fc   :  { %6936 = vadd.xlane.f32.xlu0 %v6935_v39  ;;  %v20523_v39 = vld [vmem:[#allocation29_spill] sm:$0xff]  ;;  %20526 = vst [vmem:[#allocation135_spill] sm:$0xff] %v16889_v45 }
 0x6fd   :  { %6987 = vadd.xlane.f32.xlu1 %v6986_v8  ;;  %v16866_v46 = vpop.xlane.xlu0 %6318  ;;  %v16878_v63 = vsub.f32 %v20523_v39, %v6492_v38  ;;  %v6992_v8 = vsel %vm1733_vm2, %v6728_v29, 0.0  ;;  %v7013_v38 = vsel %vm1733_vm2, %v6735_v33, 0.0  ;;  %v6496_v39 = vmul.f32 0.03125, %v16562_v51  ;;  %v20529_v33 = vld [vmem:[#allocation38_spill] sm:$0xff] }
 0x6fe   :  { %v16868_v58 = vpop.xlane.xlu1 %6399  ;;  %v16907_v2 = vsub.f32 %v20529_v33, %v6469_v28  ;;  %v6739_v51 = vmul.f32 %v16889_v45, %v16889_v45  ;;  %v20535_v45 = vld [vmem:[#allocation36_spill] sm:$0xff] }
 0x6ff   :  { %20520 = vst [vmem:[#allocation66_spill] sm:$0xff] %v16868_v58  ;;  %20524 = vst [vmem:[#allocation129_spill] sm:$0xff] %v16878_v63  ;;  %v6748_v21 = vmul.f32 %v16878_v63, %v16878_v63 }
 0x700   :  { %7008 = vadd.xlane.f32.xlu0 %v7007_v5  ;;  %v20527_v5 = vld [vmem:[#allocation122_spill] sm:$0xff]  ;;  %20530 = vst [vmem:[#allocation115_spill] sm:$0xff] %v16907_v2 }
 0x701   :  { %6993 = vadd.xlane.f32.xlu1 %v6992_v8  ;;  %v16884_v14 = vpop.xlane.xlu0 %6324  ;;  %v16896_v29 = vsub.f32 %v20527_v5, %v6494_v54  ;;  %v6998_v8 = vsel %vm1733_vm2, %v6730_v50, 0.0  ;;  %v7019_v54 = vsel %vm1733_vm2, %v6737_v34, 0.0  ;;  %v6498_v5 = vmul.f32 0.03125, %v16580_v32  ;;  %v20534_v34 = vld [vmem:[#allocation93_spill] sm:$0xff] }
 0x702   :  { %v16886_v1 = vpop.xlane.xlu1 %6357  ;;  %v6462_v33 = vmul.f32 0.03125, %v20534_v34  ;;  %v6473_v32 = vmul.f32 0.03125, %v16596_v19  ;;  %v20540_v19 = vld [vmem:[#allocation127_spill] sm:$0xff] }
 0x703   :  { %20528 = vst [vmem:[#allocation22_spill] sm:$0xff] %v16896_v29  ;;  %v6750_v63 = vmul.f32 %v16896_v29, %v16896_v29  ;;  %v6484_v29 = vmul.f32 0.03125, %v16598_v3  ;;  %v20544_v3 = vld [vmem:[#allocation34_spill] sm:$0xff] }
 0x704   :  { %7014 = vadd.xlane.f32.xlu0 %v7013_v38  ;;  %v20531_v38 = vld [vmem:[#allocation32_spill] sm:$0xff] }
 0x705   :  { %6999 = vadd.xlane.f32.xlu1 %v6998_v8  ;;  %v16902_v44 = vpop.xlane.xlu0 %6330  ;;  %v16914_v50 = vsub.f32 %v20531_v38, %v6496_v39  ;;  %v7052_v8 = vsel %vm1733_vm2, %v6748_v21, 0.0  ;;  %v16927_v39 = vsub.f32 %v20535_v45, %v6471_v57  ;;  %v6725_v21 = vmul.f32 %v16907_v2, %v16907_v2  ;;  %v20537_v38 = vld [vmem:[#allocation31_spill] sm:$0xff] }
 0x706   :  { %v16904_v23 = vpop.xlane.xlu1 %6363  ;;  %v7058_v17 = vsel %vm1733_vm2, %v6750_v63, 0.0  ;;  %v16943_v45 = vsub.f32 %v20540_v19, %v6460_v59  ;;  %v6486_v59 = vmul.f32 0.03125, %v16616_v41  ;;  %v6464_v19 = vmul.f32 0.03125, %v16272_v11 }
 0x707   :  { %20532 = vst [vmem:[#allocation132_spill] sm:$0xff] %v16914_v50  ;;  %20536 = vst [vmem:[#allocation140_spill] sm:$0xff] %v16927_v39  ;;  %v6752_v34 = vmul.f32 %v16914_v50, %v16914_v50  ;;  %v6983_v63 = vsel %vm1733_vm2, %v6725_v21, 0.0  ;;  %v20546_v50 = vld [vmem:[#allocation40_spill] sm:$0xff]  ;;  %v20549_v21 = vld [vmem:[#allocation42_spill] sm:$0xff] }
 0x708   :  { %7020 = vadd.xlane.f32.xlu0 %v7019_v54  ;;  %v7025_v54 = vsel %vm1733_vm2, %v6739_v51, 0.0  ;;  %20541 = vst [vmem:[#allocation25_spill] sm:$0xff] %v16943_v45  ;;  %v20542_v51 = vld [vmem:[#allocation98_spill] sm:$0xff]  ;;  %v16958_v2 = vsub.f32 %v20546_v50, %v6484_v29  ;;  %v6716_v29 = vmul.f32 %v16943_v45, %v16943_v45  ;;  %v6493_v50 = vmul.f32 0.03125, %v16632_v43 }
 0x709   :  { %7053 = vadd.xlane.f32.xlu1 %v7052_v8  ;;  %v16920_v28 = vpop.xlane.xlu0 %6384  ;;  %v16934_v8 = vsub.f32 %v20537_v38, %v6498_v5  ;;  %v6475_v5 = vmul.f32 0.03125, %v16614_v26  ;;  %v6466_v43 = vmul.f32 0.03125, %v16291_v6 }
 0x70a   :  { %20533 = vst [vmem:[#allocation119_spill] sm:$0xff] %v16920_v28  ;;  %v16924_v58 = vpop.xlane.xlu1 %6369  ;;  %v16946_v28 = vsub.f32 %v20542_v51, %v6462_v33  ;;  %20547 = vst [vmem:[#allocation33_spill] sm:$0xff] %v16958_v2  ;;  %v7064_v33 = vsel %vm1733_vm2, %v6752_v34, 0.0  ;;  %v6740_v45 = vmul.f32 %v16958_v2, %v16958_v2 }
 0x70b   :  { %20538 = vst [vmem:[#allocation27_spill] sm:$0xff] %v16934_v8  ;;  %v6754_v26 = vmul.f32 %v16934_v8, %v16934_v8  ;;  %v16968_v51 = vsub.f32 %v20549_v21, %v6475_v5  ;;  %v6488_v5 = vmul.f32 0.03125, %v16634_v35 }
 0x70c   :  { %7026 = vadd.xlane.f32.xlu0 %v7025_v54  ;;  %20543 = vst [vmem:[#allocation30_spill] sm:$0xff] %v16946_v28  ;;  %v16952_v54 = vsub.f32 %v20544_v3, %v6473_v32  ;;  %v6718_v41 = vmul.f32 %v16946_v28, %v16946_v28  ;;  %v20553_v28 = vld [vmem:[#allocation16_spill] sm:$0xff] }
 0x70d   :  { %7059 = vadd.xlane.f32.xlu1 %v7058_v17  ;;  %v16940_v57 = vpop.xlane.xlu0 %6390  ;;  %v6727_v17 = vmul.f32 %v16927_v39, %v16927_v39  ;;  %20550 = vst [vmem:[#allocation38_spill] sm:$0xff] %v16968_v51  ;;  %v7070_v21 = vsel %vm1733_vm2, %v6754_v26, 0.0  ;;  %v16986_v39 = vsub.f32 %v20553_v28, %v6464_v19  ;;  %v6731_v35 = vmul.f32 %v16968_v51, %v16968_v51 }
 0x70e   :  { %20539 = vst [vmem:[#allocation116_spill] sm:$0xff] %v16940_v57  ;;  %v16949_v38 = vpop.xlane.xlu1 %6375  ;;  %20545 = vst [vmem:[#allocation29_spill] sm:$0xff] %v16952_v54  ;;  %v6729_v11 = vmul.f32 %v16952_v54, %v16952_v54  ;;  %v16995_v26 = vsel %vm1733_vm2, %v6716_v29, 0.0  ;;  %v17002_v6 = vsel %vm1733_vm2, %v6718_v41, 0.0  ;;  %v7028_v51 = vsel %vm1733_vm2, %v6740_v45, 0.0  ;;  %v20560_v54 = vld [vmem:[#allocation15_spill] sm:$0xff] }
 0x70f   :  { %20554 = vst [vmem:[#allocation93_spill] sm:$0xff] %v16986_v39  ;;  %v6720_v41 = vmul.f32 %v16986_v39, %v16986_v39 }
 0x710   :  { %6984 = vadd.xlane.f32.xlu0 %v6983_v63  ;;  %v6989_v63 = vsel %vm1733_vm2, %v6727_v17, 0.0  ;;  %v6995_v19 = vsel %vm1733_vm2, %v6729_v11, 0.0 }
 0x711   :  { %7065 = vadd.xlane.f32.xlu1 %v7064_v33  ;;  %v16965_v32 = vpop.xlane.xlu0 %6396  ;;  %v20551_v33 = vld [vmem:[#allocation47_spill] sm:$0xff] }
 0x712   :  { %20548 = vst [vmem:[#allocation122_spill] sm:$0xff] %v16965_v32  ;;  %v6814_v3 = vpop.xlane.xlu1 %6813  ;;  %v16979_v8 = vsub.f32 %v20551_v33, %v6486_v59  ;;  %v6495_v59 = vmul.f32 0.03125, %v16650_v12  ;;  %v6490_v12 = vmul.f32 0.03125, %v16652_v56  ;;  %v6461_v56 = vmul.f32 0.03125, %v16341_v22  ;;  %v20600_v32 = vld [vmem:[#allocation150_spill] sm:$0xff] }
 0x713   :  { %v7180_v34 = vmul.f32 0.03125, %v6814_v3 }
 0x714   :  { %20552 = vst [vmem:[#allocation32_spill] sm:$0xff] %v16979_v8  ;;  %6990 = vadd.xlane.f32.xlu0 %v6989_v63  ;;  %v20556_v63 = vld [vmem:[#allocation39_spill] sm:$0xff]  ;;  %v6742_v29 = vmul.f32 %v16979_v8, %v16979_v8  ;;  %v20572_v8 = vld [vmem:[#allocation61_spill] sm:$0xff] }
 0x715   :  { %v7308_v17 = vadd.f32 1e-05, %v7180_v34  ;;  %7071 = vadd.xlane.f32.xlu1 %v7070_v21  ;;  %v16989_v3 = vpop.xlane.xlu0 %6402  ;;  %v16998_v2 = vsub.f32 %v20556_v63, %v6493_v50  ;;  %v20558_v34 = vld [vmem:[#allocation45_spill] sm:$0xff]  ;;  %v17012_v50 = vsub.f32 %v20560_v54, %v6466_v43  ;;  %v6497_v54 = vmul.f32 0.03125, %v16668_v48 }
 0x716   :  { %20555 = vst [vmem:[#allocation36_spill] sm:$0xff] %v16989_v3  ;;  %v6820_v33 = vpop.xlane.xlu1 %6819  ;;  %v17005_v21 = vsub.f32 %v20558_v34, %v6488_v5  ;;  %v6454_v5 = vmul.f32 0.03125, %v16326_v36  ;;  %v20562_v63 = vld [vmem:[#allocation37_spill] sm:$0xff]  ;;  %v7001_v34 = vsel %vm1733_vm2, %v6731_v35, 0.0  ;;  %v6500_v36 = vmul.f32 0.03125, %v16742_v10 }
 0x717   :  { %20557 = vst [vmem:[#allocation31_spill] sm:$0xff] %v16998_v2  ;;  %v7182_v28 = vmul.f32 0.03125, %v6820_v33  ;;  %20561 = vst [vmem:[#allocation98_spill] sm:$0xff] %v17012_v50  ;;  %11398 = vrsqrt.f32 %v7308_v17  ;;  %v17021_v45 = vsub.f32 %v20562_v63, %v6495_v59  ;;  %v20564_v17 = vld [vmem:[#allocation44_spill] sm:$0xff]  ;;  %v7034_v22 = vsel %vm1733_vm2, %v6742_v29, 0.0 }
 0x718   :  { %20559 = vst [vmem:[#allocation127_spill] sm:$0xff] %v17005_v21  ;;  %6996 = vadd.xlane.f32.xlu0 %v6995_v19  ;;  %v6744_v59 = vmul.f32 %v17005_v21, %v17005_v21  ;;  %v6456_v35 = vmul.f32 0.03125, %v16343_v27 }
 0x719   :  { %v7310_v33 = vadd.f32 1e-05, %v7182_v28  ;;  %7029 = vadd.xlane.f32.xlu1 %v7028_v51  ;;  %v17014_v11 = vpop.xlane.xlu0 %6360  ;;  %20563 = vst [vmem:[#allocation34_spill] sm:$0xff] %v17021_v45  ;;  %v6749_v51 = vmul.f32 %v16998_v2, %v16998_v2  ;;  %v17028_v28 = vsub.f32 %v20564_v17, %v6490_v12  ;;  %v6722_v12 = vmul.f32 %v17012_v50, %v17012_v50 }
 0x71a   :  { %v6826_v19 = vpop.xlane.xlu1 %6825  ;;  %v6463_v17 = vmul.f32 0.03125, %v16358_v13  ;;  %v6751_v27 = vmul.f32 %v17021_v45, %v17021_v45  ;;  %v7040_v13 = vsel %vm1733_vm2, %v6744_v59, 0.0  ;;  %v20597_v45 = vld [vmem:[#allocation103_spill] sm:$0xff] }
 0x71b   :  { %11400 = vrsqrt.f32 %v7310_v33  ;;  %v7184_v43 = vmul.f32 0.03125, %v6826_v19  ;;  %20565 = vst [vmem:[#allocation40_spill] sm:$0xff] %v17028_v28  ;;  %v17038_v33 = vsel %vm1733_vm2, %v6720_v41, 0.0  ;;  %v20566_v19 = vld [vmem:[#allocation130_spill] sm:$0xff]  ;;  %v6499_v41 = vmul.f32 0.03125, %v16686_v20 }
 0x71c   :  { %7002 = vadd.xlane.f32.xlu0 %v7001_v34  ;;  %v17043_v10 = vsub.f32 %v20566_v19, %v6454_v5  ;;  %v20568_v34 = vld [vmem:[#allocation69_spill] sm:$0xff]  ;;  %v7055_v50 = vsel %vm1733_vm2, %v6749_v51, 0.0  ;;  %v17057_v5 = vsub.f32 %v20572_v8, %v6500_v36  ;;  %v6746_v19 = vmul.f32 %v17028_v28, %v17028_v28  ;;  %v20576_v8 = vld [vmem:[#allocation74_spill] sm:$0xff] }
 0x71d   :  { %v7312_v63 = vadd.f32 1e-05, %v7184_v43  ;;  %7035 = vadd.xlane.f32.xlu1 %v7034_v22  ;;  %v17035_v48 = vpop.xlane.xlu0 %6366  ;;  %v17046_v29 = vsub.f32 %v20568_v34, %v6461_v56  ;;  %v20570_v43 = vld [vmem:[#allocation41_spill] sm:$0xff]  ;;  %v6502_v56 = vmul.f32 0.03125, %v16760_v61  ;;  %v20574_v34 = vld [vmem:[#allocation71_spill] sm:$0xff]  ;;  %v17070_v51 = vsub.f32 %v20576_v8, %v6463_v17 }
 0x71e   :  { %20567 = vst [vmem:[#allocation42_spill] sm:$0xff] %v17043_v10  ;;  %v6832_v39 = vpop.xlane.xlu1 %6831  ;;  %v17052_v22 = vsub.f32 %v20570_v43, %v6497_v54  ;;  %20573 = vst [vmem:[#allocation39_spill] sm:$0xff] %v17057_v5  ;;  %v17064_v2 = vsub.f32 %v20574_v34, %v6456_v35  ;;  %v6458_v54 = vmul.f32 0.03125, %v16360_v7  ;;  %v6485_v61 = vmul.f32 0.03125, %v16704_v55  ;;  %v20578_v43 = vld [vmem:[#allocation48_spill] sm:$0xff]  ;;  %v20580_v17 = vld [vmem:[#allocation65_spill] sm:$0xff] }
 0x71f   :  { %20569 = vst [vmem:[#allocation47_spill] sm:$0xff] %v17046_v29  ;;  %v7186_v21 = vmul.f32 0.03125, %v6832_v39  ;;  %11402 = vrsqrt.f32 %v7312_v63  ;;  %20577 = vst [vmem:[#allocation15_spill] sm:$0xff] %v17070_v51  ;;  %v7061_v36 = vsel %vm1733_vm2, %v6751_v27, 0.0  ;;  %v17077_v59 = vsel %vm1733_vm2, %v6722_v12, 0.0  ;;  %v20582_v34 = vld [vmem:[#allocation19_spill] sm:$0xff] }
 0x720   :  { %20571 = vst [vmem:[#allocation16_spill] sm:$0xff] %v17052_v22  ;;  %7056 = vadd.xlane.f32.xlu0 %v7055_v50  ;;  %20575 = vst [vmem:[#allocation45_spill] sm:$0xff] %v17064_v2  ;;  %v17080_v7 = vsub.f32 %v20578_v43, %v6499_v41  ;;  %v6753_v63 = vmul.f32 %v17052_v22, %v17052_v22  ;;  %v7046_v55 = vsel %vm1733_vm2, %v6746_v19, 0.0 }
 0x721   :  { %v7314_v20 = vadd.f32 1e-05, %v7186_v21  ;;  %7041 = vadd.xlane.f32.xlu1 %v7040_v13  ;;  %v17067_v39 = vpop.xlane.xlu0 %6372  ;;  %v11399_v35 = vpop.eup %11398  ;;  %v6504_v21 = vmul.f32 0.03125, %v16778_v60  ;;  %v17086_v13 = vsub.f32 %v20580_v17, %v6502_v56  ;;  %v6756_v12 = vmul.f32 %v17057_v5, %v17057_v5  ;;  %v20588_v5 = vld [vmem:[#allocation62_spill] sm:$0xff] }
 0x722   :  { %v17073_v50 = vpop.xlane.xlu1 %6789  ;;  %20579 = vst [vmem:[#allocation37_spill] sm:$0xff] %v17080_v7  ;;  %v6710_v27 = vmul.f32 %v17043_v10, %v17043_v10  ;;  %v17094_v8 = vsub.f32 %v20582_v34, %v6458_v54  ;;  %v6465_v60 = vmul.f32 0.03125, %v16376_v4  ;;  %v6712_v56 = vmul.f32 %v17064_v2, %v17064_v2  ;;  %v20587_v10 = vld [vmem:[#allocation94_spill] sm:$0xff] }
 0x723   :  { %11404 = vrsqrt.f32 %v7314_v20  ;;  %20581 = vst [vmem:[#allocation44_spill] sm:$0xff] %v17086_v13  ;;  %v6717_v19 = vmul.f32 %v17046_v29, %v17046_v29  ;;  %v17107_v17 = vmul.f32 %v11399_v35, %v16281_v16  ;;  %v6719_v4 = vmul.f32 %v17070_v51, %v17070_v51 }
 0x724   :  { %7062 = vadd.xlane.f32.xlu0 %v7061_v36  ;;  %20583 = vst [vmem:[#allocation130_spill] sm:$0xff] %v17094_v8  ;;  %v20585_v36 = vld [vmem:[#allocation50_spill] sm:$0xff]  ;;  %v17116_v2 = vsub.f32 %v20588_v5, %v6504_v21  ;;  %v7067_v29 = vsel %vm1733_vm2, %v6753_v63, 0.0  ;;  %v6506_v16 = vmul.f32 0.03125, %v16796_v30  ;;  %v6758_v35 = vmul.f32 %v17086_v13, %v17086_v13 }
 0x725   :  { %v11401_v41 = vpop.eup %11400  ;;  %7047 = vadd.xlane.f32.xlu1 %v7046_v55  ;;  %v17097_v20 = vpop.xlane.xlu0 %6378  ;;  %v17104_v43 = vsub.f32 %v20585_v36, %v6485_v61  ;;  %v6487_v55 = vmul.f32 0.03125, %v16722_v31  ;;  %v6755_v61 = vmul.f32 %v17080_v7, %v17080_v7  ;;  %v20590_v31 = vld [vmem:[#allocation149_spill] sm:$0xff]  ;;  %v17129_v21 = vsel %vm1733_vm2, %v6710_v27, 0.0 }
 0x726   :  { %20584 = vst [vmem:[#allocation69_spill] sm:$0xff] %v17097_v20  ;;  %v17110_v54 = vmul.f32 %v11401_v41, %v20587_v10  ;;  %v6796_v34 = vpop.xlane.xlu1 %6795  ;;  %20589 = vst [vmem:[#allocation61_spill] sm:$0xff] %v17116_v2  ;;  %v7076_v10 = vsel %vm1733_vm2, %v6756_v12, 0.0  ;;  %v6455_v36 = vmul.f32 0.03125, %v20590_v31  ;;  %v17132_v63 = vsel %vm1733_vm2, %v6712_v56, 0.0  ;;  %v20593_v41 = vld [vmem:[#allocation59_spill] sm:$0xff] }
 0x727   :  { %20586 = vst [vmem:[#allocation41_spill] sm:$0xff] %v17104_v43  ;;  %v17135_v30 = vsel %vm1733_vm2, %v6717_v19, 0.0  ;;  %v6741_v31 = vmul.f32 %v17104_v43, %v17104_v43  ;;  %v17147_v28 = vsub.f32 %v20593_v41, %v6487_v55  ;;  %v6489_v56 = vmul.f32 0.03125, %v16740_v24  ;;  %v20596_v55 = vld [vmem:[#allocation138_spill] sm:$0xff]  ;;  %v20603_v20 = vld [vmem:[#allocation56_spill] sm:$0xff] }
 0x728   :  { %7068 = vadd.xlane.f32.xlu0 %v7067_v29  ;;  %v20591_v29 = vld [vmem:[#allocation26_spill] sm:$0xff]  ;;  %v7073_v19 = vsel %vm1733_vm2, %v6755_v61, 0.0  ;;  %v7082_v43 = vsel %vm1733_vm2, %v6758_v35, 0.0  ;;  %v6467_v41 = vmul.f32 0.03125, %v20596_v55  ;;  %v17162_v24 = vsub.f32 %v20597_v45, %v6455_v36  ;;  %v20599_v61 = vld [vmem:[#allocation143_spill] sm:$0xff] }
 0x729   :  { %7077 = vadd.xlane.f32.xlu1 %v7076_v10  ;;  %v6817_v5 = vpop.xlane.xlu0 %6816  ;;  %v17138_v12 = vsub.f32 %v20591_v29, %v6465_v60  ;;  %v6714_v10 = vmul.f32 %v17094_v8, %v17094_v8  ;;  %v11403_v27 = vpop.eup %11402  ;;  %v6760_v60 = vmul.f32 %v17116_v2, %v17116_v2  ;;  %v17158_v8 = vsel %vm1733_vm2, %v6719_v4, 0.0 }
 0x72a   :  { %v7181_v51 = vmul.f32 0.03125, %v6817_v5  ;;  %v17140_v13 = vpop.xlane.xlu1 %6801  ;;  %v20594_v5 = vld [vmem:[#allocation67_spill] sm:$0xff]  ;;  %20598 = vst [vmem:[#allocation48_spill] sm:$0xff] %v17162_v24  ;;  %v6457_v3 = vmul.f32 0.03125, %v20599_v61  ;;  %v6459_v2 = vmul.f32 0.03125, %v20600_v32  ;;  %v7031_v55 = vsel %vm1733_vm2, %v6741_v31, 0.0 }
 0x72b   :  { %20592 = vst [vmem:[#allocation71_spill] sm:$0xff] %v17138_v12  ;;  %v17154_v29 = vsub.f32 %v20594_v5, %v6506_v16  ;;  %v20601_v5 = vld [vmem:[#allocation131_spill] sm:$0xff]  ;;  %v17176_v45 = vsub.f32 %v20603_v20, %v6489_v56  ;;  %v6491_v36 = vmul.f32 0.03125, %v16758_v49  ;;  %v7088_v32 = vsel %vm1733_vm2, %v6760_v60, 0.0  ;;  %v20604_v31 = vld [vmem:[#allocation18_spill] sm:$0xff]  ;;  %v20606_v20 = vld [vmem:[#allocation28_spill] sm:$0xff] }
 0x72c   :  { %v7309_v7 = vadd.f32 1e-05, %v7181_v51  ;;  %7074 = vadd.xlane.f32.xlu0 %v7073_v19  ;;  %v17167_v51 = vmul.f32 %v11403_v27, %v20601_v5  ;;  %v20602_v19 = vld [vmem:[#allocation97_spill] sm:$0xff]  ;;  %v17190_v56 = vsub.f32 %v20606_v20, %v6457_v3  ;;  %v7174_v49 = vmul.f32 0.03125, %v6796_v34 }
 0x72d   :  { %20595 = vst [vmem:[#allocation74_spill] sm:$0xff] %v17154_v29  ;;  %v11405_v22 = vpop.eup %11404  ;;  %7083 = vadd.xlane.f32.xlu1 %v7082_v43  ;;  %v6823_v16 = vpop.xlane.xlu0 %6822  ;;  %v6743_v43 = vmul.f32 %v17147_v28, %v17147_v28  ;;  %v17193_v5 = vsel %vm1733_vm2, %v6714_v10, 0.0  ;;  %v6501_v3 = vmul.f32 0.03125, %v16848_v25  ;;  %v6745_v10 = vmul.f32 %v17176_v45, %v17176_v45 }
 0x72e   :  { %v17170_v35 = vmul.f32 %v11405_v22, %v20602_v19  ;;  %v7183_v4 = vmul.f32 0.03125, %v6823_v16  ;;  %v17172_v57 = vpop.xlane.xlu1 %6807  ;;  %11406 = vrsqrt.f32 %v7309_v7  ;;  %v6762_v22 = vmul.f32 %v17154_v29, %v17154_v29  ;;  %20607 = vst [vmem:[#allocation19_spill] sm:$0xff] %v17190_v56  ;;  %v20608_v7 = vld [vmem:[#allocation137_spill] sm:$0xff] }
 0x72f   :  { %v17187_v16 = vsub.f32 %v20604_v31, %v6467_v41  ;;  %v17196_v19 = vsub.f32 %v20608_v7, %v6459_v2  ;;  %v6711_v41 = vmul.f32 %v17162_v24, %v17162_v24  ;;  %v20610_v31 = vld [vmem:[#allocation58_spill] sm:$0xff]  ;;  %v7037_v34 = vsel %vm1733_vm2, %v6743_v43, 0.0 }
 0x730   :  { %v7311_v27 = vadd.f32 1e-05, %v7183_v4  ;;  %7032 = vadd.xlane.f32.xlu0 %v7031_v55  ;;  %v17203_v61 = vsub.f32 %v20610_v31, %v6491_v36  ;;  %v7172_v2 = vmul.f32 0.03125, %v17073_v50  ;;  %v17213_v20 = vmul.f32 %v17138_v12, %v17138_v12 }
 0x731   :  { %20605 = vst [vmem:[#allocation65_spill] sm:$0xff] %v17187_v16  ;;  %7089 = vadd.xlane.f32.xlu1 %v7088_v32  ;;  %v6829_v60 = vpop.xlane.xlu0 %6828  ;;  %20609 = vst [vmem:[#allocation50_spill] sm:$0xff] %v17196_v19  ;;  %v6508_v36 = vmul.f32 0.03125, %v16670_v40  ;;  %v6713_v43 = vmul.f32 %v17190_v56, %v17190_v56  ;;  %v17220_v7 = vmul.f32 %v17187_v16, %v17187_v16  ;;  %v6510_v50 = vmul.f32 0.03125, %v16688_v9 }
 0x732   :  { %11408 = vrsqrt.f32 %v7311_v27  ;;  %v7185_v4 = vmul.f32 0.03125, %v6829_v60  ;;  %v17198_v55 = vpop.xlane.xlu1 %6861  ;;  %20611 = vst [vmem:[#allocation94_spill] sm:$0xff] %v17203_v61  ;;  %v7094_v27 = vsel %vm1733_vm2, %v6762_v22, 0.0  ;;  %v7302_v60 = vadd.f32 1e-05, %v7174_v49  ;;  %v20612_v49 = vld [vmem:[#allocation85_spill] sm:$0xff] }
 0x733   :  { %v17226_v31 = vsel %vm1733_vm2, %v6711_v41, 0.0  ;;  %v6715_v40 = vmul.f32 %v17196_v19, %v17196_v19  ;;  %v7043_v12 = vsel %vm1733_vm2, %v6745_v10, 0.0  ;;  %v6747_v16 = vmul.f32 %v17203_v61, %v17203_v61  ;;  %v20614_v41 = vld [vmem:[#allocation49_spill] sm:$0xff] }
 0x734   :  { %v7313_v32 = vadd.f32 1e-05, %v7185_v4  ;;  %7038 = vadd.xlane.f32.xlu0 %v7037_v34  ;;  %v17231_v34 = vsub.f32 %v20612_v49, %v6501_v3  ;;  %v6512_v9 = vmul.f32 0.03125, %v16706_v15  ;;  %v17239_v24 = vsub.f32 %v20614_v41, %v6508_v36  ;;  %v20616_v49 = vld [vmem:[#allocation53_spill] sm:$0xff] }
 0x735   :  { %7095 = vadd.xlane.f32.xlu1 %v7094_v27  ;;  %v6835_v25 = vpop.xlane.xlu0 %6834  ;;  %v6503_v27 = vmul.f32 0.03125, %v16866_v46  ;;  %v6514_v19 = vmul.f32 0.03125, %v16724_v62  ;;  %v17244_v3 = vsel %vm1733_vm2, %v6713_v43, 0.0  ;;  %v17247_v29 = vsub.f32 %v20616_v49, %v6510_v50  ;;  %v20620_v50 = vld [vmem:[#allocation57_spill] sm:$0xff] }
 0x736   :  { %v7187_v4 = vmul.f32 0.03125, %v6835_v25  ;;  %v17223_v22 = vpop.xlane.xlu1 %6867  ;;  %20613 = vst [vmem:[#allocation62_spill] sm:$0xff] %v17231_v34  ;;  %v7300_v25 = vadd.f32 1e-05, %v7172_v2  ;;  %11410 = vrsqrt.f32 %v7313_v32  ;;  %20615 = vst [vmem:[#allocation149_spill] sm:$0xff] %v17239_v24  ;;  %v20618_v32 = vld [vmem:[#allocation82_spill] sm:$0xff] }
 0x737   :  { %11412 = vrsqrt.f32 %v7302_v60  ;;  %20617 = vst [vmem:[#allocation26_spill] sm:$0xff] %v17247_v29  ;;  %v17255_v62 = vsub.f32 %v20618_v32, %v6503_v27  ;;  %v7049_v36 = vsel %vm1733_vm2, %v6747_v16, 0.0  ;;  %v6757_v60 = vmul.f32 %v17231_v34, %v17231_v34  ;;  %v20624_v27 = vld [vmem:[#allocation139_spill] sm:$0xff] }
 0x738   :  { %v7315_v56 = vadd.f32 1e-05, %v7187_v4  ;;  %7044 = vadd.xlane.f32.xlu0 %v7043_v12  ;;  %v11407_v10 = vpop.eup %11406  ;;  %v17252_v12 = vsel %vm1733_vm2, %v6715_v40, 0.0  ;;  %v17262_v4 = vsub.f32 %v20620_v50, %v6512_v9  ;;  %v20622_v40 = vld [vmem:[#allocation63_spill] sm:$0xff]  ;;  %v6764_v34 = vmul.f32 %v17239_v24, %v17239_v24 }
 0x739   :  { %6939 = vadd.xlane.f32.xlu1 %v17129_v21  ;;  %v6793_v46 = vpop.xlane.xlu0 %6792  ;;  %20619 = vst [vmem:[#allocation59_spill] sm:$0xff] %v17255_v62  ;;  %v6505_v21 = vmul.f32 0.03125, %v16884_v14  ;;  %v7565_v49 = vmul.f32 %v11407_v10, %v20624_v27  ;;  %v20625_v14 = vld [vmem:[#allocation111_spill] sm:$0xff]  ;;  %v6507_v9 = vmul.f32 0.03125, %v16902_v44  ;;  %v6509_v27 = vmul.f32 0.03125, %v16776_v42 }
 0x73a   :  { %11414 = vrsqrt.f32 %v7315_v56  ;;  %v7173_v15 = vmul.f32 0.03125, %v6793_v46  ;;  %v17249_v2 = vpop.xlane.xlu1 %6873  ;;  %20621 = vst [vmem:[#allocation67_spill] sm:$0xff] %v17262_v4  ;;  %v7178_v56 = vmul.f32 0.03125, %v17172_v57  ;;  %v17266_v46 = vsub.f32 %v20622_v40, %v6514_v19 }
 0x73b   :  { %11416 = vrsqrt.f32 %v7300_v25  ;;  %v7176_v25 = vmul.f32 0.03125, %v17140_v13  ;;  %v6766_v19 = vmul.f32 %v17247_v29, %v17247_v29  ;;  %v6768_v13 = vmul.f32 %v17262_v4, %v17262_v4 }
 0x73c   :  { %v11409_v43 = vpop.eup %11408  ;;  %v7301_v41 = vadd.f32 1e-05, %v7173_v15  ;;  %7050 = vadd.xlane.f32.xlu0 %v7049_v36  ;;  %20623 = vst [vmem:[#allocation138_spill] sm:$0xff] %v17266_v46  ;;  %v20626_v36 = vld [vmem:[#allocation81_spill] sm:$0xff]  ;;  %v7306_v40 = vadd.f32 1e-05, %v7178_v56 }
 0x73d   :  { %v7567_v32 = vmul.f32 %v11409_v43, %v20625_v14  ;;  %6945 = vadd.xlane.f32.xlu1 %v17132_v63  ;;  %v6799_v16 = vpop.xlane.xlu0 %6798  ;;  %v17280_v10 = vsub.f32 %v20626_v36, %v6505_v21  ;;  %v7079_v43 = vsel %vm1733_vm2, %v6757_v60, 0.0  ;;  %v6759_v63 = vmul.f32 %v17255_v62, %v17255_v62  ;;  %v20628_v60 = vld [vmem:[#allocation5_spill] sm:$0xff] }
 0x73e   :  { %v7175_v57 = vmul.f32 0.03125, %v6799_v16  ;;  %v17275_v15 = vpop.xlane.xlu1 %6879  ;;  %11418 = vrsqrt.f32 %v7301_v41  ;;  %v6770_v21 = vmul.f32 %v17266_v46, %v17266_v46  ;;  %v20629_v16 = vcombine.low %v17107_v17, %v17110_v54 }
 0x73f   :  { %20627 = vst [vmem:[#allocation103_spill] sm:$0xff] %v17280_v10  ;;  %v7760_v50 = vcombine.low %v7565_v49, %v7567_v32  ;;  %v20630_v32 = vld [vmem:[#allocation88_spill] sm:$0xff]  ;;  %v7304_v42 = vadd.f32 1e-05, %v7176_v25  ;;  %v7085_v4 = vsel %vm1733_vm2, %v6759_v63, 0.0  ;;  %v6761_v17 = vmul.f32 %v17280_v10, %v17280_v10  ;;  %v20633_v63 = vld [vmem:[#allocation35_spill] sm:$0xff] }
 0x740   :  { %v7303_v44 = vadd.f32 1e-05, %v7175_v57  ;;  %7080 = vadd.xlane.f32.xlu0 %v7079_v43  ;;  %v17295_v49 = vrot.slane %v20629_v16, %v20628_v60  ;;  %v11411_v41 = vpop.eup %11410  ;;  %v17301_v57 = vsub.f32 %v20630_v32, %v6507_v9  ;;  %v6511_v9 = vmul.f32 0.03125, %v16794_v0 }
 0x741   :  { %6951 = vadd.xlane.f32.xlu1 %v17193_v5  ;;  %v6805_v14 = vpop.xlane.xlu0 %6804  ;;  %v17298_v56 = vrot.slane %v7760_v50, %v20628_v60  ;;  %v11413_v43 = vpop.eup %11412  ;;  %v7106_v29 = vsel %vm1733_vm2, %v6766_v19, 0.0  ;;  %v7112_v10 = vsel %vm1733_vm2, %v6768_v13, 0.0 }
 0x742   :  { %20631 = vst [vmem:[#allocation143_spill] sm:$0xff] %v17301_v57  ;;  %11420 = vrsqrt.f32 %v7303_v44  ;;  %v7177_v5 = vmul.f32 0.03125, %v6805_v14  ;;  %v17303_v36 = vpop.xlane.xlu1 %6837  ;;  %v7100_v44 = vsel %vm1733_vm2, %v6764_v34, 0.0  ;;  %v20632_v14 = vld [vmem:[#allocation106_spill] sm:$0xff]  ;;  %v6763_v0 = vmul.f32 %v17301_v57, %v17301_v57  ;;  %v20712_v57 = vld [vmem:[#allocation68_spill] sm:$0xff] }
 0x743   :  { %v7785_v54 = vcombine.high %v17295_v49, %v17298_v56  ;;  %v7784_v50 = vcombine.low %v17295_v49, %v17298_v56  ;;  %11422 = vrsqrt.f32 %v7306_v40  ;;  %v7569_v32 = vmul.f32 %v11411_v41, %v20632_v14  ;;  %v20636_v41 = vld [vmem:[#allocation102_spill] sm:$0xff] }
 0x744   :  { %v11415_v16 = vpop.eup %11414  ;;  %v7305_v25 = vadd.f32 1e-05, %v7177_v5  ;;  %7086 = vadd.xlane.f32.xlu0 %v7085_v4  ;;  %11424 = vrsqrt.f32 %v7304_v42  ;;  %v7118_v34 = vsel %vm1733_vm2, %v6770_v21, 0.0  ;;  %v20634_v4 = vld [vmem:[#allocation72_spill] sm:$0xff]  ;;  %v7558_v5 = vmul.f32 %v11413_v43, %v20636_v41 }
 0x745   :  { %v7571_v24 = vmul.f32 %v11415_v16, %v20633_v63  ;;  %7101 = vadd.xlane.f32.xlu1 %v7100_v44  ;;  %v6811_v46 = vpop.xlane.xlu0 %6810  ;;  %v11417_v62 = vpop.eup %11416  ;;  %v17324_v40 = vsub.f32 %v20634_v4, %v6509_v27  ;;  %v7091_v16 = vsel %vm1733_vm2, %v6761_v17, 0.0  ;;  %v20637_v44 = vld [vmem:[#allocation70_spill] sm:$0xff]  ;;  %v6513_v14 = vmul.f32 0.03125, %v16812_v47  ;;  %v20639_v63 = vld [vmem:[#allocation108_spill] sm:$0xff] }
 0x746   :  { %v7179_v49 = vmul.f32 0.03125, %v6811_v46  ;;  %v17318_v56 = vpop.xlane.xlu1 %6843  ;;  %v17329_v13 = vsub.f32 %v20637_v44, %v6511_v9  ;;  %v7198_v46 = vmul.f32 0.03125, %v17223_v22  ;;  %11426 = vrsqrt.f32 %v7305_v25 }
 0x747   :  { %20635 = vst [vmem:[#allocation150_spill] sm:$0xff] %v17324_v40  ;;  %v7776_v19 = vcombine.low %v7569_v32, %v7571_v24  ;;  %v7556_v21 = vmul.f32 %v11417_v62, %v20639_v63  ;;  %v20640_v43 = vcombine.low %v17167_v51, %v17170_v35  ;;  %v17340_v32 = vmul.f32 0.03125, %v16814_v37  ;;  %v20641_v37 = vld [vmem:[#allocation6_spill] sm:$0xff] }
 0x748   :  { %20638 = vst [vmem:[#allocation131_spill] sm:$0xff] %v17329_v13  ;;  %v7307_v42 = vadd.f32 1e-05, %v7179_v49  ;;  %7092 = vadd.xlane.f32.xlu0 %v7091_v16  ;;  %v11419_v9 = vpop.eup %11418  ;;  %v7196_v22 = vmul.f32 0.03125, %v17198_v55  ;;  %v7097_v47 = vsel %vm1733_vm2, %v6763_v0, 0.0  ;;  %v6515_v35 = vmul.f32 0.03125, %v16830_v18 }
 0x749   :  { %7107 = vadd.xlane.f32.xlu1 %v7106_v29  ;;  %v6865_v27 = vpop.xlane.xlu0 %6864  ;;  %v7775_v17 = vrot.slane %v20640_v43, %v20628_v60  ;;  %v7783_v24 = vrot.slane %v7776_v19, %v20628_v60  ;;  %v7202_v29 = vmul.f32 0.03125, %v17275_v15  ;;  %v7684_v49 = vcombine.low %v7556_v21, %v7558_v5  ;;  %v20642_v55 = vld [vmem:[#allocation141_spill] sm:$0xff] }
 0x74a   :  { %11428 = vrsqrt.f32 %v7307_v42  ;;  %v17343_v25 = vpop.xlane.xlu1 %6849  ;;  %v7326_v41 = vadd.f32 1e-05, %v7198_v46  ;;  %v7197_v16 = vmul.f32 0.03125, %v6865_v27  ;;  %v17349_v19 = vrot.slane %v7785_v54, %v20641_v37  ;;  %v20643_v42 = vld [vmem:[#allocation146_spill] sm:$0xff] }
 0x74b   :  { %v7801_v62 = vcombine.high %v7775_v17, %v7783_v24  ;;  %v7800_v4 = vcombine.low %v7775_v17, %v7783_v24  ;;  %v7557_v44 = vmul.f32 %v11419_v9, %v20642_v55  ;;  %v7324_v18 = vadd.f32 1e-05, %v7196_v22  ;;  %v20646_v22 = vld [vmem:[#allocation112_spill] sm:$0xff] }
 0x74c   :  { %v11421_v51 = vpop.eup %11420  ;;  %7098 = vadd.xlane.f32.xlu0 %v7097_v47  ;;  %v7200_v46 = vmul.f32 0.03125, %v17249_v2  ;;  %v17363_v54 = vrot.slane %v7784_v50, %v20641_v37  ;;  %v7330_v17 = vadd.f32 1e-05, %v7202_v29  ;;  %v17368_v24 = vrot.slane %v7684_v49, %v20628_v60 }
 0x74d   :  { %v7559_v63 = vmul.f32 %v11421_v51, %v20643_v42  ;;  %7113 = vadd.xlane.f32.xlu1 %v7112_v10  ;;  %v6871_v0 = vpop.xlane.xlu0 %6870  ;;  %v17354_v15 = vrot.slane %v7801_v62, %v20641_v37  ;;  %v17357_v5 = vrot.slane %v7800_v4, %v20641_v37  ;;  %v11423_v21 = vpop.eup %11422  ;;  %v7325_v62 = vadd.f32 1e-05, %v7197_v16 }
 0x74e   :  { %v7199_v27 = vmul.f32 0.03125, %v6871_v0  ;;  %v17360_v43 = vpop.xlane.xlu1 %6855  ;;  %20645 = vst [vmem:[#allocation56_spill] sm:$0xff] %v17363_v54  ;;  %v11425_v47 = vpop.eup %11424  ;;  %v7562_v29 = vmul.f32 %v11423_v21, %v20646_v22  ;;  %11430 = vrsqrt.f32 %v7326_v41  ;;  %v7328_v42 = vadd.f32 1e-05, %v7200_v46  ;;  %v20650_v22 = vld [vmem:[#allocation73_spill] sm:$0xff] }
 0x74f   :  { %20644 = vst [vmem:[#allocation97_spill] sm:$0xff] %v17357_v5  ;;  %v7692_v9 = vcombine.low %v7557_v44, %v7559_v63  ;;  %v20647_v44 = vld [vmem:[#allocation77_spill] sm:$0xff]  ;;  %v17392_v16 = vsub.f32 %v20650_v22, %v6515_v35  ;;  %v6765_v46 = vmul.f32 %v17324_v40, %v17324_v40  ;;  %v6516_v50 = vmul.f32 0.03125, %v16886_v1 }
 0x750   :  { %v7327_v4 = vadd.f32 1e-05, %v7199_v27  ;;  %6942 = vadd.xlane.f32.xlu0 %v17226_v31  ;;  %v11427_v55 = vpop.eup %11426  ;;  %v17382_v31 = vsub.f32 %v20647_v44, %v6513_v14  ;;  %v20649_v27 = vld [vmem:[#allocation134_spill] sm:$0xff]  ;;  %v7188_v1 = vmul.f32 0.03125, %v17303_v36 }
 0x751   :  { %7119 = vadd.xlane.f32.xlu1 %v7118_v34  ;;  %v6877_v51 = vpop.xlane.xlu0 %6876  ;;  %v17377_v49 = vrot.slane %v7692_v9, %v20628_v60  ;;  %v7560_v21 = vmul.f32 %v11425_v47, %v20649_v27  ;;  %20651 = vst [vmem:[#allocation28_spill] sm:$0xff] %v17392_v16  ;;  %v20652_v47 = vld [vmem:[#allocation114_spill] sm:$0xff] }
 0x752   :  { %20648 = vst [vmem:[#allocation18_spill] sm:$0xff] %v17382_v31  ;;  %11432 = vrsqrt.f32 %v7327_v4  ;;  %v7201_v63 = vmul.f32 0.03125, %v6877_v51  ;;  %v17384_v0 = vpop.xlane.xlu1 %6909  ;;  %v20653_v4 = vld [vmem:[#allocation43_spill] sm:$0xff] }
 0x753   :  { %11434 = vrsqrt.f32 %v7330_v17  ;;  %v7716_v34 = vcombine.low %v17368_v24, %v17377_v49  ;;  %v7561_v17 = vmul.f32 %v11427_v55, %v20652_v47  ;;  %v7700_v27 = vcombine.low %v7560_v21, %v7562_v29 }
 0x754   :  { %v11429_v9 = vpop.eup %11428  ;;  %11436 = vrsqrt.f32 %v7325_v62  ;;  %v7329_v14 = vadd.f32 1e-05, %v7201_v63  ;;  %6948 = vadd.xlane.f32.xlu0 %v17244_v3  ;;  %v6767_v3 = vmul.f32 %v17329_v13, %v17329_v13  ;;  %v20654_v63 = vld [vmem:[#allocation23_spill] sm:$0xff]  ;;  %v6518_v55 = vmul.f32 0.03125, %v16904_v23  ;;  %v20711_v13 = vld [vmem:[#allocation10_spill] sm:$0xff] }
 0x755   :  { %11438 = vrsqrt.f32 %v7324_v18  ;;  %v7563_v51 = vmul.f32 %v11429_v9, %v20653_v4  ;;  %6957 = vadd.xlane.f32.xlu1 %v16995_v26  ;;  %v6883_v44 = vpop.xlane.xlu0 %6882  ;;  %v17407_v18 = vsub.f32 %v20654_v63, %v17340_v32  ;;  %v6769_v26 = vmul.f32 %v17382_v31, %v17382_v31 }
 0x756   :  { %11440 = vrsqrt.f32 %v7328_v42  ;;  %v7203_v35 = vmul.f32 0.03125, %v6883_v44  ;;  %v17401_v62 = vpop.xlane.xlu1 %6915  ;;  %v6526_v29 = vmul.f32 0.03125, %v16832_v52  ;;  %v7190_v21 = vmul.f32 0.03125, %v17318_v56  ;;  %v20656_v52 = vld [vmem:[#allocation110_spill] sm:$0xff] }
 0x757   :  { %20655 = vst [vmem:[#allocation137_spill] sm:$0xff] %v17407_v18  ;;  %v7708_v9 = vcombine.low %v7561_v17, %v7563_v51  ;;  %11442 = vrsqrt.f32 %v7329_v14  ;;  %v6771_v23 = vmul.f32 %v17392_v16, %v17392_v16  ;;  %v17420_v22 = vrot.slane %v7700_v27, %v20628_v60  ;;  %v20658_v17 = vld [vmem:[#allocation87_spill] sm:$0xff] }
 0x758   :  { %v7331_v42 = vadd.f32 1e-05, %v7203_v35  ;;  %6954 = vadd.xlane.f32.xlu0 %v17252_v12  ;;  %v17426_v36 = vsub.f32 %v20656_v52, %v6516_v50  ;;  %v7103_v12 = vsel %vm1733_vm2, %v6765_v46, 0.0  ;;  %v11431_v56 = vpop.eup %11430  ;;  %v17433_v4 = vsub.f32 %v20658_v17, %v6518_v55  ;;  %v20660_v35 = vld [vmem:[#allocation78_spill] sm:$0xff] }
 0x759   :  { %6963 = vadd.xlane.f32.xlu1 %v17002_v6  ;;  %v6841_v32 = vpop.xlane.xlu0 %6840  ;;  %v17423_v47 = vrot.slane %v7708_v9, %v20628_v60  ;;  %v7109_v6 = vsel %vm1733_vm2, %v6767_v3, 0.0  ;;  %v7194_v51 = vmul.f32 0.03125, %v17360_v43  ;;  %v17438_v44 = vmul.f32 %v17407_v18, %v17407_v18 }
 0x75a   :  { %20657 = vst [vmem:[#allocation58_spill] sm:$0xff] %v17426_v36  ;;  %11444 = vrsqrt.f32 %v7331_v42  ;;  %v17428_v14 = vpop.xlane.xlu1 %6921  ;;  %20659 = vst [vmem:[#allocation85_spill] sm:$0xff] %v17433_v4  ;;  %v17443_v63 = vsub.f32 %v20660_v35, %v6526_v29  ;;  %v7316_v46 = vadd.f32 1e-05, %v7188_v1  ;;  %v7189_v9 = vmul.f32 0.03125, %v6841_v32 }
 0x75b   :  { %v7732_v50 = vcombine.low %v17420_v22, %v17423_v47  ;;  %v7115_v3 = vsel %vm1733_vm2, %v6769_v26, 0.0  ;;  %v6528_v42 = vmul.f32 0.03125, %v16850_v53  ;;  %v7318_v43 = vadd.f32 1e-05, %v7190_v21  ;;  %v20663_v21 = vld [vmem:[#allocation147_spill] sm:$0xff] }
 0x75c   :  { %v11433_v27 = vpop.eup %11432  ;;  %20661 = vst [vmem:[#allocation49_spill] sm:$0xff] %v17443_v63  ;;  %7104 = vadd.xlane.f32.xlu0 %v7103_v12  ;;  %v7121_v17 = vsel %vm1733_vm2, %v6771_v23, 0.0  ;;  %v6520_v29 = vmul.f32 0.03125, %v16924_v58  ;;  %v7192_v1 = vmul.f32 0.03125, %v17343_v25  ;;  %v6772_v53 = vmul.f32 %v17426_v36, %v17426_v36  ;;  %v20666_v36 = vld [vmem:[#allocation51_spill] sm:$0xff] }
 0x75d   :  { %v11435_v55 = vpop.eup %11434  ;;  %6969 = vadd.xlane.f32.xlu1 %v17038_v33  ;;  %v6847_v52 = vpop.xlane.xlu0 %6846  ;;  %v17450_v2 = vrot.slane %v7732_v50, %v20641_v37  ;;  %v7583_v33 = vmul.f32 %v11433_v27, %v20663_v21  ;;  %v7322_v35 = vadd.f32 1e-05, %v7194_v51  ;;  %v6774_v23 = vmul.f32 %v17433_v4, %v17433_v4  ;;  %v20665_v50 = vld [vmem:[#allocation113_spill] sm:$0xff] }
 0x75e   :  { %v11437_v10 = vpop.eup %11436  ;;  %v7191_v32 = vmul.f32 0.03125, %v6847_v52  ;;  %v17454_v12 = vpop.xlane.xlu1 %6927  ;;  %v17465_v58 = vrot.slane %v7716_v34, %v20641_v37  ;;  %v7582_v52 = vmul.f32 %v11431_v56, %v20665_v50  ;;  %11446 = vrsqrt.f32 %v7316_v46  ;;  %v20667_v51 = vld [vmem:[#allocation145_spill] sm:$0xff] }
 0x75f   :  { %20662 = vst [vmem:[#allocation53_spill] sm:$0xff] %v17450_v2  ;;  %v11439_v26 = vpop.eup %11438  ;;  %v7317_v41 = vadd.f32 1e-05, %v7189_v9  ;;  %v7586_v16 = vmul.f32 %v11435_v55, %v20666_v36  ;;  %11448 = vrsqrt.f32 %v7318_v43  ;;  %v7581_v27 = vmul.f32 %v11437_v10, %v20667_v51  ;;  %v20669_v36 = vld [vmem:[#allocation144_spill] sm:$0xff] }
 0x760   :  { %20664 = vst [vmem:[#allocation82_spill] sm:$0xff] %v17465_v58  ;;  %v11441_v25 = vpop.eup %11440  ;;  %v7319_v18 = vadd.f32 1e-05, %v7191_v32  ;;  %7110 = vadd.xlane.f32.xlu0 %v7109_v6  ;;  %v6522_v31 = vmul.f32 0.03125, %v16949_v38  ;;  %v7320_v40 = vadd.f32 1e-05, %v7192_v1 }
 0x761   :  { %6975 = vadd.xlane.f32.xlu1 %v17077_v59  ;;  %v6853_v21 = vpop.xlane.xlu0 %6852  ;;  %v11443_v34 = vpop.eup %11442  ;;  %v20668_v6 = vld [vmem:[#allocation136_spill] sm:$0xff]  ;;  %v7584_v55 = vmul.f32 %v11441_v25, %v20669_v36  ;;  %v7896_v10 = vcombine.low %v7581_v27, %v7583_v33  ;;  %v20670_v59 = vld [vmem:[#allocation90_spill] sm:$0xff]  ;;  %v7124_v38 = vsel %vm1733_vm2, %v6772_v53, 0.0  ;;  %v20672_v1 = vld [vmem:[#allocation83_spill] sm:$0xff] }
 0x762   :  { %11450 = vrsqrt.f32 %v7319_v18  ;;  %v7193_v56 = vmul.f32 0.03125, %v6853_v21  ;;  %v17474_v46 = vpop.xlane.xlu1 %6885  ;;  %v7580_v9 = vmul.f32 %v11439_v26, %v20668_v6  ;;  %v17479_v32 = vsub.f32 %v20670_v59, %v6520_v29  ;;  %v20673_v51 = vld [vmem:[#allocation8_spill] sm:$0xff]  ;;  %v20674_v25 = vld [vmem:[#allocation79_spill] sm:$0xff] }
 0x763   :  { %11452 = vrsqrt.f32 %v7322_v35  ;;  %v7585_v18 = vmul.f32 %v11443_v34, %v20672_v1  ;;  %v7904_v6 = vcombine.low %v7584_v55, %v7586_v16  ;;  %v17485_v35 = vsub.f32 %v20674_v25, %v6528_v42  ;;  %v20676_v33 = vld [vmem:[#allocation99_spill] sm:$0xff] }
 0x764   :  { %v11445_v43 = vpop.eup %11444  ;;  %20671 = vst [vmem:[#allocation57_spill] sm:$0xff] %v17479_v32  ;;  %11454 = vrsqrt.f32 %v7317_v41  ;;  %v7321_v50 = vadd.f32 1e-05, %v7193_v56  ;;  %7116 = vadd.xlane.f32.xlu0 %v7115_v3  ;;  %v7888_v26 = vcombine.low %v7580_v9, %v7582_v52  ;;  %v17488_v27 = vsub.f32 %v20676_v33, %v6522_v31  ;;  %v20678_v3 = vld [vmem:[#allocation66_spill] sm:$0xff] }
 0x765   :  { %v7587_v21 = vmul.f32 %v11445_v43, %v20673_v51  ;;  %7125 = vadd.xlane.f32.xlu1 %v7124_v38  ;;  %v6859_v4 = vpop.xlane.xlu0 %6858  ;;  %20675 = vst [vmem:[#allocation63_spill] sm:$0xff] %v17485_v35  ;;  %11456 = vrsqrt.f32 %v7320_v40  ;;  %v6530_v53 = vmul.f32 0.03125, %v20678_v3  ;;  %v7130_v34 = vsel %vm1733_vm2, %v6774_v23, 0.0 }
 0x766   :  { %20677 = vst [vmem:[#allocation139_spill] sm:$0xff] %v17488_v27  ;;  %v7195_v41 = vmul.f32 0.03125, %v6859_v4  ;;  %v17490_v29 = vpop.xlane.xlu1 %6891  ;;  %v17495_v56 = vrot.slane %v7896_v10, %v20628_v60  ;;  %v7212_v16 = vmul.f32 0.03125, %v17384_v0  ;;  %11458 = vrsqrt.f32 %v7321_v50 }
 0x767   :  { %v7912_v36 = vcombine.low %v7585_v18, %v7587_v21  ;;  %v6776_v31 = vmul.f32 %v17479_v32, %v17479_v32  ;;  %v7214_v40 = vmul.f32 0.03125, %v17401_v62  ;;  %v17502_v52 = vrot.slane %v7888_v26, %v20628_v60 }
 0x768   :  { %v7323_v42 = vadd.f32 1e-05, %v7195_v41  ;;  %7122 = vadd.xlane.f32.xlu0 %v7121_v17  ;;  %v17505_v23 = vrot.slane %v7904_v6, %v20628_v60  ;;  %v11447_v0 = vpop.eup %11446  ;;  %v6778_v17 = vmul.f32 %v17488_v27, %v17488_v27  ;;  %v6971_v62 = vsel %vm1733_vm2, %v17213_v20, 0.0  ;;  %v20679_v6 = vld [vmem:[#allocation104_spill] sm:$0xff] }
 0x769   :  { %7131 = vadd.xlane.f32.xlu1 %v7130_v34  ;;  %v6913_v4 = vpop.xlane.xlu0 %6912  ;;  %v17508_v9 = vrot.slane %v7912_v36, %v20628_v60  ;;  %v17518_v10 = vsel %vm1733_vm2, %v17220_v7, 0.0  ;;  %v11449_v43 = vpop.eup %11448  ;;  %v7148_v50 = vsel %vm1733_vm2, %v17438_v44, 0.0  ;;  %v7920_v38 = vcombine.low %v17502_v52, %v17495_v56 }
 0x76a   :  { %11460 = vrsqrt.f32 %v7323_v42  ;;  %v17510_v55 = vpop.xlane.xlu1 %6897  ;;  %v7213_v59 = vmul.f32 0.03125, %v6913_v4  ;;  %v7340_v51 = vadd.f32 1e-05, %v7212_v16  ;;  %v7218_v21 = vmul.f32 0.03125, %v17454_v12 }
 0x76b   :  { %v7936_v1 = vcombine.low %v17505_v23, %v17508_v9  ;;  %v7136_v20 = vsel %vm1733_vm2, %v6776_v31, 0.0  ;;  %v6782_v7 = vmul.f32 %v17443_v63, %v17443_v63  ;;  %v17532_v44 = vsub.f32 %v20679_v6, %v6530_v53  ;;  %v20682_v31 = vld [vmem:[#allocation118_spill] sm:$0xff] }
 0x76c   :  { %v11451_v18 = vpop.eup %11450  ;;  %6960 = vadd.xlane.f32.xlu0 %v17135_v30  ;;  %v7342_v25 = vadd.f32 1e-05, %v7214_v40  ;;  %v6784_v41 = vmul.f32 %v17485_v35, %v17485_v35  ;;  %v6517_v30 = vmul.f32 0.03125, %v17014_v11  ;;  %v7216_v34 = vmul.f32 0.03125, %v17428_v14  ;;  %v20684_v6 = vld [vmem:[#allocation46_spill] sm:$0xff]  ;;  %v20685_v14 = vld [vmem:[#allocation148_spill] sm:$0xff] }
 0x76d   :  { %v11453_v26 = vpop.eup %11452  ;;  %20680 = vst [vmem:[#allocation111_spill] sm:$0xff] %v17532_v44  ;;  %7137 = vadd.xlane.f32.xlu1 %v7136_v20  ;;  %v6919_v33 = vpop.xlane.xlu0 %6918  ;;  %v17537_v3 = vrot.slane %v7936_v1, %v20641_v37  ;;  %v7142_v53 = vsel %vm1733_vm2, %v6778_v17, 0.0  ;;  %v6519_v42 = vmul.f32 0.03125, %v17035_v48  ;;  %v7575_v40 = vmul.f32 %v11451_v18, %v20682_v31  ;;  %v20686_v17 = vld [vmem:[#allocation117_spill] sm:$0xff]  ;;  %v20687_v18 = vld [vmem:[#allocation100_spill] sm:$0xff] }
 0x76e   :  { %v11455_v12 = vpop.eup %11454  ;;  %v7215_v36 = vmul.f32 0.03125, %v6919_v33  ;;  %v17541_v16 = vpop.xlane.xlu1 %6903  ;;  %v7341_v4 = vadd.f32 1e-05, %v7213_v59  ;;  %v17547_v20 = vrot.slane %v7920_v38, %v20641_v37  ;;  %v7574_v35 = vmul.f32 %v11449_v43, %v20684_v6  ;;  %v20692_v6 = vld [vmem:[#allocation105_spill] sm:$0xff] }
 0x76f   :  { %20681 = vst [vmem:[#allocation81_spill] sm:$0xff] %v17537_v3  ;;  %v11457_v1 = vpop.eup %11456  ;;  %11462 = vrsqrt.f32 %v7340_v51  ;;  %v7346_v11 = vadd.f32 1e-05, %v7218_v21  ;;  %v7578_v33 = vmul.f32 %v11453_v26, %v20685_v14  ;;  %v7573_v32 = vmul.f32 %v11455_v12, %v20686_v17  ;;  %v20691_v26 = vld [vmem:[#allocation52_spill] sm:$0xff] }
 0x770   :  { %20683 = vst [vmem:[#allocation5_spill] sm:$0xff] %v17547_v20  ;;  %v7343_v63 = vadd.f32 1e-05, %v7215_v36  ;;  %6966 = vadd.xlane.f32.xlu0 %v17158_v8  ;;  %11464 = vrsqrt.f32 %v7342_v25  ;;  %v11459_v38 = vpop.eup %11458  ;;  %v17556_v31 = vsub.f32 %v20687_v18, %v6517_v30  ;;  %v7344_v43 = vadd.f32 1e-05, %v7216_v34  ;;  %v20690_v8 = vld [vmem:[#allocation55_spill] sm:$0xff] }
 0x771   :  { %7143 = vadd.xlane.f32.xlu1 %v7142_v53  ;;  %v6925_v48 = vpop.xlane.xlu0 %6924  ;;  %v7572_v36 = vmul.f32 %v11447_v0, %v20690_v8  ;;  %v7576_v25 = vmul.f32 %v11457_v1, %v20691_v26  ;;  %v7828_v12 = vcombine.low %v7573_v32, %v7575_v40  ;;  %v17563_v14 = vsub.f32 %v20692_v6, %v6519_v42 }
 0x772   :  { %20688 = vst [vmem:[#allocation88_spill] sm:$0xff] %v17556_v31  ;;  %11466 = vrsqrt.f32 %v7343_v63  ;;  %v7217_v51 = vmul.f32 0.03125, %v6925_v48  ;;  %v17558_v21 = vpop.xlane.xlu1 %6933  ;;  %v6786_v30 = vmul.f32 %v17532_v44, %v17532_v44  ;;  %v20694_v63 = vld [vmem:[#allocation9_spill] sm:$0xff]  ;;  %v20695_v48 = vld [vmem:[#allocation86_spill] sm:$0xff]  ;;  %v6521_v32 = vmul.f32 0.03125, %v17067_v39 }
 0x773   :  { %20689 = vst [vmem:[#allocation106_spill] sm:$0xff] %v17558_v21  ;;  %11468 = vrsqrt.f32 %v7341_v4  ;;  %20693 = vst [vmem:[#allocation35_spill] sm:$0xff] %v17563_v14  ;;  %v7577_v34 = vmul.f32 %v11459_v38, %v20694_v63  ;;  %v7820_v8 = vcombine.low %v7572_v36, %v7574_v35  ;;  %v7836_v1 = vcombine.low %v7576_v25, %v7578_v33  ;;  %v20699_v63 = vld [vmem:[#allocation69_spill] sm:$0xff] }
 0x774   :  { %v11461_v53 = vpop.eup %11460  ;;  %11470 = vrsqrt.f32 %v7346_v11  ;;  %v7345_v17 = vadd.f32 1e-05, %v7217_v51  ;;  %6972 = vadd.xlane.f32.xlu0 %v6971_v62  ;;  %v6773_v62 = vmul.f32 %v17556_v31, %v17556_v31  ;;  %v7154_v4 = vsel %vm1733_vm2, %v6782_v7, 0.0  ;;  %v20696_v51 = vld [vmem:[#allocation119_spill] sm:$0xff] }
 0x775   :  { %v7579_v18 = vmul.f32 %v11461_v53, %v20695_v48  ;;  %7149 = vadd.xlane.f32.xlu1 %v7148_v50  ;;  %v6931_v0 = vpop.xlane.xlu0 %6930  ;;  %11472 = vrsqrt.f32 %v7344_v43  ;;  %v7160_v11 = vsel %vm1733_vm2, %v6784_v41, 0.0  ;;  %v17577_v38 = vrot.slane %v7828_v12, %v20628_v60  ;;  %v20697_v12 = vld [vmem:[#allocation142_spill] sm:$0xff] }
 0x776   :  { %v7219_v40 = vmul.f32 0.03125, %v6931_v0  ;;  %v17570_v42 = vpop.xlane.xlu1 %7005  ;;  %v6525_v35 = vmul.f32 0.03125, %v20696_v51  ;;  %11474 = vrsqrt.f32 %v7345_v17  ;;  %v6775_v39 = vmul.f32 %v17563_v14, %v17563_v14  ;;  %v20710_v14 = vld [vmem:[#allocation54_spill] sm:$0xff] }
 0x777   :  { %v7844_v50 = vcombine.low %v7577_v34, %v7579_v18  ;;  %v7206_v43 = vmul.f32 0.03125, %v17490_v29  ;;  %v17585_v7 = vrot.slane %v7820_v8, %v20628_v60  ;;  %v17588_v41 = vrot.slane %v7836_v1, %v20628_v60  ;;  %v20700_v1 = vld [vmem:[#allocation84_spill] sm:$0xff] }
 0x778   :  { %v7347_v33 = vadd.f32 1e-05, %v7219_v40  ;;  %6978 = vadd.xlane.f32.xlu0 %v17518_v10  ;;  %v17594_v53 = vsub.f32 %v20697_v12, %v6521_v32  ;;  %v7127_v29 = vsel %vm1733_vm2, %v6773_v62, 0.0  ;;  %v7166_v6 = vsel %vm1733_vm2, %v6786_v30, 0.0  ;;  %v20702_v40 = vld [vmem:[#allocation116_spill] sm:$0xff] }
 0x779   :  { %7155 = vadd.xlane.f32.xlu1 %v7154_v4  ;;  %v6889_v36 = vpop.xlane.xlu0 %6888  ;;  %v17591_v26 = vrot.slane %v7844_v50, %v20628_v60  ;;  %v11463_v25 = vpop.eup %11462  ;;  %v6523_v34 = vmul.f32 0.03125, %v20699_v63  ;;  %v7852_v18 = vcombine.low %v17585_v7, %v17577_v38  ;;  %v17606_v32 = vsub.f32 %v20700_v1, %v6525_v35  ;;  %v20703_v50 = vld [vmem:[#allocation122_spill] sm:$0xff] }
 0x77a   :  { %20698 = vst [vmem:[#allocation72_spill] sm:$0xff] %v17594_v53  ;;  %11476 = vrsqrt.f32 %v7347_v33  ;;  %v17596_v10 = vpop.xlane.xlu1 %7011  ;;  %v11465_v17 = vpop.eup %11464  ;;  %v7205_v48 = vmul.f32 0.03125, %v6889_v36  ;;  %v6527_v4 = vmul.f32 0.03125, %v20702_v40  ;;  %v6529_v62 = vmul.f32 0.03125, %v20703_v50  ;;  %v20705_v40 = vld [vmem:[#allocation121_spill] sm:$0xff] }
 0x77b   :  { %v7868_v0 = vcombine.low %v17588_v41, %v17591_v26  ;;  %20701 = vst [vmem:[#allocation102_spill] sm:$0xff] %v17606_v32  ;;  %v7210_v30 = vmul.f32 0.03125, %v17541_v16  ;;  %v7204_v33 = vmul.f32 0.03125, %v17474_v46  ;;  %v7334_v36 = vadd.f32 1e-05, %v7206_v43  ;;  %v20706_v46 = vld [vmem:[#allocation109_spill] sm:$0xff] }
 0x77c   :  { %v11467_v8 = vpop.eup %11466  ;;  %7128 = vadd.xlane.f32.xlu0 %v7127_v29  ;;  %v7133_v63 = vsel %vm1733_vm2, %v6775_v39, 0.0  ;;  %v7208_v1 = vmul.f32 0.03125, %v17510_v55  ;;  %v6777_v16 = vmul.f32 %v17594_v53, %v17594_v53  ;;  %v17623_v43 = vsub.f32 %v20706_v46, %v6523_v34 }
 0x77d   :  { %v11469_v51 = vpop.eup %11468  ;;  %7161 = vadd.xlane.f32.xlu1 %v7160_v11  ;;  %v6895_v12 = vpop.xlane.xlu0 %6894  ;;  %v17614_v59 = vrot.slane %v7868_v0, %v20641_v37  ;;  %v7599_v44 = vmul.f32 %v11467_v8, %v20705_v40  ;;  %v20708_v11 = vld [vmem:[#allocation7_spill] sm:$0xff]  ;;  %v7333_v39 = vadd.f32 1e-05, %v7205_v48  ;;  %v17627_v0 = vrot.slane %v7852_v18, %v20641_v37 }
 0x77e   :  { %v11471_v35 = vpop.eup %11470  ;;  %v7207_v50 = vmul.f32 0.03125, %v6895_v12  ;;  %v17618_v27 = vpop.xlane.xlu1 %7017  ;;  %20707 = vst [vmem:[#allocation108_spill] sm:$0xff] %v17623_v43  ;;  %v7596_v29 = vmul.f32 %v11463_v25, %v20708_v11  ;;  %v7598_v55 = vmul.f32 %v11465_v17, %v20710_v14  ;;  %v7597_v8 = vmul.f32 %v11469_v51, %v20711_v13  ;;  %v20713_v17 = vld [vmem:[#allocation60_spill] sm:$0xff] }
 0x77f   :  { %20704 = vst [vmem:[#allocation70_spill] sm:$0xff] %v17614_v59  ;;  %20709 = vst [vmem:[#allocation6_spill] sm:$0xff] %v17627_v0  ;;  %v11473_v31 = vpop.eup %11472  ;;  %v7338_v12 = vadd.f32 1e-05, %v7210_v30  ;;  %v7602_v21 = vmul.f32 %v11471_v35, %v20712_v57  ;;  %v7332_v53 = vadd.f32 1e-05, %v7204_v33  ;;  %11478 = vrsqrt.f32 %v7334_v36 }
 0x780   :  { %v7335_v40 = vadd.f32 1e-05, %v7207_v50  ;;  %7134 = vadd.xlane.f32.xlu0 %v7133_v63  ;;  %v11475_v48 = vpop.eup %11474  ;;  %v7336_v18 = vadd.f32 1e-05, %v7208_v1  ;;  %v8032_v14 = vcombine.low %v7597_v8, %v7599_v44  ;;  %v7600_v13 = vmul.f32 %v11473_v31, %v20713_v17  ;;  %v20714_v36 = vld [vmem:[#allocation123_spill] sm:$0xff]  ;;  %v20715_v35 = vld [vmem:[#allocation124_spill] sm:$0xff] }
 0x781   :  { %7167 = vadd.xlane.f32.xlu1 %v7166_v6  ;;  %v6901_v34 = vpop.xlane.xlu0 %6900  ;;  %v7139_v30 = vsel %vm1733_vm2, %v6777_v16, 0.0  ;;  %v6779_v57 = vmul.f32 %v17623_v43, %v17623_v43  ;;  %v8024_v33 = vcombine.low %v7596_v29, %v7598_v55  ;;  %v7601_v63 = vmul.f32 %v11475_v48, %v20714_v36  ;;  %v20716_v8 = vld [vmem:[#allocation89_spill] sm:$0xff]  ;;  %v20720_v48 = vld [vmem:[#allocation36_spill] sm:$0xff] }
 0x782   :  { %11480 = vrsqrt.f32 %v7335_v40  ;;  %v7209_v46 = vmul.f32 0.03125, %v6901_v34  ;;  %v7024_v11 = vpop.xlane.xlu1 %7023  ;;  %v8040_v44 = vcombine.low %v7600_v13, %v7602_v21  ;;  %v17641_v31 = vsub.f32 %v20716_v8, %v6527_v4 }
 0x783   :  { %11482 = vrsqrt.f32 %v7333_v39  ;;  %v17646_v40 = vrot.slane %v8032_v14, %v20628_v60  ;;  %v6781_v29 = vmul.f32 %v17606_v32, %v17606_v32  ;;  %v17655_v4 = vrot.slane %v8024_v33, %v20628_v60 }
 0x784   :  { %v11477_v51 = vpop.eup %11476  ;;  %11484 = vrsqrt.f32 %v7338_v12  ;;  %v7337_v6 = vadd.f32 1e-05, %v7209_v46  ;;  %7140 = vadd.xlane.f32.xlu0 %v7139_v30  ;;  %20717 = vst [vmem:[#allocation141_spill] sm:$0xff] %v17641_v31  ;;  %v20718_v12 = vld [vmem:[#allocation101_spill] sm:$0xff]  ;;  %v17661_v14 = vrot.slane %v8040_v44, %v20628_v60  ;;  %v6783_v13 = vmul.f32 %v17641_v31, %v17641_v31 }
 0x785   :  { %11486 = vrsqrt.f32 %v7332_v53  ;;  %v7603_v1 = vmul.f32 %v11477_v51, %v20715_v35  ;;  %v6907_v50 = vpop.xlane.xlu0 %6906  ;;  %v17649_v34 = vsub.f32 %v20718_v12, %v6529_v62  ;;  %v7145_v53 = vsel %vm1733_vm2, %v6779_v57, 0.0  ;;  %v20721_v35 = vld [vmem:[#allocation96_spill] sm:$0xff]  ;;  %v20724_v12 = vld [vmem:[#allocation91_spill] sm:$0xff] }
 0x786   :  { %11488 = vrsqrt.f32 %v7336_v18  ;;  %v7211_v16 = vmul.f32 0.03125, %v6907_v50  ;;  %v17643_v39 = vpop.xlane.xlu1 %6981  ;;  %v6531_v18 = vmul.f32 0.03125, %v20720_v48  ;;  %v8056_v30 = vcombine.low %v17655_v4, %v17646_v40 }
 0x787   :  { %20719 = vst [vmem:[#allocation146_spill] sm:$0xff] %v17649_v34  ;;  %v8048_v55 = vcombine.low %v7601_v63, %v7603_v1  ;;  %11490 = vrsqrt.f32 %v7337_v6  ;;  %v7151_v51 = vsel %vm1733_vm2, %v6781_v29, 0.0  ;;  %v6785_v6 = vmul.f32 %v17649_v34, %v17649_v34 }
 0x788   :  { %v7339_v21 = vadd.f32 1e-05, %v7211_v16  ;;  %7146 = vadd.xlane.f32.xlu0 %v7145_v53  ;;  %v17678_v1 = vsub.f32 %v20721_v35, %v6531_v18  ;;  %v7246_v50 = vmul.f32 0.03125, %v17596_v10  ;;  %v7250_v35 = vmul.f32 0.03125, %v7024_v11 }
 0x789   :  { %v17658_v46 = vpop.xlane.xlu0 %6936  ;;  %v17664_v62 = vrot.slane %v8048_v55, %v20628_v60  ;;  %v11479_v57 = vpop.eup %11478  ;;  %v7157_v55 = vsel %vm1733_vm2, %v6783_v13, 0.0  ;;  %v7163_v10 = vsel %vm1733_vm2, %v6785_v6, 0.0  ;;  %v7244_v34 = vmul.f32 0.03125, %v17570_v42  ;;  %v20730_v6 = vld [vmem:[#allocation64_spill] sm:$0xff] }
 0x78a   :  { %11492 = vrsqrt.f32 %v7339_v21  ;;  %v17666_v17 = vpop.xlane.xlu1 %6987  ;;  %20722 = vst [vmem:[#allocation112_spill] sm:$0xff] %v17678_v1  ;;  %v17689_v21 = vrot.slane %v8056_v30, %v20641_v37  ;;  %v20728_v30 = vld [vmem:[#allocation75_spill] sm:$0xff]  ;;  %v7374_v43 = vadd.f32 1e-05, %v7246_v50  ;;  %v6787_v11 = vmul.f32 %v17678_v1, %v17678_v1  ;;  %v20733_v1 = vld [vmem:[#allocation14_spill] sm:$0xff] }
 0x78b   :  { %v8072_v33 = vcombine.low %v17661_v14, %v17664_v62  ;;  %v20731_v50 = vcombine.high %v17349_v19, %v17354_v15  ;;  %v7378_v13 = vadd.f32 1e-05, %v7250_v35 }
 0x78c   :  { %v11481_v36 = vpop.eup %11480  ;;  %7152 = vadd.xlane.f32.xlu0 %v7151_v51  ;;  %20725 = vst [vmem:[#allocation134_spill] sm:$0xff] %v17689_v21  ;;  %v20726_v51 = vld [vmem:[#allocation120_spill] sm:$0xff]  ;;  %11494 = vrsqrt.f32 %v7374_v43  ;;  %v7937_v43 = vcombine.high %v17505_v23, %v17508_v9  ;;  %v7921_v9 = vcombine.high %v17502_v52, %v17495_v56 }
 0x78d   :  { %v11483_v63 = vpop.eup %11482  ;;  %v7009_v44 = vpop.xlane.xlu0 %7008  ;;  %v17682_v8 = vrot.slane %v8072_v33, %v20641_v37  ;;  %v7591_v53 = vmul.f32 %v11481_v36, %v20724_v12  ;;  %v7590_v18 = vmul.f32 %v11479_v57, %v20726_v51  ;;  %v7733_v33 = vcombine.high %v17420_v22, %v17423_v47  ;;  %v20727_v36 = vld [vmem:[#allocation12_spill] sm:$0xff] }
 0x78e   :  { %v11485_v16 = vpop.eup %11484  ;;  %v17685_v29 = vpop.xlane.xlu1 %6993  ;;  %v7589_v12 = vmul.f32 %v11483_v63, %v20727_v36  ;;  %v7245_v32 = vmul.f32 0.03125, %v7009_v44  ;;  %v20729_v22 = vcombine.high %v17368_v24, %v17377_v49  ;;  %v7248_v44 = vmul.f32 0.03125, %v17618_v27  ;;  %v20732_v36 = vld [vmem:[#allocation11_spill] sm:$0xff] }
 0x78f   :  { %20723 = vst [vmem:[#allocation77_spill] sm:$0xff] %v17682_v8  ;;  %v11487_v48 = vpop.eup %11486  ;;  %v7594_v31 = vmul.f32 %v11485_v16, %v20728_v30  ;;  %v7749_v24 = vcombine.high %v17465_v58, %v17450_v2  ;;  %v17718_v49 = vrot.slane %v7733_v33, %v20641_v37 }
 0x790   :  { %v11489_v25 = vpop.eup %11488  ;;  %7158 = vadd.xlane.f32.xlu0 %v7157_v55  ;;  %v17706_v47 = vrot.slane %v20729_v22, %v20641_v37  ;;  %v7588_v63 = vmul.f32 %v11487_v48, %v20730_v6  ;;  %v7964_v16 = vcombine.low %v7589_v12, %v7591_v53  ;;  %v7372_v22 = vadd.f32 1e-05, %v7244_v34 }
 0x791   :  { %v7015_v57 = vpop.xlane.xlu0 %7014  ;;  %v11491_v42 = vpop.eup %11490  ;;  %v7592_v30 = vmul.f32 %v11489_v25, %v20732_v36  ;;  %v7373_v27 = vadd.f32 1e-05, %v7245_v32  ;;  %v7376_v35 = vadd.f32 1e-05, %v7248_v44  ;;  %v7169_v32 = vsel %vm1733_vm2, %v6787_v11, 0.0 }
 0x792   :  { %v7247_v55 = vmul.f32 0.03125, %v7015_v57  ;;  %v7000_v51 = vpop.xlane.xlu1 %6999  ;;  %8918 = vrot.lane.b32.xlu1 %v20731_v50, %s11746_s23  ;;  %v7956_v6 = vcombine.low %v7588_v63, %v7590_v18  ;;  %v7593_v61 = vmul.f32 %v11491_v42, %v20733_v1  ;;  %v20734_v50 = vld [vmem:[#allocation95_spill] sm:$0xff]  ;;  %v17726_v34 = vrot.slane %v7964_v16, %v20628_v60 }
 0x793   :  { %v7972_v25 = vcombine.low %v7592_v30, %v7594_v31  ;;  %v7750_v31 = vcombine.low %v17706_v47, %v17718_v49  ;;  %v17750_v63 = vrot.slane %v7937_v43, %v20641_v37  ;;  %v7953_v30 = vcombine.high %v17547_v20, %v17537_v3  ;;  %v20798_v20 = vld [vmem:[#allocation150_spill] sm:$0xff] }
 0x794   :  { %v11493_v48 = vpop.eup %11492  ;;  %v7375_v57 = vadd.f32 1e-05, %v7247_v55  ;;  %7164 = vadd.xlane.f32.xlu0 %v7163_v10  ;;  %v17734_v10 = vrot.slane %v7956_v6, %v20628_v60  ;;  %v7236_v55 = vmul.f32 0.03125, %v17643_v39  ;;  %v7869_v6 = vcombine.high %v17588_v41, %v17591_v26  ;;  %v20737_v41 = vld [vmem:[#allocation17_spill] sm:$0xff] }
 0x795   :  { %v7595_v53 = vmul.f32 %v11493_v48, %v20734_v50  ;;  %v7021_v12 = vpop.xlane.xlu0 %7020  ;;  %v17737_v42 = vrot.slane %v7972_v25, %v20628_v60 }
 0x796   :  { %11496 = vrsqrt.f32 %v7375_v57  ;;  %v7249_v36 = vmul.f32 0.03125, %v7021_v12  ;;  %v17722_v2 = vpop.xlane.xlu1 %7053  ;;  %8788 = vrot.lane.b32.xlu1 %v7749_v24, %s11747_s5  ;;  %v7988_v11 = vcombine.low %v17734_v10, %v17726_v34  ;;  %v7238_v24 = vmul.f32 0.03125, %v17666_v17 }
 0x797   :  { %11498 = vrsqrt.f32 %v7378_v13  ;;  %v7980_v1 = vcombine.low %v7593_v61, %v7595_v53  ;;  %v7242_v57 = vmul.f32 0.03125, %v7000_v51  ;;  %v7853_v17 = vcombine.high %v17585_v7, %v17577_v38 }
 0x798   :  { %11500 = vrsqrt.f32 %v7373_v27  ;;  %v7377_v18 = vadd.f32 1e-05, %v7249_v36  ;;  %7170 = vadd.xlane.f32.xlu0 %v7169_v32  ;;  %v17768_v39 = vrot.slane %v7988_v11, %v20641_v37  ;;  %v11495_v27 = vpop.eup %11494  ;;  %v7364_v53 = vadd.f32 1e-05, %v7236_v55  ;;  %v20738_v55 = vld [vmem:[#allocation80_spill] sm:$0xff] }
 0x799   :  { %11502 = vrsqrt.f32 %v7372_v22  ;;  %v7027_v33 = vpop.xlane.xlu0 %7026  ;;  %v17740_v13 = vrot.slane %v7980_v1, %v20628_v60  ;;  %v17765_v22 = vrot.slane %v7921_v9, %v20641_v37  ;;  %v7366_v32 = vadd.f32 1e-05, %v7238_v24 }
 0x79a   :  { %11504 = vrsqrt.f32 %v7376_v35  ;;  %v7251_v23 = vmul.f32 0.03125, %v7027_v33  ;;  %v17742_v61 = vpop.xlane.xlu1 %7059  ;;  %8852 = vrot.lane.b32.xlu1 %v7750_v31, %s11745_s4  ;;  %20736 = vst [vmem:[#allocation114_spill] sm:$0xff] %v17768_v39  ;;  %v7240_v51 = vmul.f32 0.03125, %v17685_v29  ;;  %v7370_v31 = vadd.f32 1e-05, %v7242_v57  ;;  %v20766_v35 = vld [vmem:[#allocation40_spill] sm:$0xff] }
 0x79b   :  { %v8004_v44 = vcombine.low %v17737_v42, %v17740_v13  ;;  %11506 = vrsqrt.f32 %v7377_v18  ;;  %v7955_v25 = vcombine.high %v17765_v22, %v17750_v63  ;;  %v17782_v33 = vrot.slane %v7853_v17, %v20641_v37 }
 0x79c   :  { %v7379_v16 = vadd.f32 1e-05, %v7251_v23  ;;  %v17785_v23 = vrot.slane %v7869_v6, %v20641_v37  ;;  %v7885_v29 = vcombine.high %v17627_v0, %v17614_v59  ;;  %v7368_v6 = vadd.f32 1e-05, %v7240_v51  ;;  %v20743_v51 = vld [vmem:[#allocation133_spill] sm:$0xff]  ;;  %v20786_v59 = vld [vmem:[#allocation42_spill] sm:$0xff] }
 0x79d   :  { %v6985_v48 = vpop.xlane.xlu0 %6984  ;;  %v17759_v56 = vrot.slane %v8004_v44, %v20641_v37 }
 0x79e   :  { %11508 = vrsqrt.f32 %v7379_v16  ;;  %v17761_v52 = vpop.xlane.xlu1 %7065  ;;  %8794 = vrot.lane.b32.xlu1 %v7953_v30, %s11747_s5  ;;  %v7237_v12 = vmul.f32 0.03125, %v6985_v48  ;;  %v7630_v16 = vmul.f32 %v11495_v27, %v20738_v55  ;;  %v20739_v30 = vld [vmem:[#allocation92_spill] sm:$0xff]  ;;  %v8073_v27 = vcombine.high %v17661_v14, %v17664_v62  ;;  %v20744_v55 = vld [vmem:[#allocation135_spill] sm:$0xff] }
 0x79f   :  { %20735 = vst [vmem:[#allocation73_spill] sm:$0xff] %v17759_v56  ;;  %11510 = vrsqrt.f32 %v7364_v53  ;;  %v20740_v48 = vld [vmem:[#allocation128_spill] sm:$0xff]  ;;  %v8057_v14 = vcombine.high %v17655_v4, %v17646_v40 }
 0x7a0   :  { %v11497_v50 = vpop.eup %11496  ;;  %v7365_v11 = vadd.f32 1e-05, %v7237_v12  ;;  %11512 = vrsqrt.f32 %v7366_v32  ;;  %v20742_v12 = vld [vmem:[#allocation13_spill] sm:$0xff]  ;;  %v8087_v62 = vrot.slane %v8073_v27, %v20641_v37 }
 0x7a1   :  { %v11499_v36 = vpop.eup %11498  ;;  %v6991_v43 = vpop.xlane.xlu0 %6990  ;;  %v7631_v26 = vmul.f32 %v11497_v50, %v20737_v41 }
 0x7a2   :  { %v11501_v1 = vpop.eup %11500  ;;  %v7239_v18 = vmul.f32 0.03125, %v6991_v43  ;;  %v7072_v38 = vpop.xlane.xlu1 %7071  ;;  %8922 = vrot.lane.b32.xlu1 %v7955_v25, %s11746_s23  ;;  %v7634_v24 = vmul.f32 %v11499_v36, %v20739_v30  ;;  %v20741_v25 = vld [vmem:[#allocation76_spill] sm:$0xff] }
 0x7a3   :  { %v11503_v7 = vpop.eup %11502  ;;  %v7629_v57 = vmul.f32 %v11501_v1, %v20740_v48 }
 0x7a4   :  { %v11505_v9 = vpop.eup %11504  ;;  %v7367_v44 = vadd.f32 1e-05, %v7239_v18  ;;  %v7628_v43 = vmul.f32 %v11503_v7, %v20741_v25  ;;  %v7886_v7 = vcombine.low %v17782_v33, %v17785_v23 }
 0x7a5   :  { %v6997_v50 = vpop.xlane.xlu0 %6996  ;;  %v11507_v17 = vpop.eup %11506  ;;  %v7632_v18 = vmul.f32 %v11505_v9, %v20742_v12  ;;  %v8304_v36 = vcombine.low %v7629_v57, %v7631_v26  ;;  %v7260_v57 = vmul.f32 0.03125, %v17722_v2 }
 0x7a6   :  { %11514 = vrsqrt.f32 %v7367_v44  ;;  %v7241_v41 = vmul.f32 0.03125, %v6997_v50  ;;  %v17793_v53 = vpop.xlane.xlu1 %7029  ;;  %8792 = vrot.lane.b32.xlu1 %v7885_v29, %s11747_s5  ;;  %v7633_v44 = vmul.f32 %v11507_v17, %v20743_v51  ;;  %v8296_v50 = vcombine.low %v7628_v43, %v7630_v16 }
 0x7a7   :  { %11516 = vrsqrt.f32 %v7370_v31  ;;  %v8312_v29 = vcombine.low %v7632_v18, %v7634_v24  ;;  %v17810_v26 = vrot.slane %v8304_v36, %v20628_v60  ;;  %v8089_v24 = vcombine.high %v17689_v21, %v17682_v8 }
 0x7a8   :  { %v11509_v32 = vpop.eup %11508  ;;  %11518 = vrsqrt.f32 %v7365_v11  ;;  %v7369_v1 = vadd.f32 1e-05, %v7241_v41  ;;  %v7262_v17 = vmul.f32 0.03125, %v17742_v61  ;;  %v17817_v43 = vrot.slane %v8296_v50, %v20628_v60 }
 0x7a9   :  { %v7635_v30 = vmul.f32 %v11509_v32, %v20744_v55  ;;  %v7003_v48 = vpop.xlane.xlu0 %7002  ;;  %11520 = vrsqrt.f32 %v7368_v6  ;;  %v17820_v40 = vrot.slane %v8312_v29, %v20628_v60  ;;  %v11511_v6 = vpop.eup %11510  ;;  %v20745_v41 = vcombine.high %v17363_v54, %v17357_v5 }
 0x7aa   :  { %v7243_v9 = vmul.f32 0.03125, %v7003_v48  ;;  %v17803_v31 = vpop.xlane.xlu1 %7035  ;;  %8856 = vrot.lane.b32.xlu1 %v7886_v7, %s11745_s4  ;;  %11522 = vrsqrt.f32 %v7369_v1  ;;  %v8071_v61 = vrot.slane %v8057_v14, %v20641_v37  ;;  %v11513_v12 = vpop.eup %11512  ;;  %v7266_v18 = vmul.f32 0.03125, %v7072_v38 }
 0x7ab   :  { %v8320_v11 = vcombine.low %v7633_v44, %v7635_v30  ;;  %v8328_v27 = vcombine.low %v17817_v43, %v17810_v26  ;;  %v7388_v1 = vadd.f32 1e-05, %v7260_v57  ;;  %v8005_v44 = vcombine.high %v17737_v42, %v17740_v13 }
 0x7ac   :  { %v7371_v16 = vadd.f32 1e-05, %v7243_v9  ;;  %v8090_v51 = vcombine.low %v8071_v61, %v8087_v62  ;;  %v7390_v30 = vadd.f32 1e-05, %v7262_v17  ;;  %v7751_v50 = vcombine.high %v17706_v47, %v17718_v49  ;;  %v20747_v49 = vld [vmem:[#allocation20_spill] sm:$0xff] }
 0x7ad   :  { %v7057_v25 = vpop.xlane.xlu0 %7056  ;;  %v17823_v4 = vrot.slane %v8320_v11, %v20628_v60  ;;  %v7264_v9 = vmul.f32 0.03125, %v17761_v52  ;;  %v20746_v57 = vcombine.low %v17349_v19, %v17354_v15  ;;  %v8091_v42 = vcombine.high %v8071_v61, %v8087_v62  ;;  %v20749_v15 = vld [vmem:[#allocation107_spill] sm:$0xff] }
 0x7ae   :  { %11524 = vrsqrt.f32 %v7371_v16  ;;  %v17825_v2 = vpop.xlane.xlu1 %7041  ;;  %8790 = vrot.lane.b32.xlu0 %v20745_v41, %s11747_s5  ;;  %8798 = vrot.lane.b32.xlu1 %v8089_v24, %s11747_s5  ;;  %v7261_v7 = vmul.f32 0.03125, %v7057_v25  ;;  %v7989_v47 = vcombine.high %v17734_v10, %v17726_v34  ;;  %v7622_v13 = vmul.f32 %v11513_v12, %v20747_v49  ;;  %v20748_v16 = vld [vmem:[#allocation140_spill] sm:$0xff]  ;;  %v20750_v62 = vld [vmem:[#allocation115_spill] sm:$0xff]  ;;  %v20753_v49 = vld [vmem:[#allocation29_spill] sm:$0xff] }
 0x7af   :  { %v8344_v36 = vcombine.low %v17820_v40, %v17823_v4  ;;  %v7394_v17 = vadd.f32 1e-05, %v7266_v18  ;;  %v17857_v52 = vrot.slane %v8328_v27, %v20641_v37  ;;  %11526 = vrsqrt.f32 %v7388_v1 }
 0x7b0   :  { %v11515_v32 = vpop.eup %11514  ;;  %v7389_v41 = vadd.f32 1e-05, %v7261_v7  ;;  %v8019_v19 = vrot.slane %v8005_v44, %v20641_v37  ;;  %11528 = vrsqrt.f32 %v7390_v30  ;;  %v7392_v18 = vadd.f32 1e-05, %v7264_v9  ;;  %v20751_v7 = vld [vmem:[#allocation125_spill] sm:$0xff] }
 0x7b1   :  { %v11517_v55 = vpop.eup %11516  ;;  %v7063_v48 = vpop.xlane.xlu0 %7062  ;;  %v17842_v38 = vrot.slane %v8344_v36, %v20641_v37  ;;  %v7623_v24 = vmul.f32 %v11515_v32, %v20748_v16  ;;  %v8003_v1 = vrot.slane %v7989_v47, %v20641_v37  ;;  %v7620_v44 = vmul.f32 %v11511_v6, %v20751_v7 }
 0x7b2   :  { %v11519_v29 = vpop.eup %11518  ;;  %v7263_v14 = vmul.f32 0.03125, %v7063_v48  ;;  %v17845_v11 = vpop.xlane.xlu1 %7047  ;;  %8854 = vrot.lane.b32.xlu0 %v20746_v57, %s11745_s4  ;;  %8862 = vrot.lane.b32.xlu1 %v8090_v51, %s11745_s4  ;;  %v7626_v51 = vmul.f32 %v11517_v55, %v20749_v15  ;;  %v20752_v55 = vld [vmem:[#allocation24_spill] sm:$0xff]  ;;  %v7954_v9 = vcombine.low %v17765_v22, %v17750_v63 }
 0x7b3   :  { %v11521_v25 = vpop.eup %11520  ;;  %v7621_v61 = vmul.f32 %v11519_v29, %v20750_v62  ;;  %v8022_v57 = vcombine.low %v8003_v1, %v8019_v19  ;;  %v8228_v15 = vcombine.low %v7620_v44, %v7622_v13  ;;  %v7258_v7 = vmul.f32 0.03125, %v17845_v11 }
 0x7b4   :  { %v7391_v36 = vadd.f32 1e-05, %v7263_v14  ;;  %v11523_v12 = vpop.eup %11522  ;;  %v7624_v30 = vmul.f32 %v11521_v25, %v20752_v55  ;;  %v8023_v25 = vcombine.high %v8003_v1, %v8019_v19  ;;  %v8021_v44 = vcombine.high %v17768_v39, %v17759_v56 }
 0x7b5   :  { %v7069_v34 = vpop.xlane.xlu0 %7068  ;;  %v8236_v48 = vcombine.low %v7621_v61, %v7623_v24  ;;  %v7625_v16 = vmul.f32 %v11523_v12, %v20753_v49  ;;  %v7887_v24 = vcombine.high %v17782_v33, %v17785_v23  ;;  %v17887_v61 = vrot.slane %v8228_v15, %v20628_v60  ;;  %v20756_v15 = vld [vmem:[#allocation22_spill] sm:$0xff] }
 0x7b6   :  { %11530 = vrsqrt.f32 %v7391_v36  ;;  %v7265_v27 = vmul.f32 0.03125, %v7069_v34  ;;  %v17864_v32 = vpop.xlane.xlu1 %7077  ;;  %8916 = vrot.lane.b32.xlu0 %v7751_v50, %s11746_s23  ;;  %8926 = vrot.lane.b32.xlu1 %v8091_v42, %s11746_s23  ;;  %v20754_v50 = vld [vmem:[#allocation38_spill] sm:$0xff]  ;;  %v8244_v47 = vcombine.low %v7624_v30, %v7626_v51 }
 0x7b7   :  { %11532 = vrsqrt.f32 %v7394_v17  ;;  %v17882_v63 = vrot.slane %v8236_v48, %v20628_v60  ;;  %v7252_v17 = vmul.f32 0.03125, %v17793_v53 }
 0x7b8   :  { %v11525_v29 = vpop.eup %11524  ;;  %11534 = vrsqrt.f32 %v7389_v41  ;;  %v7393_v14 = vadd.f32 1e-05, %v7265_v27  ;;  %v7254_v41 = vmul.f32 0.03125, %v17803_v31  ;;  %v17890_v34 = vrot.slane %v8244_v47, %v20628_v60 }
 0x7b9   :  { %v7627_v36 = vmul.f32 %v11525_v29, %v20754_v50  ;;  %v7075_v42 = vpop.xlane.xlu0 %7074  ;;  %11536 = vrsqrt.f32 %v7392_v18  ;;  %v11527_v23 = vpop.eup %11526  ;;  %v8260_v19 = vcombine.low %v17887_v61, %v17882_v63  ;;  %v7380_v1 = vadd.f32 1e-05, %v7252_v17 }
 0x7ba   :  { %v7267_v6 = vmul.f32 0.03125, %v7075_v42  ;;  %v17875_v62 = vpop.xlane.xlu1 %7083  ;;  %8858 = vrot.lane.b32.xlu0 %v7954_v9, %s11745_s4  ;;  %8860 = vrot.lane.b32.xlu1 %v8022_v57, %s11745_s4  ;;  %11538 = vrsqrt.f32 %v7393_v14  ;;  %v11529_v53 = vpop.eup %11528  ;;  %v7382_v30 = vadd.f32 1e-05, %v7254_v41  ;;  %v7256_v9 = vmul.f32 0.03125, %v17825_v2  ;;  %v20758_v2 = vld [vmem:[#allocation31_spill] sm:$0xff] }
 0x7bb   :  { %v8252_v22 = vcombine.low %v7625_v16, %v7627_v36  ;;  %v20755_v16 = vld [vmem:[#allocation34_spill] sm:$0xff]  ;;  %v17913_v11 = vrot.slane %v8260_v19, %v20641_v37  ;;  %v7646_v47 = vmul.f32 %v11529_v53, %v20756_v15 }
 0x7bc   :  { %v7395_v13 = vadd.f32 1e-05, %v7267_v6  ;;  %v7386_v6 = vadd.f32 1e-05, %v7258_v7 }
 0x7bd   :  { %v7033_v51 = vpop.xlane.xlu0 %7032  ;;  %v17893_v33 = vrot.slane %v8252_v22, %v20628_v60  ;;  %v20757_v22 = vld [vmem:[#allocation27_spill] sm:$0xff] }
 0x7be   :  { %11540 = vrsqrt.f32 %v7395_v13  ;;  %v17895_v12 = vpop.xlane.xlu1 %7089  ;;  %8920 = vrot.lane.b32.xlu0 %v7887_v24, %s11746_s23  ;;  %8924 = vrot.lane.b32.xlu1 %v8023_v25, %s11746_s23  ;;  %v7253_v31 = vmul.f32 0.03125, %v7033_v51 }
 0x7bf   :  { %v8276_v18 = vcombine.low %v17890_v34, %v17893_v33  ;;  %11542 = vrsqrt.f32 %v7380_v1  ;;  %v20760_v1 = vld [vmem:[#allocation132_spill] sm:$0xff] }
 0x7c0   :  { %v11531_v27 = vpop.eup %11530  ;;  %v7381_v36 = vadd.f32 1e-05, %v7253_v31  ;;  %11544 = vrsqrt.f32 %v7382_v30  ;;  %v7384_v31 = vadd.f32 1e-05, %v7256_v9 }
 0x7c1   :  { %v11533_v55 = vpop.eup %11532  ;;  %v7039_v48 = vpop.xlane.xlu0 %7038  ;;  %v17907_v29 = vrot.slane %v8276_v18, %v20641_v37  ;;  %v7647_v50 = vmul.f32 %v11531_v27, %v20755_v16  ;;  %v20759_v27 = vld [vmem:[#allocation129_spill] sm:$0xff] }
 0x7c2   :  { %v11535_v14 = vpop.eup %11534  ;;  %v7255_v57 = vmul.f32 0.03125, %v7039_v48  ;;  %v7096_v49 = vpop.xlane.xlu1 %7095  ;;  %8796 = vrot.lane.b32.xlu0 %v8021_v44, %s11747_s5  ;;  %v7650_v17 = vmul.f32 %v11533_v55, %v20757_v22  ;;  %v7644_v53 = vmul.f32 %v11527_v23, %v20759_v27  ;;  %v20761_v48 = vld [vmem:[#allocation16_spill] sm:$0xff] }
 0x7c3   :  { %v11537_v42 = vpop.eup %11536  ;;  %v7645_v13 = vmul.f32 %v11535_v14, %v20758_v2 }
 0x7c4   :  { %v7383_v24 = vadd.f32 1e-05, %v7255_v57  ;;  %v11539_v51 = vpop.eup %11538  ;;  %v7648_v7 = vmul.f32 %v11537_v42, %v20760_v1  ;;  %v20762_v57 = vld [vmem:[#allocation37_spill] sm:$0xff]  ;;  %v8432_v22 = vcombine.low %v7644_v53, %v7646_v47  ;;  %v7274_v1 = vmul.f32 0.03125, %v7096_v49 }
 0x7c5   :  { %v7045_v25 = vpop.xlane.xlu0 %7044  ;;  %v8440_v44 = vcombine.low %v7645_v13, %v7647_v50  ;;  %v7649_v14 = vmul.f32 %v11539_v51, %v20761_v48 }
 0x7c6   :  { %11546 = vrsqrt.f32 %v7383_v24  ;;  %v7257_v19 = vmul.f32 0.03125, %v7045_v25  ;;  %v17920_v18 = vpop.xlane.xlu1 %6939  ;;  %v8448_v9 = vcombine.low %v7648_v7, %v7650_v17  ;;  %v17933_v13 = vrot.slane %v8432_v22, %v20628_v60 }
 0x7c7   :  { %11548 = vrsqrt.f32 %v7381_v36  ;;  %v17929_v23 = vrot.slane %v8440_v44, %v20628_v60  ;;  %v7270_v36 = vmul.f32 0.03125, %v17875_v62  ;;  %v7268_v44 = vmul.f32 0.03125, %v17864_v32 }
 0x7c8   :  { %v11541_v55 = vpop.eup %11540  ;;  %11550 = vrsqrt.f32 %v7386_v6  ;;  %v7385_v30 = vadd.f32 1e-05, %v7257_v19  ;;  %v17936_v25 = vrot.slane %v8448_v9, %v20628_v60  ;;  %v20763_v9 = vld [vmem:[#allocation33_spill] sm:$0xff]  ;;  %v7402_v41 = vadd.f32 1e-05, %v7274_v1 }
 0x7c9   :  { %v7651_v16 = vmul.f32 %v11541_v55, %v20762_v57  ;;  %v7051_v15 = vpop.xlane.xlu0 %7050  ;;  %11552 = vrsqrt.f32 %v7384_v31  ;;  %v11543_v17 = vpop.eup %11542  ;;  %v8464_v27 = vcombine.low %v17933_v13, %v17929_v23  ;;  %v7398_v55 = vadd.f32 1e-05, %v7270_v36 }
 0x7ca   :  { %v7259_v24 = vmul.f32 0.03125, %v7051_v15  ;;  %v17926_v2 = vpop.xlane.xlu1 %6945  ;;  %11554 = vrsqrt.f32 %v7385_v30  ;;  %v11545_v31 = vpop.eup %11544  ;;  %v7272_v57 = vmul.f32 0.03125, %v17895_v12  ;;  %v7396_v56 = vadd.f32 1e-05, %v7268_v44 }
 0x7cb   :  { %v8456_v42 = vcombine.low %v7649_v14, %v7651_v16  ;;  %v17955_v49 = vrot.slane %v8464_v27, %v20641_v37 }
 0x7cc   :  { %v7387_v50 = vadd.f32 1e-05, %v7259_v24  ;;  %v7636_v24 = vmul.f32 %v11543_v17, %v20763_v9 }
 0x7cd   :  { %v7081_v6 = vpop.xlane.xlu0 %7080  ;;  %v17939_v47 = vrot.slane %v8456_v42, %v20628_v60 }
 0x7ce   :  { %11556 = vrsqrt.f32 %v7387_v50  ;;  %v6952_v51 = vpop.xlane.xlu1 %6951  ;;  %v7269_v19 = vmul.f32 0.03125, %v7081_v6  ;;  %v20764_v50 = vld [vmem:[#allocation32_spill] sm:$0xff]  ;;  %v20765_v6 = vld [vmem:[#allocation41_spill] sm:$0xff] }
 0x7cf   :  { %v8480_v62 = vcombine.low %v17936_v25, %v17939_v47  ;;  %v7638_v36 = vmul.f32 %v11545_v31, %v20764_v50  ;;  %11558 = vrsqrt.f32 %v7398_v55  ;;  %v20767_v31 = vld [vmem:[#allocation127_spill] sm:$0xff] }
 0x7d0   :  { %v11547_v53 = vpop.eup %11546  ;;  %v7397_v42 = vadd.f32 1e-05, %v7269_v19  ;;  %v7400_v19 = vadd.f32 1e-05, %v7272_v57 }
 0x7d1   :  { %v11549_v7 = vpop.eup %11548  ;;  %v7087_v30 = vpop.xlane.xlu0 %7086  ;;  %v17947_v48 = vrot.slane %v8480_v62, %v20641_v37  ;;  %v7639_v16 = vmul.f32 %v11547_v53, %v17147_v28  ;;  %v8364_v44 = vcombine.low %v7636_v24, %v7638_v36  ;;  %v7226_v24 = vmul.f32 0.03125, %v6952_v51  ;;  %v20776_v53 = vld [vmem:[#allocation39_spill] sm:$0xff] }
 0x7d2   :  { %v11551_v14 = vpop.eup %11550  ;;  %v7271_v15 = vmul.f32 0.03125, %v7087_v30  ;;  %v17951_v22 = vpop.xlane.xlu1 %7101  ;;  %v7637_v62 = vmul.f32 %v11549_v7, %v20765_v6  ;;  %v7221_v7 = vmul.f32 0.03125, %v17658_v46  ;;  %v7222_v46 = vmul.f32 0.03125, %v17920_v18 }
 0x7d3   :  { %v11553_v32 = vpop.eup %11552  ;;  %v7642_v12 = vmul.f32 %v11551_v14, %v20766_v35  ;;  %v20768_v14 = vld [vmem:[#allocation94_spill] sm:$0xff] }
 0x7d4   :  { %v7399_v10 = vadd.f32 1e-05, %v7271_v15  ;;  %v11555_v17 = vpop.eup %11554  ;;  %v8372_v9 = vcombine.low %v7637_v62, %v7639_v16  ;;  %v7640_v50 = vmul.f32 %v11553_v32, %v20767_v31  ;;  %v7349_v36 = vadd.f32 1e-05, %v7221_v7 }
 0x7d5   :  { %v7093_v28 = vpop.xlane.xlu0 %7092  ;;  %v7641_v55 = vmul.f32 %v11555_v17, %v17176_v45  ;;  %v17976_v45 = vrot.slane %v8364_v44, %v20628_v60  ;;  %v7224_v62 = vmul.f32 0.03125, %v17926_v2  ;;  %v7350_v31 = vadd.f32 1e-05, %v7222_v46 }
 0x7d6   :  { %11560 = vrsqrt.f32 %v7399_v10  ;;  %v7273_v27 = vmul.f32 0.03125, %v7093_v28  ;;  %v17962_v30 = vpop.xlane.xlu1 %7107  ;;  %v8380_v10 = vcombine.low %v7640_v50, %v7642_v12  ;;  %v17971_v16 = vrot.slane %v8372_v9, %v20628_v60 }
 0x7d7   :  { %11562 = vrsqrt.f32 %v7397_v42  ;;  %v20769_v42 = vld [vmem:[#allocation106_spill] sm:$0xff]  ;;  %v7354_v2 = vadd.f32 1e-05, %v7226_v24 }
 0x7d8   :  { %v11557_v1 = vpop.eup %11556  ;;  %11564 = vrsqrt.f32 %v7402_v41  ;;  %v7401_v35 = vadd.f32 1e-05, %v7273_v27  ;;  %v7220_v32 = vmul.f32 0.03125, %v20769_v42  ;;  %v17980_v17 = vrot.slane %v8380_v10, %v20628_v60  ;;  %v20771_v10 = vld [vmem:[#allocation59_spill] sm:$0xff] }
 0x7d9   :  { %11566 = vrsqrt.f32 %v7396_v56  ;;  %v7643_v15 = vmul.f32 %v11557_v1, %v20768_v14  ;;  %v7099_v57 = vpop.xlane.xlu0 %7098  ;;  %v8396_v51 = vcombine.low %v17976_v45, %v17971_v16  ;;  %v11559_v9 = vpop.eup %11558 }
 0x7da   :  { %11568 = vrsqrt.f32 %v7400_v19  ;;  %v7275_v6 = vmul.f32 0.03125, %v7099_v57  ;;  %v17968_v28 = vpop.xlane.xlu1 %7113  ;;  %v7348_v44 = vadd.f32 1e-05, %v7220_v32 }
 0x7db   :  { %v8388_v41 = vcombine.low %v7641_v55, %v7643_v15  ;;  %11570 = vrsqrt.f32 %v7401_v35  ;;  %v7352_v55 = vadd.f32 1e-05, %v7224_v62 }
 0x7dc   :  { %v7403_v56 = vadd.f32 1e-05, %v7275_v6 }
 0x7dd   :  { %v6943_v12 = vpop.xlane.xlu0 %6942  ;;  %v17983_v19 = vrot.slane %v8388_v41, %v20628_v60  ;;  %v17996_v41 = vrot.slane %v8396_v51, %v20641_v37 }
 0x7de   :  { %11572 = vrsqrt.f32 %v7403_v56  ;;  %v7223_v27 = vmul.f32 0.03125, %v6943_v12  ;;  %v7120_v18 = vpop.xlane.xlu1 %7119  ;;  %v20773_v56 = vld [vmem:[#allocation44_spill] sm:$0xff] }
 0x7df   :  { %v8412_v50 = vcombine.low %v17980_v17, %v17983_v19  ;;  %11574 = vrsqrt.f32 %v7349_v36  ;;  %20772 = vst [vmem:[#allocation23_spill] sm:$0xff] %v17996_v41  ;;  %v7654_v12 = vmul.f32 %v11559_v9, %v20773_v56  ;;  %v20774_v36 = vld [vmem:[#allocation62_spill] sm:$0xff]  ;;  %v20799_v41 = vld [vmem:[#allocation149_spill] sm:$0xff] }
 0x7e0   :  { %v11561_v1 = vpop.eup %11560  ;;  %v7351_v7 = vadd.f32 1e-05, %v7223_v27 }
 0x7e1   :  { %v11563_v35 = vpop.eup %11562  ;;  %v6949_v14 = vpop.xlane.xlu0 %6948  ;;  %v17990_v15 = vrot.slane %v8412_v50, %v20641_v37  ;;  %v7655_v6 = vmul.f32 %v11561_v1, %v20771_v10  ;;  %v20775_v1 = vld [vmem:[#allocation74_spill] sm:$0xff] }
 0x7e2   :  { %v11565_v57 = vpop.eup %11564  ;;  %11576 = vrsqrt.f32 %v7351_v7  ;;  %v7225_v42 = vmul.f32 0.03125, %v6949_v14  ;;  %v17993_v46 = vpop.xlane.xlu1 %6957  ;;  %v7653_v62 = vmul.f32 %v11563_v35, %v20774_v36 }
 0x7e3   :  { %20770 = vst [vmem:[#allocation43_spill] sm:$0xff] %v17990_v15  ;;  %v11567_v24 = vpop.eup %11566  ;;  %11578 = vrsqrt.f32 %v7350_v31  ;;  %v7658_v7 = vmul.f32 %v11565_v57, %v20775_v1  ;;  %v20777_v31 = vld [vmem:[#allocation61_spill] sm:$0xff]  ;;  %v7278_v57 = vmul.f32 0.03125, %v17962_v30  ;;  %v20779_v1 = vld [vmem:[#allocation143_spill] sm:$0xff] }
 0x7e4   :  { %v11569_v32 = vpop.eup %11568  ;;  %11580 = vrsqrt.f32 %v7354_v2  ;;  %v7353_v27 = vadd.f32 1e-05, %v7225_v42  ;;  %v7652_v51 = vmul.f32 %v11567_v24, %v20776_v53  ;;  %v8508_v9 = vcombine.low %v7653_v62, %v7655_v6 }
 0x7e5   :  { %11582 = vrsqrt.f32 %v7348_v44  ;;  %v6955_v14 = vpop.xlane.xlu0 %6954  ;;  %v11571_v10 = vpop.eup %11570  ;;  %v7656_v56 = vmul.f32 %v11569_v32, %v20777_v31  ;;  %v7276_v2 = vmul.f32 0.03125, %v17951_v22  ;;  %v20778_v44 = vld [vmem:[#allocation103_spill] sm:$0xff]  ;;  %v7282_v62 = vmul.f32 0.03125, %v7120_v18 }
 0x7e6   :  { %11584 = vrsqrt.f32 %v7352_v55  ;;  %v7227_v39 = vmul.f32 0.03125, %v6955_v14  ;;  %v18004_v8 = vpop.xlane.xlu1 %6963  ;;  %v8500_v36 = vcombine.low %v7652_v51, %v7654_v12  ;;  %v7657_v50 = vmul.f32 %v11571_v10, %v20778_v44 }
 0x7e7   :  { %11586 = vrsqrt.f32 %v7353_v27  ;;  %v8516_v55 = vcombine.low %v7656_v56, %v7658_v7  ;;  %v18014_v6 = vrot.slane %v8508_v9, %v20628_v60  ;;  %v7406_v10 = vadd.f32 1e-05, %v7278_v57 }
 0x7e8   :  { %v11573_v35 = vpop.eup %11572  ;;  %v7355_v42 = vadd.f32 1e-05, %v7227_v39  ;;  %v7404_v39 = vadd.f32 1e-05, %v7276_v2  ;;  %v18017_v14 = vrot.slane %v8500_v36, %v20628_v60  ;;  %v7280_v56 = vmul.f32 0.03125, %v17968_v28  ;;  %v20784_v2 = vld [vmem:[#allocation48_spill] sm:$0xff] }
 0x7e9   :  { %v7659_v21 = vmul.f32 %v11573_v35, %v20779_v1  ;;  %v7105_v53 = vpop.xlane.xlu0 %7104  ;;  %20780 = vst [vmem:[#allocation110_spill] sm:$0xff] %v18014_v6  ;;  %v11575_v32 = vpop.eup %11574  ;;  %v18020_v7 = vrot.slane %v8516_v55, %v20628_v60  ;;  %v7410_v36 = vadd.f32 1e-05, %v7282_v62  ;;  %v20785_v1 = vld [vmem:[#allocation126_spill] sm:$0xff] }
 0x7ea   :  { %11588 = vrsqrt.f32 %v7355_v42  ;;  %v18011_v24 = vpop.xlane.xlu1 %6969  ;;  %v7277_v12 = vmul.f32 0.03125, %v7105_v53  ;;  %20781 = vst [vmem:[#allocation87_spill] sm:$0xff] %v18017_v14  ;;  %v7605_v53 = vmul.f32 %v11575_v32, %v20785_v1  ;;  %v7408_v62 = vadd.f32 1e-05, %v7280_v56  ;;  %v20792_v56 = vld [vmem:[#allocation19_spill] sm:$0xff] }
 0x7eb   :  { %v8524_v22 = vcombine.low %v7657_v50, %v7659_v21  ;;  %20782 = vst [vmem:[#allocation78_spill] sm:$0xff] %v18020_v7  ;;  %v8532_v50 = vcombine.low %v18017_v14, %v18014_v6  ;;  %11590 = vrsqrt.f32 %v7404_v39  ;;  %v20790_v39 = vld [vmem:[#allocation21_spill] sm:$0xff] }
 0x7ec   :  { %v11577_v27 = vpop.eup %11576  ;;  %v7405_v55 = vadd.f32 1e-05, %v7277_v12  ;;  %11592 = vrsqrt.f32 %v7406_v10 }
 0x7ed   :  { %v11579_v30 = vpop.eup %11578  ;;  %v7111_v51 = vpop.xlane.xlu0 %7110  ;;  %v18023_v31 = vrot.slane %v8524_v22, %v20628_v60  ;;  %v7607_v42 = vmul.f32 %v11577_v27, %v20784_v2  ;;  %v18040_v32 = vrot.slane %v8532_v50, %v20641_v37 }
 0x7ee   :  { %v11581_v9 = vpop.eup %11580  ;;  %v7279_v18 = vmul.f32 0.03125, %v7111_v51  ;;  %v6976_v21 = vpop.xlane.xlu1 %6975  ;;  %v7606_v28 = vmul.f32 %v11579_v30, %v20786_v59  ;;  %v20787_v51 = vld [vmem:[#allocation130_spill] sm:$0xff] }
 0x7ef   :  { %20783 = vst [vmem:[#allocation147_spill] sm:$0xff] %v18023_v31  ;;  %v11583_v35 = vpop.eup %11582  ;;  %v8548_v44 = vcombine.low %v18020_v7, %v18023_v31  ;;  %v7610_v0 = vmul.f32 %v11581_v9, %v20787_v51  ;;  %20789 = vst [vmem:[#allocation51_spill] sm:$0xff] %v18040_v32  ;;  %v8100_v30 = vcombine.low %v7605_v53, %v7607_v42 }
 0x7f0   :  { %v11585_v57 = vpop.eup %11584  ;;  %v7407_v22 = vadd.f32 1e-05, %v7279_v18  ;;  %v7604_v12 = vmul.f32 %v11583_v35, %v20790_v39  ;;  %v20791_v18 = vld [vmem:[#allocation45_spill] sm:$0xff] }
 0x7f1   :  { %v7117_v3 = vpop.xlane.xlu0 %7116  ;;  %v18035_v14 = vrot.slane %v8548_v44, %v20641_v37  ;;  %v11587_v27 = vpop.eup %11586  ;;  %v7608_v59 = vmul.f32 %v11585_v57, %v20791_v18  ;;  %v7230_v57 = vmul.f32 0.03125, %v18004_v8  ;;  %v7228_v8 = vmul.f32 0.03125, %v17993_v46 }
 0x7f2   :  { %11594 = vrsqrt.f32 %v7407_v22  ;;  %v7281_v2 = vmul.f32 0.03125, %v7117_v3  ;;  %v18037_v6 = vpop.xlane.xlu1 %7125  ;;  %v7609_v1 = vmul.f32 %v11587_v27, %v20792_v56  ;;  %v20793_v3 = vld [vmem:[#allocation50_spill] sm:$0xff]  ;;  %v8092_v7 = vcombine.low %v7604_v12, %v7606_v28 }
 0x7f3   :  { %20788 = vst [vmem:[#allocation113_spill] sm:$0xff] %v18035_v14  ;;  %11596 = vrsqrt.f32 %v7410_v36  ;;  %v8108_v50 = vcombine.low %v7608_v59, %v7610_v0  ;;  %v18051_v36 = vrot.slane %v8100_v30, %v20628_v60  ;;  %v7358_v59 = vadd.f32 1e-05, %v7230_v57  ;;  %v20796_v57 = vld [vmem:[#allocation26_spill] sm:$0xff] }
 0x7f4   :  { %v11589_v10 = vpop.eup %11588  ;;  %11598 = vrsqrt.f32 %v7405_v55  ;;  %v7409_v9 = vadd.f32 1e-05, %v7281_v2  ;;  %v18055_v27 = vrot.slane %v8092_v7, %v20628_v60  ;;  %v7234_v30 = vmul.f32 0.03125, %v6976_v21  ;;  %v20797_v14 = vld [vmem:[#allocation138_spill] sm:$0xff] }
 0x7f5   :  { %v7611_v22 = vmul.f32 %v11589_v10, %v20793_v3  ;;  %v7123_v51 = vpop.xlane.xlu0 %7122  ;;  %11600 = vrsqrt.f32 %v7408_v62  ;;  %v18058_v2 = vrot.slane %v8108_v50, %v20628_v60  ;;  %v11591_v28 = vpop.eup %11590  ;;  %v7356_v50 = vadd.f32 1e-05, %v7228_v8 }
 0x7f6   :  { %v7283_v31 = vmul.f32 0.03125, %v7123_v51  ;;  %v18048_v35 = vpop.xlane.xlu1 %7131  ;;  %11602 = vrsqrt.f32 %v7409_v9  ;;  %v11593_v12 = vpop.eup %11592 }
 0x7f7   :  { %v8116_v42 = vcombine.low %v7609_v1, %v7611_v22  ;;  %v7232_v22 = vmul.f32 0.03125, %v18011_v24  ;;  %v7662_v21 = vmul.f32 %v11593_v12, %v20796_v57  ;;  %v7660_v12 = vmul.f32 %v11591_v28, %v20799_v41 }
 0x7f8   :  { %v7411_v53 = vadd.f32 1e-05, %v7283_v31  ;;  %v8124_v31 = vcombine.low %v18055_v27, %v18051_v36  ;;  %v8345_v41 = vcombine.high %v17820_v40, %v17823_v4 }
 0x7f9   :  { %v6961_v55 = vpop.xlane.xlu0 %6960  ;;  %v18061_v0 = vrot.slane %v8116_v42, %v20628_v60  ;;  %v20795_v42 = vld [vmem:[#allocation131_spill] sm:$0xff]  ;;  %v8568_v15 = vcombine.low %v7660_v12, %v7662_v21 }
 0x7fa   :  { %11604 = vrsqrt.f32 %v7411_v53  ;;  %v7229_v62 = vmul.f32 0.03125, %v6961_v55  ;;  %v18063_v39 = vpop.xlane.xlu1 %7137  ;;  %v18076_v55 = vrot.slane %v8124_v31, %v20641_v37 }
 0x7fb   :  { %v8140_v7 = vcombine.low %v18058_v2, %v18061_v0  ;;  %11606 = vrsqrt.f32 %v7358_v59  ;;  %v20800_v59 = vld [vmem:[#allocation67_spill] sm:$0xff]  ;;  %v18098_v21 = vrot.slane %v8568_v15, %v20628_v60 }
 0x7fc   :  { %v11595_v18 = vpop.eup %11594  ;;  %v7357_v9 = vadd.f32 1e-05, %v7229_v62  ;;  %v7362_v62 = vadd.f32 1e-05, %v7234_v30 }
 0x7fd   :  { %v11597_v10 = vpop.eup %11596  ;;  %v6967_v56 = vpop.xlane.xlu0 %6966  ;;  %v18071_v1 = vrot.slane %v8140_v7, %v20641_v37  ;;  %v7663_v53 = vmul.f32 %v11595_v18, %v20795_v42  ;;  %v7360_v18 = vadd.f32 1e-05, %v7232_v22 }
 0x7fe   :  { %v11599_v3 = vpop.eup %11598  ;;  %v7231_v51 = vmul.f32 0.03125, %v6967_v56  ;;  %v7144_v46 = vpop.xlane.xlu1 %7143  ;;  %v7666_v7 = vmul.f32 %v11597_v10, %v20797_v14  ;;  %11608 = vrsqrt.f32 %v7357_v9  ;;  %v20801_v10 = vld [vmem:[#allocation18_spill] sm:$0xff] }
 0x7ff   :  { %20794 = vst [vmem:[#allocation145_spill] sm:$0xff] %v18071_v1  ;;  %v11601_v44 = vpop.eup %11600  ;;  %v7661_v58 = vmul.f32 %v11599_v3, %v20798_v20  ;;  %v20802_v3 = vld [vmem:[#allocation28_spill] sm:$0xff] }
 0x800   :  { %v7359_v32 = vadd.f32 1e-05, %v7231_v51  ;;  %v11603_v56 = vpop.eup %11602  ;;  %v7664_v30 = vmul.f32 %v11601_v44, %v20800_v59 }
 0x801   :  { %v6973_v24 = vpop.xlane.xlu0 %6972  ;;  %v8576_v51 = vcombine.low %v7661_v58, %v7663_v53  ;;  %v7665_v9 = vmul.f32 %v11603_v56, %v20801_v10  ;;  %v7286_v53 = vmul.f32 0.03125, %v18048_v35  ;;  %v7290_v35 = vmul.f32 0.03125, %v7144_v46 }
 0x802   :  { %11610 = vrsqrt.f32 %v7359_v32  ;;  %v7233_v31 = vmul.f32 0.03125, %v6973_v24  ;;  %v18083_v42 = vpop.xlane.xlu1 %7149  ;;  %v8584_v22 = vcombine.low %v7664_v30, %v7666_v7  ;;  %v7284_v30 = vmul.f32 0.03125, %v18037_v6 }
 0x803   :  { %11612 = vrsqrt.f32 %v7356_v50  ;;  %v18092_v44 = vrot.slane %v8576_v51, %v20628_v60  ;;  %v8329_v50 = vcombine.high %v17817_v43, %v17810_v26  ;;  %v7414_v51 = vadd.f32 1e-05, %v7286_v53 }
 0x804   :  { %v11605_v14 = vpop.eup %11604  ;;  %11614 = vrsqrt.f32 %v7362_v62  ;;  %v7361_v20 = vadd.f32 1e-05, %v7233_v31  ;;  %v18101_v7 = vrot.slane %v8584_v22, %v20628_v60  ;;  %v18107_v31 = vrot.slane %v8345_v41, %v20641_v37 }
 0x805   :  { %v7667_v57 = vmul.f32 %v11605_v14, %v20802_v3  ;;  %v6979_v8 = vpop.xlane.xlu0 %6978  ;;  %11616 = vrsqrt.f32 %v7360_v18  ;;  %v11607_v4 = vpop.eup %11606  ;;  %v8600_v26 = vcombine.low %v18098_v21, %v18092_v44  ;;  %v18114_v12 = vrot.slane %v8329_v50, %v20641_v37  ;;  %v20805_v14 = vld [vmem:[#allocation15_spill] sm:$0xff] }
 0x806   :  { %v7235_v32 = vmul.f32 0.03125, %v6979_v8  ;;  %v7156_v24 = vpop.xlane.xlu1 %7155  ;;  %11618 = vrsqrt.f32 %v7361_v20  ;;  %20803 = vst [vmem:[#allocation136_spill] sm:$0xff] %v18101_v7  ;;  %v7288_v46 = vmul.f32 0.03125, %v18063_v39  ;;  %v8601_v6 = vcombine.high %v18098_v21, %v18092_v44  ;;  %v18291_v44 = vld [vmem:[%s19176_s6 + $0x2] ss:$0 sm:$0xff] }
 0x807   :  { %v8592_v58 = vcombine.low %v7665_v9, %v7667_v57  ;;  %v20806_v57 = vld [vmem:[#allocation30_spill] sm:$0xff] }
 0x808   :  { %v7363_v28 = vadd.f32 1e-05, %v7235_v32  ;;  %v11609_v56 = vpop.eup %11608  ;;  %v7614_v22 = vmul.f32 %v11607_v4, %v20806_v57  ;;  %v20807_v32 = vld [vmem:[#allocation47_spill] sm:$0xff]  ;;  %v7418_v4 = vadd.f32 1e-05, %v7290_v35  ;;  %v7292_v35 = vmul.f32 0.03125, %v18083_v42 }
 0x809   :  { %v7129_v62 = vpop.xlane.xlu0 %7128  ;;  %v18104_v40 = vrot.slane %v8592_v58, %v20628_v60  ;;  %v7613_v41 = vmul.f32 %v11609_v56, %v20807_v32  ;;  %v20809_v32 = vld [vmem:[#allocation98_spill] sm:$0xff]  ;;  %v7416_v54 = vadd.f32 1e-05, %v7288_v46  ;;  %v20811_v46 = vld [vmem:[#allocation71_spill] sm:$0xff] }
 0x80a   :  { %11620 = vrsqrt.f32 %v7363_v28  ;;  %v7162_v8 = vpop.xlane.xlu1 %7161  ;;  %v7285_v18 = vmul.f32 0.03125, %v7129_v62  ;;  %v18129_v62 = vrot.slane %v8600_v26, %v20641_v37 }
 0x80b   :  { %20804 = vst [vmem:[#allocation144_spill] sm:$0xff] %v18104_v40  ;;  %v8616_v43 = vcombine.low %v18101_v7, %v18104_v40  ;;  %11622 = vrsqrt.f32 %v7414_v51  ;;  %v20810_v40 = vld [vmem:[#allocation93_spill] sm:$0xff] }
 0x80c   :  { %v11611_v15 = vpop.eup %11610  ;;  %v7413_v50 = vadd.f32 1e-05, %v7285_v18 }
 0x80d   :  { %v11613_v59 = vpop.eup %11612  ;;  %v7615_v20 = vmul.f32 %v11611_v15, %v20805_v14  ;;  %v7135_v10 = vpop.xlane.xlu0 %7134  ;;  %v18119_v9 = vrot.slane %v8616_v43, %v20641_v37  ;;  %v20808_v15 = vld [vmem:[#allocation25_spill] sm:$0xff] }
 0x80e   :  { %v11615_v3 = vpop.eup %11614  ;;  %v7287_v58 = vmul.f32 0.03125, %v7135_v10  ;;  %v7168_v28 = vpop.xlane.xlu1 %7167  ;;  %v7612_v14 = vmul.f32 %v11613_v59, %v20808_v15  ;;  %v7412_v10 = vadd.f32 1e-05, %v7284_v30  ;;  %v8261_v30 = vcombine.high %v17887_v61, %v17882_v63  ;;  %v20812_v15 = vld [vmem:[#allocation65_spill] sm:$0xff] }
 0x80f   :  { %v11617_v43 = vpop.eup %11616  ;;  %v8168_v56 = vcombine.low %v7613_v41, %v7615_v20  ;;  %v7618_v39 = vmul.f32 %v11615_v3, %v20809_v32  ;;  %v7294_v20 = vmul.f32 0.03125, %v7156_v24  ;;  %v7420_v61 = vadd.f32 1e-05, %v7292_v35 }
 0x810   :  { %v7415_v57 = vadd.f32 1e-05, %v7287_v58  ;;  %v11619_v5 = vpop.eup %11618  ;;  %v8160_v7 = vcombine.low %v7612_v14, %v7614_v22  ;;  %v7616_v59 = vmul.f32 %v11617_v43, %v20810_v40  ;;  %v7298_v40 = vmul.f32 0.03125, %v7168_v28 }
 0x811   :  { %v7141_v18 = vpop.xlane.xlu0 %7140  ;;  %v8175_v41 = vrot.slane %v8168_v56, %v20628_v60  ;;  %v7617_v58 = vmul.f32 %v11619_v5, %v20811_v46  ;;  %v7296_v43 = vmul.f32 0.03125, %v7162_v8  ;;  %v8481_v46 = vcombine.high %v17936_v25, %v17939_v47 }
 0x812   :  { %11624 = vrsqrt.f32 %v7415_v57  ;;  %v7289_v53 = vmul.f32 0.03125, %v7141_v18  ;;  %v18135_v26 = vpop.permute.xlu1 %8918  ;;  %v8176_v14 = vcombine.low %v7616_v59, %v7618_v39  ;;  %v8167_v63 = vrot.slane %v8160_v7, %v20628_v60 }
 0x813   :  { %11626 = vrsqrt.f32 %v7413_v50  ;;  %v7426_v7 = vadd.f32 1e-05, %v7298_v40  ;;  %v7424_v59 = vadd.f32 1e-05, %v7296_v43  ;;  %v8125_v25 = vcombine.high %v18055_v27, %v18051_v36  ;;  %v20816_v27 = vld [vmem:[#allocation139_spill] sm:$0xff] }
 0x814   :  { %v11621_v51 = vpop.eup %11620  ;;  %11628 = vrsqrt.f32 %v7418_v4  ;;  %v7417_v3 = vadd.f32 1e-05, %v7289_v53  ;;  %v8277_v53 = vcombine.high %v17890_v34, %v17893_v33  ;;  %v7422_v4 = vadd.f32 1e-05, %v7294_v20 }
 0x815   :  { %11630 = vrsqrt.f32 %v7412_v10  ;;  %v7619_v57 = vmul.f32 %v11621_v51, %v20812_v15  ;;  %v7147_v22 = vpop.xlane.xlu0 %7146  ;;  %v8193_v56 = vcombine.high %v8167_v63, %v8175_v41  ;;  %v8183_v39 = vrot.slane %v8176_v14, %v20628_v60  ;;  %v11623_v33 = vpop.eup %11622 }
 0x816   :  { %11632 = vrsqrt.f32 %v7416_v54  ;;  %v7291_v42 = vmul.f32 0.03125, %v7147_v22  ;;  %v18144_v50 = vpop.permute.xlu1 %8788  ;;  %v8192_v28 = vcombine.low %v8167_v63, %v8175_v41  ;;  %v18156_v34 = vrot.slane %v8261_v30, %v20641_v37 }
 0x817   :  { %v8184_v24 = vcombine.low %v7617_v58, %v7619_v57  ;;  %11634 = vrsqrt.f32 %v7417_v3  ;;  %v18159_v3 = vrot.slane %v8193_v56, %v20641_v37  ;;  %v18162_v41 = vrot.slane %v8277_v53, %v20641_v37  ;;  %v20814_v56 = vld [vmem:[#allocation85_spill] sm:$0xff] }
 0x818   :  { %v7419_v5 = vadd.f32 1e-05, %v7291_v42  ;;  %v18170_v22 = vrot.slane %v8192_v28, %v20641_v37  ;;  %v20813_v42 = vld [vmem:[#allocation35_spill] sm:$0xff] }
 0x819   :  { %v7153_v32 = vpop.xlane.xlu0 %7152  ;;  %v8191_v54 = vrot.slane %v8184_v24, %v20628_v60 }
 0x81a   :  { %11636 = vrsqrt.f32 %v7419_v5  ;;  %v7293_v8 = vmul.f32 0.03125, %v7153_v32  ;;  %v18153_v18 = vpop.permute.xlu1 %8852  ;;  %v7670_v32 = vmul.f32 %v11623_v33, %v20814_v56 }
 0x81b   :  { %11638 = vrsqrt.f32 %v7420_v61  ;;  %v8209_v35 = vcombine.high %v8183_v39, %v8191_v54  ;;  %v8208_v51 = vcombine.low %v8183_v39, %v8191_v54  ;;  %v20815_v39 = vld [vmem:[#allocation88_spill] sm:$0xff] }
 0x81c   :  { %v11625_v20 = vpop.eup %11624  ;;  %11640 = vrsqrt.f32 %v7422_v4  ;;  %v7421_v15 = vadd.f32 1e-05, %v7293_v8  ;;  %v8141_v4 = vcombine.high %v18058_v2, %v18061_v0  ;;  %v8294_v2 = vcombine.low %v18156_v34, %v18162_v41 }
 0x81d   :  { %v11627_v58 = vpop.eup %11626  ;;  %v7159_v30 = vpop.xlane.xlu0 %7158  ;;  %v18167_v57 = vrot.slane %v8209_v35, %v20641_v37  ;;  %v18173_v14 = vrot.slane %v8208_v51, %v20641_v37  ;;  %v7671_v63 = vmul.f32 %v11625_v20, %v20813_v42  ;;  %11642 = vrsqrt.f32 %v7426_v7 }
 0x81e   :  { %v11629_v40 = vpop.eup %11628  ;;  %v7295_v61 = vmul.f32 0.03125, %v7159_v30  ;;  %v18176_v43 = vpop.permute.xlu1 %8794  ;;  %11644 = vrsqrt.f32 %v7424_v59  ;;  %v7669_v54 = vmul.f32 %v11627_v58, %v20815_v39  ;;  %v8465_v0 = vcombine.high %v17933_v13, %v17929_v23  ;;  %v20817_v59 = vld [vmem:[#allocation58_spill] sm:$0xff]  ;;  %v20820_v39 = vld [vmem:[#allocation108_spill] sm:$0xff] }
 0x81f   :  { %v11631_v47 = vpop.eup %11630  ;;  %v8226_v24 = vcombine.low %v18159_v3, %v18167_v57  ;;  %v8225_v53 = vcombine.high %v18170_v22, %v18173_v14  ;;  %v7674_v7 = vmul.f32 %v11629_v40, %v20816_v27  ;;  %11646 = vrsqrt.f32 %v7421_v15  ;;  %v20818_v15 = vld [vmem:[#allocation57_spill] sm:$0xff] }
 0x820   :  { %v11633_v5 = vpop.eup %11632  ;;  %v7423_v28 = vadd.f32 1e-05, %v7295_v61  ;;  %v7668_v35 = vmul.f32 %v11631_v47, %v20817_v59  ;;  %v8644_v58 = vcombine.low %v7669_v54, %v7671_v63  ;;  %v8157_v40 = vcombine.high %v18076_v55, %v18071_v1  ;;  %v20831_v61 = vld [vmem:[#allocation97_spill] sm:$0xff]  ;;  %v20851_v1 = vld [vmem:[#allocation112_spill] sm:$0xff] }
 0x821   :  { %8866 = vrot.lane.b32.xlu0 %v8226_v24, %s11745_s4  ;;  %8802 = vrot.lane.b32.xlu1 %v8225_v53, %s11747_s5  ;;  %v7165_v8 = vpop.xlane.xlu0 %7164  ;;  %v11635_v33 = vpop.eup %11634  ;;  %v7672_v30 = vmul.f32 %v11633_v5, %v20818_v15  ;;  %v18204_v42 = vrot.slane %v8141_v4, %v20641_v37  ;;  %v18209_v47 = vrot.slane %v8125_v25, %v20641_v37  ;;  %v20819_v5 = vld [vmem:[#allocation72_spill] sm:$0xff] }
 0x822   :  { %11648 = vrsqrt.f32 %v7423_v28  ;;  %v7297_v51 = vmul.f32 0.03125, %v7165_v8  ;;  %v18198_v20 = vpop.permute.xlu1 %8922  ;;  %v18212_v24 = vrot.slane %v8481_v46, %v20641_v37  ;;  %v8636_v63 = vcombine.low %v7668_v35, %v7670_v32  ;;  %v20828_v32 = vld [vmem:[#allocation136_spill] sm:$0xff] }
 0x823   :  { %v7673_v56 = vmul.f32 %v11635_v33, %v20819_v5  ;;  %v20821_v4 = vcombine.high %v17857_v52, %v17842_v38  ;;  %v8652_v27 = vcombine.low %v7672_v30, %v7674_v7  ;;  %v18224_v46 = vrot.slane %v8465_v0, %v20641_v37 }
 0x824   :  { %v11637_v23 = vpop.eup %11636  ;;  %v7425_v13 = vadd.f32 1e-05, %v7297_v51  ;;  %v18229_v33 = vrot.slane %v8644_v58, %v20628_v60  ;;  %v8158_v35 = vcombine.low %v18209_v47, %v18204_v42  ;;  %v8397_v51 = vcombine.high %v17976_v45, %v17971_v16  ;;  %v20830_v45 = vld [vmem:[#allocation56_spill] sm:$0xff] }
 0x825   :  { %v11639_v53 = vpop.eup %11638  ;;  %v7675_v54 = vmul.f32 %v11637_v23, %v20820_v39  ;;  %8806 = vrot.lane.b32.xlu0 %v20821_v4, %s11747_s5  ;;  %8800 = vrot.lane.b32.xlu1 %v8157_v40, %s11747_s5  ;;  %v7171_v28 = vpop.xlane.xlu0 %7170  ;;  %v8413_v7 = vcombine.high %v17980_v17, %v17983_v19  ;;  %v8498_v40 = vcombine.low %v18224_v46, %v18212_v24  ;;  %v20827_v39 = vld [vmem:[#allocation144_spill] sm:$0xff] }
 0x826   :  { %v11641_v25 = vpop.eup %11640  ;;  %v7299_v8 = vmul.f32 0.03125, %v7171_v28  ;;  %v18221_v59 = vpop.permute.xlu1 %8792  ;;  %11650 = vrsqrt.f32 %v7425_v13  ;;  %v18240_v23 = vrot.slane %v8636_v63, %v20628_v60  ;;  %v20822_v5 = vcombine.high %v18114_v12, %v18107_v31  ;;  %v20823_v13 = vld [vmem:[#allocation49_spill] sm:$0xff]  ;;  %v20824_v28 = vld [vmem:[#allocation111_spill] sm:$0xff] }
 0x827   :  { %v8660_v15 = vcombine.low %v7673_v56, %v7675_v54  ;;  %v11643_v30 = vpop.eup %11642  ;;  %v18250_v17 = vrot.slane %v8652_v27, %v20628_v60  ;;  %v7678_v63 = vmul.f32 %v11641_v25, %v20823_v13  ;;  %v18265_v27 = vrot.slane %v8413_v7, %v20641_v37  ;;  %v20826_v13 = vld [vmem:[#allocation63_spill] sm:$0xff] }
 0x828   :  { %v7427_v0 = vadd.f32 1e-05, %v7299_v8  ;;  %v11645_v58 = vpop.eup %11644  ;;  %v8668_v54 = vcombine.low %v18240_v23, %v18229_v33  ;;  %v7682_v8 = vmul.f32 %v11643_v30, %v20824_v28  ;;  %v8617_v30 = vcombine.high %v20828_v32, %v20827_v39  ;;  %v20829_v28 = vld [vmem:[#allocation141_spill] sm:$0xff]  ;;  %v20834_v32 = vld [vmem:[#allocation102_spill] sm:$0xff] }
 0x829   :  { %8934 = vrot.lane.b32.xlu0 %v20822_v5, %s11746_s23  ;;  %8864 = vrot.lane.b32.xlu1 %v8158_v35, %s11745_s4  ;;  %v8791_v16 = vpop.permute.xlu0 %8790  ;;  %v18253_v19 = vrot.slane %v8660_v15, %v20628_v60  ;;  %v11647_v4 = vpop.eup %11646  ;;  %v18262_v35 = vrot.slane %v8397_v51, %v20641_v37  ;;  %v7680_v36 = vmul.f32 %v11645_v58, %v20826_v13 }
 0x82a   :  { %11652 = vrsqrt.f32 %v7427_v0  ;;  %v8857_v56 = vpop.permute.xlu1 %8856  ;;  %v20825_v0 = vld [vmem:[#allocation137_spill] sm:$0xff]  ;;  %v20832_v7 = vcombine.low %v20830_v45, %v20831_v61  ;;  %v7677_v58 = vmul.f32 %v11647_v4, %v20834_v32  ;;  %v18299_v39 = vrot.slane %v8668_v54, %v20641_v37  ;;  %v20847_v4 = vld [vmem:[#allocation134_spill] sm:$0xff] }
 0x82b   :  { %v8684_v25 = vcombine.low %v18250_v17, %v18253_v19  ;;  %v7676_v5 = vmul.f32 %v11639_v53, %v20825_v0  ;;  %v20833_v53 = vcombine.low %v18114_v12, %v18107_v31  ;;  %v18304_v31 = vld [vmem:[%s19176_s6 + $0x3] ss:$0 sm:$0xff] }
 0x82c   :  { %v11649_v15 = vpop.eup %11648  ;;  %v8965_v10 = vsel %vm4679_vm3, %v20832_v7, %v8791_v16 }
 0x82d   :  { %v7679_v51 = vmul.f32 %v11649_v15, %v20829_v28  ;;  %8868 = vrot.lane.b32.xlu0 %v8294_v2, %s11745_s4  ;;  %8870 = vrot.lane.b32.xlu1 %v20833_v53, %s11745_s4  ;;  %v8855_v21 = vpop.permute.xlu0 %8854  ;;  %v18294_v61 = vrot.slane %v8684_v25, %v20641_v37  ;;  %v8704_v2 = vcombine.low %v7676_v5, %v7678_v63  ;;  %v20835_v15 = vld [vmem:[#allocation43_spill] sm:$0xff]  ;;  %v20837_v63 = vld [vmem:[#allocation82_spill] sm:$0xff]  ;;  %v20838_v5 = vld [vmem:[#allocation53_spill] sm:$0xff] }
 0x82e   :  { %v8981_v16 = vsel %vm4696_vm4, %v8965_v10, %v8855_v21  ;;  %v8799_v45 = vpop.permute.xlu1 %8798  ;;  %v20836_v25 = vld [vmem:[#allocation23_spill] sm:$0xff]  ;;  %v8720_v10 = vcombine.low %v7680_v36, %v7682_v8  ;;  %v20839_v54 = vcombine.low %v20837_v63, %v20838_v5  ;;  %v20840_v36 = vcombine.high %v17913_v11, %v17907_v29  ;;  %v20842_v63 = vld [vmem:[#allocation81_spill] sm:$0xff] }
 0x82f   :  { %v8997_v12 = vsel %vm4713_vm5, %v8981_v16, %v18135_v26  ;;  %v8429_v0 = vcombine.high %v20836_v25, %v20835_v15  ;;  %v8712_v7 = vcombine.low %v7677_v58, %v7679_v51  ;;  %v18330_v21 = vrot.slane %v8601_v6, %v20641_v37 }
 0x830   :  { %v8964_v13 = vsel %vm4679_vm3, %v20839_v54, %v18144_v50  ;;  %v9017_v28 = vmul.f32 %v18291_v44, %v8997_v12  ;;  %v8430_v50 = vcombine.low %v18262_v35, %v18265_v27  ;;  %v11651_v51 = vpop.eup %11650  ;;  %v18338_v16 = vrot.slane %v8617_v30, %v20641_v37  ;;  %v20841_v12 = vld [vmem:[#allocation5_spill] sm:$0xff] }
 0x831   :  { %v8980_v26 = vsel %vm4696_vm4, %v8964_v13, %v18153_v18  ;;  %8874 = vrot.lane.b32.xlu0 %v8498_v40, %s11745_s4  ;;  %8804 = vrot.lane.b32.xlu1 %v20840_v36, %s11747_s5  ;;  %v8917_v8 = vpop.permute.xlu0 %8916  ;;  %v18335_v40 = vrot.slane %v8704_v2, %v20628_v60  ;;  %v20843_v5 = vcombine.low %v20841_v12, %v20842_v63  ;;  %v20844_v2 = vld [vmem:[#allocation6_spill] sm:$0xff]  ;;  %v20848_v12 = vld [vmem:[#allocation77_spill] sm:$0xff] }
 0x832   :  { %v9037_v32 = vadd.f32 %v18304_v31, %v9017_v28  ;;  %v8996_v58 = vsel %vm4713_vm5, %v8980_v26, %v8917_v8  ;;  %v8863_v18 = vpop.permute.xlu1 %8862  ;;  %v18347_v13 = vrot.slane %v8720_v10, %v20628_v60  ;;  %v8669_v28 = vcombine.high %v18240_v23, %v18229_v33  ;;  %v20845_v36 = vld [vmem:[#allocation70_spill] sm:$0xff] }
 0x833   :  { %v8967_v54 = vsel %vm4679_vm3, %v20843_v5, %v18176_v43  ;;  %v9016_v6 = vmul.f32 %v18291_v44, %v8996_v58  ;;  %v20846_v30 = vcombine.low %v20844_v2, %v20845_v36  ;;  %v20849_v63 = vcombine.low %v20847_v4, %v20848_v12  ;;  %v20850_v10 = vld [vmem:[#allocation146_spill] sm:$0xff] }
 0x834   :  { %v11653_v26 = vpop.eup %11652  ;;  %v9058_v53 = vrot.slane %v9037_v32, 4  ;;  %v18361_v58 = vrot.slane %v8712_v7, %v20628_v60  ;;  %v7681_v5 = vmul.f32 %v11651_v51, %v20850_v10  ;;  %v20852_v2 = vcombine.high %v18224_v46, %v18212_v24 }
 0x835   :  { %v8966_v8 = vsel %vm4679_vm3, %v20846_v30, %v18221_v59  ;;  %v8969_v43 = vsel %vm4679_vm3, %v20849_v63, %v8799_v45  ;;  %v7683_v33 = vmul.f32 %v11653_v26, %v20851_v1  ;;  %v9036_v23 = vadd.f32 %v18304_v31, %v9016_v6  ;;  %v8859_v45 = vpop.permute.xlu0 %8858 }
 0x836   :  { %8938 = vrot.lane.b32.xlu0 %v20852_v2, %s11746_s23  ;;  %v20853_v59 = vcombine.high %v18156_v34, %v18162_v41  ;;  %v8982_v4 = vsel %vm4696_vm4, %v8966_v8, %v8857_v56  ;;  %v9059_v7 = vadd.f32 %v9058_v53, %v9037_v32  ;;  %v8985_v51 = vsel %vm4696_vm4, %v8969_v43, %v8863_v18  ;;  %v8927_v26 = vpop.permute.xlu1 %8926 }
 0x837   :  { %v8983_v1 = vsel %vm4696_vm4, %v8967_v54, %v8859_v45  ;;  %v9052_v6 = vrot.slane %v9036_v23, 4  ;;  %v9001_v24 = vsel %vm4713_vm5, %v8985_v51, %v8927_v26  ;;  %v8728_v46 = vcombine.low %v7681_v5, %v7683_v33 }
 0x838   :  { %8932 = vrot.lane.b32.xlu1 %v20853_v59, %s11746_s23  ;;  %v8999_v36 = vsel %vm4713_vm5, %v8983_v1, %v18198_v20  ;;  %v9060_v30 = vrot.slane %v9059_v7, 2  ;;  %v9021_v41 = vmul.f32 %v18291_v44, %v9001_v24  ;;  %v8736_v56 = vcombine.low %v18335_v40, %v18361_v58 }
 0x839   :  { %v9019_v34 = vmul.f32 %v18291_v44, %v8999_v36  ;;  %v9053_v53 = vadd.f32 %v9052_v6, %v9036_v23  ;;  %v20854_v32 = vcombine.high %v17955_v49, %v17947_v48  ;;  %v8921_v20 = vpop.permute.xlu0 %8920  ;;  %v18390_v18 = vrot.slane %v8728_v46, %v20628_v60  ;;  %v20856_v6 = vld [vmem:[#allocation114_spill] sm:$0xff]  ;;  %v20857_v36 = vld [vmem:[#allocation73_spill] sm:$0xff] }
 0x83a   :  { %8808 = vrot.lane.b32.xlu0 %v8429_v0, %s11747_s5  ;;  %v8685_v54 = vcombine.high %v18250_v17, %v18253_v19  ;;  %v9061_v8 = vadd.f32 %v9060_v30, %v9059_v7  ;;  %v9041_v63 = vadd.f32 %v18304_v31, %v9021_v41  ;;  %v8998_v43 = vsel %vm4713_vm5, %v8982_v4, %v8921_v20  ;;  %v8861_v0 = vpop.permute.xlu1 %8860 }
 0x83b   :  { %v9039_v12 = vadd.f32 %v18304_v31, %v9019_v34  ;;  %v9054_v10 = vrot.slane %v9053_v53, 2  ;;  %v9018_v5 = vmul.f32 %v18291_v44, %v8998_v43  ;;  %v8633_v33 = vcombine.high %v18129_v62, %v18119_v9 }
 0x83c   :  { %8810 = vrot.lane.b32.xlu1 %v20854_v32, %s11747_s5  ;;  %v8752_v23 = vcombine.low %v18347_v13, %v18390_v18  ;;  %v9062_v2 = vrot.slane %v9061_v8, 1  ;;  %v9082_v17 = vrot.slane %v9041_v63, 4  ;;  %v18403_v19 = vrot.slane %v8736_v56, %v20641_v37 }
 0x83d   :  { %v9070_v59 = vrot.slane %v9039_v12, 4  ;;  %v9055_v45 = vadd.f32 %v9054_v10, %v9053_v53  ;;  %v9038_v7 = vadd.f32 %v18304_v31, %v9018_v5  ;;  %v20855_v4 = vcombine.high %v18262_v35, %v18265_v27  ;;  %v8797_v51 = vpop.permute.xlu0 %8796 }
 0x83e   :  { %v18412_v1 = vrot.slane %v8752_v23, %v20641_v37  ;;  %v20858_v24 = vcombine.low %v20856_v6, %v20857_v36  ;;  %v8925_v30 = vpop.permute.xlu1 %8924  ;;  %v18419_v34 = vrot.slane %v8669_v28, %v20641_v37  ;;  %v18422_v35 = vrot.slane %v8685_v54, %v20641_v37  ;;  %v20860_v23 = vld [vmem:[#allocation78_spill] sm:$0xff] }
 0x83f   :  { %8936 = vrot.lane.b32.xlu0 %v20855_v4, %s11746_s23  ;;  %v9071_v26 = vadd.f32 %v9070_v59, %v9039_v12  ;;  %v9056_v27 = vrot.slane %v9055_v45, 1  ;;  %v9063_v53 = vadd.f32 %v9062_v2, %v9061_v8  ;;  %v9083_v20 = vadd.f32 %v9082_v17, %v9041_v63  ;;  %v20859_v8 = vld [vmem:[#allocation147_spill] sm:$0xff] }
 0x840   :  { %8872 = vrot.lane.b32.xlu1 %v8430_v50, %s11745_s4  ;;  %v8968_v46 = vsel %vm4679_vm3, %v20858_v24, %v8797_v51  ;;  %v9064_v50 = vrot.slane %v9038_v7, 4  ;;  %v8769_v56 = vcombine.high %v18403_v19, %v18412_v1  ;;  %v8702_v5 = vcombine.low %v18419_v34, %v18422_v35  ;;  %v20862_v4 = vld [vmem:[#allocation87_spill] sm:$0xff]  ;;  %v20863_v24 = vld [vmem:[#allocation113_spill] sm:$0xff] }
 0x841   :  { %v8984_v41 = vsel %vm4696_vm4, %v8968_v46, %v8861_v0  ;;  %v9072_v32 = vrot.slane %v9071_v26, 2  ;;  %v9057_v43 = vadd.f32 %v9056_v27, %v9055_v45  ;;  %v8634_v0 = vcombine.low %v18330_v21, %v18338_v16  ;;  %v20864_v46 = vld [vmem:[#allocation51_spill] sm:$0xff] }
 0x842   :  { %v9000_v12 = vsel %vm4713_vm5, %v8984_v41, %v8925_v30  ;;  %v9065_v10 = vadd.f32 %v9064_v50, %v9038_v7  ;;  %v8549_v63 = vcombine.high %v20860_v23, %v20859_v8  ;;  %v8768_v17 = vcombine.low %v18403_v19, %v18412_v1  ;;  %v20861_v7 = vld [vmem:[#allocation110_spill] sm:$0xff] }
 0x843   :  { %v9020_v28 = vmul.f32 %v18291_v44, %v9000_v12  ;;  %8814 = vrot.lane.b32.xlu0 %v8633_v33, %s11747_s5  ;;  %v9073_v54 = vadd.f32 %v9072_v32, %v9071_v26  ;;  %v9184_v33 = vsel %vm9183_vm6, %v9063_v53, %v9057_v43  ;;  %v9084_v45 = vrot.slane %v9083_v20, 2 }
 0x844   :  { %8818 = vrot.lane.b32.xlu1 %v8769_v56, %s11747_s5  ;;  %v9066_v2 = vrot.slane %v9065_v10, 2  ;;  %v8533_v51 = vcombine.high %v20862_v4, %v20861_v7  ;;  %v8565_v30 = vcombine.high %v20864_v46, %v20863_v24  ;;  %v8563_v27 = vrot.slane %v8549_v63, %v20641_v37  ;;  %v9153_v7 = vld [vmem:[%s19177_s7 + $0x10] sm:$0xff] }
 0x845   :  { %v9040_v59 = vadd.f32 %v18304_v31, %v9020_v28  ;;  %v9074_v36 = vrot.slane %v9073_v54, 1  ;;  %v8635_v56 = vcombine.high %v18330_v21, %v18338_v16  ;;  %v8753_v53 = vcombine.high %v18347_v13, %v18390_v18 }
 0x846   :  { %v9067_v26 = vadd.f32 %v9066_v2, %v9065_v10  ;;  %v9085_v32 = vadd.f32 %v9084_v45, %v9083_v20  ;;  %v8547_v12 = vrot.slane %v8533_v51, %v20641_v37  ;;  %v8737_v28 = vcombine.high %v18335_v40, %v18361_v58  ;;  %v9152_v45 = vld [vmem:[%s19177_s7 + $0x8] sm:$0xff]  ;;  %v9154_v51 = vld [vmem:[%s19177_s7 + $0x18] sm:$0xff] }
 0x847   :  { %v9076_v6 = vrot.slane %v9040_v59, 4  ;;  %8878 = vrot.lane.b32.xlu0 %v8634_v0, %s11745_s4  ;;  %v9075_v0 = vadd.f32 %v9074_v36, %v9073_v54  ;;  %v8227_v16 = vcombine.high %v18159_v3, %v18167_v57  ;;  %v8767_v13 = vrot.slane %v8753_v53, %v20641_v37  ;;  %v9156_v36 = vld [vmem:[%s19177_s7 + $0x28] sm:$0xff] }
 0x848   :  { %8880 = vrot.lane.b32.xlu1 %v8702_v5, %s11745_s4  ;;  %v9068_v50 = vrot.slane %v9067_v26, 1  ;;  %v8566_v5 = vcombine.low %v8547_v12, %v8563_v27  ;;  %v9086_v20 = vrot.slane %v9085_v32, 1  ;;  %v8751_v40 = vrot.slane %v8737_v28, %v20641_v37  ;;  %v9164_v28 = vld [vmem:[%s19177_s7 + $0x68] sm:$0xff] }
 0x849   :  { %v9077_v41 = vadd.f32 %v9076_v6, %v9040_v59  ;;  %v8567_v54 = vcombine.high %v8547_v12, %v8563_v27  ;;  %v8701_v59 = vcombine.high %v18299_v39, %v18294_v61  ;;  %v9155_v6 = vld [vmem:[%s19177_s7 + $0x20] sm:$0xff] }
 0x84a   :  { %v9069_v43 = vadd.f32 %v9068_v50, %v9067_v26  ;;  %v8771_v63 = vcombine.high %v8751_v40, %v8767_v13  ;;  %v9087_v3 = vadd.f32 %v9086_v20, %v9085_v32  ;;  %v11039_v26 = vpack.c.bf16 %v9154_v51, %v9153_v7  ;;  %v9157_v50 = vld [vmem:[%s19177_s7 + $0x30] sm:$0xff]  ;;  %v9160_v32 = vld [vmem:[%s19177_s7 + $0x48] sm:$0xff] }
 0x84b   :  { %v9078_v10 = vrot.slane %v9077_v41, 2  ;;  %8812 = vrot.lane.b32.xlu0 %v8565_v30, %s11747_s5  ;;  %v8159_v30 = vcombine.high %v18209_v47, %v18204_v42  ;;  %v11043_v27 = vpack.c.bf16 %v9156_v36, %v9155_v6  ;;  %v8703_v42 = vcombine.high %v18419_v34, %v18422_v35  ;;  %v9159_v47 = vld [vmem:[%s19177_s7 + $0x40] sm:$0xff]  ;;  %v9162_v34 = vld [vmem:[%s19177_s7 + $0x58] sm:$0xff]  ;;  %v9380_v20 = vld [vmem:[#allocation2 + $0x10] sm:$0xff] }
 0x84c   :  { %8942 = vrot.lane.b32.xlu1 %v8635_v56, %s11746_s23  ;;  %v9186_v18 = vsel %vm9185_vm7, %v9069_v43, %v9184_v33  ;;  %v9151_v33 = vld [vmem:[%s19177_s7] sm:$0xff]  ;;  %v8770_v56 = vcombine.low %v8751_v40, %v8767_v13  ;;  %v11051_v12 = vpack.c.bf16 %v9160_v32, %v9159_v47  ;;  %v9161_v43 = vld [vmem:[%s19177_s7 + $0x50] sm:$0xff]  ;;  %v9387_v7 = vld [vmem:[#allocation2 + $0x48] sm:$0xff]  ;;  %v20865_v32 = vcombine.low %v17857_v52, %v17842_v38 }
 0x84d   :  { %v9079_v21 = vadd.f32 %v9078_v10, %v9077_v41  ;;  %v9188_v8 = vsel %vm9187_vm8, %v9075_v0, %v9186_v18  ;;  %v11035_v4 = vpack.c.bf16 %v9152_v45, %v9151_v33  ;;  %v9158_v41 = vld [vmem:[%s19177_s7 + $0x38] sm:$0xff]  ;;  %v11055_v35 = vpack.c.bf16 %v9162_v34, %v9161_v43  ;;  %v9163_v10 = vld [vmem:[%s19177_s7 + $0x60] sm:$0xff]  ;;  %v9379_v18 = vld [vmem:[#allocation2 + $0x8] sm:$0xff] }
 0x84e   :  { %v11047_v53 = vpack.c.bf16 %v9158_v41, %v9157_v50  ;;  %v11059_v0 = vpack.c.bf16 %v9164_v28, %v9163_v10  ;;  %v9378_v13 = vld [vmem:[#allocation2] sm:$0xff]  ;;  %v9388_v51 = vld [vmem:[#allocation2 + $0x50] sm:$0xff] }
 0x84f   :  { %v9080_v23 = vrot.slane %v9079_v21, 1  ;;  %8876 = vrot.lane.b32.xlu0 %v8566_v5, %s11745_s4  ;;  %11036 = vmatprep.subr.bf16.mxu0 %v11035_v4  ;;  %v9165_v5 = vld [vmem:[%s19177_s7 + $0x70] sm:$0xff]  ;;  %v18532_v40 = vld [vmem:[%s19178_s8] sm:$0x3] }
 0x850   :  { %8930 = vrot.lane.b32.xlu1 %v8227_v16, %s11746_s23  ;;  %11038 = vmatpush3.bf16.msra.mxu0 %v11035_v4  ;;  %v9386_v45 = vld [vmem:[#allocation2 + $0x40] sm:$0xff] }
 0x851   :  { %v9081_v58 = vadd.f32 %v9080_v23, %v9079_v21  ;;  %11040 = vmatprep.subr.bf16.mxu0 %v11039_v26  ;;  %v9166_v21 = vld [vmem:[%s19177_s7 + $0x78] sm:$0xff]  ;;  %v11083_v4 = vpack.c.bf16 %v9387_v7, %v9386_v45  ;;  %v9390_v36 = vld [vmem:[#allocation2 + $0x60] sm:$0xff] }
 0x852   :  { %v11063_v16 = vpack.c.bf16 %v9166_v21, %v9165_v5  ;;  %v9381_v23 = vld [vmem:[#allocation2 + $0x18] sm:$0xff] }
 0x853   :  { %8940 = vrot.lane.b32.xlu0 %v8567_v54, %s11746_s23  ;;  %v9190_v57 = vsel %vm9189_vm9, %v9081_v58, %v9188_v8  ;;  %v11067_v8 = vpack.c.bf16 %v9379_v18, %v9378_v13  ;;  %v11071_v58 = vpack.c.bf16 %v9381_v23, %v9380_v20  ;;  %v9382_v54 = vld [vmem:[#allocation2 + $0x20] sm:$0xff] }
 0x854   :  { %8946 = vrot.lane.b32.xlu1 %v8771_v63, %s11746_s23  ;;  %v18469_v2 = vsel %vm9191_vm10, %v9087_v3, %v9190_v57  ;;  %11042 = vmatpush3.bf16.msra.mxu0 %v11039_v26  ;;  %v9383_v63 = vld [vmem:[#allocation2 + $0x28] sm:$0xff]  ;;  %v9384_v57 = vld [vmem:[#allocation2 + $0x30] sm:$0xff]  ;;  %v9389_v26 = vld [vmem:[#allocation2 + $0x58] sm:$0xff] }
 0x855   :  { %11044 = vmatprep.subr.bf16.mxu0 %v11043_v27  ;;  %11068 = vmatprep.subr.bf16.mxu1 %v11067_v8  ;;  %v11075_v3 = vpack.c.bf16 %v9383_v63, %v9382_v54  ;;  %v11087_v6 = vpack.c.bf16 %v9389_v26, %v9388_v51  ;;  %v20868_v26 = vcombine.low %v20836_v25, %v20835_v15 }
 0x856   :  { %11070 = vmatpush3.bf16.msra.mxu1 %v11067_v8 }
 0x857   :  { %8816 = vrot.lane.b32.xlu0 %v8701_v59, %s11747_s5  ;;  %11072 = vmatprep.subr.bf16.mxu1 %v11071_v58  ;;  %v9385_v59 = vld [vmem:[#allocation2 + $0x38] sm:$0xff] }
 0x858   :  { %11046 = vmatpush3.bf16.msra.mxu0 %v11043_v27  ;;  %v11079_v33 = vpack.c.bf16 %v9385_v59, %v9384_v57 }
 0x859   :  { %11048 = vmatprep.subr.bf16.mxu0 %v11047_v53 }
 0x85a   :  { %11074 = vmatpush3.bf16.msra.mxu1 %v11071_v58 }
 0x85b   :  { %8928 = vrot.lane.b32.xlu0 %v8159_v30, %s11746_s23  ;;  %11076 = vmatprep.subr.bf16.mxu1 %v11075_v3  ;;  %v9391_v30 = vld [vmem:[#allocation2 + $0x68] sm:$0xff] }
 0x85c   :  { %11050 = vmatpush3.bf16.msra.mxu0 %v11047_v53  ;;  %v11091_v27 = vpack.c.bf16 %v9391_v30, %v9390_v36 }
 0x85d   :  { %11052 = vmatprep.subr.bf16.mxu0 %v11051_v12 }
 0x85e   :  { %11078 = vmatpush3.bf16.msra.mxu1 %v11075_v3 }
 0x85f   :  { %8882 = vrot.lane.b32.xlu0 %v8770_v56, %s11745_s4  ;;  %11080 = vmatprep.subr.bf16.mxu1 %v11079_v33 }
 0x860   :  { %11054 = vmatpush3.bf16.msra.mxu0 %v11051_v12 }
 0x861   :  { %11056 = vmatprep.subr.bf16.mxu0 %v11055_v35 }
 0x862   :  { %11082 = vmatpush3.bf16.msra.mxu1 %v11079_v33 }
 0x863   :  { %8944 = vrot.lane.b32.xlu0 %v8703_v42, %s11746_s23  ;;  %11084 = vmatprep.subr.bf16.mxu1 %v11083_v4 }
 0x864   :  { %11058 = vmatpush3.bf16.msra.mxu0 %v11055_v35 }
 0x865   :  { %11060 = vmatprep.subr.bf16.mxu0 %v11059_v0 }
 0x866   :  { %11086 = vmatpush3.bf16.msra.mxu1 %v11083_v4 }
 0x867   :  { %11088 = vmatprep.subr.bf16.mxu1 %v11087_v6 }
 0x868   :  { %11062 = vmatpush3.bf16.msra.mxu0 %v11059_v0 }
 0x869   :  { %11064 = vmatprep.subr.bf16.mxu0 %v11063_v16 }
 0x86a   :  { %11090 = vmatpush3.bf16.msra.mxu1 %v11087_v6 }
 0x86b   :  { %11092 = vmatprep.subr.bf16.mxu1 %v11091_v27 }
 0x86c   :  { %11066 = vmatpush3.bf16.msra.mxu0 %v11063_v16  ;;  %v20866_v16 = vcombine.low %v17913_v11, %v17907_v29  ;;  %v20867_v29 = vcombine.low %v17955_v49, %v17947_v48 }
 0x86d   :  { %10928 = vmatprep.subr.msk.mxu0 %vm9288_vm11, %v18532_v40 }
 0x86e   :  { %11094 = vmatpush3.bf16.msra.mxu1 %v11091_v27 }
 0x893   :  { %v18536_v50 = vpop.permute.xlu1 %8802  ;;  %v18538_v41 = vpop.permute.xlu0 %8866 }
 0x897   :  { %v18540_v56 = vpop.permute.xlu1 %8800  ;;  %v8807_v53 = vpop.permute.xlu0 %8806 }
 0x898   :  { %v8973_v12 = vsel %vm4679_vm3, %v20865_v32, %v8807_v53 }
 0x89b   :  { %v18542_v42 = vpop.permute.xlu1 %8864  ;;  %v8935_v47 = vpop.permute.xlu0 %8934 }
 0x89f   :  { %v8871_v43 = vpop.permute.xlu1 %8870  ;;  %v8869_v34 = vpop.permute.xlu0 %8868 }
 0x8a0   :  { %v8989_v35 = vsel %vm4696_vm4, %v8973_v12, %v8871_v43 }
 0x8a1   :  { %v9005_v10 = vsel %vm4713_vm5, %v8989_v35, %v8935_v47 }
 0x8a2   :  { %v9025_v28 = vmul.f32 %v18291_v44, %v9005_v10 }
 0x8a3   :  { %v8805_v0 = vpop.permute.xlu1 %8804  ;;  %v8875_v5 = vpop.permute.xlu0 %8874 }
 0x8a4   :  { %v9045_v21 = vadd.f32 %v18304_v31, %v9025_v28  ;;  %v8972_v13 = vsel %vm4679_vm3, %v20866_v16, %v8805_v0 }
 0x8a5   :  { %v8988_v18 = vsel %vm4696_vm4, %v8972_v13, %v8869_v34 }
 0x8a6   :  { %v9106_v38 = vrot.slane %v9045_v21, 4 }
 0x8a8   :  { %v8939_v20 = vpop.permute.xlu0 %8938  ;;  %v9107_v8 = vadd.f32 %v9106_v38, %v9045_v21 }
 0x8aa   :  { %v8933_v52 = vpop.permute.xlu1 %8932  ;;  %v9108_v54 = vrot.slane %v9107_v8, 2 }
 0x8ab   :  { %v9004_v23 = vsel %vm4713_vm5, %v8988_v18, %v8933_v52 }
 0x8ac   :  { %v9024_v58 = vmul.f32 %v18291_v44, %v9004_v23  ;;  %v8809_v57 = vpop.permute.xlu0 %8808  ;;  %v9109_v7 = vadd.f32 %v9108_v54, %v9107_v8  ;;  %v20869_v8 = vcombine.low %v18129_v62, %v18119_v9 }
 0x8ad   :  { %v8974_v6 = vsel %vm4679_vm3, %v20868_v26, %v8809_v57 }
 0x8ae   :  { %v9044_v63 = vadd.f32 %v18304_v31, %v9024_v58  ;;  %v8811_v3 = vpop.permute.xlu1 %8810  ;;  %v9110_v32 = vrot.slane %v9109_v7, 1 }
 0x8af   :  { %v8975_v11 = vsel %vm4679_vm3, %v20867_v29, %v8811_v3  ;;  %v20870_v3 = vcombine.low %v18170_v22, %v18173_v14 }
 0x8b0   :  { %v9100_v59 = vrot.slane %v9044_v63, 4  ;;  %v8991_v33 = vsel %vm4696_vm4, %v8975_v11, %v8875_v5  ;;  %v9111_v0 = vadd.f32 %v9110_v32, %v9109_v7 }
 0x8b1   :  { %v9007_v45 = vsel %vm4713_vm5, %v8991_v33, %v8939_v20  ;;  %v8937_v30 = vpop.permute.xlu0 %8936  ;;  %v8971_v57 = vsel %vm4679_vm3, %v20870_v3, %v18536_v50 }
 0x8b2   :  { %v9101_v4 = vadd.f32 %v9100_v59, %v9044_v63  ;;  %v9027_v51 = vmul.f32 %v18291_v44, %v9007_v45  ;;  %v8873_v36 = vpop.permute.xlu1 %8872  ;;  %v8987_v9 = vsel %vm4696_vm4, %v8971_v57, %v18538_v41 }
 0x8b3   :  { %v8990_v48 = vsel %vm4696_vm4, %v8974_v6, %v8873_v36  ;;  %v20871_v6 = vcombine.low %v20864_v46, %v20863_v24 }
 0x8b4   :  { %v9102_v49 = vrot.slane %v9101_v4, 2  ;;  %v9047_v27 = vadd.f32 %v18304_v31, %v9027_v51  ;;  %v9006_v53 = vsel %vm4713_vm5, %v8990_v48, %v8937_v30 }
 0x8b5   :  { %v9026_v47 = vmul.f32 %v18291_v44, %v9006_v53  ;;  %v8815_v35 = vpop.permute.xlu0 %8814 }
 0x8b6   :  { %v9103_v12 = vadd.f32 %v9102_v49, %v9101_v4  ;;  %v9118_v43 = vrot.slane %v9047_v27, 4  ;;  %v8819_v34 = vpop.permute.xlu1 %8818  ;;  %v8977_v23 = vsel %vm4679_vm3, %v20869_v8, %v8815_v35 }
 0x8b7   :  { %v9046_v15 = vadd.f32 %v18304_v31, %v9026_v47 }
 0x8b8   :  { %v9104_v25 = vrot.slane %v9103_v12, 1  ;;  %v9119_v10 = vadd.f32 %v9118_v43, %v9047_v27 }
 0x8b9   :  { %v9112_v28 = vrot.slane %v9046_v15, 4  ;;  %v8879_v13 = vpop.permute.xlu0 %8878 }
 0x8ba   :  { %v9105_v5 = vadd.f32 %v9104_v25, %v9103_v12  ;;  %v9120_v21 = vrot.slane %v9119_v10, 2  ;;  %v18576_v16 = vpop.permute.xlu1 %8880  ;;  %v8993_v58 = vsel %vm4696_vm4, %v8977_v23, %v8879_v13 }
 0x8bb   :  { %v9113_v38 = vadd.f32 %v9112_v28, %v9046_v15  ;;  %v20872_v15 = vld [vmem:[#allocation145_spill] sm:$0xff] }
 0x8bc   :  { %v9121_v52 = vadd.f32 %v9120_v21, %v9119_v10  ;;  %v9197_v18 = vsel %vm9183_vm6, %v9111_v0, %v9105_v5  ;;  %v20873_v25 = vcombine.low %v18076_v55, %v20872_v15  ;;  %v9392_v15 = vld [vmem:[#allocation2 + $0x70] sm:$0xff] }
 0x8bd   :  { %v9114_v20 = vrot.slane %v9113_v38, 2  ;;  %v8813_v63 = vpop.permute.xlu0 %8812 }
 0x8be   :  { %v8943_v54 = vpop.permute.xlu1 %8942  ;;  %v9122_v59 = vrot.slane %v9121_v52, 1  ;;  %v8976_v36 = vsel %vm4679_vm3, %v20871_v6, %v8813_v63  ;;  %v8970_v10 = vsel %vm4679_vm3, %v20873_v25, %v18540_v56  ;;  %v9393_v25 = vld [vmem:[#allocation2 + $0x78] sm:$0xff] }
 0x8bf   :  { %v9115_v29 = vadd.f32 %v9114_v20, %v9113_v38  ;;  %v9009_v11 = vsel %vm4713_vm5, %v8993_v58, %v8943_v54  ;;  %v8986_v28 = vsel %vm4696_vm4, %v8970_v10, %v18542_v42  ;;  %v8979_v20 = vsel %vm4679_vm3, %v8768_v17, %v8819_v34 }
 0x8c0   :  { %v9029_v33 = vmul.f32 %v18291_v44, %v9009_v11  ;;  %v9123_v50 = vadd.f32 %v9122_v59, %v9121_v52  ;;  %v20874_v58 = vcombine.low %v18299_v39, %v18294_v61  ;;  %v11095_v10 = vpack.c.bf16 %v9393_v25, %v9392_v15 }
 0x8c1   :  { %v9116_v45 = vrot.slane %v9115_v29, 1  ;;  %v8877_v4 = vpop.permute.xlu0 %8876 }
 0x8c2   :  { %v9049_v62 = vadd.f32 %v18304_v31, %v9029_v33  ;;  %v8931_v7 = vpop.permute.xlu1 %8930  ;;  %v8992_v41 = vsel %vm4696_vm4, %v8976_v36, %v8877_v4  ;;  %11096 = vmatprep.subr.bf16.mxu1 %v11095_v10 }
 0x8c3   :  { %v9117_v51 = vadd.f32 %v9116_v45, %v9115_v29  ;;  %v9003_v26 = vsel %vm4713_vm5, %v8987_v9, %v8931_v7  ;;  %11098 = vmatpush3.bf16.msra.mxu1 %v11095_v10 }
 0x8c4   :  { %v9130_v22 = vrot.slane %v9049_v62, 4  ;;  %v9023_v14 = vmul.f32 %v18291_v44, %v9003_v26 }
 0x8c5   :  { %v9198_v30 = vsel %vm9185_vm7, %v9117_v51, %v9197_v18  ;;  %v8941_v48 = vpop.permute.xlu0 %8940 }
 0x8c6   :  { %v9199_v49 = vsel %vm9187_vm8, %v9123_v50, %v9198_v30  ;;  %v9131_v27 = vadd.f32 %v9130_v22, %v9049_v62  ;;  %v9043_v53 = vadd.f32 %v18304_v31, %v9023_v14  ;;  %v9008_v47 = vsel %vm4713_vm5, %v8992_v41, %v8941_v48  ;;  %v8947_v42 = vpop.permute.xlu1 %8946 }
 0x8c7   :  { %v9028_v32 = vmul.f32 %v18291_v44, %v9008_v47 }
 0x8c8   :  { %v9132_v24 = vrot.slane %v9131_v27, 2  ;;  %v9094_v46 = vrot.slane %v9043_v53, 4 }
 0x8c9   :  { %v9048_v12 = vadd.f32 %v18304_v31, %v9028_v32  ;;  %v8817_v43 = vpop.permute.xlu0 %8816 }
 0x8ca   :  { %v9133_v21 = vadd.f32 %v9132_v24, %v9131_v27  ;;  %v9095_v13 = vadd.f32 %v9094_v46, %v9043_v53  ;;  %v8978_v54 = vsel %vm4679_vm3, %v20874_v58, %v8817_v43  ;;  %v9148_v46 = vld [vmem:[%s19171_s1] sm:$0xff] }
 0x8cb   :  { %v9124_v35 = vrot.slane %v9048_v12, 4  ;;  %v8994_v11 = vsel %vm4696_vm4, %v8978_v54, %v18576_v16 }
 0x8cc   :  { %v9134_v23 = vrot.slane %v9133_v21, 1  ;;  %v9096_v3 = vrot.slane %v9095_v13, 2 }
 0x8cd   :  { %v9125_v0 = vadd.f32 %v9124_v35, %v9048_v12  ;;  %v8929_v5 = vpop.permute.xlu0 %8928 }
 0x8ce   :  { %v9002_v38 = vsel %vm4713_vm5, %v8986_v28, %v8929_v5  ;;  %v9097_v39 = vadd.f32 %v9096_v3, %v9095_v13  ;;  %v9135_v45 = vadd.f32 %v9134_v23, %v9133_v21  ;;  %v10698_v28 = vld [vmem:[%s19179_s9] ss:$0 sm:$0xff] }
 0x8cf   :  { %v9126_v52 = vrot.slane %v9125_v0, 2  ;;  %v9022_v18 = vmul.f32 %v18291_v44, %v9002_v38 }
 0x8d0   :  { %v9098_v16 = vrot.slane %v9097_v39, 1 }
 0x8d1   :  { %v9127_v55 = vadd.f32 %v9126_v52, %v9125_v0  ;;  %v9042_v56 = vadd.f32 %v18304_v31, %v9022_v18  ;;  %v8883_v8 = vpop.permute.xlu0 %8882  ;;  %v10699_v52 = vld [vmem:[%s19181_s11] ss:$0 sm:$0xff] }
 0x8d2   :  { %v8995_v63 = vsel %vm4696_vm4, %v8979_v20, %v8883_v8  ;;  %v9099_v48 = vadd.f32 %v9098_v16, %v9097_v39 }
 0x8d3   :  { %v9128_v57 = vrot.slane %v9127_v55, 1  ;;  %v9088_v29 = vrot.slane %v9042_v56, 4  ;;  %v9011_v19 = vsel %vm4713_vm5, %v8995_v63, %v8947_v42 }
 0x8d4   :  { %v9031_v1 = vmul.f32 %v18291_v44, %v9011_v19 }
 0x8d5   :  { %v9129_v17 = vadd.f32 %v9128_v57, %v9127_v55  ;;  %v9089_v34 = vadd.f32 %v9088_v29, %v9042_v56  ;;  %v8945_v59 = vpop.permute.xlu0 %8944 }
 0x8d6   :  { %v9051_v33 = vadd.f32 %v18304_v31, %v9031_v1  ;;  %v9010_v61 = vsel %vm4713_vm5, %v8994_v11, %v8945_v59 }
 0x8d7   :  { %v9090_v9 = vrot.slane %v9089_v34, 2  ;;  %v9030_v62 = vmul.f32 %v18291_v44, %v9010_v61  ;;  %v9200_v7 = vsel %vm9189_vm9, %v9129_v17, %v9199_v49 }
 0x8d8   :  { %v9142_v4 = vrot.slane %v9051_v33, 4  ;;  %v9201_v51 = vsel %vm9191_vm10, %v9135_v45, %v9200_v7 }
 0x8d9   :  { %v9050_v26 = vadd.f32 %v18304_v31, %v9030_v62  ;;  %v9091_v22 = vadd.f32 %v9090_v9, %v9089_v34 }
 0x8da   :  { %v9143_v14 = vadd.f32 %v9142_v4, %v9051_v33 }
 0x8db   :  { %v9136_v50 = vrot.slane %v9050_v26, 4  ;;  %v9092_v6 = vrot.slane %v9091_v22, 1 }
 0x8dc   :  { %v9144_v36 = vrot.slane %v9143_v14, 2 }
 0x8dd   :  { %v9137_v30 = vadd.f32 %v9136_v50, %v9050_v26  ;;  %v9093_v41 = vadd.f32 %v9092_v6, %v9091_v22 }
 0x8de   :  { %v9145_v27 = vadd.f32 %v9144_v36, %v9143_v14 }
 0x8df   :  { %v9138_v44 = vrot.slane %v9137_v30, 2  ;;  %v9194_v49 = vsel %vm9193_vm12, %v9093_v41, %v18469_v2  ;;  %v9149_v2 = vld [vmem:[%s19171_s1 + $0x8] sm:$0xff] }
 0x8e0   :  { %v9196_v53 = vsel %vm9195_vm13, %v9099_v48, %v9194_v49  ;;  %v9146_v31 = vrot.slane %v9145_v27, 1  ;;  %v20875_v49 = vmov 0.0  }
 0x8e1   :  { %v9139_v47 = vadd.f32 %v9138_v44, %v9137_v30  ;;  %10925 = vmatprep.mubr.f32.mxu0 %v9196_v53 }
 0x8e2   :  { %v9147_v43 = vadd.f32 %v9146_v31, %v9145_v27 }
 0x8e3   :  { %v9140_v32 = vrot.slane %v9139_v47, 1 }
 0x8e5   :  { %v9141_v12 = vadd.f32 %v9140_v32, %v9139_v47 }
 0x8e7   :  { %v9202_v24 = vsel %vm9193_vm12, %v9141_v12, %v9201_v51 }
 0x8e8   :  { %v9203_v35 = vsel %vm9195_vm13, %v9147_v43, %v9202_v24 }
 0x8e9   :  { %10926 = vmatmul.mubr.f32.vlgmr.msra.gmra.mrb[0].mxu0 %v9203_v35 }
 0x8ea   :  { %10929 = vmatpush3.msk.msra.mxu0 %vm9288_vm11, %v18532_v40  ;;  %10930 = vmatprep.mubr.msk.f32.mxu0 %vm9281_vm14, %v9148_v46 }
 0x8f1   :  { %10931 = vmatmul.mubr.msk.f32.vlgmr.msra.gmra.mrb[0].mxu0 %vm9281_vm14, %v9149_v2 }
 0x9c4   :  { %v10932_v0 = vpop.f32.mrb[0].mxu0 }
 0x9c5   :  { %v9375_v5 = vadd.f32 %v10932_v0, %v10698_v28  ;;  %v9358_v21 = vpop.f32.mrb[1].mxu0 }
 0x9c6   :  { %v9374_v13 = vadd.f32 %v10698_v28, %v9358_v21 }
 0x9c7   :  { %v9377_v38 = vmax.f32 %v9375_v5, 0.0 }
 0x9c8   :  { %v9376_v40 = vmax.f32 %v9374_v13, 0.0 }
 0x9ca   :  { %10965 = vmatprep.mubr.f32.mxu1 %v9376_v40 }
 0x9cb   :  { %10966 = vmatmul.mubr.f32.vlgmr.msra.gmra.mrb[32].mxu1 %v9377_v38 }
 0xa9e   :  { %v10967_v18 = vpop.f32.mrb[32].mxu1 }
 0xa9f   :  { %v9473_v20 = vadd.f32 %v10967_v18, %v10699_v52  ;;  %v9467_v55 = vpop.f32.mrb[33].mxu1 }
 0xaa0   :  { %v9468_v56 = vadd.f32 %v10699_v52, %v9467_v55 }
 0xaa1   :  { %v9477_v8 = vmax.f32 %v9473_v20, 0.0 }
 0xaa2   :  { %v9476_v23 = vmax.f32 %v9468_v56, 0.0 }
 0xaa3   :  { %9484 = vrot.lane.b32.xlu1 %v9477_v8, %s11746_s23 }
 0xaa4   :  { %9482 = vrot.lane.b32.xlu0 %v9476_v23, %s11746_s23 }
 0xaa7   :  { %9488 = vrot.lane.b32.xlu1 %v9476_v23, %s11745_s4 }
 0xaa8   :  { %9494 = vrot.lane.b32.xlu0 %v9476_v23, %s11747_s5 }
 0xaab   :  { %9496 = vrot.lane.b32.xlu1 %v9477_v8, %s11747_s5 }
 0xaac   :  { %9490 = vrot.lane.b32.xlu0 %v9477_v8, %s11745_s4 }
 0xb15   :  { %v9485_v42 = vpop.permute.xlu1 %9484 }
 0xb16   :  { %v9483_v58 = vpop.permute.xlu0 %9482 }
 0xb19   :  { %v9489_v54 = vpop.permute.xlu1 %9488 }
 0xb1a   :  { %v9500_v63 = vcombine.low %v9476_v23, %v9489_v54  ;;  %v9495_v3 = vpop.permute.xlu0 %9494  ;;  %v9501_v22 = vcombine.high %v9476_v23, %v9489_v54 }
 0xb1b   :  { %v9516_v57 = vcombine.low %v9483_v58, %v9495_v3  ;;  %v9517_v14 = vcombine.high %v9483_v58, %v9495_v3 }
 0xb1c   :  { %v9508_v29 = vrot.slane %v9500_v63, %v20628_v60  ;;  %v9515_v48 = vrot.slane %v9501_v22, %v20628_v60 }
 0xb1d   :  { %v9524_v19 = vrot.slane %v9516_v57, %v20628_v60  ;;  %v9497_v1 = vpop.permute.xlu1 %9496  ;;  %v9531_v27 = vrot.slane %v9517_v14, %v20628_v60 }
 0xb1e   :  { %v9584_v17 = vcombine.low %v9485_v42, %v9497_v1  ;;  %v9491_v34 = vpop.permute.xlu0 %9490  ;;  %v9585_v33 = vcombine.high %v9485_v42, %v9497_v1 }
 0xb1f   :  { %v9532_v11 = vcombine.low %v9508_v29, %v9524_v19  ;;  %v9533_v59 = vcombine.high %v9508_v29, %v9524_v19  ;;  %v9568_v39 = vcombine.low %v9477_v8, %v9491_v34  ;;  %v9569_v45 = vcombine.high %v9477_v8, %v9491_v34 }
 0xb20   :  { %v9592_v61 = vrot.slane %v9584_v17, %v20628_v60  ;;  %v9599_v7 = vrot.slane %v9585_v33, %v20628_v60  ;;  %v9548_v12 = vcombine.low %v9515_v48, %v9531_v27  ;;  %v9549_v35 = vcombine.high %v9515_v48, %v9531_v27 }
 0xb21   :  { %v18663_v9 = vrot.slane %v9532_v11, %v20641_v37  ;;  %v9576_v62 = vrot.slane %v9568_v39, %v20628_v60  ;;  %v9583_v4 = vrot.slane %v9569_v45, %v20628_v60  ;;  %v18671_v26 = vrot.slane %v9533_v59, %v20641_v37 }
 0xb22   :  { %v18695_v15 = vrot.slane %v9548_v12, %v20641_v37  ;;  %v18706_v0 = vrot.slane %v9549_v35, %v20641_v37 }
 0xb23   :  { %v9636_v51 = vsel %vm1733_vm2, %v18663_v9, 0.0  ;;  %v9600_v16 = vcombine.low %v9576_v62, %v9592_v61  ;;  %v9601_v50 = vcombine.high %v9576_v62, %v9592_v61  ;;  %v9616_v36 = vcombine.low %v9583_v4, %v9599_v7 }
 0xb24   :  { %9637 = vadd.xlane.f32.xlu0 %v9636_v51  ;;  %v9642_v30 = vsel %vm1733_vm2, %v18671_v26, 0.0  ;;  %v18701_v10 = vcombine.high %v18671_v26, %v20875_v49  ;;  %v9648_v28 = vsel %vm1733_vm2, %v18695_v15, 0.0  ;;  %v9617_v5 = vcombine.high %v9583_v4, %v9599_v7 }
 0xb25   :  { %v9608_v6 = vrot.slane %v9600_v16, %v20641_v37  ;;  %v9615_v41 = vrot.slane %v9601_v50, %v20641_v37  ;;  %v18683_v31 = vrot.slane %v9616_v36, %v20641_v37  ;;  %v18712_v13 = vcombine.high %v18695_v15, %v20875_v49 }
 0xb26   :  { %v9645_v21 = vsel %vm1733_vm2, %v18701_v10, 0.0  ;;  %v9654_v40 = vsel %vm1733_vm2, %v18706_v0, 0.0  ;;  %v18718_v38 = vcombine.high %v18663_v9, %v20875_v49  ;;  %v18723_v18 = vrot.slane %v9617_v5, %v20641_v37 }
 0xb27   :  { %v9660_v44 = vsel %vm1733_vm2, %v9608_v6, 0.0  ;;  %v9632_v53 = vcombine.high %v9608_v6, %v20875_v49  ;;  %v9633_v32 = vcombine.high %v9615_v41, %v20875_v49  ;;  %v9666_v43 = vsel %vm1733_vm2, %v9615_v41, 0.0 }
 0xb28   :  { %9643 = vadd.xlane.f32.xlu0 %v9642_v30  ;;  %9661 = vadd.xlane.f32.xlu1 %v9660_v44  ;;  %v18690_v46 = vcombine.high %v18683_v31, %v20875_v49  ;;  %v9672_v2 = vsel %vm1733_vm2, %v18683_v31, 0.0  ;;  %v9651_v52 = vsel %vm1733_vm2, %v18712_v13, 0.0  ;;  %v18727_v20 = vcombine.high %v18706_v0, %v20875_v49 }
 0xb29   :  { %v9663_v47 = vsel %vm1733_vm2, %v9632_v53, 0.0  ;;  %v9669_v24 = vsel %vm1733_vm2, %v9633_v32, 0.0  ;;  %v9639_v55 = vsel %vm1733_vm2, %v18718_v38, 0.0  ;;  %v18735_v8 = vcombine.high %v18723_v18, %v20875_v49 }
 0xb2a   :  { %v9675_v25 = vsel %vm1733_vm2, %v18690_v46, 0.0  ;;  %v9657_v56 = vsel %vm1733_vm2, %v18727_v20, 0.0  ;;  %v9678_v23 = vsel %vm1733_vm2, %v18723_v18, 0.0 }
 0xb2b   :  { %v9681_v42 = vsel %vm1733_vm2, %v18735_v8, 0.0 }
 0xb2c   :  { %9664 = vadd.xlane.f32.xlu0 %v9663_v47  ;;  %9667 = vadd.xlane.f32.xlu1 %v9666_v43 }
 0xb30   :  { %9670 = vadd.xlane.f32.xlu0 %v9669_v24  ;;  %9673 = vadd.xlane.f32.xlu1 %v9672_v2 }
 0xb34   :  { %9676 = vadd.xlane.f32.xlu0 %v9675_v25  ;;  %9649 = vadd.xlane.f32.xlu1 %v9648_v28 }
 0xb38   :  { %9646 = vadd.xlane.f32.xlu0 %v9645_v21  ;;  %9655 = vadd.xlane.f32.xlu1 %v9654_v40 }
 0xb3c   :  { %9652 = vadd.xlane.f32.xlu0 %v9651_v52  ;;  %9640 = vadd.xlane.f32.xlu1 %v9639_v55 }
 0xb40   :  { %9658 = vadd.xlane.f32.xlu0 %v9657_v56  ;;  %9679 = vadd.xlane.f32.xlu1 %v9678_v23 }
 0xb44   :  { %9682 = vadd.xlane.f32.xlu0 %v9681_v42 }
 0xbb1   :  { %v9638_v58 = vpop.xlane.xlu0 %9637 }
 0xbb2   :  { %v9684_v59 = vmul.f32 0.03125, %v9638_v58 }
 0xbb4   :  { %v18758_v16 = vsub.f32 %v18663_v9, %v9684_v59 }
 0xbb5   :  { %v9644_v54 = vpop.xlane.xlu0 %9643  ;;  %v9662_v63 = vpop.xlane.xlu1 %9661 }
 0xbb6   :  { %v9692_v3 = vmul.f32 0.03125, %v9662_v63  ;;  %v9686_v50 = vmul.f32 0.03125, %v9644_v54  ;;  %v9716_v43 = vmul.f32 %v18758_v16, %v18758_v16 }
 0xbb8   :  { %v18741_v57 = vsub.f32 %v9608_v6, %v9692_v3  ;;  %v9732_v28 = vsel %vm1733_vm2, %v9716_v43, 0.0 }
 0xbb9   :  { %v9665_v29 = vpop.xlane.xlu0 %9664  ;;  %v9668_v19 = vpop.xlane.xlu1 %9667 }
 0xbba   :  { %v9693_v1 = vmul.f32 0.03125, %v9665_v29  ;;  %v9694_v17 = vmul.f32 0.03125, %v9668_v19  ;;  %v9724_v34 = vmul.f32 %v18741_v57, %v18741_v57 }
 0xbbc   :  { %v18745_v11 = vsub.f32 %v9632_v53, %v9693_v1  ;;  %v18747_v33 = vsub.f32 %v9615_v41, %v9694_v17  ;;  %v9756_v61 = vsel %vm1733_vm2, %v9724_v34, 0.0 }
 0xbbd   :  { %v9671_v39 = vpop.xlane.xlu0 %9670  ;;  %9757 = vadd.xlane.f32.xlu1 %v9756_v61  ;;  %v9674_v45 = vpop.xlane.xlu1 %9673 }
 0xbbe   :  { %v9695_v62 = vmul.f32 0.03125, %v9671_v39  ;;  %v9725_v7 = vmul.f32 %v18745_v11, %v18745_v11  ;;  %v9696_v4 = vmul.f32 0.03125, %v9674_v45  ;;  %v9726_v51 = vmul.f32 %v18747_v33, %v18747_v33 }
 0xbc0   :  { %v18754_v22 = vsub.f32 %v9633_v32, %v9695_v62  ;;  %v9759_v14 = vsel %vm1733_vm2, %v9725_v7, 0.0  ;;  %v18761_v6 = vsub.f32 %v18683_v31, %v9696_v4  ;;  %v9762_v36 = vsel %vm1733_vm2, %v9726_v51, 0.0 }
 0xbc1   :  { %9760 = vadd.xlane.f32.xlu0 %v9759_v14  ;;  %v9677_v30 = vpop.xlane.xlu0 %9676  ;;  %9763 = vadd.xlane.f32.xlu1 %v9762_v36  ;;  %v9650_v41 = vpop.xlane.xlu1 %9649  ;;  %v18773_v31 = vsub.f32 %v18671_v26, %v9686_v50 }
 0xbc2   :  { %v9697_v48 = vmul.f32 0.03125, %v9677_v30  ;;  %v9727_v27 = vmul.f32 %v18754_v22, %v18754_v22  ;;  %v9728_v44 = vmul.f32 %v18761_v6, %v18761_v6  ;;  %v9688_v53 = vmul.f32 0.03125, %v9650_v41 }
 0xbc3   :  { %v9718_v21 = vmul.f32 %v18773_v31, %v18773_v31 }
 0xbc4   :  { %v18769_v9 = vsub.f32 %v18690_v46, %v9697_v48  ;;  %v9765_v47 = vsel %vm1733_vm2, %v9727_v27, 0.0  ;;  %v9768_v32 = vsel %vm1733_vm2, %v9728_v44, 0.0  ;;  %v18781_v46 = vsub.f32 %v18695_v15, %v9688_v53 }
 0xbc5   :  { %9766 = vadd.xlane.f32.xlu0 %v9765_v47  ;;  %v9647_v12 = vpop.xlane.xlu0 %9646  ;;  %9769 = vadd.xlane.f32.xlu1 %v9768_v32  ;;  %v9656_v24 = vpop.xlane.xlu1 %9655  ;;  %v9738_v58 = vsel %vm1733_vm2, %v9718_v21, 0.0 }
 0xbc6   :  { %v9729_v35 = vmul.f32 %v18769_v9, %v18769_v9  ;;  %v9690_v2 = vmul.f32 0.03125, %v9656_v24  ;;  %v9687_v25 = vmul.f32 0.03125, %v9647_v12  ;;  %v9720_v56 = vmul.f32 %v18781_v46, %v18781_v46 }
 0xbc8   :  { %v9771_v26 = vsel %vm1733_vm2, %v9729_v35, 0.0  ;;  %v18788_v55 = vsub.f32 %v18706_v0, %v9690_v2  ;;  %v18791_v15 = vsub.f32 %v18701_v10, %v9687_v25  ;;  %v9744_v29 = vsel %vm1733_vm2, %v9720_v56, 0.0 }
 0xbc9   :  { %9772 = vadd.xlane.f32.xlu0 %v9771_v26  ;;  %v9653_v5 = vpop.xlane.xlu0 %9652  ;;  %v9641_v40 = vpop.xlane.xlu1 %9640  ;;  %9733 = vadd.xlane.f32.xlu1 %v9732_v28 }
 0xbca   :  { %v9685_v52 = vmul.f32 0.03125, %v9641_v40  ;;  %v9689_v42 = vmul.f32 0.03125, %v9653_v5  ;;  %v9722_v10 = vmul.f32 %v18788_v55, %v18788_v55  ;;  %v9719_v19 = vmul.f32 %v18791_v15, %v18791_v15 }
 0xbcc   :  { %v18796_v23 = vsub.f32 %v18718_v38, %v9685_v52  ;;  %v18807_v38 = vsub.f32 %v18712_v13, %v9689_v42  ;;  %v9750_v61 = vsel %vm1733_vm2, %v9722_v10, 0.0  ;;  %v9741_v39 = vsel %vm1733_vm2, %v9719_v19, 0.0 }
 0xbcd   :  { %v9659_v54 = vpop.xlane.xlu0 %9658  ;;  %v9680_v63 = vpop.xlane.xlu1 %9679  ;;  %9739 = vadd.xlane.f32.xlu1 %v9738_v58 }
 0xbce   :  { %v9698_v3 = vmul.f32 0.03125, %v9680_v63  ;;  %v9717_v0 = vmul.f32 %v18796_v23, %v18796_v23  ;;  %v9691_v17 = vmul.f32 0.03125, %v9659_v54 }
 0xbd0   :  { %v18810_v1 = vsub.f32 %v18723_v18, %v9698_v3  ;;  %v9735_v34 = vsel %vm1733_vm2, %v9717_v0, 0.0  ;;  %v18816_v45 = vsub.f32 %v18727_v20, %v9691_v17  ;;  %v9721_v18 = vmul.f32 %v18807_v38, %v18807_v38 }
 0xbd1   :  { %9745 = vadd.xlane.f32.xlu1 %v9744_v29  ;;  %9736 = vadd.xlane.f32.xlu0 %v9735_v34  ;;  %v9683_v59 = vpop.xlane.xlu0 %9682 }
 0xbd2   :  { %v9699_v62 = vmul.f32 0.03125, %v9683_v59  ;;  %v9730_v13 = vmul.f32 %v18810_v1, %v18810_v1  ;;  %v9747_v51 = vsel %vm1733_vm2, %v9721_v18, 0.0  ;;  %v9723_v20 = vmul.f32 %v18816_v45, %v18816_v45 }
 0xbd4   :  { %v18823_v7 = vsub.f32 %v18735_v8, %v9699_v62  ;;  %v9774_v4 = vsel %vm1733_vm2, %v9730_v13, 0.0  ;;  %v9753_v14 = vsel %vm1733_vm2, %v9723_v20, 0.0 }
 0xbd5   :  { %9751 = vadd.xlane.f32.xlu1 %v9750_v61  ;;  %9742 = vadd.xlane.f32.xlu0 %v9741_v39 }
 0xbd6   :  { %v9731_v50 = vmul.f32 %v18823_v7, %v18823_v7 }
 0xbd8   :  { %v9777_v36 = vsel %vm1733_vm2, %v9731_v50, 0.0 }
 0xbd9   :  { %9775 = vadd.xlane.f32.xlu1 %v9774_v4  ;;  %9748 = vadd.xlane.f32.xlu0 %v9747_v51 }
 0xbdd   :  { %9754 = vadd.xlane.f32.xlu0 %v9753_v14 }
 0xbe1   :  { %9778 = vadd.xlane.f32.xlu0 %v9777_v36 }
 0xc4a   :  { %v9758_v8 = vpop.xlane.xlu1 %9757 }
 0xc4b   :  { %v9788_v53 = vmul.f32 0.03125, %v9758_v8 }
 0xc4d   :  { %v9804_v24 = vadd.f32 1e-05, %v9788_v53 }
 0xc4e   :  { %v9764_v30 = vpop.xlane.xlu1 %9763  ;;  %v9761_v41 = vpop.xlane.xlu0 %9760 }
 0xc4f   :  { %v9789_v47 = vmul.f32 0.03125, %v9761_v41  ;;  %v9790_v43 = vmul.f32 0.03125, %v9764_v30  ;;  %11654 = vrsqrt.f32 %v9804_v24 }
 0xc51   :  { %v9805_v2 = vadd.f32 1e-05, %v9789_v47  ;;  %v9806_v21 = vadd.f32 1e-05, %v9790_v43 }
 0xc52   :  { %v9770_v48 = vpop.xlane.xlu1 %9769  ;;  %v9767_v27 = vpop.xlane.xlu0 %9766 }
 0xc53   :  { %v9791_v35 = vmul.f32 0.03125, %v9767_v27  ;;  %11656 = vrsqrt.f32 %v9805_v2  ;;  %v9792_v19 = vmul.f32 0.03125, %v9770_v48 }
 0xc54   :  { %11658 = vrsqrt.f32 %v9806_v21 }
 0xc55   :  { %v9807_v40 = vadd.f32 1e-05, %v9791_v35  ;;  %v9808_v51 = vadd.f32 1e-05, %v9792_v19 }
 0xc56   :  { %v9734_v44 = vpop.xlane.xlu1 %9733  ;;  %v9773_v32 = vpop.xlane.xlu0 %9772 }
 0xc57   :  { %v9780_v52 = vmul.f32 0.03125, %v9734_v44  ;;  %11660 = vrsqrt.f32 %v9807_v40  ;;  %v9793_v13 = vmul.f32 0.03125, %v9773_v32 }
 0xc59   :  { %v9796_v17 = vadd.f32 1e-05, %v9780_v52  ;;  %v11655_v14 = vpop.eup %11654  ;;  %v9809_v8 = vadd.f32 1e-05, %v9793_v13 }
 0xc5a   :  { %v9740_v12 = vpop.xlane.xlu1 %9739 }
 0xc5b   :  { %v9782_v25 = vmul.f32 0.03125, %v9740_v12 }
 0xc5d   :  { %v9798_v56 = vadd.f32 1e-05, %v9782_v25  ;;  %v11657_v36 = vpop.eup %11656 }
 0xc5e   :  { %v9746_v26 = vpop.xlane.xlu1 %9745  ;;  %v9737_v28 = vpop.xlane.xlu0 %9736 }
 0xc5f   :  { %v9781_v5 = vmul.f32 0.03125, %v9737_v28  ;;  %v9784_v54 = vmul.f32 0.03125, %v9746_v26  ;;  %11662 = vrsqrt.f32 %v9798_v56  ;;  %v11659_v41 = vpop.eup %11658  ;;  %v9837_v56 = vmul.f32 %v11657_v36, %v18745_v11 }
 0xc60   :  { %v9838_v52 = vmul.f32 %v11659_v41, %v18747_v33 }
 0xc61   :  { %v9797_v63 = vadd.f32 1e-05, %v9781_v5  ;;  %v9800_v61 = vadd.f32 1e-05, %v9784_v54  ;;  %v11661_v27 = vpop.eup %11660 }
 0xc62   :  { %v9752_v42 = vpop.xlane.xlu1 %9751  ;;  %v9743_v58 = vpop.xlane.xlu0 %9742  ;;  %v9839_v25 = vmul.f32 %v11661_v27, %v18754_v22  ;;  %v9836_v22 = vmul.f32 %v11655_v14, %v18741_v57 }
 0xc63   :  { %v9786_v3 = vmul.f32 0.03125, %v9752_v42  ;;  %v9783_v0 = vmul.f32 0.03125, %v9743_v58  ;;  %11664 = vrsqrt.f32 %v9797_v63 }
 0xc64   :  { %v9912_v11 = vcombine.low %v9836_v22, %v9838_v52 }
 0xc65   :  { %v9802_v29 = vadd.f32 1e-05, %v9786_v3  ;;  %v9799_v10 = vadd.f32 1e-05, %v9783_v0 }
 0xc66   :  { %v9776_v34 = vpop.xlane.xlu1 %9775  ;;  %v9749_v59 = vpop.xlane.xlu0 %9748 }
 0xc67   :  { %v9794_v39 = vmul.f32 0.03125, %v9776_v34  ;;  %v9785_v62 = vmul.f32 0.03125, %v9749_v59  ;;  %11666 = vrsqrt.f32 %v9799_v10 }
 0xc68   :  { %11668 = vrsqrt.f32 %v9802_v29 }
 0xc69   :  { %v9810_v18 = vadd.f32 1e-05, %v9794_v39  ;;  %v9801_v4 = vadd.f32 1e-05, %v9785_v62  ;;  %11670 = vrsqrt.f32 %v9796_v17  ;;  %v11663_v53 = vpop.eup %11662 }
 0xc6a   :  { %v9755_v20 = vpop.xlane.xlu0 %9754  ;;  %11672 = vrsqrt.f32 %v9800_v61  ;;  %v9830_v26 = vmul.f32 %v11663_v53, %v18773_v31  ;;  %v9920_v31 = vcombine.low %v9837_v56, %v9839_v25  ;;  %v9919_v61 = vrot.slane %v9912_v11, %v20628_v60 }
 0xc6b   :  { %v9787_v50 = vmul.f32 0.03125, %v9755_v20  ;;  %11674 = vrsqrt.f32 %v9810_v18 }
 0xc6c   :  { %11676 = vrsqrt.f32 %v9801_v4  ;;  %v9927_v57 = vrot.slane %v9920_v31, %v20628_v60 }
 0xc6d   :  { %v9803_v30 = vadd.f32 1e-05, %v9787_v50  ;;  %11678 = vrsqrt.f32 %v9808_v51  ;;  %v11665_v47 = vpop.eup %11664 }
 0xc6e   :  { %v9779_v48 = vpop.xlane.xlu0 %9778  ;;  %v9829_v28 = vmul.f32 %v11665_v47, %v18796_v23  ;;  %v9945_v13 = vcombine.high %v9919_v61, %v9927_v57  ;;  %v9944_v4 = vcombine.low %v9919_v61, %v9927_v57 }
 0xc6f   :  { %11680 = vrsqrt.f32 %v9803_v30  ;;  %v9795_v44 = vmul.f32 0.03125, %v9779_v48 }
 0xc70   :  { %11682 = vrsqrt.f32 %v9809_v8  ;;  %v9959_v36 = vrot.slane %v9945_v13, %v20641_v37  ;;  %v9952_v41 = vrot.slane %v9944_v4, %v20641_v37 }
 0xc71   :  { %v9811_v32 = vadd.f32 1e-05, %v9795_v44  ;;  %v11667_v12 = vpop.eup %11666 }
 0xc72   :  { %v11669_v43 = vpop.eup %11668  ;;  %v9831_v24 = vmul.f32 %v11667_v12, %v18791_v15 }
 0xc73   :  { %11684 = vrsqrt.f32 %v9811_v32  ;;  %v11671_v35 = vpop.eup %11670  ;;  %v9834_v21 = vmul.f32 %v11669_v43, %v18788_v55 }
 0xc74   :  { %v11673_v2 = vpop.eup %11672  ;;  %v9828_v42 = vmul.f32 %v11671_v35, %v18758_v16  ;;  %v9852_v15 = vcombine.low %v9829_v28, %v9831_v24 }
 0xc75   :  { %v11675_v5 = vpop.eup %11674  ;;  %v9832_v54 = vmul.f32 %v11673_v2, %v18781_v46 }
 0xc76   :  { %v11677_v40 = vpop.eup %11676  ;;  %v9844_v3 = vcombine.low %v9828_v42, %v9830_v26  ;;  %v9842_v55 = vmul.f32 %v11675_v5, %v18810_v1  ;;  %v9859_v16 = vrot.slane %v9852_v15, %v20628_v60 }
 0xc77   :  { %v11679_v58 = vpop.eup %11678  ;;  %v9860_v0 = vcombine.low %v9832_v54, %v9834_v21  ;;  %v9833_v29 = vmul.f32 %v11677_v40, %v18807_v38  ;;  %v10700_v40 = vld [vmem:[%s19176_s6 + $0x4] ss:$0 sm:$0xff] }
 0xc78   :  { %v9840_v10 = vmul.f32 %v11679_v58, %v18761_v6  ;;  %v9851_v34 = vrot.slane %v9844_v3, %v20628_v60  ;;  %v10701_v58 = vld [vmem:[%s19176_s6 + $0x5] ss:$0 sm:$0xff] }
 0xc79   :  { %v11681_v63 = vpop.eup %11680  ;;  %v9867_v38 = vrot.slane %v9860_v0, %v20628_v60 }
 0xc7a   :  { %v11683_v23 = vpop.eup %11682  ;;  %v9835_v33 = vmul.f32 %v11681_v63, %v18816_v45  ;;  %v9928_v59 = vcombine.low %v9840_v10, %v9842_v55  ;;  %v9876_v39 = vcombine.low %v9851_v34, %v9859_v16  ;;  %v9877_v27 = vcombine.high %v9851_v34, %v9859_v16 }
 0xc7b   :  { %v9841_v17 = vmul.f32 %v11683_v23, %v18769_v9 }
 0xc7c   :  { %v9868_v19 = vcombine.low %v9833_v29, %v9835_v33  ;;  %v9935_v18 = vrot.slane %v9928_v59, %v20628_v60  ;;  %v9884_v20 = vrot.slane %v9876_v39, %v20641_v37  ;;  %v9891_v12 = vrot.slane %v9877_v27, %v20641_v37 }
 0xc7d   :  { %v11685_v46 = vpop.eup %11684 }
 0xc7e   :  { %v9843_v1 = vmul.f32 %v11685_v46, %v18823_v7  ;;  %v9875_v45 = vrot.slane %v9868_v19, %v20628_v60 }
 0xc80   :  { %v9936_v62 = vcombine.low %v9841_v17, %v9843_v1  ;;  %v9892_v6 = vcombine.low %v9867_v38, %v9875_v45  ;;  %v9893_v50 = vcombine.high %v9867_v38, %v9875_v45 }
 0xc82   :  { %v9943_v9 = vrot.slane %v9936_v62, %v20628_v60  ;;  %v9900_v51 = vrot.slane %v9892_v6, %v20641_v37  ;;  %v9907_v47 = vrot.slane %v9893_v50, %v20641_v37 }
 0xc84   :  { %v9961_v7 = vcombine.high %v9935_v18, %v9943_v9  ;;  %v9960_v14 = vcombine.low %v9935_v18, %v9943_v9  ;;  %v9908_v8 = vcombine.low %v9884_v20, %v9900_v51  ;;  %v9909_v43 = vcombine.high %v9884_v20, %v9900_v51 }
 0xc85   :  { %v9911_v24 = vcombine.high %v9891_v12, %v9907_v47  ;;  %v9910_v35 = vcombine.low %v9891_v12, %v9907_v47 }
 0xc86   :  { %v9975_v30 = vrot.slane %v9961_v7, %v20641_v37  ;;  %v9968_v48 = vrot.slane %v9960_v14, %v20641_v37 }
 0xc88   :  { %v9978_v44 = vcombine.low %v9959_v36, %v9975_v30  ;;  %v9977_v53 = vcombine.high %v9952_v41, %v9968_v48  ;;  %v9976_v32 = vcombine.low %v9952_v41, %v9968_v48  ;;  %v9979_v2 = vcombine.high %v9959_v36, %v9975_v30 }
 0xc8a   :  { %9992 = vrot.lane.b32.xlu1 %v9978_v44, %s11745_s4  ;;  %9984 = vrot.lane.b32.xlu0 %v9977_v53, %s11747_s5 }
 0xc8e   :  { %9982 = vrot.lane.b32.xlu1 %v9909_v43, %s11747_s5  ;;  %9998 = vrot.lane.b32.xlu0 %v9911_v24, %s11746_s23 }
 0xc92   :  { %9990 = vrot.lane.b32.xlu1 %v9910_v35, %s11745_s4 }
 0xc96   :  { %10000 = vrot.lane.b32.xlu1 %v9979_v2, %s11746_s23 }
 0xcfc   :  { %v9993_v25 = vpop.permute.xlu1 %9992  ;;  %v9985_v26 = vpop.permute.xlu0 %9984 }
 0xcfd   :  { %v10005_v52 = vsel %vm4679_vm3, %v9976_v32, %v9985_v26 }
 0xcfe   :  { %v10007_v22 = vsel %vm4696_vm4, %v10005_v52, %v9993_v25 }
 0xd00   :  { %v9983_v28 = vpop.permute.xlu1 %9982  ;;  %v9999_v56 = vpop.permute.xlu0 %9998 }
 0xd01   :  { %v10004_v5 = vsel %vm4679_vm3, %v9908_v8, %v9983_v28 }
 0xd04   :  { %v9991_v21 = vpop.permute.xlu1 %9990 }
 0xd05   :  { %v10006_v42 = vsel %vm4696_vm4, %v10004_v5, %v9991_v21 }
 0xd06   :  { %v10008_v15 = vsel %vm4713_vm5, %v10006_v42, %v9999_v56 }
 0xd07   :  { %v10014_v54 = vmul.f32 %v10700_v40, %v10008_v15 }
 0xd08   :  { %v10001_v63 = vpop.permute.xlu1 %10000 }
 0xd09   :  { %v10009_v31 = vsel %vm4713_vm5, %v10007_v22, %v10001_v63  ;;  %v10020_v3 = vadd.f32 %v10701_v58, %v10014_v54 }
 0xd0a   :  { %v10015_v23 = vmul.f32 %v10700_v40, %v10009_v31 }
 0xd0b   :  { %10026 = vrot.lane.b32.xlu0 %v10020_v3, %s11746_s23 }
 0xd0c   :  { %v10021_v0 = vadd.f32 %v10701_v58, %v10015_v23 }
 0xd0e   :  { %10028 = vrot.lane.b32.xlu1 %v10021_v0, %s11746_s23 }
 0xd0f   :  { %10038 = vrot.lane.b32.xlu0 %v10020_v3, %s11747_s5 }
 0xd12   :  { %10032 = vrot.lane.b32.xlu1 %v10020_v3, %s11745_s4 }
 0xd13   :  { %10034 = vrot.lane.b32.xlu0 %v10021_v0, %s11745_s4 }
 0xd16   :  { %10040 = vrot.lane.b32.xlu1 %v10021_v0, %s11747_s5 }
 0xd7d   :  { %v10027_v55 = vpop.permute.xlu0 %10026 }
 0xd80   :  { %v10029_v29 = vpop.permute.xlu1 %10028 }
 0xd81   :  { %v10039_v33 = vpop.permute.xlu0 %10038 }
 0xd82   :  { %v10060_v11 = vcombine.low %v10027_v55, %v10039_v33  ;;  %v10061_v14 = vcombine.high %v10027_v55, %v10039_v33 }
 0xd84   :  { %v10033_v16 = vpop.permute.xlu1 %10032  ;;  %v10068_v46 = vrot.slane %v10060_v11, %v20628_v60  ;;  %v10075_v44 = vrot.slane %v10061_v14, %v20628_v60 }
 0xd85   :  { %v10044_v10 = vcombine.low %v10020_v3, %v10033_v16  ;;  %v10035_v19 = vpop.permute.xlu0 %10034  ;;  %v10045_v4 = vcombine.high %v10020_v3, %v10033_v16 }
 0xd86   :  { %v10112_v57 = vcombine.low %v10021_v0, %v10035_v19  ;;  %v10113_v61 = vcombine.high %v10021_v0, %v10035_v19 }
 0xd87   :  { %v10052_v17 = vrot.slane %v10044_v10, %v20628_v60  ;;  %v10059_v41 = vrot.slane %v10045_v4, %v20628_v60 }
 0xd88   :  { %v10041_v34 = vpop.permute.xlu1 %10040  ;;  %v10120_v62 = vrot.slane %v10112_v57, %v20628_v60  ;;  %v10127_v7 = vrot.slane %v10113_v61, %v20628_v60 }
 0xd89   :  { %v10076_v59 = vcombine.low %v10052_v17, %v10068_v46  ;;  %v10077_v1 = vcombine.high %v10052_v17, %v10068_v46  ;;  %v10128_v38 = vcombine.low %v10029_v29, %v10041_v34  ;;  %v10129_v45 = vcombine.high %v10029_v29, %v10041_v34 }
 0xd8a   :  { %v10092_v12 = vcombine.low %v10059_v41, %v10075_v44  ;;  %v10093_v2 = vcombine.high %v10059_v41, %v10075_v44 }
 0xd8b   :  { %v18892_v39 = vrot.slane %v10076_v59, %v20641_v37  ;;  %v10136_v6 = vrot.slane %v10128_v38, %v20628_v60  ;;  %v10143_v13 = vrot.slane %v10129_v45, %v20628_v60  ;;  %v18900_v9 = vrot.slane %v10077_v1, %v20641_v37 }
 0xd8c   :  { %v18925_v26 = vrot.slane %v10092_v12, %v20641_v37  ;;  %v18936_v40 = vrot.slane %v10093_v2, %v20641_v37 }
 0xd8d   :  { %v10180_v18 = vsel %vm1733_vm2, %v18892_v39, 0.0  ;;  %v10144_v51 = vcombine.low %v10120_v62, %v10136_v6  ;;  %v10145_v20 = vcombine.high %v10120_v62, %v10136_v6  ;;  %v10160_v36 = vcombine.low %v10127_v7, %v10143_v13 }
 0xd8e   :  { %10181 = vadd.xlane.f32.xlu0 %v10180_v18  ;;  %v10186_v8 = vsel %vm1733_vm2, %v18900_v9, 0.0  ;;  %v18931_v5 = vcombine.high %v18900_v9, %v20875_v49  ;;  %v10192_v21 = vsel %vm1733_vm2, %v18925_v26, 0.0  ;;  %v10161_v52 = vcombine.high %v10127_v7, %v10143_v13 }
 0xd8f   :  { %v10152_v50 = vrot.slane %v10144_v51, %v20641_v37  ;;  %v10159_v30 = vrot.slane %v10145_v20, %v20641_v37  ;;  %v18913_v47 = vrot.slane %v10160_v36, %v20641_v37  ;;  %v18942_v42 = vcombine.high %v18925_v26, %v20875_v49 }
 0xd90   :  { %v10189_v56 = vsel %vm1733_vm2, %v18931_v5, 0.0  ;;  %v10198_v15 = vsel %vm1733_vm2, %v18936_v40, 0.0  ;;  %v18948_v58 = vcombine.high %v18892_v39, %v20875_v49  ;;  %v18953_v63 = vrot.slane %v10161_v52, %v20641_v37 }
 0xd91   :  { %v10204_v48 = vsel %vm1733_vm2, %v10152_v50, 0.0  ;;  %v10176_v27 = vcombine.high %v10152_v50, %v20875_v49  ;;  %v10177_v32 = vcombine.high %v10159_v30, %v20875_v49  ;;  %v10210_v43 = vsel %vm1733_vm2, %v10159_v30, 0.0 }
 0xd92   :  { %10187 = vadd.xlane.f32.xlu0 %v10186_v8  ;;  %10205 = vadd.xlane.f32.xlu1 %v10204_v48  ;;  %v18920_v35 = vcombine.high %v18913_v47, %v20875_v49  ;;  %v10216_v25 = vsel %vm1733_vm2, %v18913_v47, 0.0  ;;  %v10195_v54 = vsel %vm1733_vm2, %v18942_v42, 0.0  ;;  %v18957_v22 = vcombine.high %v18936_v40, %v20875_v49 }
 0xd93   :  { %v10207_v53 = vsel %vm1733_vm2, %v10176_v27, 0.0  ;;  %v10213_v24 = vsel %vm1733_vm2, %v10177_v32, 0.0  ;;  %v10183_v31 = vsel %vm1733_vm2, %v18948_v58, 0.0  ;;  %v18965_v23 = vcombine.high %v18953_v63, %v20875_v49 }
 0xd94   :  { %v10219_v28 = vsel %vm1733_vm2, %v18920_v35, 0.0  ;;  %v10201_v3 = vsel %vm1733_vm2, %v18957_v22, 0.0  ;;  %v10222_v0 = vsel %vm1733_vm2, %v18953_v63, 0.0 }
 0xd95   :  { %v10225_v55 = vsel %vm1733_vm2, %v18965_v23, 0.0 }
 0xd96   :  { %10208 = vadd.xlane.f32.xlu0 %v10207_v53  ;;  %10211 = vadd.xlane.f32.xlu1 %v10210_v43 }
 0xd9a   :  { %10214 = vadd.xlane.f32.xlu0 %v10213_v24  ;;  %10217 = vadd.xlane.f32.xlu1 %v10216_v25 }
 0xd9e   :  { %10220 = vadd.xlane.f32.xlu0 %v10219_v28  ;;  %10193 = vadd.xlane.f32.xlu1 %v10192_v21 }
 0xda2   :  { %10190 = vadd.xlane.f32.xlu0 %v10189_v56  ;;  %10199 = vadd.xlane.f32.xlu1 %v10198_v15 }
 0xda6   :  { %10196 = vadd.xlane.f32.xlu0 %v10195_v54  ;;  %10184 = vadd.xlane.f32.xlu1 %v10183_v31 }
 0xdaa   :  { %10202 = vadd.xlane.f32.xlu0 %v10201_v3  ;;  %10223 = vadd.xlane.f32.xlu1 %v10222_v0 }
 0xdae   :  { %10226 = vadd.xlane.f32.xlu0 %v10225_v55 }
 0xe1b   :  { %v10182_v29 = vpop.xlane.xlu0 %10181 }
 0xe1c   :  { %v10228_v59 = vmul.f32 0.03125, %v10182_v29 }
 0xe1e   :  { %v18988_v20 = vsub.f32 %v18892_v39, %v10228_v59 }
 0xe1f   :  { %v10188_v33 = vpop.xlane.xlu0 %10187  ;;  %v10206_v11 = vpop.xlane.xlu1 %10205 }
 0xe20   :  { %v10236_v16 = vmul.f32 0.03125, %v10206_v11  ;;  %v10230_v7 = vmul.f32 0.03125, %v10188_v33  ;;  %v10260_v12 = vmul.f32 %v18988_v20, %v18988_v20 }
 0xe22   :  { %v18971_v10 = vsub.f32 %v10152_v50, %v10236_v16  ;;  %v19003_v53 = vsub.f32 %v18900_v9, %v10230_v7  ;;  %v10276_v28 = vsel %vm1733_vm2, %v10260_v12, 0.0 }
 0xe23   :  { %v10209_v19 = vpop.xlane.xlu0 %10208  ;;  %v10212_v46 = vpop.xlane.xlu1 %10211 }
 0xe24   :  { %v10237_v17 = vmul.f32 0.03125, %v10209_v19  ;;  %v10238_v49 = vmul.f32 0.03125, %v10212_v46  ;;  %v10268_v57 = vmul.f32 %v18971_v10, %v18971_v10  ;;  %v10262_v52 = vmul.f32 %v19003_v53, %v19003_v53 }
 0xe26   :  { %v18975_v34 = vsub.f32 %v10176_v27, %v10237_v17  ;;  %v18977_v1 = vsub.f32 %v10159_v30, %v10238_v49  ;;  %v10300_v38 = vsel %vm1733_vm2, %v10268_v57, 0.0  ;;  %v10282_v55 = vsel %vm1733_vm2, %v10262_v52, 0.0 }
 0xe27   :  { %v10215_v45 = vpop.xlane.xlu0 %10214  ;;  %10301 = vadd.xlane.f32.xlu1 %v10300_v38  ;;  %v10218_v61 = vpop.xlane.xlu1 %10217 }
 0xe28   :  { %v10239_v62 = vmul.f32 0.03125, %v10215_v45  ;;  %v10269_v6 = vmul.f32 %v18975_v34, %v18975_v34  ;;  %v10240_v13 = vmul.f32 0.03125, %v10218_v61  ;;  %v10270_v18 = vmul.f32 %v18977_v1, %v18977_v1 }
 0xe2a   :  { %v18984_v4 = vsub.f32 %v10177_v32, %v10239_v62  ;;  %v10303_v51 = vsel %vm1733_vm2, %v10269_v6, 0.0  ;;  %v18991_v14 = vsub.f32 %v18913_v47, %v10240_v13  ;;  %v10306_v50 = vsel %vm1733_vm2, %v10270_v18, 0.0 }
 0xe2b   :  { %10304 = vadd.xlane.f32.xlu0 %v10303_v51  ;;  %v10221_v36 = vpop.xlane.xlu0 %10220  ;;  %10307 = vadd.xlane.f32.xlu1 %v10306_v50  ;;  %v10194_v8 = vpop.xlane.xlu1 %10193  ;;  %v10567_v50 = vld [vmem:[%s19182_s12 + $0x8] sm:$0xff] }
 0xe2c   :  { %v10241_v30 = vmul.f32 0.03125, %v10221_v36  ;;  %v10271_v41 = vmul.f32 %v18984_v4, %v18984_v4  ;;  %v10272_v48 = vmul.f32 %v18991_v14, %v18991_v14  ;;  %v10232_v27 = vmul.f32 0.03125, %v10194_v8  ;;  %v10568_v36 = vld [vmem:[%s19182_s12 + $0x10] sm:$0xff] }
 0xe2e   :  { %v18999_v39 = vsub.f32 %v18920_v35, %v10241_v30  ;;  %v10309_v44 = vsel %vm1733_vm2, %v10271_v41, 0.0  ;;  %v10312_v47 = vsel %vm1733_vm2, %v10272_v48, 0.0  ;;  %v19011_v35 = vsub.f32 %v18925_v26, %v10232_v27  ;;  %v10569_v30 = vld [vmem:[%s19182_s12 + $0x18] sm:$0xff]  ;;  %v10570_v48 = vld [vmem:[%s19182_s12 + $0x20] sm:$0xff]  ;;  %v10571_v27 = vld [vmem:[%s19182_s12 + $0x28] sm:$0xff] }
 0xe2f   :  { %10310 = vadd.xlane.f32.xlu0 %v10309_v44  ;;  %v10191_v32 = vpop.xlane.xlu0 %10190  ;;  %10313 = vadd.xlane.f32.xlu1 %v10312_v47  ;;  %v10200_v43 = vpop.xlane.xlu1 %10199  ;;  %v11103_v41 = vpack.c.bf16 %v10569_v30, %v10568_v36  ;;  %v11107_v44 = vpack.c.bf16 %v10571_v27, %v10570_v48  ;;  %v10572_v47 = vld [vmem:[%s19182_s12 + $0x30] sm:$0xff] }
 0xe30   :  { %v10273_v24 = vmul.f32 %v18999_v39, %v18999_v39  ;;  %v10234_v2 = vmul.f32 0.03125, %v10200_v43  ;;  %v10231_v25 = vmul.f32 0.03125, %v10191_v32  ;;  %v10264_v31 = vmul.f32 %v19011_v35, %v19011_v35  ;;  %v10573_v32 = vld [vmem:[%s19182_s12 + $0x38] sm:$0xff] }
 0xe31   :  { %v11111_v12 = vpack.c.bf16 %v10573_v32, %v10572_v47 }
 0xe32   :  { %v10315_v9 = vsel %vm1733_vm2, %v10273_v24, 0.0  ;;  %v19018_v54 = vsub.f32 %v18936_v40, %v10234_v2  ;;  %v19021_v26 = vsub.f32 %v18931_v5, %v10231_v25  ;;  %v10288_v16 = vsel %vm1733_vm2, %v10264_v31, 0.0 }
 0xe33   :  { %10316 = vadd.xlane.f32.xlu0 %v10315_v9  ;;  %v10197_v21 = vpop.xlane.xlu0 %10196  ;;  %10277 = vadd.xlane.f32.xlu1 %v10276_v28  ;;  %v10185_v56 = vpop.xlane.xlu1 %10184 }
 0xe34   :  { %v10229_v15 = vmul.f32 0.03125, %v10185_v56  ;;  %v10233_v0 = vmul.f32 0.03125, %v10197_v21  ;;  %v10266_v5 = vmul.f32 %v19018_v54, %v19018_v54  ;;  %v10263_v19 = vmul.f32 %v19021_v26, %v19021_v26 }
 0xe36   :  { %v19026_v3 = vsub.f32 %v18948_v58, %v10229_v15  ;;  %v19037_v58 = vsub.f32 %v18942_v42, %v10233_v0  ;;  %v10294_v59 = vsel %vm1733_vm2, %v10266_v5, 0.0  ;;  %v10285_v38 = vsel %vm1733_vm2, %v10263_v19, 0.0 }
 0xe37   :  { %v10203_v29 = vpop.xlane.xlu0 %10202  ;;  %10283 = vadd.xlane.f32.xlu1 %v10282_v55  ;;  %v10224_v33 = vpop.xlane.xlu1 %10223 }
 0xe38   :  { %v10242_v11 = vmul.f32 0.03125, %v10224_v33  ;;  %v10261_v40 = vmul.f32 %v19026_v3, %v19026_v3  ;;  %v10235_v17 = vmul.f32 0.03125, %v10203_v29 }
 0xe3a   :  { %v19040_v46 = vsub.f32 %v18953_v63, %v10242_v11  ;;  %v10279_v49 = vsel %vm1733_vm2, %v10261_v40, 0.0  ;;  %v19046_v45 = vsub.f32 %v18957_v22, %v10235_v17  ;;  %v10265_v63 = vmul.f32 %v19037_v58, %v19037_v58 }
 0xe3b   :  { %10289 = vadd.xlane.f32.xlu1 %v10288_v16  ;;  %10280 = vadd.xlane.f32.xlu0 %v10279_v49  ;;  %v10227_v57 = vpop.xlane.xlu0 %10226 }
 0xe3c   :  { %v10243_v61 = vmul.f32 0.03125, %v10227_v57  ;;  %v10274_v42 = vmul.f32 %v19040_v46, %v19040_v46  ;;  %v10291_v13 = vsel %vm1733_vm2, %v10265_v63, 0.0  ;;  %v10267_v22 = vmul.f32 %v19046_v45, %v19046_v45 }
 0xe3e   :  { %v19053_v62 = vsub.f32 %v18965_v23, %v10243_v61  ;;  %v10318_v6 = vsel %vm1733_vm2, %v10274_v42, 0.0  ;;  %v10297_v18 = vsel %vm1733_vm2, %v10267_v22, 0.0  ;;  %v10566_v23 = vld [vmem:[%s19182_s12] sm:$0xff] }
 0xe3f   :  { %10295 = vadd.xlane.f32.xlu1 %v10294_v59  ;;  %10286 = vadd.xlane.f32.xlu0 %v10285_v38  ;;  %v11099_v8 = vpack.c.bf16 %v10567_v50, %v10566_v23 }
 0xe40   :  { %v10275_v51 = vmul.f32 %v19053_v62, %v19053_v62 }
 0xe41   :  { %11100 = vmatprep.subr.bf16.mxu0 %v11099_v8 }
 0xe42   :  { %v10321_v7 = vsel %vm1733_vm2, %v10275_v51, 0.0  ;;  %11102 = vmatpush3.bf16.msra.mxu0 %v11099_v8 }
 0xe43   :  { %10319 = vadd.xlane.f32.xlu1 %v10318_v6  ;;  %10292 = vadd.xlane.f32.xlu0 %v10291_v13 }
 0xe44   :  { %11104 = vmatprep.subr.bf16.mxu0 %v11103_v41 }
 0xe46   :  { %11106 = vmatpush3.bf16.msra.mxu0 %v11103_v41 }
 0xe47   :  { %10298 = vadd.xlane.f32.xlu0 %v10297_v18  ;;  %11108 = vmatprep.subr.bf16.mxu0 %v11107_v44 }
 0xe4a   :  { %11110 = vmatpush3.bf16.msra.mxu0 %v11107_v44 }
 0xe4b   :  { %10322 = vadd.xlane.f32.xlu0 %v10321_v7  ;;  %11112 = vmatprep.subr.bf16.mxu0 %v11111_v12 }
 0xe4e   :  { %11114 = vmatpush3.bf16.msra.mxu0 %v11111_v12 }
 0xeb4   :  { %v10302_v43 = vpop.xlane.xlu1 %10301 }
 0xeb5   :  { %v10332_v38 = vmul.f32 0.03125, %v10302_v43 }
 0xeb7   :  { %v10348_v23 = vadd.f32 1e-05, %v10332_v38 }
 0xeb8   :  { %v10308_v24 = vpop.xlane.xlu1 %10307  ;;  %v10305_v2 = vpop.xlane.xlu0 %10304 }
 0xeb9   :  { %v10333_v21 = vmul.f32 0.03125, %v10305_v2  ;;  %v10334_v15 = vmul.f32 0.03125, %v10308_v24 }
 0xebb   :  { %v10349_v55 = vadd.f32 1e-05, %v10333_v21  ;;  %v10350_v11 = vadd.f32 1e-05, %v10334_v15 }
 0xebc   :  { %v10314_v25 = vpop.xlane.xlu1 %10313  ;;  %v10311_v9 = vpop.xlane.xlu0 %10310 }
 0xebd   :  { %v10335_v31 = vmul.f32 0.03125, %v10311_v9  ;;  %11686 = vrsqrt.f32 %v10349_v55  ;;  %v10336_v22 = vmul.f32 0.03125, %v10314_v25 }
 0xebe   :  { %11688 = vrsqrt.f32 %v10350_v11 }
 0xebf   :  { %v10351_v16 = vadd.f32 1e-05, %v10335_v31  ;;  %v10352_v48 = vadd.f32 1e-05, %v10336_v22 }
 0xec0   :  { %v10278_v28 = vpop.xlane.xlu1 %10277  ;;  %v10317_v52 = vpop.xlane.xlu0 %10316 }
 0xec1   :  { %v10324_v5 = vmul.f32 0.03125, %v10278_v28  ;;  %11690 = vrsqrt.f32 %v10351_v16  ;;  %v10337_v8 = vmul.f32 0.03125, %v10317_v52 }
 0xec3   :  { %v10340_v63 = vadd.f32 1e-05, %v10324_v5  ;;  %v10353_v32 = vadd.f32 1e-05, %v10337_v8 }
 0xec4   :  { %v10284_v56 = vpop.xlane.xlu1 %10283 }
 0xec5   :  { %v10326_v0 = vmul.f32 0.03125, %v10284_v56 }
 0xec7   :  { %v10342_v19 = vadd.f32 1e-05, %v10326_v0  ;;  %v11687_v47 = vpop.eup %11686 }
 0xec8   :  { %v10290_v29 = vpop.xlane.xlu1 %10289  ;;  %v10281_v33 = vpop.xlane.xlu0 %10280  ;;  %v10381_v5 = vmul.f32 %v11687_v47, %v18975_v34 }
 0xec9   :  { %v10325_v40 = vmul.f32 0.03125, %v10281_v33  ;;  %v10328_v17 = vmul.f32 0.03125, %v10290_v29  ;;  %11692 = vrsqrt.f32 %v10342_v19  ;;  %v11689_v12 = vpop.eup %11688 }
 0xecb   :  { %v10341_v49 = vadd.f32 1e-05, %v10325_v40  ;;  %v10344_v18 = vadd.f32 1e-05, %v10328_v17  ;;  %v11691_v24 = vpop.eup %11690  ;;  %v10382_v17 = vmul.f32 %v11689_v12, %v18977_v1 }
 0xecc   :  { %v10296_v57 = vpop.xlane.xlu1 %10295  ;;  %v10287_v59 = vpop.xlane.xlu0 %10286  ;;  %v10383_v29 = vmul.f32 %v11691_v24, %v18984_v4 }
 0xecd   :  { %v10330_v61 = vmul.f32 0.03125, %v10296_v57  ;;  %v10327_v42 = vmul.f32 0.03125, %v10287_v59  ;;  %11694 = vrsqrt.f32 %v10341_v49 }
 0xecf   :  { %v10346_v6 = vadd.f32 1e-05, %v10330_v61  ;;  %v10343_v13 = vadd.f32 1e-05, %v10327_v42 }
 0xed0   :  { %v10320_v51 = vpop.xlane.xlu1 %10319  ;;  %v10293_v7 = vpop.xlane.xlu0 %10292 }
 0xed1   :  { %11696 = vrsqrt.f32 %v10346_v6  ;;  %v10338_v50 = vmul.f32 0.03125, %v10320_v51  ;;  %v10329_v36 = vmul.f32 0.03125, %v10293_v7 }
 0xed2   :  { %11698 = vrsqrt.f32 %v10343_v13 }
 0xed3   :  { %11700 = vrsqrt.f32 %v10340_v63  ;;  %v10354_v30 = vadd.f32 1e-05, %v10338_v50  ;;  %v10345_v41 = vadd.f32 1e-05, %v10329_v36  ;;  %v11693_v25 = vpop.eup %11692 }
 0xed4   :  { %11702 = vrsqrt.f32 %v10344_v18  ;;  %v10299_v27 = vpop.xlane.xlu0 %10298  ;;  %v10374_v33 = vmul.f32 %v11693_v25, %v19003_v53  ;;  %v10464_v53 = vcombine.low %v10381_v5, %v10383_v29  ;;  %v10580_v5 = vld [vmem:[%s19182_s12 + $0x70] sm:$0xff] }
 0xed5   :  { %11704 = vrsqrt.f32 %v10348_v23  ;;  %v10331_v44 = vmul.f32 0.03125, %v10299_v27 }
 0xed6   :  { %11706 = vrsqrt.f32 %v10354_v30 }
 0xed7   :  { %11708 = vrsqrt.f32 %v10345_v41  ;;  %v10347_v43 = vadd.f32 1e-05, %v10331_v44  ;;  %v11695_v28 = vpop.eup %11694 }
 0xed8   :  { %11710 = vrsqrt.f32 %v10352_v48  ;;  %v10323_v2 = vpop.xlane.xlu0 %10322  ;;  %v10373_v11 = vmul.f32 %v11695_v28, %v19026_v3  ;;  %v10576_v48 = vld [vmem:[%s19182_s12 + $0x50] sm:$0xff] }
 0xed9   :  { %11712 = vrsqrt.f32 %v10347_v43  ;;  %v10339_v9 = vmul.f32 0.03125, %v10323_v2 }
 0xeda   :  { %11714 = vrsqrt.f32 %v10353_v32 }
 0xedb   :  { %v11697_v21 = vpop.eup %11696  ;;  %v10355_v52 = vadd.f32 1e-05, %v10339_v9 }
 0xedc   :  { %v11699_v56 = vpop.eup %11698  ;;  %v10378_v40 = vmul.f32 %v11697_v21, %v19018_v54 }
 0xedd   :  { %v11701_v15 = vpop.eup %11700  ;;  %v10375_v31 = vmul.f32 %v11699_v56, %v19021_v26  ;;  %11716 = vrsqrt.f32 %v10355_v52  ;;  %v10578_v56 = vld [vmem:[%s19182_s12 + $0x60] sm:$0xff] }
 0xede   :  { %v11703_v0 = vpop.eup %11702  ;;  %v10372_v49 = vmul.f32 %v11701_v15, %v18988_v20  ;;  %v10579_v15 = vld [vmem:[%s19182_s12 + $0x68] sm:$0xff] }
 0xedf   :  { %v11705_v55 = vpop.eup %11704  ;;  %v10376_v26 = vmul.f32 %v11703_v0, %v19011_v35  ;;  %v10396_v57 = vcombine.low %v10373_v11, %v10375_v31  ;;  %v11123_v31 = vpack.c.bf16 %v10579_v15, %v10578_v56 }
 0xee0   :  { %v11707_v16 = vpop.eup %11706  ;;  %v10380_v4 = vmul.f32 %v11705_v55, %v18971_v10  ;;  %v10388_v61 = vcombine.low %v10372_v49, %v10374_v33  ;;  %v10471_v10 = vrot.slane %v10464_v53, %v20628_v60  ;;  %v10702_v53 = vld [vmem:[%s19176_s6 + $0x6] ss:$0 sm:$0xff] }
 0xee1   :  { %v11709_v19 = vpop.eup %11708  ;;  %v10404_v3 = vcombine.low %v10376_v26, %v10378_v40  ;;  %v10386_v54 = vmul.f32 %v11707_v16, %v19040_v46  ;;  %v10403_v20 = vrot.slane %v10396_v57, %v20628_v60  ;;  %v10575_v46 = vld [vmem:[%s19182_s12 + $0x48] sm:$0xff] }
 0xee2   :  { %v11711_v59 = vpop.eup %11710  ;;  %v10377_v34 = vmul.f32 %v11709_v19, %v19037_v58  ;;  %v10456_v1 = vcombine.low %v10380_v4, %v10382_v17  ;;  %v10395_v18 = vrot.slane %v10388_v61, %v20628_v60  ;;  %v10574_v58 = vld [vmem:[%s19182_s12 + $0x40] sm:$0xff]  ;;  %v10581_v19 = vld [vmem:[%s19182_s12 + $0x78] sm:$0xff] }
 0xee3   :  { %v11713_v38 = vpop.eup %11712  ;;  %v10384_v35 = vmul.f32 %v11711_v59, %v18991_v14  ;;  %v10411_v51 = vrot.slane %v10404_v3, %v20628_v60  ;;  %v11127_v17 = vpack.c.bf16 %v10581_v19, %v10580_v5 }
 0xee4   :  { %v11715_v42 = vpop.eup %11714  ;;  %v10379_v63 = vmul.f32 %v11713_v38, %v19046_v45  ;;  %v10463_v23 = vrot.slane %v10456_v1, %v20628_v60  ;;  %v10420_v50 = vcombine.low %v10395_v18, %v10403_v20 }
 0xee5   :  { %v10385_v22 = vmul.f32 %v11715_v42, %v18999_v39  ;;  %v10472_v45 = vcombine.low %v10384_v35, %v10386_v54  ;;  %v11115_v39 = vpack.c.bf16 %v10575_v46, %v10574_v58 }
 0xee6   :  { %v10412_v6 = vcombine.low %v10377_v34, %v10379_v63  ;;  %v10489_v30 = vcombine.high %v10463_v23, %v10471_v10  ;;  %v10488_v41 = vcombine.low %v10463_v23, %v10471_v10  ;;  %v10428_v12 = vrot.slane %v10420_v50, %v20641_v37  ;;  %v10703_v34 = vld [vmem:[%s19176_s6 + $0x7] ss:$0 sm:$0xff]  ;;  %v10704_v10 = vld [vmem:[%s19183_s13] ss:$0 sm:$0xff] }
 0xee7   :  { %v11717_v13 = vpop.eup %11716  ;;  %11116 = vmatprep.subr.bf16.mxu0 %v11115_v39  ;;  %v10479_v27 = vrot.slane %v10472_v45, %v20628_v60 }
 0xee8   :  { %v10387_v14 = vmul.f32 %v11717_v13, %v19053_v62  ;;  %v10419_v7 = vrot.slane %v10412_v6, %v20628_v60  ;;  %11118 = vmatpush3.bf16.msra.mxu0 %v11115_v39  ;;  %v10577_v62 = vld [vmem:[%s19182_s12 + $0x58] sm:$0xff]  ;;  %v10503_v25 = vrot.slane %v10489_v30, %v20641_v37  ;;  %v10496_v21 = vrot.slane %v10488_v41, %v20641_v37 }
 0xee9   :  { %v11119_v32 = vpack.c.bf16 %v10577_v62, %v10576_v48 }
 0xeea   :  { %v10480_v36 = vcombine.low %v10385_v22, %v10387_v14  ;;  %v10436_v8 = vcombine.low %v10411_v51, %v10419_v7  ;;  %v10437_v2 = vcombine.high %v10411_v51, %v10419_v7 }
 0xeeb   :  { %11120 = vmatprep.subr.bf16.mxu0 %v11119_v32 }
 0xeec   :  { %v10487_v44 = vrot.slane %v10480_v36, %v20628_v60  ;;  %v10444_v47 = vrot.slane %v10436_v8, %v20641_v37  ;;  %11122 = vmatpush3.bf16.msra.mxu0 %v11119_v32  ;;  %v10421_v60 = vcombine.high %v10395_v18, %v10403_v20  ;;  %v10451_v29 = vrot.slane %v10437_v2, %v20641_v37 }
 0xeed   :  { %11124 = vmatprep.subr.bf16.mxu0 %v11123_v31 }
 0xeee   :  { %v10505_v43 = vcombine.high %v10479_v27, %v10487_v44  ;;  %v10504_v24 = vcombine.low %v10479_v27, %v10487_v44  ;;  %v10452_v9 = vcombine.low %v10428_v12, %v10444_v47  ;;  %v10435_v11 = vrot.slane %v10421_v60, %v20641_v37 }
 0xeef   :  { %v10453_v40 = vcombine.high %v10428_v12, %v10444_v47 }
 0xef0   :  { %v10519_v28 = vrot.slane %v10505_v43, %v20641_v37  ;;  %v10512_v52 = vrot.slane %v10504_v24, %v20641_v37  ;;  %11126 = vmatpush3.bf16.msra.mxu0 %v11123_v31  ;;  %v10455_v16 = vcombine.high %v10435_v11, %v10451_v29  ;;  %v10454_v49 = vcombine.low %v10435_v11, %v10451_v29 }
 0xef1   :  { %11128 = vmatprep.subr.bf16.mxu0 %v11127_v17 }
 0xef2   :  { %v10522_v0 = vcombine.low %v10503_v25, %v10519_v28  ;;  %v10521_v55 = vcombine.high %v10496_v21, %v10512_v52  ;;  %v10520_v33 = vcombine.low %v10496_v21, %v10512_v52  ;;  %v10523_v37 = vcombine.high %v10503_v25, %v10519_v28 }
 0xef4   :  { %10536 = vrot.lane.b32.xlu1 %v10522_v0, %s11745_s4  ;;  %10528 = vrot.lane.b32.xlu0 %v10521_v55, %s11747_s5 }
 0xef5   :  { %11130 = vmatpush3.bf16.msra.mxu0 %v11127_v17 }
 0xef8   :  { %10526 = vrot.lane.b32.xlu1 %v10453_v40, %s11747_s5  ;;  %10542 = vrot.lane.b32.xlu0 %v10455_v16, %s11746_s23 }
 0xefc   :  { %10534 = vrot.lane.b32.xlu1 %v10454_v49, %s11745_s4 }
 0xf00   :  { %10544 = vrot.lane.b32.xlu1 %v10523_v37, %s11746_s23 }
 0xf66   :  { %v10537_v26 = vpop.permute.xlu1 %10536  ;;  %v10529_v57 = vpop.permute.xlu0 %10528 }
 0xf67   :  { %v10549_v61 = vsel %vm4679_vm3, %v10520_v33, %v10529_v57 }
 0xf68   :  { %v10551_v20 = vsel %vm4696_vm4, %v10549_v61, %v10537_v26 }
 0xf6a   :  { %v10527_v59 = vpop.permute.xlu1 %10526  ;;  %v10543_v3 = vpop.permute.xlu0 %10542 }
 0xf6b   :  { %v10548_v38 = vsel %vm4679_vm3, %v10452_v9, %v10527_v59 }
 0xf6e   :  { %v10535_v4 = vpop.permute.xlu1 %10534 }
 0xf6f   :  { %v10550_v42 = vsel %vm4696_vm4, %v10548_v38, %v10535_v4 }
 0xf70   :  { %v10552_v54 = vsel %vm4713_vm5, %v10550_v42, %v10543_v3 }
 0xf71   :  { %v10558_v63 = vmul.f32 %v10702_v53, %v10552_v54 }
 0xf72   :  { %v10545_v1 = vpop.permute.xlu1 %10544 }
 0xf73   :  { %v10553_v35 = vsel %vm4713_vm5, %v10551_v20, %v10545_v1  ;;  %v10564_v6 = vadd.f32 %v10703_v34, %v10558_v63 }
 0xf74   :  { %v10559_v13 = vmul.f32 %v10702_v53, %v10553_v35 }
 0xf75   :  { %11000 = vmatprep.mubr.f32.mxu0 %v10564_v6 }
 0xf76   :  { %v10565_v22 = vadd.f32 %v10703_v34, %v10559_v13 }
 0xf78   :  { %11001 = vmatmul.mubr.f32.vlgmr.msra.gmra.mrb[2].mxu0 %v10565_v22 }
0x104b   :  { %v11002_v18 = vpop.f32.mrb[2].mxu0 }
0x104c   :  { %v10661_v51 = vadd.f32 %v11002_v18, %v10704_v10  ;;  %v10655_v58 = vpop.f32.mrb[3].mxu0 }
0x104d   :  { %v10656_v46 = vadd.f32 %v10704_v10, %v10655_v58 }
0x104e   :  { %10666 = vst.msk [vmem:[%s19184_s14 + $0x8] sm:$0xff] %vm10664_vm15, %v10661_v51 }
0x104f   :  { %10665 = vst.msk [vmem:[%s19184_s14] sm:$0xff] %vm10664_vm15, %v10656_v46 }
0x1050   :  { %10671 = vsyncpa [#allocation3], 1 }

</bundles_post_ra>
